<compile_context>
chip_gen: v7x
topology: tpu7x:2x2x1
jax: 0.10.0
libtpu: 0.0.40
codegen_flags: <defaults>
</compile_context>

<pallas_src>
import jax
import jax.numpy as jnp
from jax import lax
from jax.experimental import pallas as pl
from jax.experimental.pallas import tpu as pltpu

BN_EPS = 1e-5
KSIZE = 5                          # 5x5 conv, stride 1, padding 2
C_PAD = 128                        # all channel axes padded to a full lane group
VMEM_LIMIT_BYTES = 32 * 1024 * 1024


def _compiler_params():
    return pltpu.CompilerParams(
        dimension_semantics=("parallel",),
        vmem_limit_bytes=VMEM_LIMIT_BYTES,
    )


# --------------------------------------------------------------------------
# In-kernel conv row: build the 5x5 patches for one output row directly from
# the padded NHWC image block resident in VMEM (no HBM im2col) and contract
# against the lane-padded weights.
# --------------------------------------------------------------------------

def _conv_row(x_ref, w_ref, h, w_out, c_in):
    """f32 [w_out, C_PAD] conv output for output row `h` of one image.

    x_ref: [H+4, W+4, c_in] (bf16)  spatially padded input image block
    w_ref: [25, c_in, C_PAD] (bf16) weights, taps ordered (dy, dx)
    """
    acc = jnp.zeros((w_out, C_PAD), jnp.float32)
    for dy in range(KSIZE):
        for dx in range(KSIZE):
            piece = x_ref[h + dy, dx:dx + w_out, :]          # [w_out, c_in]
            tap = w_ref[dy * KSIZE + dx]                     # [c_in, C_PAD]
            if c_in == 1:
                # K=1 matmuls are a poor MXU fit: use f32 VPU multiply-add.
                acc = acc + piece.astype(jnp.float32) * tap.astype(jnp.float32)
            else:
                acc = acc + jnp.dot(piece, tap,
                                    preferred_element_type=jnp.float32)
    return acc


# ----------------------------- Pallas kernels ------------------------------

def _make_conv_stats_kernel(h_out, w_out, c_in):
    # Pass A: conv + per-image per-channel sum / sum-of-squares.
    def kernel(x_ref, w_ref, stat_ref):
        def body(h, carry):
            s, ss = carry
            y = _conv_row(x_ref, w_ref, h, w_out, c_in)       # [w_out, C_PAD]
            s = s + jnp.sum(y, axis=0, keepdims=True)
            ss = ss + jnp.sum(y * y, axis=0, keepdims=True)
            return s, ss

        init = (jnp.zeros((1, C_PAD), jnp.float32),
                jnp.zeros((1, C_PAD), jnp.float32))
        s, ss = lax.fori_loop(0, h_out, body, init)
        stat_ref[0:1, :] = s
        stat_ref[1:2, :] = ss
    return kernel


def _make_conv_bn_pool_kernel(h_out, w_out, c_in):
    # Pass B: conv recompute + BN affine + ReLU + fused 2x2 max-pool.
    hp, wp = h_out // 2, w_out // 2

    def kernel(x_ref, w_ref, scale_ref, shift_ref, o_ref):
        scale = scale_ref[...]                                # [1, C_PAD] f32
        shift = shift_ref[...]
        # Column-pair selection matrices for the width half of the 2x2 pool
        # (selection-by-matmul keeps everything on well-supported ops).
        rid = lax.broadcasted_iota(jnp.int32, (wp, w_out), 0)
        cid = lax.broadcasted_iota(jnp.int32, (wp, w_out), 1)
        sel_even = (cid == 2 * rid).astype(jnp.float32)
        sel_odd = (cid == 2 * rid + 1).astype(jnp.float32)

        def body(i, carry):
            y0 = _conv_row(x_ref, w_ref, 2 * i, w_out, c_in)
            y1 = _conv_row(x_ref, w_ref, 2 * i + 1, w_out, c_in)
            y0 = jnp.maximum(y0 * scale + shift, 0.0)         # BN + ReLU (f32)
            y1 = jnp.maximum(y1 * scale + shift, 0.0)
            m = jnp.maximum(y0, y1)                           # pool row pairs
            pooled = jnp.maximum(                             # pool col pairs
                jnp.dot(sel_even, m, preferred_element_type=jnp.float32),
                jnp.dot(sel_odd, m, preferred_element_type=jnp.float32))
            o_ref[i] = pooled.astype(o_ref.dtype)             # [wp, C_PAD]
            return carry

        lax.fori_loop(0, hp, body, 0)
    return kernel


def _fc_kernel(x_ref, w_ref, b_ref, o_ref):
    o_ref[...] = (jnp.dot(x_ref[...], w_ref[...],
                          preferred_element_type=jnp.float32) + b_ref[...])


# ------------------------------ kernel wrappers -----------------------------

def conv_stats(xp, w, h_out, w_out, c_in):
    """Per-image per-channel (sum, sum^2) of the conv output: [N, 2, C_PAD]."""
    n = xp.shape[0]
    return pl.pallas_call(
        _make_conv_stats_kernel(h_out, w_out, c_in),
        out_shape=jax.ShapeDtypeStruct((n, 2, C_PAD), jnp.float32),
        grid=(n,),
        in_specs=[
            pl.BlockSpec((None,) + tuple(xp.shape[1:]),
                         lambda i: (i, 0, 0, 0)),
            pl.BlockSpec(tuple(w.shape), lambda i: (0, 0, 0)),
        ],
        out_specs=pl.BlockSpec((None, 2, C_PAD), lambda i: (i, 0, 0)),
        compiler_params=_compiler_params(),
    )(xp, w)


def conv_bn_relu_pool(xp, w, scale, shift, h_out, w_out, c_in):
    """Conv + BN(affine from batch stats) + ReLU + 2x2 max-pool, fused."""
    n = xp.shape[0]
    hp, wp = h_out // 2, w_out // 2
    return pl.pallas_call(
        _make_conv_bn_pool_kernel(h_out, w_out, c_in),
        out_shape=jax.ShapeDtypeStruct((n, hp, wp, C_PAD), jnp.bfloat16),
        grid=(n,),
        in_specs=[
            pl.BlockSpec((None,) + tuple(xp.shape[1:]),
                         lambda i: (i, 0, 0, 0)),
            pl.BlockSpec(tuple(w.shape), lambda i: (0, 0, 0)),
            pl.BlockSpec((1, C_PAD), lambda i: (0, 0)),
            pl.BlockSpec((1, C_PAD), lambda i: (0, 0)),
        ],
        out_specs=pl.BlockSpec((None, hp, wp, C_PAD), lambda i: (i, 0, 0, 0)),
        compiler_params=_compiler_params(),
    )(xp, w, scale, shift)


def fc(x, w, b):
    n, kf = x.shape
    c_out = w.shape[1]
    tn = min(n, 128)
    return pl.pallas_call(
        _fc_kernel,
        out_shape=jax.ShapeDtypeStruct((n, c_out), jnp.float32),
        grid=(pl.cdiv(n, tn),),
        in_specs=[
            pl.BlockSpec((tn, kf), lambda i: (i, 0)),
            pl.BlockSpec((kf, c_out), lambda i: (0, 0)),
            pl.BlockSpec((1, c_out), lambda i: (0, 0)),
        ],
        out_specs=pl.BlockSpec((tn, c_out), lambda i: (i, 0)),
        compiler_params=_compiler_params(),
    )(x, w, b)


# ------------------------------- JAX glue ----------------------------------

def bn_affine(stats, gamma, beta, count):
    # Reduce the per-image partials (a few KB) and fold BN into scale/shift.
    s = jnp.sum(stats[:, 0, :], axis=0)
    ss = jnp.sum(stats[:, 1, :], axis=0)
    mean = s / count
    var = jnp.maximum(ss / count - mean * mean, 0.0)          # biased variance
    scale = gamma * lax.rsqrt(var + BN_EPS)
    shift = beta - mean * scale
    return scale.reshape(1, C_PAD), shift.reshape(1, C_PAD)


@jax.jit
def convnet_forward(x_nchw, kp):
    n = x_nchw.shape[0]
    x = jnp.transpose(x_nchw, (0, 2, 3, 1)).astype(jnp.bfloat16)   # NHWC

    # layer1: Conv2d(1, 16, 5, pad=2) + BN + ReLU + MaxPool(2)
    xp1 = jnp.pad(x, ((0, 0), (2, 2), (2, 2), (0, 0)))             # [N,32,32,1]
    st1 = conv_stats(xp1, kp["w1"], 28, 28, 1)
    sc1, sh1 = bn_affine(st1, kp["g1"], kp["bt1"], n * 28 * 28)
    y1 = conv_bn_relu_pool(xp1, kp["w1"], sc1, sh1, 28, 28, 1)     # [N,14,14,128]

    # layer2: Conv2d(16, 32, 5, pad=2) + BN + ReLU + MaxPool(2)
    x2 = y1[..., :16]
    xp2 = jnp.pad(x2, ((0, 0), (2, 2), (2, 2), (0, 0)))            # [N,18,18,16]
    st2 = conv_stats(xp2, kp["w2"], 14, 14, 16)
    sc2, sh2 = bn_affine(st2, kp["g2"], kp["bt2"], n * 14 * 14)
    y2 = conv_bn_relu_pool(xp2, kp["w2"], sc2, sh2, 14, 14, 16)    # [N,7,7,128]

    # FC: PyTorch NCHW flatten order + channel padding are pre-folded into wfc.
    feat = y2.reshape(n, 7 * 7 * C_PAD)
    logits = fc(feat, kp["wfc"], kp["bfc"])                        # [N,128] f32
    return logits[:, :10]

# TODO(synk): BatchNorm running_mean/running_var buffer updates (training-time
# bookkeeping) are not reproduced; they do not affect the forward output.


# --------------------------- params & preparation ---------------------------

def init_params(key):
    ks = jax.random.split(key, 10)
    return dict(
        w1=0.1 * jax.random.normal(ks[0], (5, 5, 1, 16), jnp.float32),   # HWIO
        b1=0.1 * jax.random.normal(ks[1], (16,), jnp.float32),
        g1=1.0 + 0.1 * jax.random.normal(ks[2], (16,), jnp.float32),
        bt1=0.1 * jax.random.normal(ks[3], (16,), jnp.float32),
        w2=0.05 * jax.random.normal(ks[4], (5, 5, 16, 32), jnp.float32),
        b2=0.1 * jax.random.normal(ks[5], (32,), jnp.float32),
        g2=1.0 + 0.1 * jax.random.normal(ks[6], (32,), jnp.float32),
        bt2=0.1 * jax.random.normal(ks[7], (32,), jnp.float32),
        wfc=0.02 * jax.random.normal(ks[8], (7 * 7 * 32, 10), jnp.float32),
        bfc=0.1 * jax.random.normal(ks[9], (10,), jnp.float32),
    )


def prepare_params(p):
    """One-time padding / folding of parameters into kernel-friendly layouts."""
    kp = {}
    kp["w1"] = jnp.pad(p["w1"].reshape(KSIZE * KSIZE, 1, 16),
                       ((0, 0), (0, 0), (0, C_PAD - 16))).astype(jnp.bfloat16)
    kp["w2"] = jnp.pad(p["w2"].reshape(KSIZE * KSIZE, 16, 32),
                       ((0, 0), (0, 0), (0, C_PAD - 32))).astype(jnp.bfloat16)
    kp["g1"] = jnp.pad(p["g1"], (0, C_PAD - 16), constant_values=1.0)
    kp["bt1"] = jnp.pad(p["bt1"], (0, C_PAD - 16))
    kp["g2"] = jnp.pad(p["g2"], (0, C_PAD - 32), constant_values=1.0)
    kp["bt2"] = jnp.pad(p["bt2"], (0, C_PAD - 32))
    # Conv biases b1/b2 are dropped: training-mode BN mean subtraction cancels
    # any per-channel constant added before it (dead work otherwise).
    # Fold the PyTorch NCHW flatten order (row index c*49 + h*7 + w) and the
    # channel / class padding into the FC weight so no runtime transpose or
    # masked store is needed.
    wfc = p["wfc"].reshape(32, 7, 7, 10)              # rows indexed (c, h, w)
    wfc = jnp.transpose(wfc, (1, 2, 0, 3))            # -> (h, w, c, out)
    wfc = jnp.pad(wfc, ((0, 0), (0, 0), (0, C_PAD - 32), (0, C_PAD - 10)))
    kp["wfc"] = wfc.reshape(7 * 7 * C_PAD, C_PAD).astype(jnp.bfloat16)
    kp["bfc"] = jnp.pad(p["bfc"], (0, C_PAD - 10)).reshape(1, C_PAD)
    return kp


# ------------------------------ pure-JAX reference ---------------------------

def reference_forward(x_nchw, p):
    x = jnp.transpose(x_nchw, (0, 2, 3, 1)).astype(jnp.float32)

    def conv(x, w_hwio, b):
        y = lax.conv_general_dilated(
            x, w_hwio, (1, 1), ((2, 2), (2, 2)),
            dimension_numbers=("NHWC", "HWIO", "NHWC"))
        return y + b

    def bn_relu(y, g, bt):
        mean = jnp.mean(y, axis=(0, 1, 2), keepdims=True)
        var = jnp.mean(jnp.square(y - mean), axis=(0, 1, 2), keepdims=True)
        return jnp.maximum(g * (y - mean) * lax.rsqrt(var + BN_EPS) + bt, 0.0)

    def pool(y):
        n, h, w, c = y.shape
        return jnp.max(y.reshape(n, h // 2, 2, w // 2, 2, c), axis=(2, 4))

    y = pool(bn_relu(conv(x, p["w1"], p["b1"]), p["g1"], p["bt1"]))
    y = pool(bn_relu(conv(y, p["w2"], p["b2"]), p["g2"], p["bt2"]))
    n = x_nchw.shape[0]
    feat = jnp.transpose(y, (0, 3, 1, 2)).reshape(n, -1)
    return feat @ p["wfc"] + p["bfc"]


if __name__ == "__main__":
    key = jax.random.PRNGKey(0)
    pkey, xkey = jax.random.split(key)
    params = init_params(pkey)
    kparams = prepare_params(params)

    # MNIST-shaped input, small batch: NCHW [2, 1, 28, 28]
    x = jax.random.normal(xkey, (2, 1, 28, 28), jnp.float32)

    out = jax.block_until_ready(convnet_forward(x, kparams))
    assert out.shape == (2, 10), out.shape

    ref = reference_forward(x, params)
    err = float(jnp.max(jnp.abs(out - ref)))
    # Loose tolerance: the Pallas path feeds bf16 operands to the MXU (f32
    # accumulation / BN math), the reference runs in f32 XLA ops.
    if not bool(jnp.allclose(out, ref, atol=1e-1, rtol=1e-1)):
        raise AssertionError(f"mismatch vs reference: max abs err = {err}")

    print("KERNEL_OK")
</pallas_src>

<mosaic_0001>
module attributes {stable_mosaic.version = 11 : i64} {
  func.func @kernel(%arg0: i32, %arg1: memref<1x32x32x1xbf16, #tpu.memory_space<vmem>>, %arg2: memref<25x1x128xbf16, #tpu.memory_space<vmem>>, %arg3: memref<1x2x128xf32, #tpu.memory_space<vmem>>) attributes {dimension_semantics = [#tpu.dimension_semantics<parallel>], iteration_bounds = array<i64: 2>, scalar_prefetch = 0 : i64, scratch_operands = 0 : i64, tpu.core_type = #tpu.core_type<tc>, window_params = [{transform_indices = @transform_0, window_bounds = array<i64: 1, 32, 32, 1>}, {pipeline_mode = #tpu.pipeline_mode<synchronous>, transform_indices = @transform_1, window_bounds = array<i64: 25, 1, 128>}, {transform_indices = @transform_2, window_bounds = array<i64: 1, 2, 128>}]} {
    %cst = arith.constant 0.000000e+00 : f32
    %0 = vector.broadcast %cst : f32 to vector<1x128xf32>
    %cst_0 = arith.constant 0.000000e+00 : f32
    %1 = vector.broadcast %cst_0 : f32 to vector<1x128xf32>
    %c0_i32 = arith.constant 0 : i32
    %c28_i32 = arith.constant 28 : i32
    %2 = arith.addi %c0_i32, %c28_i32 : i32
    %c1_i32 = arith.constant 1 : i32
    %3:2 = scf.for %arg4 = %c0_i32 to %2 step %c1_i32 iter_args(%arg5 = %0, %arg6 = %1) -> (vector<1x128xf32>, vector<1x128xf32>)  : i32 {
      %cst_6 = arith.constant 0.000000e+00 : f32
      %10 = vector.broadcast %cst_6 : f32 to vector<28x128xf32>
      %c0_i32_7 = arith.constant 0 : i32
      %11 = arith.addi %arg4, %c0_i32_7 : i32
      %c0_8 = arith.constant 0 : index
      %12 = arith.index_cast %11 : i32 to index
      %c0_9 = arith.constant 0 : index
      %c0_10 = arith.constant 0 : index
      %13 = vector.load %arg1[%c0_8, %12, %c0_9, %c0_10] : memref<1x32x32x1xbf16, #tpu.memory_space<vmem>>, vector<1x1x28x1xbf16>
      %14 = vector.shape_cast %13 : vector<1x1x28x1xbf16> to vector<28x1xbf16>
      %c0_11 = arith.constant 0 : index
      %c0_12 = arith.constant 0 : index
      %c0_13 = arith.constant 0 : index
      %15 = vector.load %arg2[%c0_11, %c0_12, %c0_13] : memref<25x1x128xbf16, #tpu.memory_space<vmem>>, vector<1x1x128xbf16>
      %16 = vector.shape_cast %15 : vector<1x1x128xbf16> to vector<1x128xbf16>
      %17 = arith.extf %14 : vector<28x1xbf16> to vector<28x1xf32>
      %18 = arith.extf %16 : vector<1x128xbf16> to vector<1x128xf32>
      %19 = vector.broadcast %17 : vector<28x1xf32> to vector<28x128xf32>
      %20 = vector.broadcast %18 : vector<1x128xf32> to vector<28x128xf32>
      %21 = arith.mulf %19, %20 : vector<28x128xf32>
      %22 = arith.addf %10, %21 : vector<28x128xf32>
      %c0_i32_14 = arith.constant 0 : i32
      %23 = arith.addi %arg4, %c0_i32_14 : i32
      %c0_15 = arith.constant 0 : index
      %24 = arith.index_cast %23 : i32 to index
      %c1_16 = arith.constant 1 : index
      %c0_17 = arith.constant 0 : index
      %25 = vector.load %arg1[%c0_15, %24, %c1_16, %c0_17] : memref<1x32x32x1xbf16, #tpu.memory_space<vmem>>, vector<1x1x28x1xbf16>
      %26 = vector.shape_cast %25 : vector<1x1x28x1xbf16> to vector<28x1xbf16>
      %c1_18 = arith.constant 1 : index
      %c0_19 = arith.constant 0 : index
      %c0_20 = arith.constant 0 : index
      %27 = vector.load %arg2[%c1_18, %c0_19, %c0_20] : memref<25x1x128xbf16, #tpu.memory_space<vmem>>, vector<1x1x128xbf16>
      %28 = vector.shape_cast %27 : vector<1x1x128xbf16> to vector<1x128xbf16>
      %29 = arith.extf %26 : vector<28x1xbf16> to vector<28x1xf32>
      %30 = arith.extf %28 : vector<1x128xbf16> to vector<1x128xf32>
      %31 = vector.broadcast %29 : vector<28x1xf32> to vector<28x128xf32>
      %32 = vector.broadcast %30 : vector<1x128xf32> to vector<28x128xf32>
      %33 = arith.mulf %31, %32 : vector<28x128xf32>
      %34 = arith.addf %22, %33 : vector<28x128xf32>
      %c0_i32_21 = arith.constant 0 : i32
      %35 = arith.addi %arg4, %c0_i32_21 : i32
      %c0_22 = arith.constant 0 : index
      %36 = arith.index_cast %35 : i32 to index
      %c2 = arith.constant 2 : index
      %c0_23 = arith.constant 0 : index
      %37 = vector.load %arg1[%c0_22, %36, %c2, %c0_23] : memref<1x32x32x1xbf16, #tpu.memory_space<vmem>>, vector<1x1x28x1xbf16>
      %38 = vector.shape_cast %37 : vector<1x1x28x1xbf16> to vector<28x1xbf16>
      %c2_24 = arith.constant 2 : index
      %c0_25 = arith.constant 0 : index
      %c0_26 = arith.constant 0 : index
      %39 = vector.load %arg2[%c2_24, %c0_25, %c0_26] : memref<25x1x128xbf16, #tpu.memory_space<vmem>>, vector<1x1x128xbf16>
      %40 = vector.shape_cast %39 : vector<1x1x128xbf16> to vector<1x128xbf16>
      %41 = arith.extf %38 : vector<28x1xbf16> to vector<28x1xf32>
      %42 = arith.extf %40 : vector<1x128xbf16> to vector<1x128xf32>
      %43 = vector.broadcast %41 : vector<28x1xf32> to vector<28x128xf32>
      %44 = vector.broadcast %42 : vector<1x128xf32> to vector<28x128xf32>
      %45 = arith.mulf %43, %44 : vector<28x128xf32>
      %46 = arith.addf %34, %45 : vector<28x128xf32>
      %c0_i32_27 = arith.constant 0 : i32
      %47 = arith.addi %arg4, %c0_i32_27 : i32
      %c0_28 = arith.constant 0 : index
      %48 = arith.index_cast %47 : i32 to index
      %c3 = arith.constant 3 : index
      %c0_29 = arith.constant 0 : index
      %49 = vector.load %arg1[%c0_28, %48, %c3, %c0_29] : memref<1x32x32x1xbf16, #tpu.memory_space<vmem>>, vector<1x1x28x1xbf16>
      %50 = vector.shape_cast %49 : vector<1x1x28x1xbf16> to vector<28x1xbf16>
      %c3_30 = arith.constant 3 : index
      %c0_31 = arith.constant 0 : index
      %c0_32 = arith.constant 0 : index
      %51 = vector.load %arg2[%c3_30, %c0_31, %c0_32] : memref<25x1x128xbf16, #tpu.memory_space<vmem>>, vector<1x1x128xbf16>
      %52 = vector.shape_cast %51 : vector<1x1x128xbf16> to vector<1x128xbf16>
      %53 = arith.extf %50 : vector<28x1xbf16> to vector<28x1xf32>
      %54 = arith.extf %52 : vector<1x128xbf16> to vector<1x128xf32>
      %55 = vector.broadcast %53 : vector<28x1xf32> to vector<28x128xf32>
      %56 = vector.broadcast %54 : vector<1x128xf32> to vector<28x128xf32>
      %57 = arith.mulf %55, %56 : vector<28x128xf32>
      %58 = arith.addf %46, %57 : vector<28x128xf32>
      %c0_i32_33 = arith.constant 0 : i32
      %59 = arith.addi %arg4, %c0_i32_33 : i32
      %c0_34 = arith.constant 0 : index
      %60 = arith.index_cast %59 : i32 to index
      %c4 = arith.constant 4 : index
      %c0_35 = arith.constant 0 : index
      %61 = vector.load %arg1[%c0_34, %60, %c4, %c0_35] : memref<1x32x32x1xbf16, #tpu.memory_space<vmem>>, vector<1x1x28x1xbf16>
      %62 = vector.shape_cast %61 : vector<1x1x28x1xbf16> to vector<28x1xbf16>
      %c4_36 = arith.constant 4 : index
      %c0_37 = arith.constant 0 : index
      %c0_38 = arith.constant 0 : index
      %63 = vector.load %arg2[%c4_36, %c0_37, %c0_38] : memref<25x1x128xbf16, #tpu.memory_space<vmem>>, vector<1x1x128xbf16>
      %64 = vector.shape_cast %63 : vector<1x1x128xbf16> to vector<1x128xbf16>
      %65 = arith.extf %62 : vector<28x1xbf16> to vector<28x1xf32>
      %66 = arith.extf %64 : vector<1x128xbf16> to vector<1x128xf32>
      %67 = vector.broadcast %65 : vector<28x1xf32> to vector<28x128xf32>
      %68 = vector.broadcast %66 : vector<1x128xf32> to vector<28x128xf32>
      %69 = arith.mulf %67, %68 : vector<28x128xf32>
      %70 = arith.addf %58, %69 : vector<28x128xf32>
      %c1_i32_39 = arith.constant 1 : i32
      %71 = arith.addi %arg4, %c1_i32_39 : i32
      %c0_40 = arith.constant 0 : index
      %72 = arith.index_cast %71 : i32 to index
      %c0_41 = arith.constant 0 : index
      %c0_42 = arith.constant 0 : index
      %73 = vector.load %arg1[%c0_40, %72, %c0_41, %c0_42] : memref<1x32x32x1xbf16, #tpu.memory_space<vmem>>, vector<1x1x28x1xbf16>
      %74 = vector.shape_cast %73 : vector<1x1x28x1xbf16> to vector<28x1xbf16>
      %c5 = arith.constant 5 : index
      %c0_43 = arith.constant 0 : index
      %c0_44 = arith.constant 0 : index
      %75 = vector.load %arg2[%c5, %c0_43, %c0_44] : memref<25x1x128xbf16, #tpu.memory_space<vmem>>, vector<1x1x128xbf16>
      %76 = vector.shape_cast %75 : vector<1x1x128xbf16> to vector<1x128xbf16>
      %77 = arith.extf %74 : vector<28x1xbf16> to vector<28x1xf32>
      %78 = arith.extf %76 : vector<1x128xbf16> to vector<1x128xf32>
      %79 = vector.broadcast %77 : vector<28x1xf32> to vector<28x128xf32>
      %80 = vector.broadcast %78 : vector<1x128xf32> to vector<28x128xf32>
      %81 = arith.mulf %79, %80 : vector<28x128xf32>
      %82 = arith.addf %70, %81 : vector<28x128xf32>
      %c1_i32_45 = arith.constant 1 : i32
      %83 = arith.addi %arg4, %c1_i32_45 : i32
      %c0_46 = arith.constant 0 : index
      %84 = arith.index_cast %83 : i32 to index
      %c1_47 = arith.constant 1 : index
      %c0_48 = arith.constant 0 : index
      %85 = vector.load %arg1[%c0_46, %84, %c1_47, %c0_48] : memref<1x32x32x1xbf16, #tpu.memory_space<vmem>>, vector<1x1x28x1xbf16>
      %86 = vector.shape_cast %85 : vector<1x1x28x1xbf16> to vector<28x1xbf16>
      %c6 = arith.constant 6 : index
      %c0_49 = arith.constant 0 : index
      %c0_50 = arith.constant 0 : index
      %87 = vector.load %arg2[%c6, %c0_49, %c0_50] : memref<25x1x128xbf16, #tpu.memory_space<vmem>>, vector<1x1x128xbf16>
      %88 = vector.shape_cast %87 : vector<1x1x128xbf16> to vector<1x128xbf16>
      %89 = arith.extf %86 : vector<28x1xbf16> to vector<28x1xf32>
      %90 = arith.extf %88 : vector<1x128xbf16> to vector<1x128xf32>
      %91 = vector.broadcast %89 : vector<28x1xf32> to vector<28x128xf32>
      %92 = vector.broadcast %90 : vector<1x128xf32> to vector<28x128xf32>
      %93 = arith.mulf %91, %92 : vector<28x128xf32>
      %94 = arith.addf %82, %93 : vector<28x128xf32>
      %c1_i32_51 = arith.constant 1 : i32
      %95 = arith.addi %arg4, %c1_i32_51 : i32
      %c0_52 = arith.constant 0 : index
      %96 = arith.index_cast %95 : i32 to index
      %c2_53 = arith.constant 2 : index
      %c0_54 = arith.constant 0 : index
      %97 = vector.load %arg1[%c0_52, %96, %c2_53, %c0_54] : memref<1x32x32x1xbf16, #tpu.memory_space<vmem>>, vector<1x1x28x1xbf16>
      %98 = vector.shape_cast %97 : vector<1x1x28x1xbf16> to vector<28x1xbf16>
      %c7 = arith.constant 7 : index
      %c0_55 = arith.constant 0 : index
      %c0_56 = arith.constant 0 : index
      %99 = vector.load %arg2[%c7, %c0_55, %c0_56] : memref<25x1x128xbf16, #tpu.memory_space<vmem>>, vector<1x1x128xbf16>
      %100 = vector.shape_cast %99 : vector<1x1x128xbf16> to vector<1x128xbf16>
      %101 = arith.extf %98 : vector<28x1xbf16> to vector<28x1xf32>
      %102 = arith.extf %100 : vector<1x128xbf16> to vector<1x128xf32>
      %103 = vector.broadcast %101 : vector<28x1xf32> to vector<28x128xf32>
      %104 = vector.broadcast %102 : vector<1x128xf32> to vector<28x128xf32>
      %105 = arith.mulf %103, %104 : vector<28x128xf32>
      %106 = arith.addf %94, %105 : vector<28x128xf32>
      %c1_i32_57 = arith.constant 1 : i32
      %107 = arith.addi %arg4, %c1_i32_57 : i32
      %c0_58 = arith.constant 0 : index
      %108 = arith.index_cast %107 : i32 to index
      %c3_59 = arith.constant 3 : index
      %c0_60 = arith.constant 0 : index
      %109 = vector.load %arg1[%c0_58, %108, %c3_59, %c0_60] : memref<1x32x32x1xbf16, #tpu.memory_space<vmem>>, vector<1x1x28x1xbf16>
      %110 = vector.shape_cast %109 : vector<1x1x28x1xbf16> to vector<28x1xbf16>
      %c8 = arith.constant 8 : index
      %c0_61 = arith.constant 0 : index
      %c0_62 = arith.constant 0 : index
      %111 = vector.load %arg2[%c8, %c0_61, %c0_62] : memref<25x1x128xbf16, #tpu.memory_space<vmem>>, vector<1x1x128xbf16>
      %112 = vector.shape_cast %111 : vector<1x1x128xbf16> to vector<1x128xbf16>
      %113 = arith.extf %110 : vector<28x1xbf16> to vector<28x1xf32>
      %114 = arith.extf %112 : vector<1x128xbf16> to vector<1x128xf32>
      %115 = vector.broadcast %113 : vector<28x1xf32> to vector<28x128xf32>
      %116 = vector.broadcast %114 : vector<1x128xf32> to vector<28x128xf32>
      %117 = arith.mulf %115, %116 : vector<28x128xf32>
      %118 = arith.addf %106, %117 : vector<28x128xf32>
      %c1_i32_63 = arith.constant 1 : i32
      %119 = arith.addi %arg4, %c1_i32_63 : i32
      %c0_64 = arith.constant 0 : index
      %120 = arith.index_cast %119 : i32 to index
      %c4_65 = arith.constant 4 : index
      %c0_66 = arith.constant 0 : index
      %121 = vector.load %arg1[%c0_64, %120, %c4_65, %c0_66] : memref<1x32x32x1xbf16, #tpu.memory_space<vmem>>, vector<1x1x28x1xbf16>
      %122 = vector.shape_cast %121 : vector<1x1x28x1xbf16> to vector<28x1xbf16>
      %c9 = arith.constant 9 : index
      %c0_67 = arith.constant 0 : index
      %c0_68 = arith.constant 0 : index
      %123 = vector.load %arg2[%c9, %c0_67, %c0_68] : memref<25x1x128xbf16, #tpu.memory_space<vmem>>, vector<1x1x128xbf16>
      %124 = vector.shape_cast %123 : vector<1x1x128xbf16> to vector<1x128xbf16>
      %125 = arith.extf %122 : vector<28x1xbf16> to vector<28x1xf32>
      %126 = arith.extf %124 : vector<1x128xbf16> to vector<1x128xf32>
      %127 = vector.broadcast %125 : vector<28x1xf32> to vector<28x128xf32>
      %128 = vector.broadcast %126 : vector<1x128xf32> to vector<28x128xf32>
      %129 = arith.mulf %127, %128 : vector<28x128xf32>
      %130 = arith.addf %118, %129 : vector<28x128xf32>
      %c2_i32 = arith.constant 2 : i32
      %131 = arith.addi %arg4, %c2_i32 : i32
      %c0_69 = arith.constant 0 : index
      %132 = arith.index_cast %131 : i32 to index
      %c0_70 = arith.constant 0 : index
      %c0_71 = arith.constant 0 : index
      %133 = vector.load %arg1[%c0_69, %132, %c0_70, %c0_71] : memref<1x32x32x1xbf16, #tpu.memory_space<vmem>>, vector<1x1x28x1xbf16>
      %134 = vector.shape_cast %133 : vector<1x1x28x1xbf16> to vector<28x1xbf16>
      %c10 = arith.constant 10 : index
      %c0_72 = arith.constant 0 : index
      %c0_73 = arith.constant 0 : index
      %135 = vector.load %arg2[%c10, %c0_72, %c0_73] : memref<25x1x128xbf16, #tpu.memory_space<vmem>>, vector<1x1x128xbf16>
      %136 = vector.shape_cast %135 : vector<1x1x128xbf16> to vector<1x128xbf16>
      %137 = arith.extf %134 : vector<28x1xbf16> to vector<28x1xf32>
      %138 = arith.extf %136 : vector<1x128xbf16> to vector<1x128xf32>
      %139 = vector.broadcast %137 : vector<28x1xf32> to vector<28x128xf32>
      %140 = vector.broadcast %138 : vector<1x128xf32> to vector<28x128xf32>
      %141 = arith.mulf %139, %140 : vector<28x128xf32>
      %142 = arith.addf %130, %141 : vector<28x128xf32>
      %c2_i32_74 = arith.constant 2 : i32
      %143 = arith.addi %arg4, %c2_i32_74 : i32
      %c0_75 = arith.constant 0 : index
      %144 = arith.index_cast %143 : i32 to index
      %c1_76 = arith.constant 1 : index
      %c0_77 = arith.constant 0 : index
      %145 = vector.load %arg1[%c0_75, %144, %c1_76, %c0_77] : memref<1x32x32x1xbf16, #tpu.memory_space<vmem>>, vector<1x1x28x1xbf16>
      %146 = vector.shape_cast %145 : vector<1x1x28x1xbf16> to vector<28x1xbf16>
      %c11 = arith.constant 11 : index
      %c0_78 = arith.constant 0 : index
      %c0_79 = arith.constant 0 : index
      %147 = vector.load %arg2[%c11, %c0_78, %c0_79] : memref<25x1x128xbf16, #tpu.memory_space<vmem>>, vector<1x1x128xbf16>
      %148 = vector.shape_cast %147 : vector<1x1x128xbf16> to vector<1x128xbf16>
      %149 = arith.extf %146 : vector<28x1xbf16> to vector<28x1xf32>
      %150 = arith.extf %148 : vector<1x128xbf16> to vector<1x128xf32>
      %151 = vector.broadcast %149 : vector<28x1xf32> to vector<28x128xf32>
      %152 = vector.broadcast %150 : vector<1x128xf32> to vector<28x128xf32>
      %153 = arith.mulf %151, %152 : vector<28x128xf32>
      %154 = arith.addf %142, %153 : vector<28x128xf32>
      %c2_i32_80 = arith.constant 2 : i32
      %155 = arith.addi %arg4, %c2_i32_80 : i32
      %c0_81 = arith.constant 0 : index
      %156 = arith.index_cast %155 : i32 to index
      %c2_82 = arith.constant 2 : index
      %c0_83 = arith.constant 0 : index
      %157 = vector.load %arg1[%c0_81, %156, %c2_82, %c0_83] : memref<1x32x32x1xbf16, #tpu.memory_space<vmem>>, vector<1x1x28x1xbf16>
      %158 = vector.shape_cast %157 : vector<1x1x28x1xbf16> to vector<28x1xbf16>
      %c12 = arith.constant 12 : index
      %c0_84 = arith.constant 0 : index
      %c0_85 = arith.constant 0 : index
      %159 = vector.load %arg2[%c12, %c0_84, %c0_85] : memref<25x1x128xbf16, #tpu.memory_space<vmem>>, vector<1x1x128xbf16>
      %160 = vector.shape_cast %159 : vector<1x1x128xbf16> to vector<1x128xbf16>
      %161 = arith.extf %158 : vector<28x1xbf16> to vector<28x1xf32>
      %162 = arith.extf %160 : vector<1x128xbf16> to vector<1x128xf32>
      %163 = vector.broadcast %161 : vector<28x1xf32> to vector<28x128xf32>
      %164 = vector.broadcast %162 : vector<1x128xf32> to vector<28x128xf32>
      %165 = arith.mulf %163, %164 : vector<28x128xf32>
      %166 = arith.addf %154, %165 : vector<28x128xf32>
      %c2_i32_86 = arith.constant 2 : i32
      %167 = arith.addi %arg4, %c2_i32_86 : i32
      %c0_87 = arith.constant 0 : index
      %168 = arith.index_cast %167 : i32 to index
      %c3_88 = arith.constant 3 : index
      %c0_89 = arith.constant 0 : index
      %169 = vector.load %arg1[%c0_87, %168, %c3_88, %c0_89] : memref<1x32x32x1xbf16, #tpu.memory_space<vmem>>, vector<1x1x28x1xbf16>
      %170 = vector.shape_cast %169 : vector<1x1x28x1xbf16> to vector<28x1xbf16>
      %c13 = arith.constant 13 : index
      %c0_90 = arith.constant 0 : index
      %c0_91 = arith.constant 0 : index
      %171 = vector.load %arg2[%c13, %c0_90, %c0_91] : memref<25x1x128xbf16, #tpu.memory_space<vmem>>, vector<1x1x128xbf16>
      %172 = vector.shape_cast %171 : vector<1x1x128xbf16> to vector<1x128xbf16>
      %173 = arith.extf %170 : vector<28x1xbf16> to vector<28x1xf32>
      %174 = arith.extf %172 : vector<1x128xbf16> to vector<1x128xf32>
      %175 = vector.broadcast %173 : vector<28x1xf32> to vector<28x128xf32>
      %176 = vector.broadcast %174 : vector<1x128xf32> to vector<28x128xf32>
      %177 = arith.mulf %175, %176 : vector<28x128xf32>
      %178 = arith.addf %166, %177 : vector<28x128xf32>
      %c2_i32_92 = arith.constant 2 : i32
      %179 = arith.addi %arg4, %c2_i32_92 : i32
      %c0_93 = arith.constant 0 : index
      %180 = arith.index_cast %179 : i32 to index
      %c4_94 = arith.constant 4 : index
      %c0_95 = arith.constant 0 : index
      %181 = vector.load %arg1[%c0_93, %180, %c4_94, %c0_95] : memref<1x32x32x1xbf16, #tpu.memory_space<vmem>>, vector<1x1x28x1xbf16>
      %182 = vector.shape_cast %181 : vector<1x1x28x1xbf16> to vector<28x1xbf16>
      %c14 = arith.constant 14 : index
      %c0_96 = arith.constant 0 : index
      %c0_97 = arith.constant 0 : index
      %183 = vector.load %arg2[%c14, %c0_96, %c0_97] : memref<25x1x128xbf16, #tpu.memory_space<vmem>>, vector<1x1x128xbf16>
      %184 = vector.shape_cast %183 : vector<1x1x128xbf16> to vector<1x128xbf16>
      %185 = arith.extf %182 : vector<28x1xbf16> to vector<28x1xf32>
      %186 = arith.extf %184 : vector<1x128xbf16> to vector<1x128xf32>
      %187 = vector.broadcast %185 : vector<28x1xf32> to vector<28x128xf32>
      %188 = vector.broadcast %186 : vector<1x128xf32> to vector<28x128xf32>
      %189 = arith.mulf %187, %188 : vector<28x128xf32>
      %190 = arith.addf %178, %189 : vector<28x128xf32>
      %c3_i32 = arith.constant 3 : i32
      %191 = arith.addi %arg4, %c3_i32 : i32
      %c0_98 = arith.constant 0 : index
      %192 = arith.index_cast %191 : i32 to index
      %c0_99 = arith.constant 0 : index
      %c0_100 = arith.constant 0 : index
      %193 = vector.load %arg1[%c0_98, %192, %c0_99, %c0_100] : memref<1x32x32x1xbf16, #tpu.memory_space<vmem>>, vector<1x1x28x1xbf16>
      %194 = vector.shape_cast %193 : vector<1x1x28x1xbf16> to vector<28x1xbf16>
      %c15 = arith.constant 15 : index
      %c0_101 = arith.constant 0 : index
      %c0_102 = arith.constant 0 : index
      %195 = vector.load %arg2[%c15, %c0_101, %c0_102] : memref<25x1x128xbf16, #tpu.memory_space<vmem>>, vector<1x1x128xbf16>
      %196 = vector.shape_cast %195 : vector<1x1x128xbf16> to vector<1x128xbf16>
      %197 = arith.extf %194 : vector<28x1xbf16> to vector<28x1xf32>
      %198 = arith.extf %196 : vector<1x128xbf16> to vector<1x128xf32>
      %199 = vector.broadcast %197 : vector<28x1xf32> to vector<28x128xf32>
      %200 = vector.broadcast %198 : vector<1x128xf32> to vector<28x128xf32>
      %201 = arith.mulf %199, %200 : vector<28x128xf32>
      %202 = arith.addf %190, %201 : vector<28x128xf32>
      %c3_i32_103 = arith.constant 3 : i32
      %203 = arith.addi %arg4, %c3_i32_103 : i32
      %c0_104 = arith.constant 0 : index
      %204 = arith.index_cast %203 : i32 to index
      %c1_105 = arith.constant 1 : index
      %c0_106 = arith.constant 0 : index
      %205 = vector.load %arg1[%c0_104, %204, %c1_105, %c0_106] : memref<1x32x32x1xbf16, #tpu.memory_space<vmem>>, vector<1x1x28x1xbf16>
      %206 = vector.shape_cast %205 : vector<1x1x28x1xbf16> to vector<28x1xbf16>
      %c16 = arith.constant 16 : index
      %c0_107 = arith.constant 0 : index
      %c0_108 = arith.constant 0 : index
      %207 = vector.load %arg2[%c16, %c0_107, %c0_108] : memref<25x1x128xbf16, #tpu.memory_space<vmem>>, vector<1x1x128xbf16>
      %208 = vector.shape_cast %207 : vector<1x1x128xbf16> to vector<1x128xbf16>
      %209 = arith.extf %206 : vector<28x1xbf16> to vector<28x1xf32>
      %210 = arith.extf %208 : vector<1x128xbf16> to vector<1x128xf32>
      %211 = vector.broadcast %209 : vector<28x1xf32> to vector<28x128xf32>
      %212 = vector.broadcast %210 : vector<1x128xf32> to vector<28x128xf32>
      %213 = arith.mulf %211, %212 : vector<28x128xf32>
      %214 = arith.addf %202, %213 : vector<28x128xf32>
      %c3_i32_109 = arith.constant 3 : i32
      %215 = arith.addi %arg4, %c3_i32_109 : i32
      %c0_110 = arith.constant 0 : index
      %216 = arith.index_cast %215 : i32 to index
      %c2_111 = arith.constant 2 : index
      %c0_112 = arith.constant 0 : index
      %217 = vector.load %arg1[%c0_110, %216, %c2_111, %c0_112] : memref<1x32x32x1xbf16, #tpu.memory_space<vmem>>, vector<1x1x28x1xbf16>
      %218 = vector.shape_cast %217 : vector<1x1x28x1xbf16> to vector<28x1xbf16>
      %c17 = arith.constant 17 : index
      %c0_113 = arith.constant 0 : index
      %c0_114 = arith.constant 0 : index
      %219 = vector.load %arg2[%c17, %c0_113, %c0_114] : memref<25x1x128xbf16, #tpu.memory_space<vmem>>, vector<1x1x128xbf16>
      %220 = vector.shape_cast %219 : vector<1x1x128xbf16> to vector<1x128xbf16>
      %221 = arith.extf %218 : vector<28x1xbf16> to vector<28x1xf32>
      %222 = arith.extf %220 : vector<1x128xbf16> to vector<1x128xf32>
      %223 = vector.broadcast %221 : vector<28x1xf32> to vector<28x128xf32>
      %224 = vector.broadcast %222 : vector<1x128xf32> to vector<28x128xf32>
      %225 = arith.mulf %223, %224 : vector<28x128xf32>
      %226 = arith.addf %214, %225 : vector<28x128xf32>
      %c3_i32_115 = arith.constant 3 : i32
      %227 = arith.addi %arg4, %c3_i32_115 : i32
      %c0_116 = arith.constant 0 : index
      %228 = arith.index_cast %227 : i32 to index
      %c3_117 = arith.constant 3 : index
      %c0_118 = arith.constant 0 : index
      %229 = vector.load %arg1[%c0_116, %228, %c3_117, %c0_118] : memref<1x32x32x1xbf16, #tpu.memory_space<vmem>>, vector<1x1x28x1xbf16>
      %230 = vector.shape_cast %229 : vector<1x1x28x1xbf16> to vector<28x1xbf16>
      %c18 = arith.constant 18 : index
      %c0_119 = arith.constant 0 : index
      %c0_120 = arith.constant 0 : index
      %231 = vector.load %arg2[%c18, %c0_119, %c0_120] : memref<25x1x128xbf16, #tpu.memory_space<vmem>>, vector<1x1x128xbf16>
      %232 = vector.shape_cast %231 : vector<1x1x128xbf16> to vector<1x128xbf16>
      %233 = arith.extf %230 : vector<28x1xbf16> to vector<28x1xf32>
      %234 = arith.extf %232 : vector<1x128xbf16> to vector<1x128xf32>
      %235 = vector.broadcast %233 : vector<28x1xf32> to vector<28x128xf32>
      %236 = vector.broadcast %234 : vector<1x128xf32> to vector<28x128xf32>
      %237 = arith.mulf %235, %236 : vector<28x128xf32>
      %238 = arith.addf %226, %237 : vector<28x128xf32>
      %c3_i32_121 = arith.constant 3 : i32
      %239 = arith.addi %arg4, %c3_i32_121 : i32
      %c0_122 = arith.constant 0 : index
      %240 = arith.index_cast %239 : i32 to index
      %c4_123 = arith.constant 4 : index
      %c0_124 = arith.constant 0 : index
      %241 = vector.load %arg1[%c0_122, %240, %c4_123, %c0_124] : memref<1x32x32x1xbf16, #tpu.memory_space<vmem>>, vector<1x1x28x1xbf16>
      %242 = vector.shape_cast %241 : vector<1x1x28x1xbf16> to vector<28x1xbf16>
      %c19 = arith.constant 19 : index
      %c0_125 = arith.constant 0 : index
      %c0_126 = arith.constant 0 : index
      %243 = vector.load %arg2[%c19, %c0_125, %c0_126] : memref<25x1x128xbf16, #tpu.memory_space<vmem>>, vector<1x1x128xbf16>
      %244 = vector.shape_cast %243 : vector<1x1x128xbf16> to vector<1x128xbf16>
      %245 = arith.extf %242 : vector<28x1xbf16> to vector<28x1xf32>
      %246 = arith.extf %244 : vector<1x128xbf16> to vector<1x128xf32>
      %247 = vector.broadcast %245 : vector<28x1xf32> to vector<28x128xf32>
      %248 = vector.broadcast %246 : vector<1x128xf32> to vector<28x128xf32>
      %249 = arith.mulf %247, %248 : vector<28x128xf32>
      %250 = arith.addf %238, %249 : vector<28x128xf32>
      %c4_i32 = arith.constant 4 : i32
      %251 = arith.addi %arg4, %c4_i32 : i32
      %c0_127 = arith.constant 0 : index
      %252 = arith.index_cast %251 : i32 to index
      %c0_128 = arith.constant 0 : index
      %c0_129 = arith.constant 0 : index
      %253 = vector.load %arg1[%c0_127, %252, %c0_128, %c0_129] : memref<1x32x32x1xbf16, #tpu.memory_space<vmem>>, vector<1x1x28x1xbf16>
      %254 = vector.shape_cast %253 : vector<1x1x28x1xbf16> to vector<28x1xbf16>
      %c20 = arith.constant 20 : index
      %c0_130 = arith.constant 0 : index
      %c0_131 = arith.constant 0 : index
      %255 = vector.load %arg2[%c20, %c0_130, %c0_131] : memref<25x1x128xbf16, #tpu.memory_space<vmem>>, vector<1x1x128xbf16>
      %256 = vector.shape_cast %255 : vector<1x1x128xbf16> to vector<1x128xbf16>
      %257 = arith.extf %254 : vector<28x1xbf16> to vector<28x1xf32>
      %258 = arith.extf %256 : vector<1x128xbf16> to vector<1x128xf32>
      %259 = vector.broadcast %257 : vector<28x1xf32> to vector<28x128xf32>
      %260 = vector.broadcast %258 : vector<1x128xf32> to vector<28x128xf32>
      %261 = arith.mulf %259, %260 : vector<28x128xf32>
      %262 = arith.addf %250, %261 : vector<28x128xf32>
      %c4_i32_132 = arith.constant 4 : i32
      %263 = arith.addi %arg4, %c4_i32_132 : i32
      %c0_133 = arith.constant 0 : index
      %264 = arith.index_cast %263 : i32 to index
      %c1_134 = arith.constant 1 : index
      %c0_135 = arith.constant 0 : index
      %265 = vector.load %arg1[%c0_133, %264, %c1_134, %c0_135] : memref<1x32x32x1xbf16, #tpu.memory_space<vmem>>, vector<1x1x28x1xbf16>
      %266 = vector.shape_cast %265 : vector<1x1x28x1xbf16> to vector<28x1xbf16>
      %c21 = arith.constant 21 : index
      %c0_136 = arith.constant 0 : index
      %c0_137 = arith.constant 0 : index
      %267 = vector.load %arg2[%c21, %c0_136, %c0_137] : memref<25x1x128xbf16, #tpu.memory_space<vmem>>, vector<1x1x128xbf16>
      %268 = vector.shape_cast %267 : vector<1x1x128xbf16> to vector<1x128xbf16>
      %269 = arith.extf %266 : vector<28x1xbf16> to vector<28x1xf32>
      %270 = arith.extf %268 : vector<1x128xbf16> to vector<1x128xf32>
      %271 = vector.broadcast %269 : vector<28x1xf32> to vector<28x128xf32>
      %272 = vector.broadcast %270 : vector<1x128xf32> to vector<28x128xf32>
      %273 = arith.mulf %271, %272 : vector<28x128xf32>
      %274 = arith.addf %262, %273 : vector<28x128xf32>
      %c4_i32_138 = arith.constant 4 : i32
      %275 = arith.addi %arg4, %c4_i32_138 : i32
      %c0_139 = arith.constant 0 : index
      %276 = arith.index_cast %275 : i32 to index
      %c2_140 = arith.constant 2 : index
      %c0_141 = arith.constant 0 : index
      %277 = vector.load %arg1[%c0_139, %276, %c2_140, %c0_141] : memref<1x32x32x1xbf16, #tpu.memory_space<vmem>>, vector<1x1x28x1xbf16>
      %278 = vector.shape_cast %277 : vector<1x1x28x1xbf16> to vector<28x1xbf16>
      %c22 = arith.constant 22 : index
      %c0_142 = arith.constant 0 : index
      %c0_143 = arith.constant 0 : index
      %279 = vector.load %arg2[%c22, %c0_142, %c0_143] : memref<25x1x128xbf16, #tpu.memory_space<vmem>>, vector<1x1x128xbf16>
      %280 = vector.shape_cast %279 : vector<1x1x128xbf16> to vector<1x128xbf16>
      %281 = arith.extf %278 : vector<28x1xbf16> to vector<28x1xf32>
      %282 = arith.extf %280 : vector<1x128xbf16> to vector<1x128xf32>
      %283 = vector.broadcast %281 : vector<28x1xf32> to vector<28x128xf32>
      %284 = vector.broadcast %282 : vector<1x128xf32> to vector<28x128xf32>
      %285 = arith.mulf %283, %284 : vector<28x128xf32>
      %286 = arith.addf %274, %285 : vector<28x128xf32>
      %c4_i32_144 = arith.constant 4 : i32
      %287 = arith.addi %arg4, %c4_i32_144 : i32
      %c0_145 = arith.constant 0 : index
      %288 = arith.index_cast %287 : i32 to index
      %c3_146 = arith.constant 3 : index
      %c0_147 = arith.constant 0 : index
      %289 = vector.load %arg1[%c0_145, %288, %c3_146, %c0_147] : memref<1x32x32x1xbf16, #tpu.memory_space<vmem>>, vector<1x1x28x1xbf16>
      %290 = vector.shape_cast %289 : vector<1x1x28x1xbf16> to vector<28x1xbf16>
      %c23 = arith.constant 23 : index
      %c0_148 = arith.constant 0 : index
      %c0_149 = arith.constant 0 : index
      %291 = vector.load %arg2[%c23, %c0_148, %c0_149] : memref<25x1x128xbf16, #tpu.memory_space<vmem>>, vector<1x1x128xbf16>
      %292 = vector.shape_cast %291 : vector<1x1x128xbf16> to vector<1x128xbf16>
      %293 = arith.extf %290 : vector<28x1xbf16> to vector<28x1xf32>
      %294 = arith.extf %292 : vector<1x128xbf16> to vector<1x128xf32>
      %295 = vector.broadcast %293 : vector<28x1xf32> to vector<28x128xf32>
      %296 = vector.broadcast %294 : vector<1x128xf32> to vector<28x128xf32>
      %297 = arith.mulf %295, %296 : vector<28x128xf32>
      %298 = arith.addf %286, %297 : vector<28x128xf32>
      %c4_i32_150 = arith.constant 4 : i32
      %299 = arith.addi %arg4, %c4_i32_150 : i32
      %c0_151 = arith.constant 0 : index
      %300 = arith.index_cast %299 : i32 to index
      %c4_152 = arith.constant 4 : index
      %c0_153 = arith.constant 0 : index
      %301 = vector.load %arg1[%c0_151, %300, %c4_152, %c0_153] : memref<1x32x32x1xbf16, #tpu.memory_space<vmem>>, vector<1x1x28x1xbf16>
      %302 = vector.shape_cast %301 : vector<1x1x28x1xbf16> to vector<28x1xbf16>
      %c24 = arith.constant 24 : index
      %c0_154 = arith.constant 0 : index
      %c0_155 = arith.constant 0 : index
      %303 = vector.load %arg2[%c24, %c0_154, %c0_155] : memref<25x1x128xbf16, #tpu.memory_space<vmem>>, vector<1x1x128xbf16>
      %304 = vector.shape_cast %303 : vector<1x1x128xbf16> to vector<1x128xbf16>
      %305 = arith.extf %302 : vector<28x1xbf16> to vector<28x1xf32>
      %306 = arith.extf %304 : vector<1x128xbf16> to vector<1x128xf32>
      %307 = vector.broadcast %305 : vector<28x1xf32> to vector<28x128xf32>
      %308 = vector.broadcast %306 : vector<1x128xf32> to vector<28x128xf32>
      %309 = arith.mulf %307, %308 : vector<28x128xf32>
      %310 = arith.addf %298, %309 : vector<28x128xf32>
      %cst_156 = arith.constant dense<0.000000e+00> : vector<128xf32>
      %311 = vector.multi_reduction <add>, %310, %cst_156 [0] : vector<28x128xf32> to vector<128xf32>
      %312 = vector.shape_cast %311 : vector<128xf32> to vector<1x128xf32>
      %313 = arith.addf %arg5, %312 : vector<1x128xf32>
      %314 = arith.mulf %310, %310 : vector<28x128xf32>
      %cst_157 = arith.constant dense<0.000000e+00> : vector<128xf32>
      %315 = vector.multi_reduction <add>, %314, %cst_157 [0] : vector<28x128xf32> to vector<128xf32>
      %316 = vector.shape_cast %315 : vector<128xf32> to vector<1x128xf32>
      %317 = arith.addf %arg6, %316 : vector<1x128xf32>
      scf.yield %313, %317 : vector<1x128xf32>, vector<1x128xf32>
    }
    %c28_i32_1 = arith.constant 28 : i32
    %c0 = arith.constant 0 : index
    %c0_2 = arith.constant 0 : index
    %c0_3 = arith.constant 0 : index
    %4 = vector.load %arg3[%c0, %c0_2, %c0_3] : memref<1x2x128xf32, #tpu.memory_space<vmem>>, vector<1x1x128xf32>
    %5 = vector.shape_cast %4 : vector<1x1x128xf32> to vector<1x128xf32>
    %6 = vector.shape_cast %3#0 : vector<1x128xf32> to vector<1x1x128xf32>
    tpu.vector_store %arg3[%c0, %c0_2, %c0_3], %6 {strides = array<i32>} : memref<1x2x128xf32, #tpu.memory_space<vmem>>, vector<1x1x128xf32>,
    %c0_4 = arith.constant 0 : index
    %c1 = arith.constant 1 : index
    %c0_5 = arith.constant 0 : index
    %7 = vector.load %arg3[%c0_4, %c1, %c0_5] : memref<1x2x128xf32, #tpu.memory_space<vmem>>, vector<1x1x128xf32>
    %8 = vector.shape_cast %7 : vector<1x1x128xf32> to vector<1x128xf32>
    %9 = vector.shape_cast %3#1 : vector<1x128xf32> to vector<1x1x128xf32>
    tpu.vector_store %arg3[%c0_4, %c1, %c0_5], %9 {strides = array<i32>} : memref<1x2x128xf32, #tpu.memory_space<vmem>>, vector<1x1x128xf32>,
    return
  }
  func.func @transform_0(%arg0: i32) -> (i32, i32, i32, i32) {
    %c0_i32 = arith.constant 0 : i32
    %c0_i32_0 = arith.constant 0 : i32
    %c0_i32_1 = arith.constant 0 : i32
    %c0_i32_2 = arith.constant 0 : i32
    return %arg0, %c0_i32, %c0_i32_0, %c0_i32_1 : i32, i32, i32, i32
  }
  func.func @transform_1(%arg0: i32) -> (i32, i32, i32) {
    %c0_i32 = arith.constant 0 : i32
    %c0_i32_0 = arith.constant 0 : i32
    %c0_i32_1 = arith.constant 0 : i32
    %c0_i32_2 = arith.constant 0 : i32
    return %c0_i32, %c0_i32_0, %c0_i32_1 : i32, i32, i32
  }
  func.func @transform_2(%arg0: i32) -> (i32, i32, i32) {
    %c0_i32 = arith.constant 0 : i32
    %c0_i32_0 = arith.constant 0 : i32
    %c0_i32_1 = arith.constant 0 : i32
    return %arg0, %c0_i32, %c0_i32_0 : i32, i32, i32
  }
}

module attributes {stable_mosaic.version = 11 : i64} {
  func.func @kernel(%arg0: i32, %arg1: memref<1x32x32x1xbf16, #tpu.memory_space<vmem>>, %arg2: memref<25x1x128xbf16, #tpu.memory_space<vmem>>, %arg3: memref<1x128xf32, #tpu.memory_space<vmem>>, %arg4: memref<1x128xf32, #tpu.memory_space<vmem>>, %arg5: memref<1x14x14x128xbf16, #tpu.memory_space<vmem>>) attributes {dimension_semantics = [#tpu.dimension_semantics<parallel>], iteration_bounds = array<i64: 2>, scalar_prefetch = 0 : i64, scratch_operands = 0 : i64, tpu.core_type = #tpu.core_type<tc>, window_params = [{transform_indices = @transform_0, window_bounds = array<i64: 1, 32, 32, 1>}, {pipeline_mode = #tpu.pipeline_mode<synchronous>, transform_indices = @transform_1, window_bounds = array<i64: 25, 1, 128>}, {pipeline_mode = #tpu.pipeline_mode<synchronous>, transform_indices = @transform_2, window_bounds = array<i64: 1, 128>}, {pipeline_mode = #tpu.pipeline_mode<synchronous>, transform_indices = @transform_3, window_bounds = array<i64: 1, 128>}, {transform_indices = @transform_4, window_bounds = array<i64: 1, 14, 14, 128>}]} {
    %c0 = arith.constant 0 : index
    %c0_0 = arith.constant 0 : index
    %0 = vector.load %arg3[%c0, %c0_0] : memref<1x128xf32, #tpu.memory_space<vmem>>, vector<1x128xf32>
    %c0_1 = arith.constant 0 : index
    %c0_2 = arith.constant 0 : index
    %1 = vector.load %arg4[%c0_1, %c0_2] : memref<1x128xf32, #tpu.memory_space<vmem>>, vector<1x128xf32>
    %2 = tpu.iota {dimensions = array<i32: 0>} : vector<14x28xi32>
    %3 = tpu.iota {dimensions = array<i32: 1>} : vector<14x28xi32>
    %c2_i32 = arith.constant 2 : i32
    %4 = vector.broadcast %c2_i32 : i32 to vector<14x28xi32>
    %5 = arith.muli %4, %2 : vector<14x28xi32>
    %6 = arith.cmpi eq, %3, %5 : vector<14x28xi32>
    %7 = arith.extui %6 : vector<14x28xi1> to vector<14x28xi32>
    %8 = arith.sitofp %7 : vector<14x28xi32> to vector<14x28xf32>
    %c2_i32_3 = arith.constant 2 : i32
    %9 = vector.broadcast %c2_i32_3 : i32 to vector<14x28xi32>
    %10 = arith.muli %9, %2 : vector<14x28xi32>
    %c1_i32 = arith.constant 1 : i32
    %11 = vector.broadcast %c1_i32 : i32 to vector<14x28xi32>
    %12 = arith.addi %10, %11 : vector<14x28xi32>
    %13 = arith.cmpi eq, %3, %12 : vector<14x28xi32>
    %14 = arith.extui %13 : vector<14x28xi1> to vector<14x28xi32>
    %15 = arith.sitofp %14 : vector<14x28xi32> to vector<14x28xf32>
    %c0_i32 = arith.constant 0 : i32
    %c14_i32 = arith.constant 14 : i32
    %16 = arith.addi %c0_i32, %c14_i32 : i32
    %c1_i32_4 = arith.constant 1 : i32
    scf.for %arg6 = %c0_i32 to %16 step %c1_i32_4  : i32 {
      %c2_i32_6 = arith.constant 2 : i32
      %17 = arith.muli %c2_i32_6, %arg6 : i32
      %cst = arith.constant 0.000000e+00 : f32
      %18 = vector.broadcast %cst : f32 to vector<28x128xf32>
      %c0_i32_7 = arith.constant 0 : i32
      %19 = arith.addi %17, %c0_i32_7 : i32
      %c0_8 = arith.constant 0 : index
      %20 = arith.index_cast %19 : i32 to index
      %c0_9 = arith.constant 0 : index
      %c0_10 = arith.constant 0 : index
      %21 = vector.load %arg1[%c0_8, %20, %c0_9, %c0_10] : memref<1x32x32x1xbf16, #tpu.memory_space<vmem>>, vector<1x1x28x1xbf16>
      %22 = vector.shape_cast %21 : vector<1x1x28x1xbf16> to vector<28x1xbf16>
      %c0_11 = arith.constant 0 : index
      %c0_12 = arith.constant 0 : index
      %c0_13 = arith.constant 0 : index
      %23 = vector.load %arg2[%c0_11, %c0_12, %c0_13] : memref<25x1x128xbf16, #tpu.memory_space<vmem>>, vector<1x1x128xbf16>
      %24 = vector.shape_cast %23 : vector<1x1x128xbf16> to vector<1x128xbf16>
      %25 = arith.extf %22 : vector<28x1xbf16> to vector<28x1xf32>
      %26 = arith.extf %24 : vector<1x128xbf16> to vector<1x128xf32>
      %27 = vector.broadcast %25 : vector<28x1xf32> to vector<28x128xf32>
      %28 = vector.broadcast %26 : vector<1x128xf32> to vector<28x128xf32>
      %29 = arith.mulf %27, %28 : vector<28x128xf32>
      %30 = arith.addf %18, %29 : vector<28x128xf32>
      %c0_i32_14 = arith.constant 0 : i32
      %31 = arith.addi %17, %c0_i32_14 : i32
      %c0_15 = arith.constant 0 : index
      %32 = arith.index_cast %31 : i32 to index
      %c1 = arith.constant 1 : index
      %c0_16 = arith.constant 0 : index
      %33 = vector.load %arg1[%c0_15, %32, %c1, %c0_16] : memref<1x32x32x1xbf16, #tpu.memory_space<vmem>>, vector<1x1x28x1xbf16>
      %34 = vector.shape_cast %33 : vector<1x1x28x1xbf16> to vector<28x1xbf16>
      %c1_17 = arith.constant 1 : index
      %c0_18 = arith.constant 0 : index
      %c0_19 = arith.constant 0 : index
      %35 = vector.load %arg2[%c1_17, %c0_18, %c0_19] : memref<25x1x128xbf16, #tpu.memory_space<vmem>>, vector<1x1x128xbf16>
      %36 = vector.shape_cast %35 : vector<1x1x128xbf16> to vector<1x128xbf16>
      %37 = arith.extf %34 : vector<28x1xbf16> to vector<28x1xf32>
      %38 = arith.extf %36 : vector<1x128xbf16> to vector<1x128xf32>
      %39 = vector.broadcast %37 : vector<28x1xf32> to vector<28x128xf32>
      %40 = vector.broadcast %38 : vector<1x128xf32> to vector<28x128xf32>
      %41 = arith.mulf %39, %40 : vector<28x128xf32>
      %42 = arith.addf %30, %41 : vector<28x128xf32>
      %c0_i32_20 = arith.constant 0 : i32
      %43 = arith.addi %17, %c0_i32_20 : i32
      %c0_21 = arith.constant 0 : index
      %44 = arith.index_cast %43 : i32 to index
      %c2 = arith.constant 2 : index
      %c0_22 = arith.constant 0 : index
      %45 = vector.load %arg1[%c0_21, %44, %c2, %c0_22] : memref<1x32x32x1xbf16, #tpu.memory_space<vmem>>, vector<1x1x28x1xbf16>
      %46 = vector.shape_cast %45 : vector<1x1x28x1xbf16> to vector<28x1xbf16>
      %c2_23 = arith.constant 2 : index
      %c0_24 = arith.constant 0 : index
      %c0_25 = arith.constant 0 : index
      %47 = vector.load %arg2[%c2_23, %c0_24, %c0_25] : memref<25x1x128xbf16, #tpu.memory_space<vmem>>, vector<1x1x128xbf16>
      %48 = vector.shape_cast %47 : vector<1x1x128xbf16> to vector<1x128xbf16>
      %49 = arith.extf %46 : vector<28x1xbf16> to vector<28x1xf32>
      %50 = arith.extf %48 : vector<1x128xbf16> to vector<1x128xf32>
      %51 = vector.broadcast %49 : vector<28x1xf32> to vector<28x128xf32>
      %52 = vector.broadcast %50 : vector<1x128xf32> to vector<28x128xf32>
      %53 = arith.mulf %51, %52 : vector<28x128xf32>
      %54 = arith.addf %42, %53 : vector<28x128xf32>
      %c0_i32_26 = arith.constant 0 : i32
      %55 = arith.addi %17, %c0_i32_26 : i32
      %c0_27 = arith.constant 0 : index
      %56 = arith.index_cast %55 : i32 to index
      %c3 = arith.constant 3 : index
      %c0_28 = arith.constant 0 : index
      %57 = vector.load %arg1[%c0_27, %56, %c3, %c0_28] : memref<1x32x32x1xbf16, #tpu.memory_space<vmem>>, vector<1x1x28x1xbf16>
      %58 = vector.shape_cast %57 : vector<1x1x28x1xbf16> to vector<28x1xbf16>
      %c3_29 = arith.constant 3 : index
      %c0_30 = arith.constant 0 : index
      %c0_31 = arith.constant 0 : index
      %59 = vector.load %arg2[%c3_29, %c0_30, %c0_31] : memref<25x1x128xbf16, #tpu.memory_space<vmem>>, vector<1x1x128xbf16>
      %60 = vector.shape_cast %59 : vector<1x1x128xbf16> to vector<1x128xbf16>
      %61 = arith.extf %58 : vector<28x1xbf16> to vector<28x1xf32>
      %62 = arith.extf %60 : vector<1x128xbf16> to vector<1x128xf32>
      %63 = vector.broadcast %61 : vector<28x1xf32> to vector<28x128xf32>
      %64 = vector.broadcast %62 : vector<1x128xf32> to vector<28x128xf32>
      %65 = arith.mulf %63, %64 : vector<28x128xf32>
      %66 = arith.addf %54, %65 : vector<28x128xf32>
      %c0_i32_32 = arith.constant 0 : i32
      %67 = arith.addi %17, %c0_i32_32 : i32
      %c0_33 = arith.constant 0 : index
      %68 = arith.index_cast %67 : i32 to index
      %c4 = arith.constant 4 : index
      %c0_34 = arith.constant 0 : index
      %69 = vector.load %arg1[%c0_33, %68, %c4, %c0_34] : memref<1x32x32x1xbf16, #tpu.memory_space<vmem>>, vector<1x1x28x1xbf16>
      %70 = vector.shape_cast %69 : vector<1x1x28x1xbf16> to vector<28x1xbf16>
      %c4_35 = arith.constant 4 : index
      %c0_36 = arith.constant 0 : index
      %c0_37 = arith.constant 0 : index
      %71 = vector.load %arg2[%c4_35, %c0_36, %c0_37] : memref<25x1x128xbf16, #tpu.memory_space<vmem>>, vector<1x1x128xbf16>
      %72 = vector.shape_cast %71 : vector<1x1x128xbf16> to vector<1x128xbf16>
      %73 = arith.extf %70 : vector<28x1xbf16> to vector<28x1xf32>
      %74 = arith.extf %72 : vector<1x128xbf16> to vector<1x128xf32>
      %75 = vector.broadcast %73 : vector<28x1xf32> to vector<28x128xf32>
      %76 = vector.broadcast %74 : vector<1x128xf32> to vector<28x128xf32>
      %77 = arith.mulf %75, %76 : vector<28x128xf32>
      %78 = arith.addf %66, %77 : vector<28x128xf32>
      %c1_i32_38 = arith.constant 1 : i32
      %79 = arith.addi %17, %c1_i32_38 : i32
      %c0_39 = arith.constant 0 : index
      %80 = arith.index_cast %79 : i32 to index
      %c0_40 = arith.constant 0 : index
      %c0_41 = arith.constant 0 : index
      %81 = vector.load %arg1[%c0_39, %80, %c0_40, %c0_41] : memref<1x32x32x1xbf16, #tpu.memory_space<vmem>>, vector<1x1x28x1xbf16>
      %82 = vector.shape_cast %81 : vector<1x1x28x1xbf16> to vector<28x1xbf16>
      %c5 = arith.constant 5 : index
      %c0_42 = arith.constant 0 : index
      %c0_43 = arith.constant 0 : index
      %83 = vector.load %arg2[%c5, %c0_42, %c0_43] : memref<25x1x128xbf16, #tpu.memory_space<vmem>>, vector<1x1x128xbf16>
      %84 = vector.shape_cast %83 : vector<1x1x128xbf16> to vector<1x128xbf16>
      %85 = arith.extf %82 : vector<28x1xbf16> to vector<28x1xf32>
      %86 = arith.extf %84 : vector<1x128xbf16> to vector<1x128xf32>
      %87 = vector.broadcast %85 : vector<28x1xf32> to vector<28x128xf32>
      %88 = vector.broadcast %86 : vector<1x128xf32> to vector<28x128xf32>
      %89 = arith.mulf %87, %88 : vector<28x128xf32>
      %90 = arith.addf %78, %89 : vector<28x128xf32>
      %c1_i32_44 = arith.constant 1 : i32
      %91 = arith.addi %17, %c1_i32_44 : i32
      %c0_45 = arith.constant 0 : index
      %92 = arith.index_cast %91 : i32 to index
      %c1_46 = arith.constant 1 : index
      %c0_47 = arith.constant 0 : index
      %93 = vector.load %arg1[%c0_45, %92, %c1_46, %c0_47] : memref<1x32x32x1xbf16, #tpu.memory_space<vmem>>, vector<1x1x28x1xbf16>
      %94 = vector.shape_cast %93 : vector<1x1x28x1xbf16> to vector<28x1xbf16>
      %c6 = arith.constant 6 : index
      %c0_48 = arith.constant 0 : index
      %c0_49 = arith.constant 0 : index
      %95 = vector.load %arg2[%c6, %c0_48, %c0_49] : memref<25x1x128xbf16, #tpu.memory_space<vmem>>, vector<1x1x128xbf16>
      %96 = vector.shape_cast %95 : vector<1x1x128xbf16> to vector<1x128xbf16>
      %97 = arith.extf %94 : vector<28x1xbf16> to vector<28x1xf32>
      %98 = arith.extf %96 : vector<1x128xbf16> to vector<1x128xf32>
      %99 = vector.broadcast %97 : vector<28x1xf32> to vector<28x128xf32>
      %100 = vector.broadcast %98 : vector<1x128xf32> to vector<28x128xf32>
      %101 = arith.mulf %99, %100 : vector<28x128xf32>
      %102 = arith.addf %90, %101 : vector<28x128xf32>
      %c1_i32_50 = arith.constant 1 : i32
      %103 = arith.addi %17, %c1_i32_50 : i32
      %c0_51 = arith.constant 0 : index
      %104 = arith.index_cast %103 : i32 to index
      %c2_52 = arith.constant 2 : index
      %c0_53 = arith.constant 0 : index
      %105 = vector.load %arg1[%c0_51, %104, %c2_52, %c0_53] : memref<1x32x32x1xbf16, #tpu.memory_space<vmem>>, vector<1x1x28x1xbf16>
      %106 = vector.shape_cast %105 : vector<1x1x28x1xbf16> to vector<28x1xbf16>
      %c7 = arith.constant 7 : index
      %c0_54 = arith.constant 0 : index
      %c0_55 = arith.constant 0 : index
      %107 = vector.load %arg2[%c7, %c0_54, %c0_55] : memref<25x1x128xbf16, #tpu.memory_space<vmem>>, vector<1x1x128xbf16>
      %108 = vector.shape_cast %107 : vector<1x1x128xbf16> to vector<1x128xbf16>
      %109 = arith.extf %106 : vector<28x1xbf16> to vector<28x1xf32>
      %110 = arith.extf %108 : vector<1x128xbf16> to vector<1x128xf32>
      %111 = vector.broadcast %109 : vector<28x1xf32> to vector<28x128xf32>
      %112 = vector.broadcast %110 : vector<1x128xf32> to vector<28x128xf32>
      %113 = arith.mulf %111, %112 : vector<28x128xf32>
      %114 = arith.addf %102, %113 : vector<28x128xf32>
      %c1_i32_56 = arith.constant 1 : i32
      %115 = arith.addi %17, %c1_i32_56 : i32
      %c0_57 = arith.constant 0 : index
      %116 = arith.index_cast %115 : i32 to index
      %c3_58 = arith.constant 3 : index
      %c0_59 = arith.constant 0 : index
      %117 = vector.load %arg1[%c0_57, %116, %c3_58, %c0_59] : memref<1x32x32x1xbf16, #tpu.memory_space<vmem>>, vector<1x1x28x1xbf16>
      %118 = vector.shape_cast %117 : vector<1x1x28x1xbf16> to vector<28x1xbf16>
      %c8 = arith.constant 8 : index
      %c0_60 = arith.constant 0 : index
      %c0_61 = arith.constant 0 : index
      %119 = vector.load %arg2[%c8, %c0_60, %c0_61] : memref<25x1x128xbf16, #tpu.memory_space<vmem>>, vector<1x1x128xbf16>
      %120 = vector.shape_cast %119 : vector<1x1x128xbf16> to vector<1x128xbf16>
      %121 = arith.extf %118 : vector<28x1xbf16> to vector<28x1xf32>
      %122 = arith.extf %120 : vector<1x128xbf16> to vector<1x128xf32>
      %123 = vector.broadcast %121 : vector<28x1xf32> to vector<28x128xf32>
      %124 = vector.broadcast %122 : vector<1x128xf32> to vector<28x128xf32>
      %125 = arith.mulf %123, %124 : vector<28x128xf32>
      %126 = arith.addf %114, %125 : vector<28x128xf32>
      %c1_i32_62 = arith.constant 1 : i32
      %127 = arith.addi %17, %c1_i32_62 : i32
      %c0_63 = arith.constant 0 : index
      %128 = arith.index_cast %127 : i32 to index
      %c4_64 = arith.constant 4 : index
      %c0_65 = arith.constant 0 : index
      %129 = vector.load %arg1[%c0_63, %128, %c4_64, %c0_65] : memref<1x32x32x1xbf16, #tpu.memory_space<vmem>>, vector<1x1x28x1xbf16>
      %130 = vector.shape_cast %129 : vector<1x1x28x1xbf16> to vector<28x1xbf16>
      %c9 = arith.constant 9 : index
      %c0_66 = arith.constant 0 : index
      %c0_67 = arith.constant 0 : index
      %131 = vector.load %arg2[%c9, %c0_66, %c0_67] : memref<25x1x128xbf16, #tpu.memory_space<vmem>>, vector<1x1x128xbf16>
      %132 = vector.shape_cast %131 : vector<1x1x128xbf16> to vector<1x128xbf16>
      %133 = arith.extf %130 : vector<28x1xbf16> to vector<28x1xf32>
      %134 = arith.extf %132 : vector<1x128xbf16> to vector<1x128xf32>
      %135 = vector.broadcast %133 : vector<28x1xf32> to vector<28x128xf32>
      %136 = vector.broadcast %134 : vector<1x128xf32> to vector<28x128xf32>
      %137 = arith.mulf %135, %136 : vector<28x128xf32>
      %138 = arith.addf %126, %137 : vector<28x128xf32>
      %c2_i32_68 = arith.constant 2 : i32
      %139 = arith.addi %17, %c2_i32_68 : i32
      %c0_69 = arith.constant 0 : index
      %140 = arith.index_cast %139 : i32 to index
      %c0_70 = arith.constant 0 : index
      %c0_71 = arith.constant 0 : index
      %141 = vector.load %arg1[%c0_69, %140, %c0_70, %c0_71] : memref<1x32x32x1xbf16, #tpu.memory_space<vmem>>, vector<1x1x28x1xbf16>
      %142 = vector.shape_cast %141 : vector<1x1x28x1xbf16> to vector<28x1xbf16>
      %c10 = arith.constant 10 : index
      %c0_72 = arith.constant 0 : index
      %c0_73 = arith.constant 0 : index
      %143 = vector.load %arg2[%c10, %c0_72, %c0_73] : memref<25x1x128xbf16, #tpu.memory_space<vmem>>, vector<1x1x128xbf16>
      %144 = vector.shape_cast %143 : vector<1x1x128xbf16> to vector<1x128xbf16>
      %145 = arith.extf %142 : vector<28x1xbf16> to vector<28x1xf32>
      %146 = arith.extf %144 : vector<1x128xbf16> to vector<1x128xf32>
      %147 = vector.broadcast %145 : vector<28x1xf32> to vector<28x128xf32>
      %148 = vector.broadcast %146 : vector<1x128xf32> to vector<28x128xf32>
      %149 = arith.mulf %147, %148 : vector<28x128xf32>
      %150 = arith.addf %138, %149 : vector<28x128xf32>
      %c2_i32_74 = arith.constant 2 : i32
      %151 = arith.addi %17, %c2_i32_74 : i32
      %c0_75 = arith.constant 0 : index
      %152 = arith.index_cast %151 : i32 to index
      %c1_76 = arith.constant 1 : index
      %c0_77 = arith.constant 0 : index
      %153 = vector.load %arg1[%c0_75, %152, %c1_76, %c0_77] : memref<1x32x32x1xbf16, #tpu.memory_space<vmem>>, vector<1x1x28x1xbf16>
      %154 = vector.shape_cast %153 : vector<1x1x28x1xbf16> to vector<28x1xbf16>
      %c11 = arith.constant 11 : index
      %c0_78 = arith.constant 0 : index
      %c0_79 = arith.constant 0 : index
      %155 = vector.load %arg2[%c11, %c0_78, %c0_79] : memref<25x1x128xbf16, #tpu.memory_space<vmem>>, vector<1x1x128xbf16>
      %156 = vector.shape_cast %155 : vector<1x1x128xbf16> to vector<1x128xbf16>
      %157 = arith.extf %154 : vector<28x1xbf16> to vector<28x1xf32>
      %158 = arith.extf %156 : vector<1x128xbf16> to vector<1x128xf32>
      %159 = vector.broadcast %157 : vector<28x1xf32> to vector<28x128xf32>
      %160 = vector.broadcast %158 : vector<1x128xf32> to vector<28x128xf32>
      %161 = arith.mulf %159, %160 : vector<28x128xf32>
      %162 = arith.addf %150, %161 : vector<28x128xf32>
      %c2_i32_80 = arith.constant 2 : i32
      %163 = arith.addi %17, %c2_i32_80 : i32
      %c0_81 = arith.constant 0 : index
      %164 = arith.index_cast %163 : i32 to index
      %c2_82 = arith.constant 2 : index
      %c0_83 = arith.constant 0 : index
      %165 = vector.load %arg1[%c0_81, %164, %c2_82, %c0_83] : memref<1x32x32x1xbf16, #tpu.memory_space<vmem>>, vector<1x1x28x1xbf16>
      %166 = vector.shape_cast %165 : vector<1x1x28x1xbf16> to vector<28x1xbf16>
      %c12 = arith.constant 12 : index
      %c0_84 = arith.constant 0 : index
      %c0_85 = arith.constant 0 : index
      %167 = vector.load %arg2[%c12, %c0_84, %c0_85] : memref<25x1x128xbf16, #tpu.memory_space<vmem>>, vector<1x1x128xbf16>
      %168 = vector.shape_cast %167 : vector<1x1x128xbf16> to vector<1x128xbf16>
      %169 = arith.extf %166 : vector<28x1xbf16> to vector<28x1xf32>
      %170 = arith.extf %168 : vector<1x128xbf16> to vector<1x128xf32>
      %171 = vector.broadcast %169 : vector<28x1xf32> to vector<28x128xf32>
      %172 = vector.broadcast %170 : vector<1x128xf32> to vector<28x128xf32>
      %173 = arith.mulf %171, %172 : vector<28x128xf32>
      %174 = arith.addf %162, %173 : vector<28x128xf32>
      %c2_i32_86 = arith.constant 2 : i32
      %175 = arith.addi %17, %c2_i32_86 : i32
      %c0_87 = arith.constant 0 : index
      %176 = arith.index_cast %175 : i32 to index
      %c3_88 = arith.constant 3 : index
      %c0_89 = arith.constant 0 : index
      %177 = vector.load %arg1[%c0_87, %176, %c3_88, %c0_89] : memref<1x32x32x1xbf16, #tpu.memory_space<vmem>>, vector<1x1x28x1xbf16>
      %178 = vector.shape_cast %177 : vector<1x1x28x1xbf16> to vector<28x1xbf16>
      %c13 = arith.constant 13 : index
      %c0_90 = arith.constant 0 : index
      %c0_91 = arith.constant 0 : index
      %179 = vector.load %arg2[%c13, %c0_90, %c0_91] : memref<25x1x128xbf16, #tpu.memory_space<vmem>>, vector<1x1x128xbf16>
      %180 = vector.shape_cast %179 : vector<1x1x128xbf16> to vector<1x128xbf16>
      %181 = arith.extf %178 : vector<28x1xbf16> to vector<28x1xf32>
      %182 = arith.extf %180 : vector<1x128xbf16> to vector<1x128xf32>
      %183 = vector.broadcast %181 : vector<28x1xf32> to vector<28x128xf32>
      %184 = vector.broadcast %182 : vector<1x128xf32> to vector<28x128xf32>
      %185 = arith.mulf %183, %184 : vector<28x128xf32>
      %186 = arith.addf %174, %185 : vector<28x128xf32>
      %c2_i32_92 = arith.constant 2 : i32
      %187 = arith.addi %17, %c2_i32_92 : i32
      %c0_93 = arith.constant 0 : index
      %188 = arith.index_cast %187 : i32 to index
      %c4_94 = arith.constant 4 : index
      %c0_95 = arith.constant 0 : index
      %189 = vector.load %arg1[%c0_93, %188, %c4_94, %c0_95] : memref<1x32x32x1xbf16, #tpu.memory_space<vmem>>, vector<1x1x28x1xbf16>
      %190 = vector.shape_cast %189 : vector<1x1x28x1xbf16> to vector<28x1xbf16>
      %c14 = arith.constant 14 : index
      %c0_96 = arith.constant 0 : index
      %c0_97 = arith.constant 0 : index
      %191 = vector.load %arg2[%c14, %c0_96, %c0_97] : memref<25x1x128xbf16, #tpu.memory_space<vmem>>, vector<1x1x128xbf16>
      %192 = vector.shape_cast %191 : vector<1x1x128xbf16> to vector<1x128xbf16>
      %193 = arith.extf %190 : vector<28x1xbf16> to vector<28x1xf32>
      %194 = arith.extf %192 : vector<1x128xbf16> to vector<1x128xf32>
      %195 = vector.broadcast %193 : vector<28x1xf32> to vector<28x128xf32>
      %196 = vector.broadcast %194 : vector<1x128xf32> to vector<28x128xf32>
      %197 = arith.mulf %195, %196 : vector<28x128xf32>
      %198 = arith.addf %186, %197 : vector<28x128xf32>
      %c3_i32 = arith.constant 3 : i32
      %199 = arith.addi %17, %c3_i32 : i32
      %c0_98 = arith.constant 0 : index
      %200 = arith.index_cast %199 : i32 to index
      %c0_99 = arith.constant 0 : index
      %c0_100 = arith.constant 0 : index
      %201 = vector.load %arg1[%c0_98, %200, %c0_99, %c0_100] : memref<1x32x32x1xbf16, #tpu.memory_space<vmem>>, vector<1x1x28x1xbf16>
      %202 = vector.shape_cast %201 : vector<1x1x28x1xbf16> to vector<28x1xbf16>
      %c15 = arith.constant 15 : index
      %c0_101 = arith.constant 0 : index
      %c0_102 = arith.constant 0 : index
      %203 = vector.load %arg2[%c15, %c0_101, %c0_102] : memref<25x1x128xbf16, #tpu.memory_space<vmem>>, vector<1x1x128xbf16>
      %204 = vector.shape_cast %203 : vector<1x1x128xbf16> to vector<1x128xbf16>
      %205 = arith.extf %202 : vector<28x1xbf16> to vector<28x1xf32>
      %206 = arith.extf %204 : vector<1x128xbf16> to vector<1x128xf32>
      %207 = vector.broadcast %205 : vector<28x1xf32> to vector<28x128xf32>
      %208 = vector.broadcast %206 : vector<1x128xf32> to vector<28x128xf32>
      %209 = arith.mulf %207, %208 : vector<28x128xf32>
      %210 = arith.addf %198, %209 : vector<28x128xf32>
      %c3_i32_103 = arith.constant 3 : i32
      %211 = arith.addi %17, %c3_i32_103 : i32
      %c0_104 = arith.constant 0 : index
      %212 = arith.index_cast %211 : i32 to index
      %c1_105 = arith.constant 1 : index
      %c0_106 = arith.constant 0 : index
      %213 = vector.load %arg1[%c0_104, %212, %c1_105, %c0_106] : memref<1x32x32x1xbf16, #tpu.memory_space<vmem>>, vector<1x1x28x1xbf16>
      %214 = vector.shape_cast %213 : vector<1x1x28x1xbf16> to vector<28x1xbf16>
      %c16 = arith.constant 16 : index
      %c0_107 = arith.constant 0 : index
      %c0_108 = arith.constant 0 : index
      %215 = vector.load %arg2[%c16, %c0_107, %c0_108] : memref<25x1x128xbf16, #tpu.memory_space<vmem>>, vector<1x1x128xbf16>
      %216 = vector.shape_cast %215 : vector<1x1x128xbf16> to vector<1x128xbf16>
      %217 = arith.extf %214 : vector<28x1xbf16> to vector<28x1xf32>
      %218 = arith.extf %216 : vector<1x128xbf16> to vector<1x128xf32>
      %219 = vector.broadcast %217 : vector<28x1xf32> to vector<28x128xf32>
      %220 = vector.broadcast %218 : vector<1x128xf32> to vector<28x128xf32>
      %221 = arith.mulf %219, %220 : vector<28x128xf32>
      %222 = arith.addf %210, %221 : vector<28x128xf32>
      %c3_i32_109 = arith.constant 3 : i32
      %223 = arith.addi %17, %c3_i32_109 : i32
      %c0_110 = arith.constant 0 : index
      %224 = arith.index_cast %223 : i32 to index
      %c2_111 = arith.constant 2 : index
      %c0_112 = arith.constant 0 : index
      %225 = vector.load %arg1[%c0_110, %224, %c2_111, %c0_112] : memref<1x32x32x1xbf16, #tpu.memory_space<vmem>>, vector<1x1x28x1xbf16>
      %226 = vector.shape_cast %225 : vector<1x1x28x1xbf16> to vector<28x1xbf16>
      %c17 = arith.constant 17 : index
      %c0_113 = arith.constant 0 : index
      %c0_114 = arith.constant 0 : index
      %227 = vector.load %arg2[%c17, %c0_113, %c0_114] : memref<25x1x128xbf16, #tpu.memory_space<vmem>>, vector<1x1x128xbf16>
      %228 = vector.shape_cast %227 : vector<1x1x128xbf16> to vector<1x128xbf16>
      %229 = arith.extf %226 : vector<28x1xbf16> to vector<28x1xf32>
      %230 = arith.extf %228 : vector<1x128xbf16> to vector<1x128xf32>
      %231 = vector.broadcast %229 : vector<28x1xf32> to vector<28x128xf32>
      %232 = vector.broadcast %230 : vector<1x128xf32> to vector<28x128xf32>
      %233 = arith.mulf %231, %232 : vector<28x128xf32>
      %234 = arith.addf %222, %233 : vector<28x128xf32>
      %c3_i32_115 = arith.constant 3 : i32
      %235 = arith.addi %17, %c3_i32_115 : i32
      %c0_116 = arith.constant 0 : index
      %236 = arith.index_cast %235 : i32 to index
      %c3_117 = arith.constant 3 : index
      %c0_118 = arith.constant 0 : index
      %237 = vector.load %arg1[%c0_116, %236, %c3_117, %c0_118] : memref<1x32x32x1xbf16, #tpu.memory_space<vmem>>, vector<1x1x28x1xbf16>
      %238 = vector.shape_cast %237 : vector<1x1x28x1xbf16> to vector<28x1xbf16>
      %c18 = arith.constant 18 : index
      %c0_119 = arith.constant 0 : index
      %c0_120 = arith.constant 0 : index
      %239 = vector.load %arg2[%c18, %c0_119, %c0_120] : memref<25x1x128xbf16, #tpu.memory_space<vmem>>, vector<1x1x128xbf16>
      %240 = vector.shape_cast %239 : vector<1x1x128xbf16> to vector<1x128xbf16>
      %241 = arith.extf %238 : vector<28x1xbf16> to vector<28x1xf32>
      %242 = arith.extf %240 : vector<1x128xbf16> to vector<1x128xf32>
      %243 = vector.broadcast %241 : vector<28x1xf32> to vector<28x128xf32>
      %244 = vector.broadcast %242 : vector<1x128xf32> to vector<28x128xf32>
      %245 = arith.mulf %243, %244 : vector<28x128xf32>
      %246 = arith.addf %234, %245 : vector<28x128xf32>
      %c3_i32_121 = arith.constant 3 : i32
      %247 = arith.addi %17, %c3_i32_121 : i32
      %c0_122 = arith.constant 0 : index
      %248 = arith.index_cast %247 : i32 to index
      %c4_123 = arith.constant 4 : index
      %c0_124 = arith.constant 0 : index
      %249 = vector.load %arg1[%c0_122, %248, %c4_123, %c0_124] : memref<1x32x32x1xbf16, #tpu.memory_space<vmem>>, vector<1x1x28x1xbf16>
      %250 = vector.shape_cast %249 : vector<1x1x28x1xbf16> to vector<28x1xbf16>
      %c19 = arith.constant 19 : index
      %c0_125 = arith.constant 0 : index
      %c0_126 = arith.constant 0 : index
      %251 = vector.load %arg2[%c19, %c0_125, %c0_126] : memref<25x1x128xbf16, #tpu.memory_space<vmem>>, vector<1x1x128xbf16>
      %252 = vector.shape_cast %251 : vector<1x1x128xbf16> to vector<1x128xbf16>
      %253 = arith.extf %250 : vector<28x1xbf16> to vector<28x1xf32>
      %254 = arith.extf %252 : vector<1x128xbf16> to vector<1x128xf32>
      %255 = vector.broadcast %253 : vector<28x1xf32> to vector<28x128xf32>
      %256 = vector.broadcast %254 : vector<1x128xf32> to vector<28x128xf32>
      %257 = arith.mulf %255, %256 : vector<28x128xf32>
      %258 = arith.addf %246, %257 : vector<28x128xf32>
      %c4_i32 = arith.constant 4 : i32
      %259 = arith.addi %17, %c4_i32 : i32
      %c0_127 = arith.constant 0 : index
      %260 = arith.index_cast %259 : i32 to index
      %c0_128 = arith.constant 0 : index
      %c0_129 = arith.constant 0 : index
      %261 = vector.load %arg1[%c0_127, %260, %c0_128, %c0_129] : memref<1x32x32x1xbf16, #tpu.memory_space<vmem>>, vector<1x1x28x1xbf16>
      %262 = vector.shape_cast %261 : vector<1x1x28x1xbf16> to vector<28x1xbf16>
      %c20 = arith.constant 20 : index
      %c0_130 = arith.constant 0 : index
      %c0_131 = arith.constant 0 : index
      %263 = vector.load %arg2[%c20, %c0_130, %c0_131] : memref<25x1x128xbf16, #tpu.memory_space<vmem>>, vector<1x1x128xbf16>
      %264 = vector.shape_cast %263 : vector<1x1x128xbf16> to vector<1x128xbf16>
      %265 = arith.extf %262 : vector<28x1xbf16> to vector<28x1xf32>
      %266 = arith.extf %264 : vector<1x128xbf16> to vector<1x128xf32>
      %267 = vector.broadcast %265 : vector<28x1xf32> to vector<28x128xf32>
      %268 = vector.broadcast %266 : vector<1x128xf32> to vector<28x128xf32>
      %269 = arith.mulf %267, %268 : vector<28x128xf32>
      %270 = arith.addf %258, %269 : vector<28x128xf32>
      %c4_i32_132 = arith.constant 4 : i32
      %271 = arith.addi %17, %c4_i32_132 : i32
      %c0_133 = arith.constant 0 : index
      %272 = arith.index_cast %271 : i32 to index
      %c1_134 = arith.constant 1 : index
      %c0_135 = arith.constant 0 : index
      %273 = vector.load %arg1[%c0_133, %272, %c1_134, %c0_135] : memref<1x32x32x1xbf16, #tpu.memory_space<vmem>>, vector<1x1x28x1xbf16>
      %274 = vector.shape_cast %273 : vector<1x1x28x1xbf16> to vector<28x1xbf16>
      %c21 = arith.constant 21 : index
      %c0_136 = arith.constant 0 : index
      %c0_137 = arith.constant 0 : index
      %275 = vector.load %arg2[%c21, %c0_136, %c0_137] : memref<25x1x128xbf16, #tpu.memory_space<vmem>>, vector<1x1x128xbf16>
      %276 = vector.shape_cast %275 : vector<1x1x128xbf16> to vector<1x128xbf16>
      %277 = arith.extf %274 : vector<28x1xbf16> to vector<28x1xf32>
      %278 = arith.extf %276 : vector<1x128xbf16> to vector<1x128xf32>
      %279 = vector.broadcast %277 : vector<28x1xf32> to vector<28x128xf32>
      %280 = vector.broadcast %278 : vector<1x128xf32> to vector<28x128xf32>
      %281 = arith.mulf %279, %280 : vector<28x128xf32>
      %282 = arith.addf %270, %281 : vector<28x128xf32>
      %c4_i32_138 = arith.constant 4 : i32
      %283 = arith.addi %17, %c4_i32_138 : i32
      %c0_139 = arith.constant 0 : index
      %284 = arith.index_cast %283 : i32 to index
      %c2_140 = arith.constant 2 : index
      %c0_141 = arith.constant 0 : index
      %285 = vector.load %arg1[%c0_139, %284, %c2_140, %c0_141] : memref<1x32x32x1xbf16, #tpu.memory_space<vmem>>, vector<1x1x28x1xbf16>
      %286 = vector.shape_cast %285 : vector<1x1x28x1xbf16> to vector<28x1xbf16>
      %c22 = arith.constant 22 : index
      %c0_142 = arith.constant 0 : index
      %c0_143 = arith.constant 0 : index
      %287 = vector.load %arg2[%c22, %c0_142, %c0_143] : memref<25x1x128xbf16, #tpu.memory_space<vmem>>, vector<1x1x128xbf16>
      %288 = vector.shape_cast %287 : vector<1x1x128xbf16> to vector<1x128xbf16>
      %289 = arith.extf %286 : vector<28x1xbf16> to vector<28x1xf32>
      %290 = arith.extf %288 : vector<1x128xbf16> to vector<1x128xf32>
      %291 = vector.broadcast %289 : vector<28x1xf32> to vector<28x128xf32>
      %292 = vector.broadcast %290 : vector<1x128xf32> to vector<28x128xf32>
      %293 = arith.mulf %291, %292 : vector<28x128xf32>
      %294 = arith.addf %282, %293 : vector<28x128xf32>
      %c4_i32_144 = arith.constant 4 : i32
      %295 = arith.addi %17, %c4_i32_144 : i32
      %c0_145 = arith.constant 0 : index
      %296 = arith.index_cast %295 : i32 to index
      %c3_146 = arith.constant 3 : index
      %c0_147 = arith.constant 0 : index
      %297 = vector.load %arg1[%c0_145, %296, %c3_146, %c0_147] : memref<1x32x32x1xbf16, #tpu.memory_space<vmem>>, vector<1x1x28x1xbf16>
      %298 = vector.shape_cast %297 : vector<1x1x28x1xbf16> to vector<28x1xbf16>
      %c23 = arith.constant 23 : index
      %c0_148 = arith.constant 0 : index
      %c0_149 = arith.constant 0 : index
      %299 = vector.load %arg2[%c23, %c0_148, %c0_149] : memref<25x1x128xbf16, #tpu.memory_space<vmem>>, vector<1x1x128xbf16>
      %300 = vector.shape_cast %299 : vector<1x1x128xbf16> to vector<1x128xbf16>
      %301 = arith.extf %298 : vector<28x1xbf16> to vector<28x1xf32>
      %302 = arith.extf %300 : vector<1x128xbf16> to vector<1x128xf32>
      %303 = vector.broadcast %301 : vector<28x1xf32> to vector<28x128xf32>
      %304 = vector.broadcast %302 : vector<1x128xf32> to vector<28x128xf32>
      %305 = arith.mulf %303, %304 : vector<28x128xf32>
      %306 = arith.addf %294, %305 : vector<28x128xf32>
      %c4_i32_150 = arith.constant 4 : i32
      %307 = arith.addi %17, %c4_i32_150 : i32
      %c0_151 = arith.constant 0 : index
      %308 = arith.index_cast %307 : i32 to index
      %c4_152 = arith.constant 4 : index
      %c0_153 = arith.constant 0 : index
      %309 = vector.load %arg1[%c0_151, %308, %c4_152, %c0_153] : memref<1x32x32x1xbf16, #tpu.memory_space<vmem>>, vector<1x1x28x1xbf16>
      %310 = vector.shape_cast %309 : vector<1x1x28x1xbf16> to vector<28x1xbf16>
      %c24 = arith.constant 24 : index
      %c0_154 = arith.constant 0 : index
      %c0_155 = arith.constant 0 : index
      %311 = vector.load %arg2[%c24, %c0_154, %c0_155] : memref<25x1x128xbf16, #tpu.memory_space<vmem>>, vector<1x1x128xbf16>
      %312 = vector.shape_cast %311 : vector<1x1x128xbf16> to vector<1x128xbf16>
      %313 = arith.extf %310 : vector<28x1xbf16> to vector<28x1xf32>
      %314 = arith.extf %312 : vector<1x128xbf16> to vector<1x128xf32>
      %315 = vector.broadcast %313 : vector<28x1xf32> to vector<28x128xf32>
      %316 = vector.broadcast %314 : vector<1x128xf32> to vector<28x128xf32>
      %317 = arith.mulf %315, %316 : vector<28x128xf32>
      %318 = arith.addf %306, %317 : vector<28x128xf32>
      %c2_i32_156 = arith.constant 2 : i32
      %319 = arith.muli %c2_i32_156, %arg6 : i32
      %c1_i32_157 = arith.constant 1 : i32
      %320 = arith.addi %319, %c1_i32_157 : i32
      %cst_158 = arith.constant 0.000000e+00 : f32
      %321 = vector.broadcast %cst_158 : f32 to vector<28x128xf32>
      %c0_i32_159 = arith.constant 0 : i32
      %322 = arith.addi %320, %c0_i32_159 : i32
      %c0_160 = arith.constant 0 : index
      %323 = arith.index_cast %322 : i32 to index
      %c0_161 = arith.constant 0 : index
      %c0_162 = arith.constant 0 : index
      %324 = vector.load %arg1[%c0_160, %323, %c0_161, %c0_162] : memref<1x32x32x1xbf16, #tpu.memory_space<vmem>>, vector<1x1x28x1xbf16>
      %325 = vector.shape_cast %324 : vector<1x1x28x1xbf16> to vector<28x1xbf16>
      %c0_163 = arith.constant 0 : index
      %c0_164 = arith.constant 0 : index
      %c0_165 = arith.constant 0 : index
      %326 = vector.load %arg2[%c0_163, %c0_164, %c0_165] : memref<25x1x128xbf16, #tpu.memory_space<vmem>>, vector<1x1x128xbf16>
      %327 = vector.shape_cast %326 : vector<1x1x128xbf16> to vector<1x128xbf16>
      %328 = arith.extf %325 : vector<28x1xbf16> to vector<28x1xf32>
      %329 = arith.extf %327 : vector<1x128xbf16> to vector<1x128xf32>
      %330 = vector.broadcast %328 : vector<28x1xf32> to vector<28x128xf32>
      %331 = vector.broadcast %329 : vector<1x128xf32> to vector<28x128xf32>
      %332 = arith.mulf %330, %331 : vector<28x128xf32>
      %333 = arith.addf %321, %332 : vector<28x128xf32>
      %c0_i32_166 = arith.constant 0 : i32
      %334 = arith.addi %320, %c0_i32_166 : i32
      %c0_167 = arith.constant 0 : index
      %335 = arith.index_cast %334 : i32 to index
      %c1_168 = arith.constant 1 : index
      %c0_169 = arith.constant 0 : index
      %336 = vector.load %arg1[%c0_167, %335, %c1_168, %c0_169] : memref<1x32x32x1xbf16, #tpu.memory_space<vmem>>, vector<1x1x28x1xbf16>
      %337 = vector.shape_cast %336 : vector<1x1x28x1xbf16> to vector<28x1xbf16>
      %c1_170 = arith.constant 1 : index
      %c0_171 = arith.constant 0 : index
      %c0_172 = arith.constant 0 : index
      %338 = vector.load %arg2[%c1_170, %c0_171, %c0_172] : memref<25x1x128xbf16, #tpu.memory_space<vmem>>, vector<1x1x128xbf16>
      %339 = vector.shape_cast %338 : vector<1x1x128xbf16> to vector<1x128xbf16>
      %340 = arith.extf %337 : vector<28x1xbf16> to vector<28x1xf32>
      %341 = arith.extf %339 : vector<1x128xbf16> to vector<1x128xf32>
      %342 = vector.broadcast %340 : vector<28x1xf32> to vector<28x128xf32>
      %343 = vector.broadcast %341 : vector<1x128xf32> to vector<28x128xf32>
      %344 = arith.mulf %342, %343 : vector<28x128xf32>
      %345 = arith.addf %333, %344 : vector<28x128xf32>
      %c0_i32_173 = arith.constant 0 : i32
      %346 = arith.addi %320, %c0_i32_173 : i32
      %c0_174 = arith.constant 0 : index
      %347 = arith.index_cast %346 : i32 to index
      %c2_175 = arith.constant 2 : index
      %c0_176 = arith.constant 0 : index
      %348 = vector.load %arg1[%c0_174, %347, %c2_175, %c0_176] : memref<1x32x32x1xbf16, #tpu.memory_space<vmem>>, vector<1x1x28x1xbf16>
      %349 = vector.shape_cast %348 : vector<1x1x28x1xbf16> to vector<28x1xbf16>
      %c2_177 = arith.constant 2 : index
      %c0_178 = arith.constant 0 : index
      %c0_179 = arith.constant 0 : index
      %350 = vector.load %arg2[%c2_177, %c0_178, %c0_179] : memref<25x1x128xbf16, #tpu.memory_space<vmem>>, vector<1x1x128xbf16>
      %351 = vector.shape_cast %350 : vector<1x1x128xbf16> to vector<1x128xbf16>
      %352 = arith.extf %349 : vector<28x1xbf16> to vector<28x1xf32>
      %353 = arith.extf %351 : vector<1x128xbf16> to vector<1x128xf32>
      %354 = vector.broadcast %352 : vector<28x1xf32> to vector<28x128xf32>
      %355 = vector.broadcast %353 : vector<1x128xf32> to vector<28x128xf32>
      %356 = arith.mulf %354, %355 : vector<28x128xf32>
      %357 = arith.addf %345, %356 : vector<28x128xf32>
      %c0_i32_180 = arith.constant 0 : i32
      %358 = arith.addi %320, %c0_i32_180 : i32
      %c0_181 = arith.constant 0 : index
      %359 = arith.index_cast %358 : i32 to index
      %c3_182 = arith.constant 3 : index
      %c0_183 = arith.constant 0 : index
      %360 = vector.load %arg1[%c0_181, %359, %c3_182, %c0_183] : memref<1x32x32x1xbf16, #tpu.memory_space<vmem>>, vector<1x1x28x1xbf16>
      %361 = vector.shape_cast %360 : vector<1x1x28x1xbf16> to vector<28x1xbf16>
      %c3_184 = arith.constant 3 : index
      %c0_185 = arith.constant 0 : index
      %c0_186 = arith.constant 0 : index
      %362 = vector.load %arg2[%c3_184, %c0_185, %c0_186] : memref<25x1x128xbf16, #tpu.memory_space<vmem>>, vector<1x1x128xbf16>
      %363 = vector.shape_cast %362 : vector<1x1x128xbf16> to vector<1x128xbf16>
      %364 = arith.extf %361 : vector<28x1xbf16> to vector<28x1xf32>
      %365 = arith.extf %363 : vector<1x128xbf16> to vector<1x128xf32>
      %366 = vector.broadcast %364 : vector<28x1xf32> to vector<28x128xf32>
      %367 = vector.broadcast %365 : vector<1x128xf32> to vector<28x128xf32>
      %368 = arith.mulf %366, %367 : vector<28x128xf32>
      %369 = arith.addf %357, %368 : vector<28x128xf32>
      %c0_i32_187 = arith.constant 0 : i32
      %370 = arith.addi %320, %c0_i32_187 : i32
      %c0_188 = arith.constant 0 : index
      %371 = arith.index_cast %370 : i32 to index
      %c4_189 = arith.constant 4 : index
      %c0_190 = arith.constant 0 : index
      %372 = vector.load %arg1[%c0_188, %371, %c4_189, %c0_190] : memref<1x32x32x1xbf16, #tpu.memory_space<vmem>>, vector<1x1x28x1xbf16>
      %373 = vector.shape_cast %372 : vector<1x1x28x1xbf16> to vector<28x1xbf16>
      %c4_191 = arith.constant 4 : index
      %c0_192 = arith.constant 0 : index
      %c0_193 = arith.constant 0 : index
      %374 = vector.load %arg2[%c4_191, %c0_192, %c0_193] : memref<25x1x128xbf16, #tpu.memory_space<vmem>>, vector<1x1x128xbf16>
      %375 = vector.shape_cast %374 : vector<1x1x128xbf16> to vector<1x128xbf16>
      %376 = arith.extf %373 : vector<28x1xbf16> to vector<28x1xf32>
      %377 = arith.extf %375 : vector<1x128xbf16> to vector<1x128xf32>
      %378 = vector.broadcast %376 : vector<28x1xf32> to vector<28x128xf32>
      %379 = vector.broadcast %377 : vector<1x128xf32> to vector<28x128xf32>
      %380 = arith.mulf %378, %379 : vector<28x128xf32>
      %381 = arith.addf %369, %380 : vector<28x128xf32>
      %c1_i32_194 = arith.constant 1 : i32
      %382 = arith.addi %320, %c1_i32_194 : i32
      %c0_195 = arith.constant 0 : index
      %383 = arith.index_cast %382 : i32 to index
      %c0_196 = arith.constant 0 : index
      %c0_197 = arith.constant 0 : index
      %384 = vector.load %arg1[%c0_195, %383, %c0_196, %c0_197] : memref<1x32x32x1xbf16, #tpu.memory_space<vmem>>, vector<1x1x28x1xbf16>
      %385 = vector.shape_cast %384 : vector<1x1x28x1xbf16> to vector<28x1xbf16>
      %c5_198 = arith.constant 5 : index
      %c0_199 = arith.constant 0 : index
      %c0_200 = arith.constant 0 : index
      %386 = vector.load %arg2[%c5_198, %c0_199, %c0_200] : memref<25x1x128xbf16, #tpu.memory_space<vmem>>, vector<1x1x128xbf16>
      %387 = vector.shape_cast %386 : vector<1x1x128xbf16> to vector<1x128xbf16>
      %388 = arith.extf %385 : vector<28x1xbf16> to vector<28x1xf32>
      %389 = arith.extf %387 : vector<1x128xbf16> to vector<1x128xf32>
      %390 = vector.broadcast %388 : vector<28x1xf32> to vector<28x128xf32>
      %391 = vector.broadcast %389 : vector<1x128xf32> to vector<28x128xf32>
      %392 = arith.mulf %390, %391 : vector<28x128xf32>
      %393 = arith.addf %381, %392 : vector<28x128xf32>
      %c1_i32_201 = arith.constant 1 : i32
      %394 = arith.addi %320, %c1_i32_201 : i32
      %c0_202 = arith.constant 0 : index
      %395 = arith.index_cast %394 : i32 to index
      %c1_203 = arith.constant 1 : index
      %c0_204 = arith.constant 0 : index
      %396 = vector.load %arg1[%c0_202, %395, %c1_203, %c0_204] : memref<1x32x32x1xbf16, #tpu.memory_space<vmem>>, vector<1x1x28x1xbf16>
      %397 = vector.shape_cast %396 : vector<1x1x28x1xbf16> to vector<28x1xbf16>
      %c6_205 = arith.constant 6 : index
      %c0_206 = arith.constant 0 : index
      %c0_207 = arith.constant 0 : index
      %398 = vector.load %arg2[%c6_205, %c0_206, %c0_207] : memref<25x1x128xbf16, #tpu.memory_space<vmem>>, vector<1x1x128xbf16>
      %399 = vector.shape_cast %398 : vector<1x1x128xbf16> to vector<1x128xbf16>
      %400 = arith.extf %397 : vector<28x1xbf16> to vector<28x1xf32>
      %401 = arith.extf %399 : vector<1x128xbf16> to vector<1x128xf32>
      %402 = vector.broadcast %400 : vector<28x1xf32> to vector<28x128xf32>
      %403 = vector.broadcast %401 : vector<1x128xf32> to vector<28x128xf32>
      %404 = arith.mulf %402, %403 : vector<28x128xf32>
      %405 = arith.addf %393, %404 : vector<28x128xf32>
      %c1_i32_208 = arith.constant 1 : i32
      %406 = arith.addi %320, %c1_i32_208 : i32
      %c0_209 = arith.constant 0 : index
      %407 = arith.index_cast %406 : i32 to index
      %c2_210 = arith.constant 2 : index
      %c0_211 = arith.constant 0 : index
      %408 = vector.load %arg1[%c0_209, %407, %c2_210, %c0_211] : memref<1x32x32x1xbf16, #tpu.memory_space<vmem>>, vector<1x1x28x1xbf16>
      %409 = vector.shape_cast %408 : vector<1x1x28x1xbf16> to vector<28x1xbf16>
      %c7_212 = arith.constant 7 : index
      %c0_213 = arith.constant 0 : index
      %c0_214 = arith.constant 0 : index
      %410 = vector.load %arg2[%c7_212, %c0_213, %c0_214] : memref<25x1x128xbf16, #tpu.memory_space<vmem>>, vector<1x1x128xbf16>
      %411 = vector.shape_cast %410 : vector<1x1x128xbf16> to vector<1x128xbf16>
      %412 = arith.extf %409 : vector<28x1xbf16> to vector<28x1xf32>
      %413 = arith.extf %411 : vector<1x128xbf16> to vector<1x128xf32>
      %414 = vector.broadcast %412 : vector<28x1xf32> to vector<28x128xf32>
      %415 = vector.broadcast %413 : vector<1x128xf32> to vector<28x128xf32>
      %416 = arith.mulf %414, %415 : vector<28x128xf32>
      %417 = arith.addf %405, %416 : vector<28x128xf32>
      %c1_i32_215 = arith.constant 1 : i32
      %418 = arith.addi %320, %c1_i32_215 : i32
      %c0_216 = arith.constant 0 : index
      %419 = arith.index_cast %418 : i32 to index
      %c3_217 = arith.constant 3 : index
      %c0_218 = arith.constant 0 : index
      %420 = vector.load %arg1[%c0_216, %419, %c3_217, %c0_218] : memref<1x32x32x1xbf16, #tpu.memory_space<vmem>>, vector<1x1x28x1xbf16>
      %421 = vector.shape_cast %420 : vector<1x1x28x1xbf16> to vector<28x1xbf16>
      %c8_219 = arith.constant 8 : index
      %c0_220 = arith.constant 0 : index
      %c0_221 = arith.constant 0 : index
      %422 = vector.load %arg2[%c8_219, %c0_220, %c0_221] : memref<25x1x128xbf16, #tpu.memory_space<vmem>>, vector<1x1x128xbf16>
      %423 = vector.shape_cast %422 : vector<1x1x128xbf16> to vector<1x128xbf16>
      %424 = arith.extf %421 : vector<28x1xbf16> to vector<28x1xf32>
      %425 = arith.extf %423 : vector<1x128xbf16> to vector<1x128xf32>
      %426 = vector.broadcast %424 : vector<28x1xf32> to vector<28x128xf32>
      %427 = vector.broadcast %425 : vector<1x128xf32> to vector<28x128xf32>
      %428 = arith.mulf %426, %427 : vector<28x128xf32>
      %429 = arith.addf %417, %428 : vector<28x128xf32>
      %c1_i32_222 = arith.constant 1 : i32
      %430 = arith.addi %320, %c1_i32_222 : i32
      %c0_223 = arith.constant 0 : index
      %431 = arith.index_cast %430 : i32 to index
      %c4_224 = arith.constant 4 : index
      %c0_225 = arith.constant 0 : index
      %432 = vector.load %arg1[%c0_223, %431, %c4_224, %c0_225] : memref<1x32x32x1xbf16, #tpu.memory_space<vmem>>, vector<1x1x28x1xbf16>
      %433 = vector.shape_cast %432 : vector<1x1x28x1xbf16> to vector<28x1xbf16>
      %c9_226 = arith.constant 9 : index
      %c0_227 = arith.constant 0 : index
      %c0_228 = arith.constant 0 : index
      %434 = vector.load %arg2[%c9_226, %c0_227, %c0_228] : memref<25x1x128xbf16, #tpu.memory_space<vmem>>, vector<1x1x128xbf16>
      %435 = vector.shape_cast %434 : vector<1x1x128xbf16> to vector<1x128xbf16>
      %436 = arith.extf %433 : vector<28x1xbf16> to vector<28x1xf32>
      %437 = arith.extf %435 : vector<1x128xbf16> to vector<1x128xf32>
      %438 = vector.broadcast %436 : vector<28x1xf32> to vector<28x128xf32>
      %439 = vector.broadcast %437 : vector<1x128xf32> to vector<28x128xf32>
      %440 = arith.mulf %438, %439 : vector<28x128xf32>
      %441 = arith.addf %429, %440 : vector<28x128xf32>
      %c2_i32_229 = arith.constant 2 : i32
      %442 = arith.addi %320, %c2_i32_229 : i32
      %c0_230 = arith.constant 0 : index
      %443 = arith.index_cast %442 : i32 to index
      %c0_231 = arith.constant 0 : index
      %c0_232 = arith.constant 0 : index
      %444 = vector.load %arg1[%c0_230, %443, %c0_231, %c0_232] : memref<1x32x32x1xbf16, #tpu.memory_space<vmem>>, vector<1x1x28x1xbf16>
      %445 = vector.shape_cast %444 : vector<1x1x28x1xbf16> to vector<28x1xbf16>
      %c10_233 = arith.constant 10 : index
      %c0_234 = arith.constant 0 : index
      %c0_235 = arith.constant 0 : index
      %446 = vector.load %arg2[%c10_233, %c0_234, %c0_235] : memref<25x1x128xbf16, #tpu.memory_space<vmem>>, vector<1x1x128xbf16>
      %447 = vector.shape_cast %446 : vector<1x1x128xbf16> to vector<1x128xbf16>
      %448 = arith.extf %445 : vector<28x1xbf16> to vector<28x1xf32>
      %449 = arith.extf %447 : vector<1x128xbf16> to vector<1x128xf32>
      %450 = vector.broadcast %448 : vector<28x1xf32> to vector<28x128xf32>
      %451 = vector.broadcast %449 : vector<1x128xf32> to vector<28x128xf32>
      %452 = arith.mulf %450, %451 : vector<28x128xf32>
      %453 = arith.addf %441, %452 : vector<28x128xf32>
      %c2_i32_236 = arith.constant 2 : i32
      %454 = arith.addi %320, %c2_i32_236 : i32
      %c0_237 = arith.constant 0 : index
      %455 = arith.index_cast %454 : i32 to index
      %c1_238 = arith.constant 1 : index
      %c0_239 = arith.constant 0 : index
      %456 = vector.load %arg1[%c0_237, %455, %c1_238, %c0_239] : memref<1x32x32x1xbf16, #tpu.memory_space<vmem>>, vector<1x1x28x1xbf16>
      %457 = vector.shape_cast %456 : vector<1x1x28x1xbf16> to vector<28x1xbf16>
      %c11_240 = arith.constant 11 : index
      %c0_241 = arith.constant 0 : index
      %c0_242 = arith.constant 0 : index
      %458 = vector.load %arg2[%c11_240, %c0_241, %c0_242] : memref<25x1x128xbf16, #tpu.memory_space<vmem>>, vector<1x1x128xbf16>
      %459 = vector.shape_cast %458 : vector<1x1x128xbf16> to vector<1x128xbf16>
      %460 = arith.extf %457 : vector<28x1xbf16> to vector<28x1xf32>
      %461 = arith.extf %459 : vector<1x128xbf16> to vector<1x128xf32>
      %462 = vector.broadcast %460 : vector<28x1xf32> to vector<28x128xf32>
      %463 = vector.broadcast %461 : vector<1x128xf32> to vector<28x128xf32>
      %464 = arith.mulf %462, %463 : vector<28x128xf32>
      %465 = arith.addf %453, %464 : vector<28x128xf32>
      %c2_i32_243 = arith.constant 2 : i32
      %466 = arith.addi %320, %c2_i32_243 : i32
      %c0_244 = arith.constant 0 : index
      %467 = arith.index_cast %466 : i32 to index
      %c2_245 = arith.constant 2 : index
      %c0_246 = arith.constant 0 : index
      %468 = vector.load %arg1[%c0_244, %467, %c2_245, %c0_246] : memref<1x32x32x1xbf16, #tpu.memory_space<vmem>>, vector<1x1x28x1xbf16>
      %469 = vector.shape_cast %468 : vector<1x1x28x1xbf16> to vector<28x1xbf16>
      %c12_247 = arith.constant 12 : index
      %c0_248 = arith.constant 0 : index
      %c0_249 = arith.constant 0 : index
      %470 = vector.load %arg2[%c12_247, %c0_248, %c0_249] : memref<25x1x128xbf16, #tpu.memory_space<vmem>>, vector<1x1x128xbf16>
      %471 = vector.shape_cast %470 : vector<1x1x128xbf16> to vector<1x128xbf16>
      %472 = arith.extf %469 : vector<28x1xbf16> to vector<28x1xf32>
      %473 = arith.extf %471 : vector<1x128xbf16> to vector<1x128xf32>
      %474 = vector.broadcast %472 : vector<28x1xf32> to vector<28x128xf32>
      %475 = vector.broadcast %473 : vector<1x128xf32> to vector<28x128xf32>
      %476 = arith.mulf %474, %475 : vector<28x128xf32>
      %477 = arith.addf %465, %476 : vector<28x128xf32>
      %c2_i32_250 = arith.constant 2 : i32
      %478 = arith.addi %320, %c2_i32_250 : i32
      %c0_251 = arith.constant 0 : index
      %479 = arith.index_cast %478 : i32 to index
      %c3_252 = arith.constant 3 : index
      %c0_253 = arith.constant 0 : index
      %480 = vector.load %arg1[%c0_251, %479, %c3_252, %c0_253] : memref<1x32x32x1xbf16, #tpu.memory_space<vmem>>, vector<1x1x28x1xbf16>
      %481 = vector.shape_cast %480 : vector<1x1x28x1xbf16> to vector<28x1xbf16>
      %c13_254 = arith.constant 13 : index
      %c0_255 = arith.constant 0 : index
      %c0_256 = arith.constant 0 : index
      %482 = vector.load %arg2[%c13_254, %c0_255, %c0_256] : memref<25x1x128xbf16, #tpu.memory_space<vmem>>, vector<1x1x128xbf16>
      %483 = vector.shape_cast %482 : vector<1x1x128xbf16> to vector<1x128xbf16>
      %484 = arith.extf %481 : vector<28x1xbf16> to vector<28x1xf32>
      %485 = arith.extf %483 : vector<1x128xbf16> to vector<1x128xf32>
      %486 = vector.broadcast %484 : vector<28x1xf32> to vector<28x128xf32>
      %487 = vector.broadcast %485 : vector<1x128xf32> to vector<28x128xf32>
      %488 = arith.mulf %486, %487 : vector<28x128xf32>
      %489 = arith.addf %477, %488 : vector<28x128xf32>
      %c2_i32_257 = arith.constant 2 : i32
      %490 = arith.addi %320, %c2_i32_257 : i32
      %c0_258 = arith.constant 0 : index
      %491 = arith.index_cast %490 : i32 to index
      %c4_259 = arith.constant 4 : index
      %c0_260 = arith.constant 0 : index
      %492 = vector.load %arg1[%c0_258, %491, %c4_259, %c0_260] : memref<1x32x32x1xbf16, #tpu.memory_space<vmem>>, vector<1x1x28x1xbf16>
      %493 = vector.shape_cast %492 : vector<1x1x28x1xbf16> to vector<28x1xbf16>
      %c14_261 = arith.constant 14 : index
      %c0_262 = arith.constant 0 : index
      %c0_263 = arith.constant 0 : index
      %494 = vector.load %arg2[%c14_261, %c0_262, %c0_263] : memref<25x1x128xbf16, #tpu.memory_space<vmem>>, vector<1x1x128xbf16>
      %495 = vector.shape_cast %494 : vector<1x1x128xbf16> to vector<1x128xbf16>
      %496 = arith.extf %493 : vector<28x1xbf16> to vector<28x1xf32>
      %497 = arith.extf %495 : vector<1x128xbf16> to vector<1x128xf32>
      %498 = vector.broadcast %496 : vector<28x1xf32> to vector<28x128xf32>
      %499 = vector.broadcast %497 : vector<1x128xf32> to vector<28x128xf32>
      %500 = arith.mulf %498, %499 : vector<28x128xf32>
      %501 = arith.addf %489, %500 : vector<28x128xf32>
      %c3_i32_264 = arith.constant 3 : i32
      %502 = arith.addi %320, %c3_i32_264 : i32
      %c0_265 = arith.constant 0 : index
      %503 = arith.index_cast %502 : i32 to index
      %c0_266 = arith.constant 0 : index
      %c0_267 = arith.constant 0 : index
      %504 = vector.load %arg1[%c0_265, %503, %c0_266, %c0_267] : memref<1x32x32x1xbf16, #tpu.memory_space<vmem>>, vector<1x1x28x1xbf16>
      %505 = vector.shape_cast %504 : vector<1x1x28x1xbf16> to vector<28x1xbf16>
      %c15_268 = arith.constant 15 : index
      %c0_269 = arith.constant 0 : index
      %c0_270 = arith.constant 0 : index
      %506 = vector.load %arg2[%c15_268, %c0_269, %c0_270] : memref<25x1x128xbf16, #tpu.memory_space<vmem>>, vector<1x1x128xbf16>
      %507 = vector.shape_cast %506 : vector<1x1x128xbf16> to vector<1x128xbf16>
      %508 = arith.extf %505 : vector<28x1xbf16> to vector<28x1xf32>
      %509 = arith.extf %507 : vector<1x128xbf16> to vector<1x128xf32>
      %510 = vector.broadcast %508 : vector<28x1xf32> to vector<28x128xf32>
      %511 = vector.broadcast %509 : vector<1x128xf32> to vector<28x128xf32>
      %512 = arith.mulf %510, %511 : vector<28x128xf32>
      %513 = arith.addf %501, %512 : vector<28x128xf32>
      %c3_i32_271 = arith.constant 3 : i32
      %514 = arith.addi %320, %c3_i32_271 : i32
      %c0_272 = arith.constant 0 : index
      %515 = arith.index_cast %514 : i32 to index
      %c1_273 = arith.constant 1 : index
      %c0_274 = arith.constant 0 : index
      %516 = vector.load %arg1[%c0_272, %515, %c1_273, %c0_274] : memref<1x32x32x1xbf16, #tpu.memory_space<vmem>>, vector<1x1x28x1xbf16>
      %517 = vector.shape_cast %516 : vector<1x1x28x1xbf16> to vector<28x1xbf16>
      %c16_275 = arith.constant 16 : index
      %c0_276 = arith.constant 0 : index
      %c0_277 = arith.constant 0 : index
      %518 = vector.load %arg2[%c16_275, %c0_276, %c0_277] : memref<25x1x128xbf16, #tpu.memory_space<vmem>>, vector<1x1x128xbf16>
      %519 = vector.shape_cast %518 : vector<1x1x128xbf16> to vector<1x128xbf16>
      %520 = arith.extf %517 : vector<28x1xbf16> to vector<28x1xf32>
      %521 = arith.extf %519 : vector<1x128xbf16> to vector<1x128xf32>
      %522 = vector.broadcast %520 : vector<28x1xf32> to vector<28x128xf32>
      %523 = vector.broadcast %521 : vector<1x128xf32> to vector<28x128xf32>
      %524 = arith.mulf %522, %523 : vector<28x128xf32>
      %525 = arith.addf %513, %524 : vector<28x128xf32>
      %c3_i32_278 = arith.constant 3 : i32
      %526 = arith.addi %320, %c3_i32_278 : i32
      %c0_279 = arith.constant 0 : index
      %527 = arith.index_cast %526 : i32 to index
      %c2_280 = arith.constant 2 : index
      %c0_281 = arith.constant 0 : index
      %528 = vector.load %arg1[%c0_279, %527, %c2_280, %c0_281] : memref<1x32x32x1xbf16, #tpu.memory_space<vmem>>, vector<1x1x28x1xbf16>
      %529 = vector.shape_cast %528 : vector<1x1x28x1xbf16> to vector<28x1xbf16>
      %c17_282 = arith.constant 17 : index
      %c0_283 = arith.constant 0 : index
      %c0_284 = arith.constant 0 : index
      %530 = vector.load %arg2[%c17_282, %c0_283, %c0_284] : memref<25x1x128xbf16, #tpu.memory_space<vmem>>, vector<1x1x128xbf16>
      %531 = vector.shape_cast %530 : vector<1x1x128xbf16> to vector<1x128xbf16>
      %532 = arith.extf %529 : vector<28x1xbf16> to vector<28x1xf32>
      %533 = arith.extf %531 : vector<1x128xbf16> to vector<1x128xf32>
      %534 = vector.broadcast %532 : vector<28x1xf32> to vector<28x128xf32>
      %535 = vector.broadcast %533 : vector<1x128xf32> to vector<28x128xf32>
      %536 = arith.mulf %534, %535 : vector<28x128xf32>
      %537 = arith.addf %525, %536 : vector<28x128xf32>
      %c3_i32_285 = arith.constant 3 : i32
      %538 = arith.addi %320, %c3_i32_285 : i32
      %c0_286 = arith.constant 0 : index
      %539 = arith.index_cast %538 : i32 to index
      %c3_287 = arith.constant 3 : index
      %c0_288 = arith.constant 0 : index
      %540 = vector.load %arg1[%c0_286, %539, %c3_287, %c0_288] : memref<1x32x32x1xbf16, #tpu.memory_space<vmem>>, vector<1x1x28x1xbf16>
      %541 = vector.shape_cast %540 : vector<1x1x28x1xbf16> to vector<28x1xbf16>
      %c18_289 = arith.constant 18 : index
      %c0_290 = arith.constant 0 : index
      %c0_291 = arith.constant 0 : index
      %542 = vector.load %arg2[%c18_289, %c0_290, %c0_291] : memref<25x1x128xbf16, #tpu.memory_space<vmem>>, vector<1x1x128xbf16>
      %543 = vector.shape_cast %542 : vector<1x1x128xbf16> to vector<1x128xbf16>
      %544 = arith.extf %541 : vector<28x1xbf16> to vector<28x1xf32>
      %545 = arith.extf %543 : vector<1x128xbf16> to vector<1x128xf32>
      %546 = vector.broadcast %544 : vector<28x1xf32> to vector<28x128xf32>
      %547 = vector.broadcast %545 : vector<1x128xf32> to vector<28x128xf32>
      %548 = arith.mulf %546, %547 : vector<28x128xf32>
      %549 = arith.addf %537, %548 : vector<28x128xf32>
      %c3_i32_292 = arith.constant 3 : i32
      %550 = arith.addi %320, %c3_i32_292 : i32
      %c0_293 = arith.constant 0 : index
      %551 = arith.index_cast %550 : i32 to index
      %c4_294 = arith.constant 4 : index
      %c0_295 = arith.constant 0 : index
      %552 = vector.load %arg1[%c0_293, %551, %c4_294, %c0_295] : memref<1x32x32x1xbf16, #tpu.memory_space<vmem>>, vector<1x1x28x1xbf16>
      %553 = vector.shape_cast %552 : vector<1x1x28x1xbf16> to vector<28x1xbf16>
      %c19_296 = arith.constant 19 : index
      %c0_297 = arith.constant 0 : index
      %c0_298 = arith.constant 0 : index
      %554 = vector.load %arg2[%c19_296, %c0_297, %c0_298] : memref<25x1x128xbf16, #tpu.memory_space<vmem>>, vector<1x1x128xbf16>
      %555 = vector.shape_cast %554 : vector<1x1x128xbf16> to vector<1x128xbf16>
      %556 = arith.extf %553 : vector<28x1xbf16> to vector<28x1xf32>
      %557 = arith.extf %555 : vector<1x128xbf16> to vector<1x128xf32>
      %558 = vector.broadcast %556 : vector<28x1xf32> to vector<28x128xf32>
      %559 = vector.broadcast %557 : vector<1x128xf32> to vector<28x128xf32>
      %560 = arith.mulf %558, %559 : vector<28x128xf32>
      %561 = arith.addf %549, %560 : vector<28x128xf32>
      %c4_i32_299 = arith.constant 4 : i32
      %562 = arith.addi %320, %c4_i32_299 : i32
      %c0_300 = arith.constant 0 : index
      %563 = arith.index_cast %562 : i32 to index
      %c0_301 = arith.constant 0 : index
      %c0_302 = arith.constant 0 : index
      %564 = vector.load %arg1[%c0_300, %563, %c0_301, %c0_302] : memref<1x32x32x1xbf16, #tpu.memory_space<vmem>>, vector<1x1x28x1xbf16>
      %565 = vector.shape_cast %564 : vector<1x1x28x1xbf16> to vector<28x1xbf16>
      %c20_303 = arith.constant 20 : index
      %c0_304 = arith.constant 0 : index
      %c0_305 = arith.constant 0 : index
      %566 = vector.load %arg2[%c20_303, %c0_304, %c0_305] : memref<25x1x128xbf16, #tpu.memory_space<vmem>>, vector<1x1x128xbf16>
      %567 = vector.shape_cast %566 : vector<1x1x128xbf16> to vector<1x128xbf16>
      %568 = arith.extf %565 : vector<28x1xbf16> to vector<28x1xf32>
      %569 = arith.extf %567 : vector<1x128xbf16> to vector<1x128xf32>
      %570 = vector.broadcast %568 : vector<28x1xf32> to vector<28x128xf32>
      %571 = vector.broadcast %569 : vector<1x128xf32> to vector<28x128xf32>
      %572 = arith.mulf %570, %571 : vector<28x128xf32>
      %573 = arith.addf %561, %572 : vector<28x128xf32>
      %c4_i32_306 = arith.constant 4 : i32
      %574 = arith.addi %320, %c4_i32_306 : i32
      %c0_307 = arith.constant 0 : index
      %575 = arith.index_cast %574 : i32 to index
      %c1_308 = arith.constant 1 : index
      %c0_309 = arith.constant 0 : index
      %576 = vector.load %arg1[%c0_307, %575, %c1_308, %c0_309] : memref<1x32x32x1xbf16, #tpu.memory_space<vmem>>, vector<1x1x28x1xbf16>
      %577 = vector.shape_cast %576 : vector<1x1x28x1xbf16> to vector<28x1xbf16>
      %c21_310 = arith.constant 21 : index
      %c0_311 = arith.constant 0 : index
      %c0_312 = arith.constant 0 : index
      %578 = vector.load %arg2[%c21_310, %c0_311, %c0_312] : memref<25x1x128xbf16, #tpu.memory_space<vmem>>, vector<1x1x128xbf16>
      %579 = vector.shape_cast %578 : vector<1x1x128xbf16> to vector<1x128xbf16>
      %580 = arith.extf %577 : vector<28x1xbf16> to vector<28x1xf32>
      %581 = arith.extf %579 : vector<1x128xbf16> to vector<1x128xf32>
      %582 = vector.broadcast %580 : vector<28x1xf32> to vector<28x128xf32>
      %583 = vector.broadcast %581 : vector<1x128xf32> to vector<28x128xf32>
      %584 = arith.mulf %582, %583 : vector<28x128xf32>
      %585 = arith.addf %573, %584 : vector<28x128xf32>
      %c4_i32_313 = arith.constant 4 : i32
      %586 = arith.addi %320, %c4_i32_313 : i32
      %c0_314 = arith.constant 0 : index
      %587 = arith.index_cast %586 : i32 to index
      %c2_315 = arith.constant 2 : index
      %c0_316 = arith.constant 0 : index
      %588 = vector.load %arg1[%c0_314, %587, %c2_315, %c0_316] : memref<1x32x32x1xbf16, #tpu.memory_space<vmem>>, vector<1x1x28x1xbf16>
      %589 = vector.shape_cast %588 : vector<1x1x28x1xbf16> to vector<28x1xbf16>
      %c22_317 = arith.constant 22 : index
      %c0_318 = arith.constant 0 : index
      %c0_319 = arith.constant 0 : index
      %590 = vector.load %arg2[%c22_317, %c0_318, %c0_319] : memref<25x1x128xbf16, #tpu.memory_space<vmem>>, vector<1x1x128xbf16>
      %591 = vector.shape_cast %590 : vector<1x1x128xbf16> to vector<1x128xbf16>
      %592 = arith.extf %589 : vector<28x1xbf16> to vector<28x1xf32>
      %593 = arith.extf %591 : vector<1x128xbf16> to vector<1x128xf32>
      %594 = vector.broadcast %592 : vector<28x1xf32> to vector<28x128xf32>
      %595 = vector.broadcast %593 : vector<1x128xf32> to vector<28x128xf32>
      %596 = arith.mulf %594, %595 : vector<28x128xf32>
      %597 = arith.addf %585, %596 : vector<28x128xf32>
      %c4_i32_320 = arith.constant 4 : i32
      %598 = arith.addi %320, %c4_i32_320 : i32
      %c0_321 = arith.constant 0 : index
      %599 = arith.index_cast %598 : i32 to index
      %c3_322 = arith.constant 3 : index
      %c0_323 = arith.constant 0 : index
      %600 = vector.load %arg1[%c0_321, %599, %c3_322, %c0_323] : memref<1x32x32x1xbf16, #tpu.memory_space<vmem>>, vector<1x1x28x1xbf16>
      %601 = vector.shape_cast %600 : vector<1x1x28x1xbf16> to vector<28x1xbf16>
      %c23_324 = arith.constant 23 : index
      %c0_325 = arith.constant 0 : index
      %c0_326 = arith.constant 0 : index
      %602 = vector.load %arg2[%c23_324, %c0_325, %c0_326] : memref<25x1x128xbf16, #tpu.memory_space<vmem>>, vector<1x1x128xbf16>
      %603 = vector.shape_cast %602 : vector<1x1x128xbf16> to vector<1x128xbf16>
      %604 = arith.extf %601 : vector<28x1xbf16> to vector<28x1xf32>
      %605 = arith.extf %603 : vector<1x128xbf16> to vector<1x128xf32>
      %606 = vector.broadcast %604 : vector<28x1xf32> to vector<28x128xf32>
      %607 = vector.broadcast %605 : vector<1x128xf32> to vector<28x128xf32>
      %608 = arith.mulf %606, %607 : vector<28x128xf32>
      %609 = arith.addf %597, %608 : vector<28x128xf32>
      %c4_i32_327 = arith.constant 4 : i32
      %610 = arith.addi %320, %c4_i32_327 : i32
      %c0_328 = arith.constant 0 : index
      %611 = arith.index_cast %610 : i32 to index
      %c4_329 = arith.constant 4 : index
      %c0_330 = arith.constant 0 : index
      %612 = vector.load %arg1[%c0_328, %611, %c4_329, %c0_330] : memref<1x32x32x1xbf16, #tpu.memory_space<vmem>>, vector<1x1x28x1xbf16>
      %613 = vector.shape_cast %612 : vector<1x1x28x1xbf16> to vector<28x1xbf16>
      %c24_331 = arith.constant 24 : index
      %c0_332 = arith.constant 0 : index
      %c0_333 = arith.constant 0 : index
      %614 = vector.load %arg2[%c24_331, %c0_332, %c0_333] : memref<25x1x128xbf16, #tpu.memory_space<vmem>>, vector<1x1x128xbf16>
      %615 = vector.shape_cast %614 : vector<1x1x128xbf16> to vector<1x128xbf16>
      %616 = arith.extf %613 : vector<28x1xbf16> to vector<28x1xf32>
      %617 = arith.extf %615 : vector<1x128xbf16> to vector<1x128xf32>
      %618 = vector.broadcast %616 : vector<28x1xf32> to vector<28x128xf32>
      %619 = vector.broadcast %617 : vector<1x128xf32> to vector<28x128xf32>
      %620 = arith.mulf %618, %619 : vector<28x128xf32>
      %621 = arith.addf %609, %620 : vector<28x128xf32>
      %622 = vector.broadcast %0 : vector<1x128xf32> to vector<28x128xf32>
      %623 = arith.mulf %318, %622 : vector<28x128xf32>
      %624 = vector.broadcast %1 : vector<1x128xf32> to vector<28x128xf32>
      %625 = arith.addf %623, %624 : vector<28x128xf32>
      %cst_334 = arith.constant 0.000000e+00 : f32
      %626 = vector.broadcast %cst_334 : f32 to vector<28x128xf32>
      %627 = arith.maximumf %625, %626 : vector<28x128xf32>
      %628 = vector.broadcast %0 : vector<1x128xf32> to vector<28x128xf32>
      %629 = arith.mulf %621, %628 : vector<28x128xf32>
      %630 = vector.broadcast %1 : vector<1x128xf32> to vector<28x128xf32>
      %631 = arith.addf %629, %630 : vector<28x128xf32>
      %cst_335 = arith.constant 0.000000e+00 : f32
      %632 = vector.broadcast %cst_335 : f32 to vector<28x128xf32>
      %633 = arith.maximumf %631, %632 : vector<28x128xf32>
      %634 = arith.maximumf %627, %633 : vector<28x128xf32>
      %cst_336 = arith.constant dense<0.000000e+00> : vector<14x128xf32>
      %635 = tpu.matmul %8, %634, %cst_336 {dimension_numbers = #tpu.dot_dimension_numbers<[1], [0], [0], [1], [0, 0, 1, 1], [], []>} : vector<14x28xf32>, vector<28x128xf32>, vector<14x128xf32> -> vector<14x128xf32>
      %cst_337 = arith.constant dense<0.000000e+00> : vector<14x128xf32>
      %636 = tpu.matmul %15, %634, %cst_337 {dimension_numbers = #tpu.dot_dimension_numbers<[1], [0], [0], [1], [0, 0, 1, 1], [], []>} : vector<14x28xf32>, vector<28x128xf32>, vector<14x128xf32> -> vector<14x128xf32>
      %637 = arith.maximumf %635, %636 : vector<14x128xf32>
      %638 = arith.truncf %637 : vector<14x128xf32> to vector<14x128xbf16>
      %c0_338 = arith.constant 0 : index
      %639 = arith.index_cast %arg6 : i32 to index
      %c0_339 = arith.constant 0 : index
      %c0_340 = arith.constant 0 : index
      %640 = vector.load %arg5[%c0_338, %639, %c0_339, %c0_340] : memref<1x14x14x128xbf16, #tpu.memory_space<vmem>>, vector<1x1x14x128xbf16>
      %641 = vector.shape_cast %640 : vector<1x1x14x128xbf16> to vector<14x128xbf16>
      %642 = vector.shape_cast %638 : vector<14x128xbf16> to vector<1x1x14x128xbf16>
      tpu.vector_store %arg5[%c0_338, %639, %c0_339, %c0_340], %642 {strides = array<i32>} : memref<1x14x14x128xbf16, #tpu.memory_space<vmem>>, vector<1x1x14x128xbf16>,
    }
    %c14_i32_5 = arith.constant 14 : i32
    return
  }
  func.func @transform_0(%arg0: i32) -> (i32, i32, i32, i32) {
    %c0_i32 = arith.constant 0 : i32
    %c0_i32_0 = arith.constant 0 : i32
    %c0_i32_1 = arith.constant 0 : i32
    %c0_i32_2 = arith.constant 0 : i32
    return %arg0, %c0_i32, %c0_i32_0, %c0_i32_1 : i32, i32, i32, i32
  }
  func.func @transform_1(%arg0: i32) -> (i32, i32, i32) {
    %c0_i32 = arith.constant 0 : i32
    %c0_i32_0 = arith.constant 0 : i32
    %c0_i32_1 = arith.constant 0 : i32
    %c0_i32_2 = arith.constant 0 : i32
    return %c0_i32, %c0_i32_0, %c0_i32_1 : i32, i32, i32
  }
  func.func @transform_2(%arg0: i32) -> (i32, i32) {
    %c0_i32 = arith.constant 0 : i32
    %c0_i32_0 = arith.constant 0 : i32
    %c0_i32_1 = arith.constant 0 : i32
    return %c0_i32, %c0_i32_0 : i32, i32
  }
  func.func @transform_3(%arg0: i32) -> (i32, i32) {
    %c0_i32 = arith.constant 0 : i32
    %c0_i32_0 = arith.constant 0 : i32
    %c0_i32_1 = arith.constant 0 : i32
    return %c0_i32, %c0_i32_0 : i32, i32
  }
  func.func @transform_4(%arg0: i32) -> (i32, i32, i32, i32) {
    %c0_i32 = arith.constant 0 : i32
    %c0_i32_0 = arith.constant 0 : i32
    %c0_i32_1 = arith.constant 0 : i32
    %c0_i32_2 = arith.constant 0 : i32
    return %arg0, %c0_i32, %c0_i32_0, %c0_i32_1 : i32, i32, i32, i32
  }
}

module attributes {stable_mosaic.version = 11 : i64} {
  func.func @kernel(%arg0: i32, %arg1: memref<1x18x18x16xbf16, #tpu.memory_space<vmem>>, %arg2: memref<25x16x128xbf16, #tpu.memory_space<vmem>>, %arg3: memref<1x2x128xf32, #tpu.memory_space<vmem>>) attributes {dimension_semantics = [#tpu.dimension_semantics<parallel>], iteration_bounds = array<i64: 2>, scalar_prefetch = 0 : i64, scratch_operands = 0 : i64, tpu.core_type = #tpu.core_type<tc>, window_params = [{transform_indices = @transform_0, window_bounds = array<i64: 1, 18, 18, 16>}, {pipeline_mode = #tpu.pipeline_mode<synchronous>, transform_indices = @transform_1, window_bounds = array<i64: 25, 16, 128>}, {transform_indices = @transform_2, window_bounds = array<i64: 1, 2, 128>}]} {
    %cst = arith.constant 0.000000e+00 : f32
    %0 = vector.broadcast %cst : f32 to vector<1x128xf32>
    %cst_0 = arith.constant 0.000000e+00 : f32
    %1 = vector.broadcast %cst_0 : f32 to vector<1x128xf32>
    %c0_i32 = arith.constant 0 : i32
    %c14_i32 = arith.constant 14 : i32
    %2 = arith.addi %c0_i32, %c14_i32 : i32
    %c1_i32 = arith.constant 1 : i32
    %3:2 = scf.for %arg4 = %c0_i32 to %2 step %c1_i32 iter_args(%arg5 = %0, %arg6 = %1) -> (vector<1x128xf32>, vector<1x128xf32>)  : i32 {
      %cst_6 = arith.constant 0.000000e+00 : f32
      %10 = vector.broadcast %cst_6 : f32 to vector<14x128xf32>
      %c0_i32_7 = arith.constant 0 : i32
      %11 = arith.addi %arg4, %c0_i32_7 : i32
      %c0_8 = arith.constant 0 : index
      %12 = arith.index_cast %11 : i32 to index
      %c0_9 = arith.constant 0 : index
      %c0_10 = arith.constant 0 : index
      %13 = vector.load %arg1[%c0_8, %12, %c0_9, %c0_10] : memref<1x18x18x16xbf16, #tpu.memory_space<vmem>>, vector<1x1x14x16xbf16>
      %14 = vector.shape_cast %13 : vector<1x1x14x16xbf16> to vector<14x16xbf16>
      %c0_11 = arith.constant 0 : index
      %c0_12 = arith.constant 0 : index
      %c0_13 = arith.constant 0 : index
      %15 = vector.load %arg2[%c0_11, %c0_12, %c0_13] : memref<25x16x128xbf16, #tpu.memory_space<vmem>>, vector<1x16x128xbf16>
      %16 = vector.shape_cast %15 : vector<1x16x128xbf16> to vector<16x128xbf16>
      %cst_14 = arith.constant dense<0.000000e+00> : vector<14x128xf32>
      %17 = tpu.matmul %14, %16, %cst_14 {dimension_numbers = #tpu.dot_dimension_numbers<[1], [0], [0], [1], [0, 0, 1, 1], [], []>} : vector<14x16xbf16>, vector<16x128xbf16>, vector<14x128xf32> -> vector<14x128xf32>
      %18 = arith.addf %10, %17 : vector<14x128xf32>
      %c0_i32_15 = arith.constant 0 : i32
      %19 = arith.addi %arg4, %c0_i32_15 : i32
      %c0_16 = arith.constant 0 : index
      %20 = arith.index_cast %19 : i32 to index
      %c1_17 = arith.constant 1 : index
      %c0_18 = arith.constant 0 : index
      %21 = vector.load %arg1[%c0_16, %20, %c1_17, %c0_18] : memref<1x18x18x16xbf16, #tpu.memory_space<vmem>>, vector<1x1x14x16xbf16>
      %22 = vector.shape_cast %21 : vector<1x1x14x16xbf16> to vector<14x16xbf16>
      %c1_19 = arith.constant 1 : index
      %c0_20 = arith.constant 0 : index
      %c0_21 = arith.constant 0 : index
      %23 = vector.load %arg2[%c1_19, %c0_20, %c0_21] : memref<25x16x128xbf16, #tpu.memory_space<vmem>>, vector<1x16x128xbf16>
      %24 = vector.shape_cast %23 : vector<1x16x128xbf16> to vector<16x128xbf16>
      %cst_22 = arith.constant dense<0.000000e+00> : vector<14x128xf32>
      %25 = tpu.matmul %22, %24, %cst_22 {dimension_numbers = #tpu.dot_dimension_numbers<[1], [0], [0], [1], [0, 0, 1, 1], [], []>} : vector<14x16xbf16>, vector<16x128xbf16>, vector<14x128xf32> -> vector<14x128xf32>
      %26 = arith.addf %18, %25 : vector<14x128xf32>
      %c0_i32_23 = arith.constant 0 : i32
      %27 = arith.addi %arg4, %c0_i32_23 : i32
      %c0_24 = arith.constant 0 : index
      %28 = arith.index_cast %27 : i32 to index
      %c2 = arith.constant 2 : index
      %c0_25 = arith.constant 0 : index
      %29 = vector.load %arg1[%c0_24, %28, %c2, %c0_25] : memref<1x18x18x16xbf16, #tpu.memory_space<vmem>>, vector<1x1x14x16xbf16>
      %30 = vector.shape_cast %29 : vector<1x1x14x16xbf16> to vector<14x16xbf16>
      %c2_26 = arith.constant 2 : index
      %c0_27 = arith.constant 0 : index
      %c0_28 = arith.constant 0 : index
      %31 = vector.load %arg2[%c2_26, %c0_27, %c0_28] : memref<25x16x128xbf16, #tpu.memory_space<vmem>>, vector<1x16x128xbf16>
      %32 = vector.shape_cast %31 : vector<1x16x128xbf16> to vector<16x128xbf16>
      %cst_29 = arith.constant dense<0.000000e+00> : vector<14x128xf32>
      %33 = tpu.matmul %30, %32, %cst_29 {dimension_numbers = #tpu.dot_dimension_numbers<[1], [0], [0], [1], [0, 0, 1, 1], [], []>} : vector<14x16xbf16>, vector<16x128xbf16>, vector<14x128xf32> -> vector<14x128xf32>
      %34 = arith.addf %26, %33 : vector<14x128xf32>
      %c0_i32_30 = arith.constant 0 : i32
      %35 = arith.addi %arg4, %c0_i32_30 : i32
      %c0_31 = arith.constant 0 : index
      %36 = arith.index_cast %35 : i32 to index
      %c3 = arith.constant 3 : index
      %c0_32 = arith.constant 0 : index
      %37 = vector.load %arg1[%c0_31, %36, %c3, %c0_32] : memref<1x18x18x16xbf16, #tpu.memory_space<vmem>>, vector<1x1x14x16xbf16>
      %38 = vector.shape_cast %37 : vector<1x1x14x16xbf16> to vector<14x16xbf16>
      %c3_33 = arith.constant 3 : index
      %c0_34 = arith.constant 0 : index
      %c0_35 = arith.constant 0 : index
      %39 = vector.load %arg2[%c3_33, %c0_34, %c0_35] : memref<25x16x128xbf16, #tpu.memory_space<vmem>>, vector<1x16x128xbf16>
      %40 = vector.shape_cast %39 : vector<1x16x128xbf16> to vector<16x128xbf16>
      %cst_36 = arith.constant dense<0.000000e+00> : vector<14x128xf32>
      %41 = tpu.matmul %38, %40, %cst_36 {dimension_numbers = #tpu.dot_dimension_numbers<[1], [0], [0], [1], [0, 0, 1, 1], [], []>} : vector<14x16xbf16>, vector<16x128xbf16>, vector<14x128xf32> -> vector<14x128xf32>
      %42 = arith.addf %34, %41 : vector<14x128xf32>
      %c0_i32_37 = arith.constant 0 : i32
      %43 = arith.addi %arg4, %c0_i32_37 : i32
      %c0_38 = arith.constant 0 : index
      %44 = arith.index_cast %43 : i32 to index
      %c4 = arith.constant 4 : index
      %c0_39 = arith.constant 0 : index
      %45 = vector.load %arg1[%c0_38, %44, %c4, %c0_39] : memref<1x18x18x16xbf16, #tpu.memory_space<vmem>>, vector<1x1x14x16xbf16>
      %46 = vector.shape_cast %45 : vector<1x1x14x16xbf16> to vector<14x16xbf16>
      %c4_40 = arith.constant 4 : index
      %c0_41 = arith.constant 0 : index
      %c0_42 = arith.constant 0 : index
      %47 = vector.load %arg2[%c4_40, %c0_41, %c0_42] : memref<25x16x128xbf16, #tpu.memory_space<vmem>>, vector<1x16x128xbf16>
      %48 = vector.shape_cast %47 : vector<1x16x128xbf16> to vector<16x128xbf16>
      %cst_43 = arith.constant dense<0.000000e+00> : vector<14x128xf32>
      %49 = tpu.matmul %46, %48, %cst_43 {dimension_numbers = #tpu.dot_dimension_numbers<[1], [0], [0], [1], [0, 0, 1, 1], [], []>} : vector<14x16xbf16>, vector<16x128xbf16>, vector<14x128xf32> -> vector<14x128xf32>
      %50 = arith.addf %42, %49 : vector<14x128xf32>
      %c1_i32_44 = arith.constant 1 : i32
      %51 = arith.addi %arg4, %c1_i32_44 : i32
      %c0_45 = arith.constant 0 : index
      %52 = arith.index_cast %51 : i32 to index
      %c0_46 = arith.constant 0 : index
      %c0_47 = arith.constant 0 : index
      %53 = vector.load %arg1[%c0_45, %52, %c0_46, %c0_47] : memref<1x18x18x16xbf16, #tpu.memory_space<vmem>>, vector<1x1x14x16xbf16>
      %54 = vector.shape_cast %53 : vector<1x1x14x16xbf16> to vector<14x16xbf16>
      %c5 = arith.constant 5 : index
      %c0_48 = arith.constant 0 : index
      %c0_49 = arith.constant 0 : index
      %55 = vector.load %arg2[%c5, %c0_48, %c0_49] : memref<25x16x128xbf16, #tpu.memory_space<vmem>>, vector<1x16x128xbf16>
      %56 = vector.shape_cast %55 : vector<1x16x128xbf16> to vector<16x128xbf16>
      %cst_50 = arith.constant dense<0.000000e+00> : vector<14x128xf32>
      %57 = tpu.matmul %54, %56, %cst_50 {dimension_numbers = #tpu.dot_dimension_numbers<[1], [0], [0], [1], [0, 0, 1, 1], [], []>} : vector<14x16xbf16>, vector<16x128xbf16>, vector<14x128xf32> -> vector<14x128xf32>
      %58 = arith.addf %50, %57 : vector<14x128xf32>
      %c1_i32_51 = arith.constant 1 : i32
      %59 = arith.addi %arg4, %c1_i32_51 : i32
      %c0_52 = arith.constant 0 : index
      %60 = arith.index_cast %59 : i32 to index
      %c1_53 = arith.constant 1 : index
      %c0_54 = arith.constant 0 : index
      %61 = vector.load %arg1[%c0_52, %60, %c1_53, %c0_54] : memref<1x18x18x16xbf16, #tpu.memory_space<vmem>>, vector<1x1x14x16xbf16>
      %62 = vector.shape_cast %61 : vector<1x1x14x16xbf16> to vector<14x16xbf16>
      %c6 = arith.constant 6 : index
      %c0_55 = arith.constant 0 : index
      %c0_56 = arith.constant 0 : index
      %63 = vector.load %arg2[%c6, %c0_55, %c0_56] : memref<25x16x128xbf16, #tpu.memory_space<vmem>>, vector<1x16x128xbf16>
      %64 = vector.shape_cast %63 : vector<1x16x128xbf16> to vector<16x128xbf16>
      %cst_57 = arith.constant dense<0.000000e+00> : vector<14x128xf32>
      %65 = tpu.matmul %62, %64, %cst_57 {dimension_numbers = #tpu.dot_dimension_numbers<[1], [0], [0], [1], [0, 0, 1, 1], [], []>} : vector<14x16xbf16>, vector<16x128xbf16>, vector<14x128xf32> -> vector<14x128xf32>
      %66 = arith.addf %58, %65 : vector<14x128xf32>
      %c1_i32_58 = arith.constant 1 : i32
      %67 = arith.addi %arg4, %c1_i32_58 : i32
      %c0_59 = arith.constant 0 : index
      %68 = arith.index_cast %67 : i32 to index
      %c2_60 = arith.constant 2 : index
      %c0_61 = arith.constant 0 : index
      %69 = vector.load %arg1[%c0_59, %68, %c2_60, %c0_61] : memref<1x18x18x16xbf16, #tpu.memory_space<vmem>>, vector<1x1x14x16xbf16>
      %70 = vector.shape_cast %69 : vector<1x1x14x16xbf16> to vector<14x16xbf16>
      %c7 = arith.constant 7 : index
      %c0_62 = arith.constant 0 : index
      %c0_63 = arith.constant 0 : index
      %71 = vector.load %arg2[%c7, %c0_62, %c0_63] : memref<25x16x128xbf16, #tpu.memory_space<vmem>>, vector<1x16x128xbf16>
      %72 = vector.shape_cast %71 : vector<1x16x128xbf16> to vector<16x128xbf16>
      %cst_64 = arith.constant dense<0.000000e+00> : vector<14x128xf32>
      %73 = tpu.matmul %70, %72, %cst_64 {dimension_numbers = #tpu.dot_dimension_numbers<[1], [0], [0], [1], [0, 0, 1, 1], [], []>} : vector<14x16xbf16>, vector<16x128xbf16>, vector<14x128xf32> -> vector<14x128xf32>
      %74 = arith.addf %66, %73 : vector<14x128xf32>
      %c1_i32_65 = arith.constant 1 : i32
      %75 = arith.addi %arg4, %c1_i32_65 : i32
      %c0_66 = arith.constant 0 : index
      %76 = arith.index_cast %75 : i32 to index
      %c3_67 = arith.constant 3 : index
      %c0_68 = arith.constant 0 : index
      %77 = vector.load %arg1[%c0_66, %76, %c3_67, %c0_68] : memref<1x18x18x16xbf16, #tpu.memory_space<vmem>>, vector<1x1x14x16xbf16>
      %78 = vector.shape_cast %77 : vector<1x1x14x16xbf16> to vector<14x16xbf16>
      %c8 = arith.constant 8 : index
      %c0_69 = arith.constant 0 : index
      %c0_70 = arith.constant 0 : index
      %79 = vector.load %arg2[%c8, %c0_69, %c0_70] : memref<25x16x128xbf16, #tpu.memory_space<vmem>>, vector<1x16x128xbf16>
      %80 = vector.shape_cast %79 : vector<1x16x128xbf16> to vector<16x128xbf16>
      %cst_71 = arith.constant dense<0.000000e+00> : vector<14x128xf32>
      %81 = tpu.matmul %78, %80, %cst_71 {dimension_numbers = #tpu.dot_dimension_numbers<[1], [0], [0], [1], [0, 0, 1, 1], [], []>} : vector<14x16xbf16>, vector<16x128xbf16>, vector<14x128xf32> -> vector<14x128xf32>
      %82 = arith.addf %74, %81 : vector<14x128xf32>
      %c1_i32_72 = arith.constant 1 : i32
      %83 = arith.addi %arg4, %c1_i32_72 : i32
      %c0_73 = arith.constant 0 : index
      %84 = arith.index_cast %83 : i32 to index
      %c4_74 = arith.constant 4 : index
      %c0_75 = arith.constant 0 : index
      %85 = vector.load %arg1[%c0_73, %84, %c4_74, %c0_75] : memref<1x18x18x16xbf16, #tpu.memory_space<vmem>>, vector<1x1x14x16xbf16>
      %86 = vector.shape_cast %85 : vector<1x1x14x16xbf16> to vector<14x16xbf16>
      %c9 = arith.constant 9 : index
      %c0_76 = arith.constant 0 : index
      %c0_77 = arith.constant 0 : index
      %87 = vector.load %arg2[%c9, %c0_76, %c0_77] : memref<25x16x128xbf16, #tpu.memory_space<vmem>>, vector<1x16x128xbf16>
      %88 = vector.shape_cast %87 : vector<1x16x128xbf16> to vector<16x128xbf16>
      %cst_78 = arith.constant dense<0.000000e+00> : vector<14x128xf32>
      %89 = tpu.matmul %86, %88, %cst_78 {dimension_numbers = #tpu.dot_dimension_numbers<[1], [0], [0], [1], [0, 0, 1, 1], [], []>} : vector<14x16xbf16>, vector<16x128xbf16>, vector<14x128xf32> -> vector<14x128xf32>
      %90 = arith.addf %82, %89 : vector<14x128xf32>
      %c2_i32 = arith.constant 2 : i32
      %91 = arith.addi %arg4, %c2_i32 : i32
      %c0_79 = arith.constant 0 : index
      %92 = arith.index_cast %91 : i32 to index
      %c0_80 = arith.constant 0 : index
      %c0_81 = arith.constant 0 : index
      %93 = vector.load %arg1[%c0_79, %92, %c0_80, %c0_81] : memref<1x18x18x16xbf16, #tpu.memory_space<vmem>>, vector<1x1x14x16xbf16>
      %94 = vector.shape_cast %93 : vector<1x1x14x16xbf16> to vector<14x16xbf16>
      %c10 = arith.constant 10 : index
      %c0_82 = arith.constant 0 : index
      %c0_83 = arith.constant 0 : index
      %95 = vector.load %arg2[%c10, %c0_82, %c0_83] : memref<25x16x128xbf16, #tpu.memory_space<vmem>>, vector<1x16x128xbf16>
      %96 = vector.shape_cast %95 : vector<1x16x128xbf16> to vector<16x128xbf16>
      %cst_84 = arith.constant dense<0.000000e+00> : vector<14x128xf32>
      %97 = tpu.matmul %94, %96, %cst_84 {dimension_numbers = #tpu.dot_dimension_numbers<[1], [0], [0], [1], [0, 0, 1, 1], [], []>} : vector<14x16xbf16>, vector<16x128xbf16>, vector<14x128xf32> -> vector<14x128xf32>
      %98 = arith.addf %90, %97 : vector<14x128xf32>
      %c2_i32_85 = arith.constant 2 : i32
      %99 = arith.addi %arg4, %c2_i32_85 : i32
      %c0_86 = arith.constant 0 : index
      %100 = arith.index_cast %99 : i32 to index
      %c1_87 = arith.constant 1 : index
      %c0_88 = arith.constant 0 : index
      %101 = vector.load %arg1[%c0_86, %100, %c1_87, %c0_88] : memref<1x18x18x16xbf16, #tpu.memory_space<vmem>>, vector<1x1x14x16xbf16>
      %102 = vector.shape_cast %101 : vector<1x1x14x16xbf16> to vector<14x16xbf16>
      %c11 = arith.constant 11 : index
      %c0_89 = arith.constant 0 : index
      %c0_90 = arith.constant 0 : index
      %103 = vector.load %arg2[%c11, %c0_89, %c0_90] : memref<25x16x128xbf16, #tpu.memory_space<vmem>>, vector<1x16x128xbf16>
      %104 = vector.shape_cast %103 : vector<1x16x128xbf16> to vector<16x128xbf16>
      %cst_91 = arith.constant dense<0.000000e+00> : vector<14x128xf32>
      %105 = tpu.matmul %102, %104, %cst_91 {dimension_numbers = #tpu.dot_dimension_numbers<[1], [0], [0], [1], [0, 0, 1, 1], [], []>} : vector<14x16xbf16>, vector<16x128xbf16>, vector<14x128xf32> -> vector<14x128xf32>
      %106 = arith.addf %98, %105 : vector<14x128xf32>
      %c2_i32_92 = arith.constant 2 : i32
      %107 = arith.addi %arg4, %c2_i32_92 : i32
      %c0_93 = arith.constant 0 : index
      %108 = arith.index_cast %107 : i32 to index
      %c2_94 = arith.constant 2 : index
      %c0_95 = arith.constant 0 : index
      %109 = vector.load %arg1[%c0_93, %108, %c2_94, %c0_95] : memref<1x18x18x16xbf16, #tpu.memory_space<vmem>>, vector<1x1x14x16xbf16>
      %110 = vector.shape_cast %109 : vector<1x1x14x16xbf16> to vector<14x16xbf16>
      %c12 = arith.constant 12 : index
      %c0_96 = arith.constant 0 : index
      %c0_97 = arith.constant 0 : index
      %111 = vector.load %arg2[%c12, %c0_96, %c0_97] : memref<25x16x128xbf16, #tpu.memory_space<vmem>>, vector<1x16x128xbf16>
      %112 = vector.shape_cast %111 : vector<1x16x128xbf16> to vector<16x128xbf16>
      %cst_98 = arith.constant dense<0.000000e+00> : vector<14x128xf32>
      %113 = tpu.matmul %110, %112, %cst_98 {dimension_numbers = #tpu.dot_dimension_numbers<[1], [0], [0], [1], [0, 0, 1, 1], [], []>} : vector<14x16xbf16>, vector<16x128xbf16>, vector<14x128xf32> -> vector<14x128xf32>
      %114 = arith.addf %106, %113 : vector<14x128xf32>
      %c2_i32_99 = arith.constant 2 : i32
      %115 = arith.addi %arg4, %c2_i32_99 : i32
      %c0_100 = arith.constant 0 : index
      %116 = arith.index_cast %115 : i32 to index
      %c3_101 = arith.constant 3 : index
      %c0_102 = arith.constant 0 : index
      %117 = vector.load %arg1[%c0_100, %116, %c3_101, %c0_102] : memref<1x18x18x16xbf16, #tpu.memory_space<vmem>>, vector<1x1x14x16xbf16>
      %118 = vector.shape_cast %117 : vector<1x1x14x16xbf16> to vector<14x16xbf16>
      %c13 = arith.constant 13 : index
      %c0_103 = arith.constant 0 : index
      %c0_104 = arith.constant 0 : index
      %119 = vector.load %arg2[%c13, %c0_103, %c0_104] : memref<25x16x128xbf16, #tpu.memory_space<vmem>>, vector<1x16x128xbf16>
      %120 = vector.shape_cast %119 : vector<1x16x128xbf16> to vector<16x128xbf16>
      %cst_105 = arith.constant dense<0.000000e+00> : vector<14x128xf32>
      %121 = tpu.matmul %118, %120, %cst_105 {dimension_numbers = #tpu.dot_dimension_numbers<[1], [0], [0], [1], [0, 0, 1, 1], [], []>} : vector<14x16xbf16>, vector<16x128xbf16>, vector<14x128xf32> -> vector<14x128xf32>
      %122 = arith.addf %114, %121 : vector<14x128xf32>
      %c2_i32_106 = arith.constant 2 : i32
      %123 = arith.addi %arg4, %c2_i32_106 : i32
      %c0_107 = arith.constant 0 : index
      %124 = arith.index_cast %123 : i32 to index
      %c4_108 = arith.constant 4 : index
      %c0_109 = arith.constant 0 : index
      %125 = vector.load %arg1[%c0_107, %124, %c4_108, %c0_109] : memref<1x18x18x16xbf16, #tpu.memory_space<vmem>>, vector<1x1x14x16xbf16>
      %126 = vector.shape_cast %125 : vector<1x1x14x16xbf16> to vector<14x16xbf16>
      %c14 = arith.constant 14 : index
      %c0_110 = arith.constant 0 : index
      %c0_111 = arith.constant 0 : index
      %127 = vector.load %arg2[%c14, %c0_110, %c0_111] : memref<25x16x128xbf16, #tpu.memory_space<vmem>>, vector<1x16x128xbf16>
      %128 = vector.shape_cast %127 : vector<1x16x128xbf16> to vector<16x128xbf16>
      %cst_112 = arith.constant dense<0.000000e+00> : vector<14x128xf32>
      %129 = tpu.matmul %126, %128, %cst_112 {dimension_numbers = #tpu.dot_dimension_numbers<[1], [0], [0], [1], [0, 0, 1, 1], [], []>} : vector<14x16xbf16>, vector<16x128xbf16>, vector<14x128xf32> -> vector<14x128xf32>
      %130 = arith.addf %122, %129 : vector<14x128xf32>
      %c3_i32 = arith.constant 3 : i32
      %131 = arith.addi %arg4, %c3_i32 : i32
      %c0_113 = arith.constant 0 : index
      %132 = arith.index_cast %131 : i32 to index
      %c0_114 = arith.constant 0 : index
      %c0_115 = arith.constant 0 : index
      %133 = vector.load %arg1[%c0_113, %132, %c0_114, %c0_115] : memref<1x18x18x16xbf16, #tpu.memory_space<vmem>>, vector<1x1x14x16xbf16>
      %134 = vector.shape_cast %133 : vector<1x1x14x16xbf16> to vector<14x16xbf16>
      %c15 = arith.constant 15 : index
      %c0_116 = arith.constant 0 : index
      %c0_117 = arith.constant 0 : index
      %135 = vector.load %arg2[%c15, %c0_116, %c0_117] : memref<25x16x128xbf16, #tpu.memory_space<vmem>>, vector<1x16x128xbf16>
      %136 = vector.shape_cast %135 : vector<1x16x128xbf16> to vector<16x128xbf16>
      %cst_118 = arith.constant dense<0.000000e+00> : vector<14x128xf32>
      %137 = tpu.matmul %134, %136, %cst_118 {dimension_numbers = #tpu.dot_dimension_numbers<[1], [0], [0], [1], [0, 0, 1, 1], [], []>} : vector<14x16xbf16>, vector<16x128xbf16>, vector<14x128xf32> -> vector<14x128xf32>
      %138 = arith.addf %130, %137 : vector<14x128xf32>
      %c3_i32_119 = arith.constant 3 : i32
      %139 = arith.addi %arg4, %c3_i32_119 : i32
      %c0_120 = arith.constant 0 : index
      %140 = arith.index_cast %139 : i32 to index
      %c1_121 = arith.constant 1 : index
      %c0_122 = arith.constant 0 : index
      %141 = vector.load %arg1[%c0_120, %140, %c1_121, %c0_122] : memref<1x18x18x16xbf16, #tpu.memory_space<vmem>>, vector<1x1x14x16xbf16>
      %142 = vector.shape_cast %141 : vector<1x1x14x16xbf16> to vector<14x16xbf16>
      %c16 = arith.constant 16 : index
      %c0_123 = arith.constant 0 : index
      %c0_124 = arith.constant 0 : index
      %143 = vector.load %arg2[%c16, %c0_123, %c0_124] : memref<25x16x128xbf16, #tpu.memory_space<vmem>>, vector<1x16x128xbf16>
      %144 = vector.shape_cast %143 : vector<1x16x128xbf16> to vector<16x128xbf16>
      %cst_125 = arith.constant dense<0.000000e+00> : vector<14x128xf32>
      %145 = tpu.matmul %142, %144, %cst_125 {dimension_numbers = #tpu.dot_dimension_numbers<[1], [0], [0], [1], [0, 0, 1, 1], [], []>} : vector<14x16xbf16>, vector<16x128xbf16>, vector<14x128xf32> -> vector<14x128xf32>
      %146 = arith.addf %138, %145 : vector<14x128xf32>
      %c3_i32_126 = arith.constant 3 : i32
      %147 = arith.addi %arg4, %c3_i32_126 : i32
      %c0_127 = arith.constant 0 : index
      %148 = arith.index_cast %147 : i32 to index
      %c2_128 = arith.constant 2 : index
      %c0_129 = arith.constant 0 : index
      %149 = vector.load %arg1[%c0_127, %148, %c2_128, %c0_129] : memref<1x18x18x16xbf16, #tpu.memory_space<vmem>>, vector<1x1x14x16xbf16>
      %150 = vector.shape_cast %149 : vector<1x1x14x16xbf16> to vector<14x16xbf16>
      %c17 = arith.constant 17 : index
      %c0_130 = arith.constant 0 : index
      %c0_131 = arith.constant 0 : index
      %151 = vector.load %arg2[%c17, %c0_130, %c0_131] : memref<25x16x128xbf16, #tpu.memory_space<vmem>>, vector<1x16x128xbf16>
      %152 = vector.shape_cast %151 : vector<1x16x128xbf16> to vector<16x128xbf16>
      %cst_132 = arith.constant dense<0.000000e+00> : vector<14x128xf32>
      %153 = tpu.matmul %150, %152, %cst_132 {dimension_numbers = #tpu.dot_dimension_numbers<[1], [0], [0], [1], [0, 0, 1, 1], [], []>} : vector<14x16xbf16>, vector<16x128xbf16>, vector<14x128xf32> -> vector<14x128xf32>
      %154 = arith.addf %146, %153 : vector<14x128xf32>
      %c3_i32_133 = arith.constant 3 : i32
      %155 = arith.addi %arg4, %c3_i32_133 : i32
      %c0_134 = arith.constant 0 : index
      %156 = arith.index_cast %155 : i32 to index
      %c3_135 = arith.constant 3 : index
      %c0_136 = arith.constant 0 : index
      %157 = vector.load %arg1[%c0_134, %156, %c3_135, %c0_136] : memref<1x18x18x16xbf16, #tpu.memory_space<vmem>>, vector<1x1x14x16xbf16>
      %158 = vector.shape_cast %157 : vector<1x1x14x16xbf16> to vector<14x16xbf16>
      %c18 = arith.constant 18 : index
      %c0_137 = arith.constant 0 : index
      %c0_138 = arith.constant 0 : index
      %159 = vector.load %arg2[%c18, %c0_137, %c0_138] : memref<25x16x128xbf16, #tpu.memory_space<vmem>>, vector<1x16x128xbf16>
      %160 = vector.shape_cast %159 : vector<1x16x128xbf16> to vector<16x128xbf16>
      %cst_139 = arith.constant dense<0.000000e+00> : vector<14x128xf32>
      %161 = tpu.matmul %158, %160, %cst_139 {dimension_numbers = #tpu.dot_dimension_numbers<[1], [0], [0], [1], [0, 0, 1, 1], [], []>} : vector<14x16xbf16>, vector<16x128xbf16>, vector<14x128xf32> -> vector<14x128xf32>
      %162 = arith.addf %154, %161 : vector<14x128xf32>
      %c3_i32_140 = arith.constant 3 : i32
      %163 = arith.addi %arg4, %c3_i32_140 : i32
      %c0_141 = arith.constant 0 : index
      %164 = arith.index_cast %163 : i32 to index
      %c4_142 = arith.constant 4 : index
      %c0_143 = arith.constant 0 : index
      %165 = vector.load %arg1[%c0_141, %164, %c4_142, %c0_143] : memref<1x18x18x16xbf16, #tpu.memory_space<vmem>>, vector<1x1x14x16xbf16>
      %166 = vector.shape_cast %165 : vector<1x1x14x16xbf16> to vector<14x16xbf16>
      %c19 = arith.constant 19 : index
      %c0_144 = arith.constant 0 : index
      %c0_145 = arith.constant 0 : index
      %167 = vector.load %arg2[%c19, %c0_144, %c0_145] : memref<25x16x128xbf16, #tpu.memory_space<vmem>>, vector<1x16x128xbf16>
      %168 = vector.shape_cast %167 : vector<1x16x128xbf16> to vector<16x128xbf16>
      %cst_146 = arith.constant dense<0.000000e+00> : vector<14x128xf32>
      %169 = tpu.matmul %166, %168, %cst_146 {dimension_numbers = #tpu.dot_dimension_numbers<[1], [0], [0], [1], [0, 0, 1, 1], [], []>} : vector<14x16xbf16>, vector<16x128xbf16>, vector<14x128xf32> -> vector<14x128xf32>
      %170 = arith.addf %162, %169 : vector<14x128xf32>
      %c4_i32 = arith.constant 4 : i32
      %171 = arith.addi %arg4, %c4_i32 : i32
      %c0_147 = arith.constant 0 : index
      %172 = arith.index_cast %171 : i32 to index
      %c0_148 = arith.constant 0 : index
      %c0_149 = arith.constant 0 : index
      %173 = vector.load %arg1[%c0_147, %172, %c0_148, %c0_149] : memref<1x18x18x16xbf16, #tpu.memory_space<vmem>>, vector<1x1x14x16xbf16>
      %174 = vector.shape_cast %173 : vector<1x1x14x16xbf16> to vector<14x16xbf16>
      %c20 = arith.constant 20 : index
      %c0_150 = arith.constant 0 : index
      %c0_151 = arith.constant 0 : index
      %175 = vector.load %arg2[%c20, %c0_150, %c0_151] : memref<25x16x128xbf16, #tpu.memory_space<vmem>>, vector<1x16x128xbf16>
      %176 = vector.shape_cast %175 : vector<1x16x128xbf16> to vector<16x128xbf16>
      %cst_152 = arith.constant dense<0.000000e+00> : vector<14x128xf32>
      %177 = tpu.matmul %174, %176, %cst_152 {dimension_numbers = #tpu.dot_dimension_numbers<[1], [0], [0], [1], [0, 0, 1, 1], [], []>} : vector<14x16xbf16>, vector<16x128xbf16>, vector<14x128xf32> -> vector<14x128xf32>
      %178 = arith.addf %170, %177 : vector<14x128xf32>
      %c4_i32_153 = arith.constant 4 : i32
      %179 = arith.addi %arg4, %c4_i32_153 : i32
      %c0_154 = arith.constant 0 : index
      %180 = arith.index_cast %179 : i32 to index
      %c1_155 = arith.constant 1 : index
      %c0_156 = arith.constant 0 : index
      %181 = vector.load %arg1[%c0_154, %180, %c1_155, %c0_156] : memref<1x18x18x16xbf16, #tpu.memory_space<vmem>>, vector<1x1x14x16xbf16>
      %182 = vector.shape_cast %181 : vector<1x1x14x16xbf16> to vector<14x16xbf16>
      %c21 = arith.constant 21 : index
      %c0_157 = arith.constant 0 : index
      %c0_158 = arith.constant 0 : index
      %183 = vector.load %arg2[%c21, %c0_157, %c0_158] : memref<25x16x128xbf16, #tpu.memory_space<vmem>>, vector<1x16x128xbf16>
      %184 = vector.shape_cast %183 : vector<1x16x128xbf16> to vector<16x128xbf16>
      %cst_159 = arith.constant dense<0.000000e+00> : vector<14x128xf32>
      %185 = tpu.matmul %182, %184, %cst_159 {dimension_numbers = #tpu.dot_dimension_numbers<[1], [0], [0], [1], [0, 0, 1, 1], [], []>} : vector<14x16xbf16>, vector<16x128xbf16>, vector<14x128xf32> -> vector<14x128xf32>
      %186 = arith.addf %178, %185 : vector<14x128xf32>
      %c4_i32_160 = arith.constant 4 : i32
      %187 = arith.addi %arg4, %c4_i32_160 : i32
      %c0_161 = arith.constant 0 : index
      %188 = arith.index_cast %187 : i32 to index
      %c2_162 = arith.constant 2 : index
      %c0_163 = arith.constant 0 : index
      %189 = vector.load %arg1[%c0_161, %188, %c2_162, %c0_163] : memref<1x18x18x16xbf16, #tpu.memory_space<vmem>>, vector<1x1x14x16xbf16>
      %190 = vector.shape_cast %189 : vector<1x1x14x16xbf16> to vector<14x16xbf16>
      %c22 = arith.constant 22 : index
      %c0_164 = arith.constant 0 : index
      %c0_165 = arith.constant 0 : index
      %191 = vector.load %arg2[%c22, %c0_164, %c0_165] : memref<25x16x128xbf16, #tpu.memory_space<vmem>>, vector<1x16x128xbf16>
      %192 = vector.shape_cast %191 : vector<1x16x128xbf16> to vector<16x128xbf16>
      %cst_166 = arith.constant dense<0.000000e+00> : vector<14x128xf32>
      %193 = tpu.matmul %190, %192, %cst_166 {dimension_numbers = #tpu.dot_dimension_numbers<[1], [0], [0], [1], [0, 0, 1, 1], [], []>} : vector<14x16xbf16>, vector<16x128xbf16>, vector<14x128xf32> -> vector<14x128xf32>
      %194 = arith.addf %186, %193 : vector<14x128xf32>
      %c4_i32_167 = arith.constant 4 : i32
      %195 = arith.addi %arg4, %c4_i32_167 : i32
      %c0_168 = arith.constant 0 : index
      %196 = arith.index_cast %195 : i32 to index
      %c3_169 = arith.constant 3 : index
      %c0_170 = arith.constant 0 : index
      %197 = vector.load %arg1[%c0_168, %196, %c3_169, %c0_170] : memref<1x18x18x16xbf16, #tpu.memory_space<vmem>>, vector<1x1x14x16xbf16>
      %198 = vector.shape_cast %197 : vector<1x1x14x16xbf16> to vector<14x16xbf16>
      %c23 = arith.constant 23 : index
      %c0_171 = arith.constant 0 : index
      %c0_172 = arith.constant 0 : index
      %199 = vector.load %arg2[%c23, %c0_171, %c0_172] : memref<25x16x128xbf16, #tpu.memory_space<vmem>>, vector<1x16x128xbf16>
      %200 = vector.shape_cast %199 : vector<1x16x128xbf16> to vector<16x128xbf16>
      %cst_173 = arith.constant dense<0.000000e+00> : vector<14x128xf32>
      %201 = tpu.matmul %198, %200, %cst_173 {dimension_numbers = #tpu.dot_dimension_numbers<[1], [0], [0], [1], [0, 0, 1, 1], [], []>} : vector<14x16xbf16>, vector<16x128xbf16>, vector<14x128xf32> -> vector<14x128xf32>
      %202 = arith.addf %194, %201 : vector<14x128xf32>
      %c4_i32_174 = arith.constant 4 : i32
      %203 = arith.addi %arg4, %c4_i32_174 : i32
      %c0_175 = arith.constant 0 : index
      %204 = arith.index_cast %203 : i32 to index
      %c4_176 = arith.constant 4 : index
      %c0_177 = arith.constant 0 : index
      %205 = vector.load %arg1[%c0_175, %204, %c4_176, %c0_177] : memref<1x18x18x16xbf16, #tpu.memory_space<vmem>>, vector<1x1x14x16xbf16>
      %206 = vector.shape_cast %205 : vector<1x1x14x16xbf16> to vector<14x16xbf16>
      %c24 = arith.constant 24 : index
      %c0_178 = arith.constant 0 : index
      %c0_179 = arith.constant 0 : index
      %207 = vector.load %arg2[%c24, %c0_178, %c0_179] : memref<25x16x128xbf16, #tpu.memory_space<vmem>>, vector<1x16x128xbf16>
      %208 = vector.shape_cast %207 : vector<1x16x128xbf16> to vector<16x128xbf16>
      %cst_180 = arith.constant dense<0.000000e+00> : vector<14x128xf32>
      %209 = tpu.matmul %206, %208, %cst_180 {dimension_numbers = #tpu.dot_dimension_numbers<[1], [0], [0], [1], [0, 0, 1, 1], [], []>} : vector<14x16xbf16>, vector<16x128xbf16>, vector<14x128xf32> -> vector<14x128xf32>
      %210 = arith.addf %202, %209 : vector<14x128xf32>
      %cst_181 = arith.constant dense<0.000000e+00> : vector<128xf32>
      %211 = vector.multi_reduction <add>, %210, %cst_181 [0] : vector<14x128xf32> to vector<128xf32>
      %212 = vector.shape_cast %211 : vector<128xf32> to vector<1x128xf32>
      %213 = arith.addf %arg5, %212 : vector<1x128xf32>
      %214 = arith.mulf %210, %210 : vector<14x128xf32>
      %cst_182 = arith.constant dense<0.000000e+00> : vector<128xf32>
      %215 = vector.multi_reduction <add>, %214, %cst_182 [0] : vector<14x128xf32> to vector<128xf32>
      %216 = vector.shape_cast %215 : vector<128xf32> to vector<1x128xf32>
      %217 = arith.addf %arg6, %216 : vector<1x128xf32>
      scf.yield %213, %217 : vector<1x128xf32>, vector<1x128xf32>
    }
    %c14_i32_1 = arith.constant 14 : i32
    %c0 = arith.constant 0 : index
    %c0_2 = arith.constant 0 : index
    %c0_3 = arith.constant 0 : index
    %4 = vector.load %arg3[%c0, %c0_2, %c0_3] : memref<1x2x128xf32, #tpu.memory_space<vmem>>, vector<1x1x128xf32>
    %5 = vector.shape_cast %4 : vector<1x1x128xf32> to vector<1x128xf32>
    %6 = vector.shape_cast %3#0 : vector<1x128xf32> to vector<1x1x128xf32>
    tpu.vector_store %arg3[%c0, %c0_2, %c0_3], %6 {strides = array<i32>} : memref<1x2x128xf32, #tpu.memory_space<vmem>>, vector<1x1x128xf32>,
    %c0_4 = arith.constant 0 : index
    %c1 = arith.constant 1 : index
    %c0_5 = arith.constant 0 : index
    %7 = vector.load %arg3[%c0_4, %c1, %c0_5] : memref<1x2x128xf32, #tpu.memory_space<vmem>>, vector<1x1x128xf32>
    %8 = vector.shape_cast %7 : vector<1x1x128xf32> to vector<1x128xf32>
    %9 = vector.shape_cast %3#1 : vector<1x128xf32> to vector<1x1x128xf32>
    tpu.vector_store %arg3[%c0_4, %c1, %c0_5], %9 {strides = array<i32>} : memref<1x2x128xf32, #tpu.memory_space<vmem>>, vector<1x1x128xf32>,
    return
  }
  func.func @transform_0(%arg0: i32) -> (i32, i32, i32, i32) {
    %c0_i32 = arith.constant 0 : i32
    %c0_i32_0 = arith.constant 0 : i32
    %c0_i32_1 = arith.constant 0 : i32
    %c0_i32_2 = arith.constant 0 : i32
    return %arg0, %c0_i32, %c0_i32_0, %c0_i32_1 : i32, i32, i32, i32
  }
  func.func @transform_1(%arg0: i32) -> (i32, i32, i32) {
    %c0_i32 = arith.constant 0 : i32
    %c0_i32_0 = arith.constant 0 : i32
    %c0_i32_1 = arith.constant 0 : i32
    %c0_i32_2 = arith.constant 0 : i32
    return %c0_i32, %c0_i32_0, %c0_i32_1 : i32, i32, i32
  }
  func.func @transform_2(%arg0: i32) -> (i32, i32, i32) {
    %c0_i32 = arith.constant 0 : i32
    %c0_i32_0 = arith.constant 0 : i32
    %c0_i32_1 = arith.constant 0 : i32
    return %arg0, %c0_i32, %c0_i32_0 : i32, i32, i32
  }
}

module attributes {stable_mosaic.version = 11 : i64} {
  func.func @kernel(%arg0: i32, %arg1: memref<1x18x18x16xbf16, #tpu.memory_space<vmem>>, %arg2: memref<25x16x128xbf16, #tpu.memory_space<vmem>>, %arg3: memref<1x128xf32, #tpu.memory_space<vmem>>, %arg4: memref<1x128xf32, #tpu.memory_space<vmem>>, %arg5: memref<1x7x7x128xbf16, #tpu.memory_space<vmem>>) attributes {dimension_semantics = [#tpu.dimension_semantics<parallel>], iteration_bounds = array<i64: 2>, scalar_prefetch = 0 : i64, scratch_operands = 0 : i64, tpu.core_type = #tpu.core_type<tc>, window_params = [{transform_indices = @transform_0, window_bounds = array<i64: 1, 18, 18, 16>}, {pipeline_mode = #tpu.pipeline_mode<synchronous>, transform_indices = @transform_1, window_bounds = array<i64: 25, 16, 128>}, {pipeline_mode = #tpu.pipeline_mode<synchronous>, transform_indices = @transform_2, window_bounds = array<i64: 1, 128>}, {pipeline_mode = #tpu.pipeline_mode<synchronous>, transform_indices = @transform_3, window_bounds = array<i64: 1, 128>}, {transform_indices = @transform_4, window_bounds = array<i64: 1, 7, 7, 128>}]} {
    %c0 = arith.constant 0 : index
    %c0_0 = arith.constant 0 : index
    %0 = vector.load %arg3[%c0, %c0_0] : memref<1x128xf32, #tpu.memory_space<vmem>>, vector<1x128xf32>
    %c0_1 = arith.constant 0 : index
    %c0_2 = arith.constant 0 : index
    %1 = vector.load %arg4[%c0_1, %c0_2] : memref<1x128xf32, #tpu.memory_space<vmem>>, vector<1x128xf32>
    %2 = tpu.iota {dimensions = array<i32: 0>} : vector<7x14xi32>
    %3 = tpu.iota {dimensions = array<i32: 1>} : vector<7x14xi32>
    %c2_i32 = arith.constant 2 : i32
    %4 = vector.broadcast %c2_i32 : i32 to vector<7x14xi32>
    %5 = arith.muli %4, %2 : vector<7x14xi32>
    %6 = arith.cmpi eq, %3, %5 : vector<7x14xi32>
    %7 = arith.extui %6 : vector<7x14xi1> to vector<7x14xi32>
    %8 = arith.sitofp %7 : vector<7x14xi32> to vector<7x14xf32>
    %c2_i32_3 = arith.constant 2 : i32
    %9 = vector.broadcast %c2_i32_3 : i32 to vector<7x14xi32>
    %10 = arith.muli %9, %2 : vector<7x14xi32>
    %c1_i32 = arith.constant 1 : i32
    %11 = vector.broadcast %c1_i32 : i32 to vector<7x14xi32>
    %12 = arith.addi %10, %11 : vector<7x14xi32>
    %13 = arith.cmpi eq, %3, %12 : vector<7x14xi32>
    %14 = arith.extui %13 : vector<7x14xi1> to vector<7x14xi32>
    %15 = arith.sitofp %14 : vector<7x14xi32> to vector<7x14xf32>
    %c0_i32 = arith.constant 0 : i32
    %c7_i32 = arith.constant 7 : i32
    %16 = arith.addi %c0_i32, %c7_i32 : i32
    %c1_i32_4 = arith.constant 1 : i32
    scf.for %arg6 = %c0_i32 to %16 step %c1_i32_4  : i32 {
      %c2_i32_6 = arith.constant 2 : i32
      %17 = arith.muli %c2_i32_6, %arg6 : i32
      %cst = arith.constant 0.000000e+00 : f32
      %18 = vector.broadcast %cst : f32 to vector<14x128xf32>
      %c0_i32_7 = arith.constant 0 : i32
      %19 = arith.addi %17, %c0_i32_7 : i32
      %c0_8 = arith.constant 0 : index
      %20 = arith.index_cast %19 : i32 to index
      %c0_9 = arith.constant 0 : index
      %c0_10 = arith.constant 0 : index
      %21 = vector.load %arg1[%c0_8, %20, %c0_9, %c0_10] : memref<1x18x18x16xbf16, #tpu.memory_space<vmem>>, vector<1x1x14x16xbf16>
      %22 = vector.shape_cast %21 : vector<1x1x14x16xbf16> to vector<14x16xbf16>
      %c0_11 = arith.constant 0 : index
      %c0_12 = arith.constant 0 : index
      %c0_13 = arith.constant 0 : index
      %23 = vector.load %arg2[%c0_11, %c0_12, %c0_13] : memref<25x16x128xbf16, #tpu.memory_space<vmem>>, vector<1x16x128xbf16>
      %24 = vector.shape_cast %23 : vector<1x16x128xbf16> to vector<16x128xbf16>
      %cst_14 = arith.constant dense<0.000000e+00> : vector<14x128xf32>
      %25 = tpu.matmul %22, %24, %cst_14 {dimension_numbers = #tpu.dot_dimension_numbers<[1], [0], [0], [1], [0, 0, 1, 1], [], []>} : vector<14x16xbf16>, vector<16x128xbf16>, vector<14x128xf32> -> vector<14x128xf32>
      %26 = arith.addf %18, %25 : vector<14x128xf32>
      %c0_i32_15 = arith.constant 0 : i32
      %27 = arith.addi %17, %c0_i32_15 : i32
      %c0_16 = arith.constant 0 : index
      %28 = arith.index_cast %27 : i32 to index
      %c1 = arith.constant 1 : index
      %c0_17 = arith.constant 0 : index
      %29 = vector.load %arg1[%c0_16, %28, %c1, %c0_17] : memref<1x18x18x16xbf16, #tpu.memory_space<vmem>>, vector<1x1x14x16xbf16>
      %30 = vector.shape_cast %29 : vector<1x1x14x16xbf16> to vector<14x16xbf16>
      %c1_18 = arith.constant 1 : index
      %c0_19 = arith.constant 0 : index
      %c0_20 = arith.constant 0 : index
      %31 = vector.load %arg2[%c1_18, %c0_19, %c0_20] : memref<25x16x128xbf16, #tpu.memory_space<vmem>>, vector<1x16x128xbf16>
      %32 = vector.shape_cast %31 : vector<1x16x128xbf16> to vector<16x128xbf16>
      %cst_21 = arith.constant dense<0.000000e+00> : vector<14x128xf32>
      %33 = tpu.matmul %30, %32, %cst_21 {dimension_numbers = #tpu.dot_dimension_numbers<[1], [0], [0], [1], [0, 0, 1, 1], [], []>} : vector<14x16xbf16>, vector<16x128xbf16>, vector<14x128xf32> -> vector<14x128xf32>
      %34 = arith.addf %26, %33 : vector<14x128xf32>
      %c0_i32_22 = arith.constant 0 : i32
      %35 = arith.addi %17, %c0_i32_22 : i32
      %c0_23 = arith.constant 0 : index
      %36 = arith.index_cast %35 : i32 to index
      %c2 = arith.constant 2 : index
      %c0_24 = arith.constant 0 : index
      %37 = vector.load %arg1[%c0_23, %36, %c2, %c0_24] : memref<1x18x18x16xbf16, #tpu.memory_space<vmem>>, vector<1x1x14x16xbf16>
      %38 = vector.shape_cast %37 : vector<1x1x14x16xbf16> to vector<14x16xbf16>
      %c2_25 = arith.constant 2 : index
      %c0_26 = arith.constant 0 : index
      %c0_27 = arith.constant 0 : index
      %39 = vector.load %arg2[%c2_25, %c0_26, %c0_27] : memref<25x16x128xbf16, #tpu.memory_space<vmem>>, vector<1x16x128xbf16>
      %40 = vector.shape_cast %39 : vector<1x16x128xbf16> to vector<16x128xbf16>
      %cst_28 = arith.constant dense<0.000000e+00> : vector<14x128xf32>
      %41 = tpu.matmul %38, %40, %cst_28 {dimension_numbers = #tpu.dot_dimension_numbers<[1], [0], [0], [1], [0, 0, 1, 1], [], []>} : vector<14x16xbf16>, vector<16x128xbf16>, vector<14x128xf32> -> vector<14x128xf32>
      %42 = arith.addf %34, %41 : vector<14x128xf32>
      %c0_i32_29 = arith.constant 0 : i32
      %43 = arith.addi %17, %c0_i32_29 : i32
      %c0_30 = arith.constant 0 : index
      %44 = arith.index_cast %43 : i32 to index
      %c3 = arith.constant 3 : index
      %c0_31 = arith.constant 0 : index
      %45 = vector.load %arg1[%c0_30, %44, %c3, %c0_31] : memref<1x18x18x16xbf16, #tpu.memory_space<vmem>>, vector<1x1x14x16xbf16>
      %46 = vector.shape_cast %45 : vector<1x1x14x16xbf16> to vector<14x16xbf16>
      %c3_32 = arith.constant 3 : index
      %c0_33 = arith.constant 0 : index
      %c0_34 = arith.constant 0 : index
      %47 = vector.load %arg2[%c3_32, %c0_33, %c0_34] : memref<25x16x128xbf16, #tpu.memory_space<vmem>>, vector<1x16x128xbf16>
      %48 = vector.shape_cast %47 : vector<1x16x128xbf16> to vector<16x128xbf16>
      %cst_35 = arith.constant dense<0.000000e+00> : vector<14x128xf32>
      %49 = tpu.matmul %46, %48, %cst_35 {dimension_numbers = #tpu.dot_dimension_numbers<[1], [0], [0], [1], [0, 0, 1, 1], [], []>} : vector<14x16xbf16>, vector<16x128xbf16>, vector<14x128xf32> -> vector<14x128xf32>
      %50 = arith.addf %42, %49 : vector<14x128xf32>
      %c0_i32_36 = arith.constant 0 : i32
      %51 = arith.addi %17, %c0_i32_36 : i32
      %c0_37 = arith.constant 0 : index
      %52 = arith.index_cast %51 : i32 to index
      %c4 = arith.constant 4 : index
      %c0_38 = arith.constant 0 : index
      %53 = vector.load %arg1[%c0_37, %52, %c4, %c0_38] : memref<1x18x18x16xbf16, #tpu.memory_space<vmem>>, vector<1x1x14x16xbf16>
      %54 = vector.shape_cast %53 : vector<1x1x14x16xbf16> to vector<14x16xbf16>
      %c4_39 = arith.constant 4 : index
      %c0_40 = arith.constant 0 : index
      %c0_41 = arith.constant 0 : index
      %55 = vector.load %arg2[%c4_39, %c0_40, %c0_41] : memref<25x16x128xbf16, #tpu.memory_space<vmem>>, vector<1x16x128xbf16>
      %56 = vector.shape_cast %55 : vector<1x16x128xbf16> to vector<16x128xbf16>
      %cst_42 = arith.constant dense<0.000000e+00> : vector<14x128xf32>
      %57 = tpu.matmul %54, %56, %cst_42 {dimension_numbers = #tpu.dot_dimension_numbers<[1], [0], [0], [1], [0, 0, 1, 1], [], []>} : vector<14x16xbf16>, vector<16x128xbf16>, vector<14x128xf32> -> vector<14x128xf32>
      %58 = arith.addf %50, %57 : vector<14x128xf32>
      %c1_i32_43 = arith.constant 1 : i32
      %59 = arith.addi %17, %c1_i32_43 : i32
      %c0_44 = arith.constant 0 : index
      %60 = arith.index_cast %59 : i32 to index
      %c0_45 = arith.constant 0 : index
      %c0_46 = arith.constant 0 : index
      %61 = vector.load %arg1[%c0_44, %60, %c0_45, %c0_46] : memref<1x18x18x16xbf16, #tpu.memory_space<vmem>>, vector<1x1x14x16xbf16>
      %62 = vector.shape_cast %61 : vector<1x1x14x16xbf16> to vector<14x16xbf16>
      %c5 = arith.constant 5 : index
      %c0_47 = arith.constant 0 : index
      %c0_48 = arith.constant 0 : index
      %63 = vector.load %arg2[%c5, %c0_47, %c0_48] : memref<25x16x128xbf16, #tpu.memory_space<vmem>>, vector<1x16x128xbf16>
      %64 = vector.shape_cast %63 : vector<1x16x128xbf16> to vector<16x128xbf16>
      %cst_49 = arith.constant dense<0.000000e+00> : vector<14x128xf32>
      %65 = tpu.matmul %62, %64, %cst_49 {dimension_numbers = #tpu.dot_dimension_numbers<[1], [0], [0], [1], [0, 0, 1, 1], [], []>} : vector<14x16xbf16>, vector<16x128xbf16>, vector<14x128xf32> -> vector<14x128xf32>
      %66 = arith.addf %58, %65 : vector<14x128xf32>
      %c1_i32_50 = arith.constant 1 : i32
      %67 = arith.addi %17, %c1_i32_50 : i32
      %c0_51 = arith.constant 0 : index
      %68 = arith.index_cast %67 : i32 to index
      %c1_52 = arith.constant 1 : index
      %c0_53 = arith.constant 0 : index
      %69 = vector.load %arg1[%c0_51, %68, %c1_52, %c0_53] : memref<1x18x18x16xbf16, #tpu.memory_space<vmem>>, vector<1x1x14x16xbf16>
      %70 = vector.shape_cast %69 : vector<1x1x14x16xbf16> to vector<14x16xbf16>
      %c6 = arith.constant 6 : index
      %c0_54 = arith.constant 0 : index
      %c0_55 = arith.constant 0 : index
      %71 = vector.load %arg2[%c6, %c0_54, %c0_55] : memref<25x16x128xbf16, #tpu.memory_space<vmem>>, vector<1x16x128xbf16>
      %72 = vector.shape_cast %71 : vector<1x16x128xbf16> to vector<16x128xbf16>
      %cst_56 = arith.constant dense<0.000000e+00> : vector<14x128xf32>
      %73 = tpu.matmul %70, %72, %cst_56 {dimension_numbers = #tpu.dot_dimension_numbers<[1], [0], [0], [1], [0, 0, 1, 1], [], []>} : vector<14x16xbf16>, vector<16x128xbf16>, vector<14x128xf32> -> vector<14x128xf32>
      %74 = arith.addf %66, %73 : vector<14x128xf32>
      %c1_i32_57 = arith.constant 1 : i32
      %75 = arith.addi %17, %c1_i32_57 : i32
      %c0_58 = arith.constant 0 : index
      %76 = arith.index_cast %75 : i32 to index
      %c2_59 = arith.constant 2 : index
      %c0_60 = arith.constant 0 : index
      %77 = vector.load %arg1[%c0_58, %76, %c2_59, %c0_60] : memref<1x18x18x16xbf16, #tpu.memory_space<vmem>>, vector<1x1x14x16xbf16>
      %78 = vector.shape_cast %77 : vector<1x1x14x16xbf16> to vector<14x16xbf16>
      %c7 = arith.constant 7 : index
      %c0_61 = arith.constant 0 : index
      %c0_62 = arith.constant 0 : index
      %79 = vector.load %arg2[%c7, %c0_61, %c0_62] : memref<25x16x128xbf16, #tpu.memory_space<vmem>>, vector<1x16x128xbf16>
      %80 = vector.shape_cast %79 : vector<1x16x128xbf16> to vector<16x128xbf16>
      %cst_63 = arith.constant dense<0.000000e+00> : vector<14x128xf32>
      %81 = tpu.matmul %78, %80, %cst_63 {dimension_numbers = #tpu.dot_dimension_numbers<[1], [0], [0], [1], [0, 0, 1, 1], [], []>} : vector<14x16xbf16>, vector<16x128xbf16>, vector<14x128xf32> -> vector<14x128xf32>
      %82 = arith.addf %74, %81 : vector<14x128xf32>
      %c1_i32_64 = arith.constant 1 : i32
      %83 = arith.addi %17, %c1_i32_64 : i32
      %c0_65 = arith.constant 0 : index
      %84 = arith.index_cast %83 : i32 to index
      %c3_66 = arith.constant 3 : index
      %c0_67 = arith.constant 0 : index
      %85 = vector.load %arg1[%c0_65, %84, %c3_66, %c0_67] : memref<1x18x18x16xbf16, #tpu.memory_space<vmem>>, vector<1x1x14x16xbf16>
      %86 = vector.shape_cast %85 : vector<1x1x14x16xbf16> to vector<14x16xbf16>
      %c8 = arith.constant 8 : index
      %c0_68 = arith.constant 0 : index
      %c0_69 = arith.constant 0 : index
      %87 = vector.load %arg2[%c8, %c0_68, %c0_69] : memref<25x16x128xbf16, #tpu.memory_space<vmem>>, vector<1x16x128xbf16>
      %88 = vector.shape_cast %87 : vector<1x16x128xbf16> to vector<16x128xbf16>
      %cst_70 = arith.constant dense<0.000000e+00> : vector<14x128xf32>
      %89 = tpu.matmul %86, %88, %cst_70 {dimension_numbers = #tpu.dot_dimension_numbers<[1], [0], [0], [1], [0, 0, 1, 1], [], []>} : vector<14x16xbf16>, vector<16x128xbf16>, vector<14x128xf32> -> vector<14x128xf32>
      %90 = arith.addf %82, %89 : vector<14x128xf32>
      %c1_i32_71 = arith.constant 1 : i32
      %91 = arith.addi %17, %c1_i32_71 : i32
      %c0_72 = arith.constant 0 : index
      %92 = arith.index_cast %91 : i32 to index
      %c4_73 = arith.constant 4 : index
      %c0_74 = arith.constant 0 : index
      %93 = vector.load %arg1[%c0_72, %92, %c4_73, %c0_74] : memref<1x18x18x16xbf16, #tpu.memory_space<vmem>>, vector<1x1x14x16xbf16>
      %94 = vector.shape_cast %93 : vector<1x1x14x16xbf16> to vector<14x16xbf16>
      %c9 = arith.constant 9 : index
      %c0_75 = arith.constant 0 : index
      %c0_76 = arith.constant 0 : index
      %95 = vector.load %arg2[%c9, %c0_75, %c0_76] : memref<25x16x128xbf16, #tpu.memory_space<vmem>>, vector<1x16x128xbf16>
      %96 = vector.shape_cast %95 : vector<1x16x128xbf16> to vector<16x128xbf16>
      %cst_77 = arith.constant dense<0.000000e+00> : vector<14x128xf32>
      %97 = tpu.matmul %94, %96, %cst_77 {dimension_numbers = #tpu.dot_dimension_numbers<[1], [0], [0], [1], [0, 0, 1, 1], [], []>} : vector<14x16xbf16>, vector<16x128xbf16>, vector<14x128xf32> -> vector<14x128xf32>
      %98 = arith.addf %90, %97 : vector<14x128xf32>
      %c2_i32_78 = arith.constant 2 : i32
      %99 = arith.addi %17, %c2_i32_78 : i32
      %c0_79 = arith.constant 0 : index
      %100 = arith.index_cast %99 : i32 to index
      %c0_80 = arith.constant 0 : index
      %c0_81 = arith.constant 0 : index
      %101 = vector.load %arg1[%c0_79, %100, %c0_80, %c0_81] : memref<1x18x18x16xbf16, #tpu.memory_space<vmem>>, vector<1x1x14x16xbf16>
      %102 = vector.shape_cast %101 : vector<1x1x14x16xbf16> to vector<14x16xbf16>
      %c10 = arith.constant 10 : index
      %c0_82 = arith.constant 0 : index
      %c0_83 = arith.constant 0 : index
      %103 = vector.load %arg2[%c10, %c0_82, %c0_83] : memref<25x16x128xbf16, #tpu.memory_space<vmem>>, vector<1x16x128xbf16>
      %104 = vector.shape_cast %103 : vector<1x16x128xbf16> to vector<16x128xbf16>
      %cst_84 = arith.constant dense<0.000000e+00> : vector<14x128xf32>
      %105 = tpu.matmul %102, %104, %cst_84 {dimension_numbers = #tpu.dot_dimension_numbers<[1], [0], [0], [1], [0, 0, 1, 1], [], []>} : vector<14x16xbf16>, vector<16x128xbf16>, vector<14x128xf32> -> vector<14x128xf32>
      %106 = arith.addf %98, %105 : vector<14x128xf32>
      %c2_i32_85 = arith.constant 2 : i32
      %107 = arith.addi %17, %c2_i32_85 : i32
      %c0_86 = arith.constant 0 : index
      %108 = arith.index_cast %107 : i32 to index
      %c1_87 = arith.constant 1 : index
      %c0_88 = arith.constant 0 : index
      %109 = vector.load %arg1[%c0_86, %108, %c1_87, %c0_88] : memref<1x18x18x16xbf16, #tpu.memory_space<vmem>>, vector<1x1x14x16xbf16>
      %110 = vector.shape_cast %109 : vector<1x1x14x16xbf16> to vector<14x16xbf16>
      %c11 = arith.constant 11 : index
      %c0_89 = arith.constant 0 : index
      %c0_90 = arith.constant 0 : index
      %111 = vector.load %arg2[%c11, %c0_89, %c0_90] : memref<25x16x128xbf16, #tpu.memory_space<vmem>>, vector<1x16x128xbf16>
      %112 = vector.shape_cast %111 : vector<1x16x128xbf16> to vector<16x128xbf16>
      %cst_91 = arith.constant dense<0.000000e+00> : vector<14x128xf32>
      %113 = tpu.matmul %110, %112, %cst_91 {dimension_numbers = #tpu.dot_dimension_numbers<[1], [0], [0], [1], [0, 0, 1, 1], [], []>} : vector<14x16xbf16>, vector<16x128xbf16>, vector<14x128xf32> -> vector<14x128xf32>
      %114 = arith.addf %106, %113 : vector<14x128xf32>
      %c2_i32_92 = arith.constant 2 : i32
      %115 = arith.addi %17, %c2_i32_92 : i32
      %c0_93 = arith.constant 0 : index
      %116 = arith.index_cast %115 : i32 to index
      %c2_94 = arith.constant 2 : index
      %c0_95 = arith.constant 0 : index
      %117 = vector.load %arg1[%c0_93, %116, %c2_94, %c0_95] : memref<1x18x18x16xbf16, #tpu.memory_space<vmem>>, vector<1x1x14x16xbf16>
      %118 = vector.shape_cast %117 : vector<1x1x14x16xbf16> to vector<14x16xbf16>
      %c12 = arith.constant 12 : index
      %c0_96 = arith.constant 0 : index
      %c0_97 = arith.constant 0 : index
      %119 = vector.load %arg2[%c12, %c0_96, %c0_97] : memref<25x16x128xbf16, #tpu.memory_space<vmem>>, vector<1x16x128xbf16>
      %120 = vector.shape_cast %119 : vector<1x16x128xbf16> to vector<16x128xbf16>
      %cst_98 = arith.constant dense<0.000000e+00> : vector<14x128xf32>
      %121 = tpu.matmul %118, %120, %cst_98 {dimension_numbers = #tpu.dot_dimension_numbers<[1], [0], [0], [1], [0, 0, 1, 1], [], []>} : vector<14x16xbf16>, vector<16x128xbf16>, vector<14x128xf32> -> vector<14x128xf32>
      %122 = arith.addf %114, %121 : vector<14x128xf32>
      %c2_i32_99 = arith.constant 2 : i32
      %123 = arith.addi %17, %c2_i32_99 : i32
      %c0_100 = arith.constant 0 : index
      %124 = arith.index_cast %123 : i32 to index
      %c3_101 = arith.constant 3 : index
      %c0_102 = arith.constant 0 : index
      %125 = vector.load %arg1[%c0_100, %124, %c3_101, %c0_102] : memref<1x18x18x16xbf16, #tpu.memory_space<vmem>>, vector<1x1x14x16xbf16>
      %126 = vector.shape_cast %125 : vector<1x1x14x16xbf16> to vector<14x16xbf16>
      %c13 = arith.constant 13 : index
      %c0_103 = arith.constant 0 : index
      %c0_104 = arith.constant 0 : index
      %127 = vector.load %arg2[%c13, %c0_103, %c0_104] : memref<25x16x128xbf16, #tpu.memory_space<vmem>>, vector<1x16x128xbf16>
      %128 = vector.shape_cast %127 : vector<1x16x128xbf16> to vector<16x128xbf16>
      %cst_105 = arith.constant dense<0.000000e+00> : vector<14x128xf32>
      %129 = tpu.matmul %126, %128, %cst_105 {dimension_numbers = #tpu.dot_dimension_numbers<[1], [0], [0], [1], [0, 0, 1, 1], [], []>} : vector<14x16xbf16>, vector<16x128xbf16>, vector<14x128xf32> -> vector<14x128xf32>
      %130 = arith.addf %122, %129 : vector<14x128xf32>
      %c2_i32_106 = arith.constant 2 : i32
      %131 = arith.addi %17, %c2_i32_106 : i32
      %c0_107 = arith.constant 0 : index
      %132 = arith.index_cast %131 : i32 to index
      %c4_108 = arith.constant 4 : index
      %c0_109 = arith.constant 0 : index
      %133 = vector.load %arg1[%c0_107, %132, %c4_108, %c0_109] : memref<1x18x18x16xbf16, #tpu.memory_space<vmem>>, vector<1x1x14x16xbf16>
      %134 = vector.shape_cast %133 : vector<1x1x14x16xbf16> to vector<14x16xbf16>
      %c14 = arith.constant 14 : index
      %c0_110 = arith.constant 0 : index
      %c0_111 = arith.constant 0 : index
      %135 = vector.load %arg2[%c14, %c0_110, %c0_111] : memref<25x16x128xbf16, #tpu.memory_space<vmem>>, vector<1x16x128xbf16>
      %136 = vector.shape_cast %135 : vector<1x16x128xbf16> to vector<16x128xbf16>
      %cst_112 = arith.constant dense<0.000000e+00> : vector<14x128xf32>
      %137 = tpu.matmul %134, %136, %cst_112 {dimension_numbers = #tpu.dot_dimension_numbers<[1], [0], [0], [1], [0, 0, 1, 1], [], []>} : vector<14x16xbf16>, vector<16x128xbf16>, vector<14x128xf32> -> vector<14x128xf32>
      %138 = arith.addf %130, %137 : vector<14x128xf32>
      %c3_i32 = arith.constant 3 : i32
      %139 = arith.addi %17, %c3_i32 : i32
      %c0_113 = arith.constant 0 : index
      %140 = arith.index_cast %139 : i32 to index
      %c0_114 = arith.constant 0 : index
      %c0_115 = arith.constant 0 : index
      %141 = vector.load %arg1[%c0_113, %140, %c0_114, %c0_115] : memref<1x18x18x16xbf16, #tpu.memory_space<vmem>>, vector<1x1x14x16xbf16>
      %142 = vector.shape_cast %141 : vector<1x1x14x16xbf16> to vector<14x16xbf16>
      %c15 = arith.constant 15 : index
      %c0_116 = arith.constant 0 : index
      %c0_117 = arith.constant 0 : index
      %143 = vector.load %arg2[%c15, %c0_116, %c0_117] : memref<25x16x128xbf16, #tpu.memory_space<vmem>>, vector<1x16x128xbf16>
      %144 = vector.shape_cast %143 : vector<1x16x128xbf16> to vector<16x128xbf16>
      %cst_118 = arith.constant dense<0.000000e+00> : vector<14x128xf32>
      %145 = tpu.matmul %142, %144, %cst_118 {dimension_numbers = #tpu.dot_dimension_numbers<[1], [0], [0], [1], [0, 0, 1, 1], [], []>} : vector<14x16xbf16>, vector<16x128xbf16>, vector<14x128xf32> -> vector<14x128xf32>
      %146 = arith.addf %138, %145 : vector<14x128xf32>
      %c3_i32_119 = arith.constant 3 : i32
      %147 = arith.addi %17, %c3_i32_119 : i32
      %c0_120 = arith.constant 0 : index
      %148 = arith.index_cast %147 : i32 to index
      %c1_121 = arith.constant 1 : index
      %c0_122 = arith.constant 0 : index
      %149 = vector.load %arg1[%c0_120, %148, %c1_121, %c0_122] : memref<1x18x18x16xbf16, #tpu.memory_space<vmem>>, vector<1x1x14x16xbf16>
      %150 = vector.shape_cast %149 : vector<1x1x14x16xbf16> to vector<14x16xbf16>
      %c16 = arith.constant 16 : index
      %c0_123 = arith.constant 0 : index
      %c0_124 = arith.constant 0 : index
      %151 = vector.load %arg2[%c16, %c0_123, %c0_124] : memref<25x16x128xbf16, #tpu.memory_space<vmem>>, vector<1x16x128xbf16>
      %152 = vector.shape_cast %151 : vector<1x16x128xbf16> to vector<16x128xbf16>
      %cst_125 = arith.constant dense<0.000000e+00> : vector<14x128xf32>
      %153 = tpu.matmul %150, %152, %cst_125 {dimension_numbers = #tpu.dot_dimension_numbers<[1], [0], [0], [1], [0, 0, 1, 1], [], []>} : vector<14x16xbf16>, vector<16x128xbf16>, vector<14x128xf32> -> vector<14x128xf32>
      %154 = arith.addf %146, %153 : vector<14x128xf32>
      %c3_i32_126 = arith.constant 3 : i32
      %155 = arith.addi %17, %c3_i32_126 : i32
      %c0_127 = arith.constant 0 : index
      %156 = arith.index_cast %155 : i32 to index
      %c2_128 = arith.constant 2 : index
      %c0_129 = arith.constant 0 : index
      %157 = vector.load %arg1[%c0_127, %156, %c2_128, %c0_129] : memref<1x18x18x16xbf16, #tpu.memory_space<vmem>>, vector<1x1x14x16xbf16>
      %158 = vector.shape_cast %157 : vector<1x1x14x16xbf16> to vector<14x16xbf16>
      %c17 = arith.constant 17 : index
      %c0_130 = arith.constant 0 : index
      %c0_131 = arith.constant 0 : index
      %159 = vector.load %arg2[%c17, %c0_130, %c0_131] : memref<25x16x128xbf16, #tpu.memory_space<vmem>>, vector<1x16x128xbf16>
      %160 = vector.shape_cast %159 : vector<1x16x128xbf16> to vector<16x128xbf16>
      %cst_132 = arith.constant dense<0.000000e+00> : vector<14x128xf32>
      %161 = tpu.matmul %158, %160, %cst_132 {dimension_numbers = #tpu.dot_dimension_numbers<[1], [0], [0], [1], [0, 0, 1, 1], [], []>} : vector<14x16xbf16>, vector<16x128xbf16>, vector<14x128xf32> -> vector<14x128xf32>
      %162 = arith.addf %154, %161 : vector<14x128xf32>
      %c3_i32_133 = arith.constant 3 : i32
      %163 = arith.addi %17, %c3_i32_133 : i32
      %c0_134 = arith.constant 0 : index
      %164 = arith.index_cast %163 : i32 to index
      %c3_135 = arith.constant 3 : index
      %c0_136 = arith.constant 0 : index
      %165 = vector.load %arg1[%c0_134, %164, %c3_135, %c0_136] : memref<1x18x18x16xbf16, #tpu.memory_space<vmem>>, vector<1x1x14x16xbf16>
      %166 = vector.shape_cast %165 : vector<1x1x14x16xbf16> to vector<14x16xbf16>
      %c18 = arith.constant 18 : index
      %c0_137 = arith.constant 0 : index
      %c0_138 = arith.constant 0 : index
      %167 = vector.load %arg2[%c18, %c0_137, %c0_138] : memref<25x16x128xbf16, #tpu.memory_space<vmem>>, vector<1x16x128xbf16>
      %168 = vector.shape_cast %167 : vector<1x16x128xbf16> to vector<16x128xbf16>
      %cst_139 = arith.constant dense<0.000000e+00> : vector<14x128xf32>
      %169 = tpu.matmul %166, %168, %cst_139 {dimension_numbers = #tpu.dot_dimension_numbers<[1], [0], [0], [1], [0, 0, 1, 1], [], []>} : vector<14x16xbf16>, vector<16x128xbf16>, vector<14x128xf32> -> vector<14x128xf32>
      %170 = arith.addf %162, %169 : vector<14x128xf32>
      %c3_i32_140 = arith.constant 3 : i32
      %171 = arith.addi %17, %c3_i32_140 : i32
      %c0_141 = arith.constant 0 : index
      %172 = arith.index_cast %171 : i32 to index
      %c4_142 = arith.constant 4 : index
      %c0_143 = arith.constant 0 : index
      %173 = vector.load %arg1[%c0_141, %172, %c4_142, %c0_143] : memref<1x18x18x16xbf16, #tpu.memory_space<vmem>>, vector<1x1x14x16xbf16>
      %174 = vector.shape_cast %173 : vector<1x1x14x16xbf16> to vector<14x16xbf16>
      %c19 = arith.constant 19 : index
      %c0_144 = arith.constant 0 : index
      %c0_145 = arith.constant 0 : index
      %175 = vector.load %arg2[%c19, %c0_144, %c0_145] : memref<25x16x128xbf16, #tpu.memory_space<vmem>>, vector<1x16x128xbf16>
      %176 = vector.shape_cast %175 : vector<1x16x128xbf16> to vector<16x128xbf16>
      %cst_146 = arith.constant dense<0.000000e+00> : vector<14x128xf32>
      %177 = tpu.matmul %174, %176, %cst_146 {dimension_numbers = #tpu.dot_dimension_numbers<[1], [0], [0], [1], [0, 0, 1, 1], [], []>} : vector<14x16xbf16>, vector<16x128xbf16>, vector<14x128xf32> -> vector<14x128xf32>
      %178 = arith.addf %170, %177 : vector<14x128xf32>
      %c4_i32 = arith.constant 4 : i32
      %179 = arith.addi %17, %c4_i32 : i32
      %c0_147 = arith.constant 0 : index
      %180 = arith.index_cast %179 : i32 to index
      %c0_148 = arith.constant 0 : index
      %c0_149 = arith.constant 0 : index
      %181 = vector.load %arg1[%c0_147, %180, %c0_148, %c0_149] : memref<1x18x18x16xbf16, #tpu.memory_space<vmem>>, vector<1x1x14x16xbf16>
      %182 = vector.shape_cast %181 : vector<1x1x14x16xbf16> to vector<14x16xbf16>
      %c20 = arith.constant 20 : index
      %c0_150 = arith.constant 0 : index
      %c0_151 = arith.constant 0 : index
      %183 = vector.load %arg2[%c20, %c0_150, %c0_151] : memref<25x16x128xbf16, #tpu.memory_space<vmem>>, vector<1x16x128xbf16>
      %184 = vector.shape_cast %183 : vector<1x16x128xbf16> to vector<16x128xbf16>
      %cst_152 = arith.constant dense<0.000000e+00> : vector<14x128xf32>
      %185 = tpu.matmul %182, %184, %cst_152 {dimension_numbers = #tpu.dot_dimension_numbers<[1], [0], [0], [1], [0, 0, 1, 1], [], []>} : vector<14x16xbf16>, vector<16x128xbf16>, vector<14x128xf32> -> vector<14x128xf32>
      %186 = arith.addf %178, %185 : vector<14x128xf32>
      %c4_i32_153 = arith.constant 4 : i32
      %187 = arith.addi %17, %c4_i32_153 : i32
      %c0_154 = arith.constant 0 : index
      %188 = arith.index_cast %187 : i32 to index
      %c1_155 = arith.constant 1 : index
      %c0_156 = arith.constant 0 : index
      %189 = vector.load %arg1[%c0_154, %188, %c1_155, %c0_156] : memref<1x18x18x16xbf16, #tpu.memory_space<vmem>>, vector<1x1x14x16xbf16>
      %190 = vector.shape_cast %189 : vector<1x1x14x16xbf16> to vector<14x16xbf16>
      %c21 = arith.constant 21 : index
      %c0_157 = arith.constant 0 : index
      %c0_158 = arith.constant 0 : index
      %191 = vector.load %arg2[%c21, %c0_157, %c0_158] : memref<25x16x128xbf16, #tpu.memory_space<vmem>>, vector<1x16x128xbf16>
      %192 = vector.shape_cast %191 : vector<1x16x128xbf16> to vector<16x128xbf16>
      %cst_159 = arith.constant dense<0.000000e+00> : vector<14x128xf32>
      %193 = tpu.matmul %190, %192, %cst_159 {dimension_numbers = #tpu.dot_dimension_numbers<[1], [0], [0], [1], [0, 0, 1, 1], [], []>} : vector<14x16xbf16>, vector<16x128xbf16>, vector<14x128xf32> -> vector<14x128xf32>
      %194 = arith.addf %186, %193 : vector<14x128xf32>
      %c4_i32_160 = arith.constant 4 : i32
      %195 = arith.addi %17, %c4_i32_160 : i32
      %c0_161 = arith.constant 0 : index
      %196 = arith.index_cast %195 : i32 to index
      %c2_162 = arith.constant 2 : index
      %c0_163 = arith.constant 0 : index
      %197 = vector.load %arg1[%c0_161, %196, %c2_162, %c0_163] : memref<1x18x18x16xbf16, #tpu.memory_space<vmem>>, vector<1x1x14x16xbf16>
      %198 = vector.shape_cast %197 : vector<1x1x14x16xbf16> to vector<14x16xbf16>
      %c22 = arith.constant 22 : index
      %c0_164 = arith.constant 0 : index
      %c0_165 = arith.constant 0 : index
      %199 = vector.load %arg2[%c22, %c0_164, %c0_165] : memref<25x16x128xbf16, #tpu.memory_space<vmem>>, vector<1x16x128xbf16>
      %200 = vector.shape_cast %199 : vector<1x16x128xbf16> to vector<16x128xbf16>
      %cst_166 = arith.constant dense<0.000000e+00> : vector<14x128xf32>
      %201 = tpu.matmul %198, %200, %cst_166 {dimension_numbers = #tpu.dot_dimension_numbers<[1], [0], [0], [1], [0, 0, 1, 1], [], []>} : vector<14x16xbf16>, vector<16x128xbf16>, vector<14x128xf32> -> vector<14x128xf32>
      %202 = arith.addf %194, %201 : vector<14x128xf32>
      %c4_i32_167 = arith.constant 4 : i32
      %203 = arith.addi %17, %c4_i32_167 : i32
      %c0_168 = arith.constant 0 : index
      %204 = arith.index_cast %203 : i32 to index
      %c3_169 = arith.constant 3 : index
      %c0_170 = arith.constant 0 : index
      %205 = vector.load %arg1[%c0_168, %204, %c3_169, %c0_170] : memref<1x18x18x16xbf16, #tpu.memory_space<vmem>>, vector<1x1x14x16xbf16>
      %206 = vector.shape_cast %205 : vector<1x1x14x16xbf16> to vector<14x16xbf16>
      %c23 = arith.constant 23 : index
      %c0_171 = arith.constant 0 : index
      %c0_172 = arith.constant 0 : index
      %207 = vector.load %arg2[%c23, %c0_171, %c0_172] : memref<25x16x128xbf16, #tpu.memory_space<vmem>>, vector<1x16x128xbf16>
      %208 = vector.shape_cast %207 : vector<1x16x128xbf16> to vector<16x128xbf16>
      %cst_173 = arith.constant dense<0.000000e+00> : vector<14x128xf32>
      %209 = tpu.matmul %206, %208, %cst_173 {dimension_numbers = #tpu.dot_dimension_numbers<[1], [0], [0], [1], [0, 0, 1, 1], [], []>} : vector<14x16xbf16>, vector<16x128xbf16>, vector<14x128xf32> -> vector<14x128xf32>
      %210 = arith.addf %202, %209 : vector<14x128xf32>
      %c4_i32_174 = arith.constant 4 : i32
      %211 = arith.addi %17, %c4_i32_174 : i32
      %c0_175 = arith.constant 0 : index
      %212 = arith.index_cast %211 : i32 to index
      %c4_176 = arith.constant 4 : index
      %c0_177 = arith.constant 0 : index
      %213 = vector.load %arg1[%c0_175, %212, %c4_176, %c0_177] : memref<1x18x18x16xbf16, #tpu.memory_space<vmem>>, vector<1x1x14x16xbf16>
      %214 = vector.shape_cast %213 : vector<1x1x14x16xbf16> to vector<14x16xbf16>
      %c24 = arith.constant 24 : index
      %c0_178 = arith.constant 0 : index
      %c0_179 = arith.constant 0 : index
      %215 = vector.load %arg2[%c24, %c0_178, %c0_179] : memref<25x16x128xbf16, #tpu.memory_space<vmem>>, vector<1x16x128xbf16>
      %216 = vector.shape_cast %215 : vector<1x16x128xbf16> to vector<16x128xbf16>
      %cst_180 = arith.constant dense<0.000000e+00> : vector<14x128xf32>
      %217 = tpu.matmul %214, %216, %cst_180 {dimension_numbers = #tpu.dot_dimension_numbers<[1], [0], [0], [1], [0, 0, 1, 1], [], []>} : vector<14x16xbf16>, vector<16x128xbf16>, vector<14x128xf32> -> vector<14x128xf32>
      %218 = arith.addf %210, %217 : vector<14x128xf32>
      %c2_i32_181 = arith.constant 2 : i32
      %219 = arith.muli %c2_i32_181, %arg6 : i32
      %c1_i32_182 = arith.constant 1 : i32
      %220 = arith.addi %219, %c1_i32_182 : i32
      %cst_183 = arith.constant 0.000000e+00 : f32
      %221 = vector.broadcast %cst_183 : f32 to vector<14x128xf32>
      %c0_i32_184 = arith.constant 0 : i32
      %222 = arith.addi %220, %c0_i32_184 : i32
      %c0_185 = arith.constant 0 : index
      %223 = arith.index_cast %222 : i32 to index
      %c0_186 = arith.constant 0 : index
      %c0_187 = arith.constant 0 : index
      %224 = vector.load %arg1[%c0_185, %223, %c0_186, %c0_187] : memref<1x18x18x16xbf16, #tpu.memory_space<vmem>>, vector<1x1x14x16xbf16>
      %225 = vector.shape_cast %224 : vector<1x1x14x16xbf16> to vector<14x16xbf16>
      %c0_188 = arith.constant 0 : index
      %c0_189 = arith.constant 0 : index
      %c0_190 = arith.constant 0 : index
      %226 = vector.load %arg2[%c0_188, %c0_189, %c0_190] : memref<25x16x128xbf16, #tpu.memory_space<vmem>>, vector<1x16x128xbf16>
      %227 = vector.shape_cast %226 : vector<1x16x128xbf16> to vector<16x128xbf16>
      %cst_191 = arith.constant dense<0.000000e+00> : vector<14x128xf32>
      %228 = tpu.matmul %225, %227, %cst_191 {dimension_numbers = #tpu.dot_dimension_numbers<[1], [0], [0], [1], [0, 0, 1, 1], [], []>} : vector<14x16xbf16>, vector<16x128xbf16>, vector<14x128xf32> -> vector<14x128xf32>
      %229 = arith.addf %221, %228 : vector<14x128xf32>
      %c0_i32_192 = arith.constant 0 : i32
      %230 = arith.addi %220, %c0_i32_192 : i32
      %c0_193 = arith.constant 0 : index
      %231 = arith.index_cast %230 : i32 to index
      %c1_194 = arith.constant 1 : index
      %c0_195 = arith.constant 0 : index
      %232 = vector.load %arg1[%c0_193, %231, %c1_194, %c0_195] : memref<1x18x18x16xbf16, #tpu.memory_space<vmem>>, vector<1x1x14x16xbf16>
      %233 = vector.shape_cast %232 : vector<1x1x14x16xbf16> to vector<14x16xbf16>
      %c1_196 = arith.constant 1 : index
      %c0_197 = arith.constant 0 : index
      %c0_198 = arith.constant 0 : index
      %234 = vector.load %arg2[%c1_196, %c0_197, %c0_198] : memref<25x16x128xbf16, #tpu.memory_space<vmem>>, vector<1x16x128xbf16>
      %235 = vector.shape_cast %234 : vector<1x16x128xbf16> to vector<16x128xbf16>
      %cst_199 = arith.constant dense<0.000000e+00> : vector<14x128xf32>
      %236 = tpu.matmul %233, %235, %cst_199 {dimension_numbers = #tpu.dot_dimension_numbers<[1], [0], [0], [1], [0, 0, 1, 1], [], []>} : vector<14x16xbf16>, vector<16x128xbf16>, vector<14x128xf32> -> vector<14x128xf32>
      %237 = arith.addf %229, %236 : vector<14x128xf32>
      %c0_i32_200 = arith.constant 0 : i32
      %238 = arith.addi %220, %c0_i32_200 : i32
      %c0_201 = arith.constant 0 : index
      %239 = arith.index_cast %238 : i32 to index
      %c2_202 = arith.constant 2 : index
      %c0_203 = arith.constant 0 : index
      %240 = vector.load %arg1[%c0_201, %239, %c2_202, %c0_203] : memref<1x18x18x16xbf16, #tpu.memory_space<vmem>>, vector<1x1x14x16xbf16>
      %241 = vector.shape_cast %240 : vector<1x1x14x16xbf16> to vector<14x16xbf16>
      %c2_204 = arith.constant 2 : index
      %c0_205 = arith.constant 0 : index
      %c0_206 = arith.constant 0 : index
      %242 = vector.load %arg2[%c2_204, %c0_205, %c0_206] : memref<25x16x128xbf16, #tpu.memory_space<vmem>>, vector<1x16x128xbf16>
      %243 = vector.shape_cast %242 : vector<1x16x128xbf16> to vector<16x128xbf16>
      %cst_207 = arith.constant dense<0.000000e+00> : vector<14x128xf32>
      %244 = tpu.matmul %241, %243, %cst_207 {dimension_numbers = #tpu.dot_dimension_numbers<[1], [0], [0], [1], [0, 0, 1, 1], [], []>} : vector<14x16xbf16>, vector<16x128xbf16>, vector<14x128xf32> -> vector<14x128xf32>
      %245 = arith.addf %237, %244 : vector<14x128xf32>
      %c0_i32_208 = arith.constant 0 : i32
      %246 = arith.addi %220, %c0_i32_208 : i32
      %c0_209 = arith.constant 0 : index
      %247 = arith.index_cast %246 : i32 to index
      %c3_210 = arith.constant 3 : index
      %c0_211 = arith.constant 0 : index
      %248 = vector.load %arg1[%c0_209, %247, %c3_210, %c0_211] : memref<1x18x18x16xbf16, #tpu.memory_space<vmem>>, vector<1x1x14x16xbf16>
      %249 = vector.shape_cast %248 : vector<1x1x14x16xbf16> to vector<14x16xbf16>
      %c3_212 = arith.constant 3 : index
      %c0_213 = arith.constant 0 : index
      %c0_214 = arith.constant 0 : index
      %250 = vector.load %arg2[%c3_212, %c0_213, %c0_214] : memref<25x16x128xbf16, #tpu.memory_space<vmem>>, vector<1x16x128xbf16>
      %251 = vector.shape_cast %250 : vector<1x16x128xbf16> to vector<16x128xbf16>
      %cst_215 = arith.constant dense<0.000000e+00> : vector<14x128xf32>
      %252 = tpu.matmul %249, %251, %cst_215 {dimension_numbers = #tpu.dot_dimension_numbers<[1], [0], [0], [1], [0, 0, 1, 1], [], []>} : vector<14x16xbf16>, vector<16x128xbf16>, vector<14x128xf32> -> vector<14x128xf32>
      %253 = arith.addf %245, %252 : vector<14x128xf32>
      %c0_i32_216 = arith.constant 0 : i32
      %254 = arith.addi %220, %c0_i32_216 : i32
      %c0_217 = arith.constant 0 : index
      %255 = arith.index_cast %254 : i32 to index
      %c4_218 = arith.constant 4 : index
      %c0_219 = arith.constant 0 : index
      %256 = vector.load %arg1[%c0_217, %255, %c4_218, %c0_219] : memref<1x18x18x16xbf16, #tpu.memory_space<vmem>>, vector<1x1x14x16xbf16>
      %257 = vector.shape_cast %256 : vector<1x1x14x16xbf16> to vector<14x16xbf16>
      %c4_220 = arith.constant 4 : index
      %c0_221 = arith.constant 0 : index
      %c0_222 = arith.constant 0 : index
      %258 = vector.load %arg2[%c4_220, %c0_221, %c0_222] : memref<25x16x128xbf16, #tpu.memory_space<vmem>>, vector<1x16x128xbf16>
      %259 = vector.shape_cast %258 : vector<1x16x128xbf16> to vector<16x128xbf16>
      %cst_223 = arith.constant dense<0.000000e+00> : vector<14x128xf32>
      %260 = tpu.matmul %257, %259, %cst_223 {dimension_numbers = #tpu.dot_dimension_numbers<[1], [0], [0], [1], [0, 0, 1, 1], [], []>} : vector<14x16xbf16>, vector<16x128xbf16>, vector<14x128xf32> -> vector<14x128xf32>
      %261 = arith.addf %253, %260 : vector<14x128xf32>
      %c1_i32_224 = arith.constant 1 : i32
      %262 = arith.addi %220, %c1_i32_224 : i32
      %c0_225 = arith.constant 0 : index
      %263 = arith.index_cast %262 : i32 to index
      %c0_226 = arith.constant 0 : index
      %c0_227 = arith.constant 0 : index
      %264 = vector.load %arg1[%c0_225, %263, %c0_226, %c0_227] : memref<1x18x18x16xbf16, #tpu.memory_space<vmem>>, vector<1x1x14x16xbf16>
      %265 = vector.shape_cast %264 : vector<1x1x14x16xbf16> to vector<14x16xbf16>
      %c5_228 = arith.constant 5 : index
      %c0_229 = arith.constant 0 : index
      %c0_230 = arith.constant 0 : index
      %266 = vector.load %arg2[%c5_228, %c0_229, %c0_230] : memref<25x16x128xbf16, #tpu.memory_space<vmem>>, vector<1x16x128xbf16>
      %267 = vector.shape_cast %266 : vector<1x16x128xbf16> to vector<16x128xbf16>
      %cst_231 = arith.constant dense<0.000000e+00> : vector<14x128xf32>
      %268 = tpu.matmul %265, %267, %cst_231 {dimension_numbers = #tpu.dot_dimension_numbers<[1], [0], [0], [1], [0, 0, 1, 1], [], []>} : vector<14x16xbf16>, vector<16x128xbf16>, vector<14x128xf32> -> vector<14x128xf32>
      %269 = arith.addf %261, %268 : vector<14x128xf32>
      %c1_i32_232 = arith.constant 1 : i32
      %270 = arith.addi %220, %c1_i32_232 : i32
      %c0_233 = arith.constant 0 : index
      %271 = arith.index_cast %270 : i32 to index
      %c1_234 = arith.constant 1 : index
      %c0_235 = arith.constant 0 : index
      %272 = vector.load %arg1[%c0_233, %271, %c1_234, %c0_235] : memref<1x18x18x16xbf16, #tpu.memory_space<vmem>>, vector<1x1x14x16xbf16>
      %273 = vector.shape_cast %272 : vector<1x1x14x16xbf16> to vector<14x16xbf16>
      %c6_236 = arith.constant 6 : index
      %c0_237 = arith.constant 0 : index
      %c0_238 = arith.constant 0 : index
      %274 = vector.load %arg2[%c6_236, %c0_237, %c0_238] : memref<25x16x128xbf16, #tpu.memory_space<vmem>>, vector<1x16x128xbf16>
      %275 = vector.shape_cast %274 : vector<1x16x128xbf16> to vector<16x128xbf16>
      %cst_239 = arith.constant dense<0.000000e+00> : vector<14x128xf32>
      %276 = tpu.matmul %273, %275, %cst_239 {dimension_numbers = #tpu.dot_dimension_numbers<[1], [0], [0], [1], [0, 0, 1, 1], [], []>} : vector<14x16xbf16>, vector<16x128xbf16>, vector<14x128xf32> -> vector<14x128xf32>
      %277 = arith.addf %269, %276 : vector<14x128xf32>
      %c1_i32_240 = arith.constant 1 : i32
      %278 = arith.addi %220, %c1_i32_240 : i32
      %c0_241 = arith.constant 0 : index
      %279 = arith.index_cast %278 : i32 to index
      %c2_242 = arith.constant 2 : index
      %c0_243 = arith.constant 0 : index
      %280 = vector.load %arg1[%c0_241, %279, %c2_242, %c0_243] : memref<1x18x18x16xbf16, #tpu.memory_space<vmem>>, vector<1x1x14x16xbf16>
      %281 = vector.shape_cast %280 : vector<1x1x14x16xbf16> to vector<14x16xbf16>
      %c7_244 = arith.constant 7 : index
      %c0_245 = arith.constant 0 : index
      %c0_246 = arith.constant 0 : index
      %282 = vector.load %arg2[%c7_244, %c0_245, %c0_246] : memref<25x16x128xbf16, #tpu.memory_space<vmem>>, vector<1x16x128xbf16>
      %283 = vector.shape_cast %282 : vector<1x16x128xbf16> to vector<16x128xbf16>
      %cst_247 = arith.constant dense<0.000000e+00> : vector<14x128xf32>
      %284 = tpu.matmul %281, %283, %cst_247 {dimension_numbers = #tpu.dot_dimension_numbers<[1], [0], [0], [1], [0, 0, 1, 1], [], []>} : vector<14x16xbf16>, vector<16x128xbf16>, vector<14x128xf32> -> vector<14x128xf32>
      %285 = arith.addf %277, %284 : vector<14x128xf32>
      %c1_i32_248 = arith.constant 1 : i32
      %286 = arith.addi %220, %c1_i32_248 : i32
      %c0_249 = arith.constant 0 : index
      %287 = arith.index_cast %286 : i32 to index
      %c3_250 = arith.constant 3 : index
      %c0_251 = arith.constant 0 : index
      %288 = vector.load %arg1[%c0_249, %287, %c3_250, %c0_251] : memref<1x18x18x16xbf16, #tpu.memory_space<vmem>>, vector<1x1x14x16xbf16>
      %289 = vector.shape_cast %288 : vector<1x1x14x16xbf16> to vector<14x16xbf16>
      %c8_252 = arith.constant 8 : index
      %c0_253 = arith.constant 0 : index
      %c0_254 = arith.constant 0 : index
      %290 = vector.load %arg2[%c8_252, %c0_253, %c0_254] : memref<25x16x128xbf16, #tpu.memory_space<vmem>>, vector<1x16x128xbf16>
      %291 = vector.shape_cast %290 : vector<1x16x128xbf16> to vector<16x128xbf16>
      %cst_255 = arith.constant dense<0.000000e+00> : vector<14x128xf32>
      %292 = tpu.matmul %289, %291, %cst_255 {dimension_numbers = #tpu.dot_dimension_numbers<[1], [0], [0], [1], [0, 0, 1, 1], [], []>} : vector<14x16xbf16>, vector<16x128xbf16>, vector<14x128xf32> -> vector<14x128xf32>
      %293 = arith.addf %285, %292 : vector<14x128xf32>
      %c1_i32_256 = arith.constant 1 : i32
      %294 = arith.addi %220, %c1_i32_256 : i32
      %c0_257 = arith.constant 0 : index
      %295 = arith.index_cast %294 : i32 to index
      %c4_258 = arith.constant 4 : index
      %c0_259 = arith.constant 0 : index
      %296 = vector.load %arg1[%c0_257, %295, %c4_258, %c0_259] : memref<1x18x18x16xbf16, #tpu.memory_space<vmem>>, vector<1x1x14x16xbf16>
      %297 = vector.shape_cast %296 : vector<1x1x14x16xbf16> to vector<14x16xbf16>
      %c9_260 = arith.constant 9 : index
      %c0_261 = arith.constant 0 : index
      %c0_262 = arith.constant 0 : index
      %298 = vector.load %arg2[%c9_260, %c0_261, %c0_262] : memref<25x16x128xbf16, #tpu.memory_space<vmem>>, vector<1x16x128xbf16>
      %299 = vector.shape_cast %298 : vector<1x16x128xbf16> to vector<16x128xbf16>
      %cst_263 = arith.constant dense<0.000000e+00> : vector<14x128xf32>
      %300 = tpu.matmul %297, %299, %cst_263 {dimension_numbers = #tpu.dot_dimension_numbers<[1], [0], [0], [1], [0, 0, 1, 1], [], []>} : vector<14x16xbf16>, vector<16x128xbf16>, vector<14x128xf32> -> vector<14x128xf32>
      %301 = arith.addf %293, %300 : vector<14x128xf32>
      %c2_i32_264 = arith.constant 2 : i32
      %302 = arith.addi %220, %c2_i32_264 : i32
      %c0_265 = arith.constant 0 : index
      %303 = arith.index_cast %302 : i32 to index
      %c0_266 = arith.constant 0 : index
      %c0_267 = arith.constant 0 : index
      %304 = vector.load %arg1[%c0_265, %303, %c0_266, %c0_267] : memref<1x18x18x16xbf16, #tpu.memory_space<vmem>>, vector<1x1x14x16xbf16>
      %305 = vector.shape_cast %304 : vector<1x1x14x16xbf16> to vector<14x16xbf16>
      %c10_268 = arith.constant 10 : index
      %c0_269 = arith.constant 0 : index
      %c0_270 = arith.constant 0 : index
      %306 = vector.load %arg2[%c10_268, %c0_269, %c0_270] : memref<25x16x128xbf16, #tpu.memory_space<vmem>>, vector<1x16x128xbf16>
      %307 = vector.shape_cast %306 : vector<1x16x128xbf16> to vector<16x128xbf16>
      %cst_271 = arith.constant dense<0.000000e+00> : vector<14x128xf32>
      %308 = tpu.matmul %305, %307, %cst_271 {dimension_numbers = #tpu.dot_dimension_numbers<[1], [0], [0], [1], [0, 0, 1, 1], [], []>} : vector<14x16xbf16>, vector<16x128xbf16>, vector<14x128xf32> -> vector<14x128xf32>
      %309 = arith.addf %301, %308 : vector<14x128xf32>
      %c2_i32_272 = arith.constant 2 : i32
      %310 = arith.addi %220, %c2_i32_272 : i32
      %c0_273 = arith.constant 0 : index
      %311 = arith.index_cast %310 : i32 to index
      %c1_274 = arith.constant 1 : index
      %c0_275 = arith.constant 0 : index
      %312 = vector.load %arg1[%c0_273, %311, %c1_274, %c0_275] : memref<1x18x18x16xbf16, #tpu.memory_space<vmem>>, vector<1x1x14x16xbf16>
      %313 = vector.shape_cast %312 : vector<1x1x14x16xbf16> to vector<14x16xbf16>
      %c11_276 = arith.constant 11 : index
      %c0_277 = arith.constant 0 : index
      %c0_278 = arith.constant 0 : index
      %314 = vector.load %arg2[%c11_276, %c0_277, %c0_278] : memref<25x16x128xbf16, #tpu.memory_space<vmem>>, vector<1x16x128xbf16>
      %315 = vector.shape_cast %314 : vector<1x16x128xbf16> to vector<16x128xbf16>
      %cst_279 = arith.constant dense<0.000000e+00> : vector<14x128xf32>
      %316 = tpu.matmul %313, %315, %cst_279 {dimension_numbers = #tpu.dot_dimension_numbers<[1], [0], [0], [1], [0, 0, 1, 1], [], []>} : vector<14x16xbf16>, vector<16x128xbf16>, vector<14x128xf32> -> vector<14x128xf32>
      %317 = arith.addf %309, %316 : vector<14x128xf32>
      %c2_i32_280 = arith.constant 2 : i32
      %318 = arith.addi %220, %c2_i32_280 : i32
      %c0_281 = arith.constant 0 : index
      %319 = arith.index_cast %318 : i32 to index
      %c2_282 = arith.constant 2 : index
      %c0_283 = arith.constant 0 : index
      %320 = vector.load %arg1[%c0_281, %319, %c2_282, %c0_283] : memref<1x18x18x16xbf16, #tpu.memory_space<vmem>>, vector<1x1x14x16xbf16>
      %321 = vector.shape_cast %320 : vector<1x1x14x16xbf16> to vector<14x16xbf16>
      %c12_284 = arith.constant 12 : index
      %c0_285 = arith.constant 0 : index
      %c0_286 = arith.constant 0 : index
      %322 = vector.load %arg2[%c12_284, %c0_285, %c0_286] : memref<25x16x128xbf16, #tpu.memory_space<vmem>>, vector<1x16x128xbf16>
      %323 = vector.shape_cast %322 : vector<1x16x128xbf16> to vector<16x128xbf16>
      %cst_287 = arith.constant dense<0.000000e+00> : vector<14x128xf32>
      %324 = tpu.matmul %321, %323, %cst_287 {dimension_numbers = #tpu.dot_dimension_numbers<[1], [0], [0], [1], [0, 0, 1, 1], [], []>} : vector<14x16xbf16>, vector<16x128xbf16>, vector<14x128xf32> -> vector<14x128xf32>
      %325 = arith.addf %317, %324 : vector<14x128xf32>
      %c2_i32_288 = arith.constant 2 : i32
      %326 = arith.addi %220, %c2_i32_288 : i32
      %c0_289 = arith.constant 0 : index
      %327 = arith.index_cast %326 : i32 to index
      %c3_290 = arith.constant 3 : index
      %c0_291 = arith.constant 0 : index
      %328 = vector.load %arg1[%c0_289, %327, %c3_290, %c0_291] : memref<1x18x18x16xbf16, #tpu.memory_space<vmem>>, vector<1x1x14x16xbf16>
      %329 = vector.shape_cast %328 : vector<1x1x14x16xbf16> to vector<14x16xbf16>
      %c13_292 = arith.constant 13 : index
      %c0_293 = arith.constant 0 : index
      %c0_294 = arith.constant 0 : index
      %330 = vector.load %arg2[%c13_292, %c0_293, %c0_294] : memref<25x16x128xbf16, #tpu.memory_space<vmem>>, vector<1x16x128xbf16>
      %331 = vector.shape_cast %330 : vector<1x16x128xbf16> to vector<16x128xbf16>
      %cst_295 = arith.constant dense<0.000000e+00> : vector<14x128xf32>
      %332 = tpu.matmul %329, %331, %cst_295 {dimension_numbers = #tpu.dot_dimension_numbers<[1], [0], [0], [1], [0, 0, 1, 1], [], []>} : vector<14x16xbf16>, vector<16x128xbf16>, vector<14x128xf32> -> vector<14x128xf32>
      %333 = arith.addf %325, %332 : vector<14x128xf32>
      %c2_i32_296 = arith.constant 2 : i32
      %334 = arith.addi %220, %c2_i32_296 : i32
      %c0_297 = arith.constant 0 : index
      %335 = arith.index_cast %334 : i32 to index
      %c4_298 = arith.constant 4 : index
      %c0_299 = arith.constant 0 : index
      %336 = vector.load %arg1[%c0_297, %335, %c4_298, %c0_299] : memref<1x18x18x16xbf16, #tpu.memory_space<vmem>>, vector<1x1x14x16xbf16>
      %337 = vector.shape_cast %336 : vector<1x1x14x16xbf16> to vector<14x16xbf16>
      %c14_300 = arith.constant 14 : index
      %c0_301 = arith.constant 0 : index
      %c0_302 = arith.constant 0 : index
      %338 = vector.load %arg2[%c14_300, %c0_301, %c0_302] : memref<25x16x128xbf16, #tpu.memory_space<vmem>>, vector<1x16x128xbf16>
      %339 = vector.shape_cast %338 : vector<1x16x128xbf16> to vector<16x128xbf16>
      %cst_303 = arith.constant dense<0.000000e+00> : vector<14x128xf32>
      %340 = tpu.matmul %337, %339, %cst_303 {dimension_numbers = #tpu.dot_dimension_numbers<[1], [0], [0], [1], [0, 0, 1, 1], [], []>} : vector<14x16xbf16>, vector<16x128xbf16>, vector<14x128xf32> -> vector<14x128xf32>
      %341 = arith.addf %333, %340 : vector<14x128xf32>
      %c3_i32_304 = arith.constant 3 : i32
      %342 = arith.addi %220, %c3_i32_304 : i32
      %c0_305 = arith.constant 0 : index
      %343 = arith.index_cast %342 : i32 to index
      %c0_306 = arith.constant 0 : index
      %c0_307 = arith.constant 0 : index
      %344 = vector.load %arg1[%c0_305, %343, %c0_306, %c0_307] : memref<1x18x18x16xbf16, #tpu.memory_space<vmem>>, vector<1x1x14x16xbf16>
      %345 = vector.shape_cast %344 : vector<1x1x14x16xbf16> to vector<14x16xbf16>
      %c15_308 = arith.constant 15 : index
      %c0_309 = arith.constant 0 : index
      %c0_310 = arith.constant 0 : index
      %346 = vector.load %arg2[%c15_308, %c0_309, %c0_310] : memref<25x16x128xbf16, #tpu.memory_space<vmem>>, vector<1x16x128xbf16>
      %347 = vector.shape_cast %346 : vector<1x16x128xbf16> to vector<16x128xbf16>
      %cst_311 = arith.constant dense<0.000000e+00> : vector<14x128xf32>
      %348 = tpu.matmul %345, %347, %cst_311 {dimension_numbers = #tpu.dot_dimension_numbers<[1], [0], [0], [1], [0, 0, 1, 1], [], []>} : vector<14x16xbf16>, vector<16x128xbf16>, vector<14x128xf32> -> vector<14x128xf32>
      %349 = arith.addf %341, %348 : vector<14x128xf32>
      %c3_i32_312 = arith.constant 3 : i32
      %350 = arith.addi %220, %c3_i32_312 : i32
      %c0_313 = arith.constant 0 : index
      %351 = arith.index_cast %350 : i32 to index
      %c1_314 = arith.constant 1 : index
      %c0_315 = arith.constant 0 : index
      %352 = vector.load %arg1[%c0_313, %351, %c1_314, %c0_315] : memref<1x18x18x16xbf16, #tpu.memory_space<vmem>>, vector<1x1x14x16xbf16>
      %353 = vector.shape_cast %352 : vector<1x1x14x16xbf16> to vector<14x16xbf16>
      %c16_316 = arith.constant 16 : index
      %c0_317 = arith.constant 0 : index
      %c0_318 = arith.constant 0 : index
      %354 = vector.load %arg2[%c16_316, %c0_317, %c0_318] : memref<25x16x128xbf16, #tpu.memory_space<vmem>>, vector<1x16x128xbf16>
      %355 = vector.shape_cast %354 : vector<1x16x128xbf16> to vector<16x128xbf16>
      %cst_319 = arith.constant dense<0.000000e+00> : vector<14x128xf32>
      %356 = tpu.matmul %353, %355, %cst_319 {dimension_numbers = #tpu.dot_dimension_numbers<[1], [0], [0], [1], [0, 0, 1, 1], [], []>} : vector<14x16xbf16>, vector<16x128xbf16>, vector<14x128xf32> -> vector<14x128xf32>
      %357 = arith.addf %349, %356 : vector<14x128xf32>
      %c3_i32_320 = arith.constant 3 : i32
      %358 = arith.addi %220, %c3_i32_320 : i32
      %c0_321 = arith.constant 0 : index
      %359 = arith.index_cast %358 : i32 to index
      %c2_322 = arith.constant 2 : index
      %c0_323 = arith.constant 0 : index
      %360 = vector.load %arg1[%c0_321, %359, %c2_322, %c0_323] : memref<1x18x18x16xbf16, #tpu.memory_space<vmem>>, vector<1x1x14x16xbf16>
      %361 = vector.shape_cast %360 : vector<1x1x14x16xbf16> to vector<14x16xbf16>
      %c17_324 = arith.constant 17 : index
      %c0_325 = arith.constant 0 : index
      %c0_326 = arith.constant 0 : index
      %362 = vector.load %arg2[%c17_324, %c0_325, %c0_326] : memref<25x16x128xbf16, #tpu.memory_space<vmem>>, vector<1x16x128xbf16>
      %363 = vector.shape_cast %362 : vector<1x16x128xbf16> to vector<16x128xbf16>
      %cst_327 = arith.constant dense<0.000000e+00> : vector<14x128xf32>
      %364 = tpu.matmul %361, %363, %cst_327 {dimension_numbers = #tpu.dot_dimension_numbers<[1], [0], [0], [1], [0, 0, 1, 1], [], []>} : vector<14x16xbf16>, vector<16x128xbf16>, vector<14x128xf32> -> vector<14x128xf32>
      %365 = arith.addf %357, %364 : vector<14x128xf32>
      %c3_i32_328 = arith.constant 3 : i32
      %366 = arith.addi %220, %c3_i32_328 : i32
      %c0_329 = arith.constant 0 : index
      %367 = arith.index_cast %366 : i32 to index
      %c3_330 = arith.constant 3 : index
      %c0_331 = arith.constant 0 : index
      %368 = vector.load %arg1[%c0_329, %367, %c3_330, %c0_331] : memref<1x18x18x16xbf16, #tpu.memory_space<vmem>>, vector<1x1x14x16xbf16>
      %369 = vector.shape_cast %368 : vector<1x1x14x16xbf16> to vector<14x16xbf16>
      %c18_332 = arith.constant 18 : index
      %c0_333 = arith.constant 0 : index
      %c0_334 = arith.constant 0 : index
      %370 = vector.load %arg2[%c18_332, %c0_333, %c0_334] : memref<25x16x128xbf16, #tpu.memory_space<vmem>>, vector<1x16x128xbf16>
      %371 = vector.shape_cast %370 : vector<1x16x128xbf16> to vector<16x128xbf16>
      %cst_335 = arith.constant dense<0.000000e+00> : vector<14x128xf32>
      %372 = tpu.matmul %369, %371, %cst_335 {dimension_numbers = #tpu.dot_dimension_numbers<[1], [0], [0], [1], [0, 0, 1, 1], [], []>} : vector<14x16xbf16>, vector<16x128xbf16>, vector<14x128xf32> -> vector<14x128xf32>
      %373 = arith.addf %365, %372 : vector<14x128xf32>
      %c3_i32_336 = arith.constant 3 : i32
      %374 = arith.addi %220, %c3_i32_336 : i32
      %c0_337 = arith.constant 0 : index
      %375 = arith.index_cast %374 : i32 to index
      %c4_338 = arith.constant 4 : index
      %c0_339 = arith.constant 0 : index
      %376 = vector.load %arg1[%c0_337, %375, %c4_338, %c0_339] : memref<1x18x18x16xbf16, #tpu.memory_space<vmem>>, vector<1x1x14x16xbf16>
      %377 = vector.shape_cast %376 : vector<1x1x14x16xbf16> to vector<14x16xbf16>
      %c19_340 = arith.constant 19 : index
      %c0_341 = arith.constant 0 : index
      %c0_342 = arith.constant 0 : index
      %378 = vector.load %arg2[%c19_340, %c0_341, %c0_342] : memref<25x16x128xbf16, #tpu.memory_space<vmem>>, vector<1x16x128xbf16>
      %379 = vector.shape_cast %378 : vector<1x16x128xbf16> to vector<16x128xbf16>
      %cst_343 = arith.constant dense<0.000000e+00> : vector<14x128xf32>
      %380 = tpu.matmul %377, %379, %cst_343 {dimension_numbers = #tpu.dot_dimension_numbers<[1], [0], [0], [1], [0, 0, 1, 1], [], []>} : vector<14x16xbf16>, vector<16x128xbf16>, vector<14x128xf32> -> vector<14x128xf32>
      %381 = arith.addf %373, %380 : vector<14x128xf32>
      %c4_i32_344 = arith.constant 4 : i32
      %382 = arith.addi %220, %c4_i32_344 : i32
      %c0_345 = arith.constant 0 : index
      %383 = arith.index_cast %382 : i32 to index
      %c0_346 = arith.constant 0 : index
      %c0_347 = arith.constant 0 : index
      %384 = vector.load %arg1[%c0_345, %383, %c0_346, %c0_347] : memref<1x18x18x16xbf16, #tpu.memory_space<vmem>>, vector<1x1x14x16xbf16>
      %385 = vector.shape_cast %384 : vector<1x1x14x16xbf16> to vector<14x16xbf16>
      %c20_348 = arith.constant 20 : index
      %c0_349 = arith.constant 0 : index
      %c0_350 = arith.constant 0 : index
      %386 = vector.load %arg2[%c20_348, %c0_349, %c0_350] : memref<25x16x128xbf16, #tpu.memory_space<vmem>>, vector<1x16x128xbf16>
      %387 = vector.shape_cast %386 : vector<1x16x128xbf16> to vector<16x128xbf16>
      %cst_351 = arith.constant dense<0.000000e+00> : vector<14x128xf32>
      %388 = tpu.matmul %385, %387, %cst_351 {dimension_numbers = #tpu.dot_dimension_numbers<[1], [0], [0], [1], [0, 0, 1, 1], [], []>} : vector<14x16xbf16>, vector<16x128xbf16>, vector<14x128xf32> -> vector<14x128xf32>
      %389 = arith.addf %381, %388 : vector<14x128xf32>
      %c4_i32_352 = arith.constant 4 : i32
      %390 = arith.addi %220, %c4_i32_352 : i32
      %c0_353 = arith.constant 0 : index
      %391 = arith.index_cast %390 : i32 to index
      %c1_354 = arith.constant 1 : index
      %c0_355 = arith.constant 0 : index
      %392 = vector.load %arg1[%c0_353, %391, %c1_354, %c0_355] : memref<1x18x18x16xbf16, #tpu.memory_space<vmem>>, vector<1x1x14x16xbf16>
      %393 = vector.shape_cast %392 : vector<1x1x14x16xbf16> to vector<14x16xbf16>
      %c21_356 = arith.constant 21 : index
      %c0_357 = arith.constant 0 : index
      %c0_358 = arith.constant 0 : index
      %394 = vector.load %arg2[%c21_356, %c0_357, %c0_358] : memref<25x16x128xbf16, #tpu.memory_space<vmem>>, vector<1x16x128xbf16>
      %395 = vector.shape_cast %394 : vector<1x16x128xbf16> to vector<16x128xbf16>
      %cst_359 = arith.constant dense<0.000000e+00> : vector<14x128xf32>
      %396 = tpu.matmul %393, %395, %cst_359 {dimension_numbers = #tpu.dot_dimension_numbers<[1], [0], [0], [1], [0, 0, 1, 1], [], []>} : vector<14x16xbf16>, vector<16x128xbf16>, vector<14x128xf32> -> vector<14x128xf32>
      %397 = arith.addf %389, %396 : vector<14x128xf32>
      %c4_i32_360 = arith.constant 4 : i32
      %398 = arith.addi %220, %c4_i32_360 : i32
      %c0_361 = arith.constant 0 : index
      %399 = arith.index_cast %398 : i32 to index
      %c2_362 = arith.constant 2 : index
      %c0_363 = arith.constant 0 : index
      %400 = vector.load %arg1[%c0_361, %399, %c2_362, %c0_363] : memref<1x18x18x16xbf16, #tpu.memory_space<vmem>>, vector<1x1x14x16xbf16>
      %401 = vector.shape_cast %400 : vector<1x1x14x16xbf16> to vector<14x16xbf16>
      %c22_364 = arith.constant 22 : index
      %c0_365 = arith.constant 0 : index
      %c0_366 = arith.constant 0 : index
      %402 = vector.load %arg2[%c22_364, %c0_365, %c0_366] : memref<25x16x128xbf16, #tpu.memory_space<vmem>>, vector<1x16x128xbf16>
      %403 = vector.shape_cast %402 : vector<1x16x128xbf16> to vector<16x128xbf16>
      %cst_367 = arith.constant dense<0.000000e+00> : vector<14x128xf32>
      %404 = tpu.matmul %401, %403, %cst_367 {dimension_numbers = #tpu.dot_dimension_numbers<[1], [0], [0], [1], [0, 0, 1, 1], [], []>} : vector<14x16xbf16>, vector<16x128xbf16>, vector<14x128xf32> -> vector<14x128xf32>
      %405 = arith.addf %397, %404 : vector<14x128xf32>
      %c4_i32_368 = arith.constant 4 : i32
      %406 = arith.addi %220, %c4_i32_368 : i32
      %c0_369 = arith.constant 0 : index
      %407 = arith.index_cast %406 : i32 to index
      %c3_370 = arith.constant 3 : index
      %c0_371 = arith.constant 0 : index
      %408 = vector.load %arg1[%c0_369, %407, %c3_370, %c0_371] : memref<1x18x18x16xbf16, #tpu.memory_space<vmem>>, vector<1x1x14x16xbf16>
      %409 = vector.shape_cast %408 : vector<1x1x14x16xbf16> to vector<14x16xbf16>
      %c23_372 = arith.constant 23 : index
      %c0_373 = arith.constant 0 : index
      %c0_374 = arith.constant 0 : index
      %410 = vector.load %arg2[%c23_372, %c0_373, %c0_374] : memref<25x16x128xbf16, #tpu.memory_space<vmem>>, vector<1x16x128xbf16>
      %411 = vector.shape_cast %410 : vector<1x16x128xbf16> to vector<16x128xbf16>
      %cst_375 = arith.constant dense<0.000000e+00> : vector<14x128xf32>
      %412 = tpu.matmul %409, %411, %cst_375 {dimension_numbers = #tpu.dot_dimension_numbers<[1], [0], [0], [1], [0, 0, 1, 1], [], []>} : vector<14x16xbf16>, vector<16x128xbf16>, vector<14x128xf32> -> vector<14x128xf32>
      %413 = arith.addf %405, %412 : vector<14x128xf32>
      %c4_i32_376 = arith.constant 4 : i32
      %414 = arith.addi %220, %c4_i32_376 : i32
      %c0_377 = arith.constant 0 : index
      %415 = arith.index_cast %414 : i32 to index
      %c4_378 = arith.constant 4 : index
      %c0_379 = arith.constant 0 : index
      %416 = vector.load %arg1[%c0_377, %415, %c4_378, %c0_379] : memref<1x18x18x16xbf16, #tpu.memory_space<vmem>>, vector<1x1x14x16xbf16>
      %417 = vector.shape_cast %416 : vector<1x1x14x16xbf16> to vector<14x16xbf16>
      %c24_380 = arith.constant 24 : index
      %c0_381 = arith.constant 0 : index
      %c0_382 = arith.constant 0 : index
      %418 = vector.load %arg2[%c24_380, %c0_381, %c0_382] : memref<25x16x128xbf16, #tpu.memory_space<vmem>>, vector<1x16x128xbf16>
      %419 = vector.shape_cast %418 : vector<1x16x128xbf16> to vector<16x128xbf16>
      %cst_383 = arith.constant dense<0.000000e+00> : vector<14x128xf32>
      %420 = tpu.matmul %417, %419, %cst_383 {dimension_numbers = #tpu.dot_dimension_numbers<[1], [0], [0], [1], [0, 0, 1, 1], [], []>} : vector<14x16xbf16>, vector<16x128xbf16>, vector<14x128xf32> -> vector<14x128xf32>
      %421 = arith.addf %413, %420 : vector<14x128xf32>
      %422 = vector.broadcast %0 : vector<1x128xf32> to vector<14x128xf32>
      %423 = arith.mulf %218, %422 : vector<14x128xf32>
      %424 = vector.broadcast %1 : vector<1x128xf32> to vector<14x128xf32>
      %425 = arith.addf %423, %424 : vector<14x128xf32>
      %cst_384 = arith.constant 0.000000e+00 : f32
      %426 = vector.broadcast %cst_384 : f32 to vector<14x128xf32>
      %427 = arith.maximumf %425, %426 : vector<14x128xf32>
      %428 = vector.broadcast %0 : vector<1x128xf32> to vector<14x128xf32>
      %429 = arith.mulf %421, %428 : vector<14x128xf32>
      %430 = vector.broadcast %1 : vector<1x128xf32> to vector<14x128xf32>
      %431 = arith.addf %429, %430 : vector<14x128xf32>
      %cst_385 = arith.constant 0.000000e+00 : f32
      %432 = vector.broadcast %cst_385 : f32 to vector<14x128xf32>
      %433 = arith.maximumf %431, %432 : vector<14x128xf32>
      %434 = arith.maximumf %427, %433 : vector<14x128xf32>
      %cst_386 = arith.constant dense<0.000000e+00> : vector<7x128xf32>
      %435 = tpu.matmul %8, %434, %cst_386 {dimension_numbers = #tpu.dot_dimension_numbers<[1], [0], [0], [1], [0, 0, 1, 1], [], []>} : vector<7x14xf32>, vector<14x128xf32>, vector<7x128xf32> -> vector<7x128xf32>
      %cst_387 = arith.constant dense<0.000000e+00> : vector<7x128xf32>
      %436 = tpu.matmul %15, %434, %cst_387 {dimension_numbers = #tpu.dot_dimension_numbers<[1], [0], [0], [1], [0, 0, 1, 1], [], []>} : vector<7x14xf32>, vector<14x128xf32>, vector<7x128xf32> -> vector<7x128xf32>
      %437 = arith.maximumf %435, %436 : vector<7x128xf32>
      %438 = arith.truncf %437 : vector<7x128xf32> to vector<7x128xbf16>
      %c0_388 = arith.constant 0 : index
      %439 = arith.index_cast %arg6 : i32 to index
      %c0_389 = arith.constant 0 : index
      %c0_390 = arith.constant 0 : index
      %440 = vector.load %arg5[%c0_388, %439, %c0_389, %c0_390] : memref<1x7x7x128xbf16, #tpu.memory_space<vmem>>, vector<1x1x7x128xbf16>
      %441 = vector.shape_cast %440 : vector<1x1x7x128xbf16> to vector<7x128xbf16>
      %442 = vector.shape_cast %438 : vector<7x128xbf16> to vector<1x1x7x128xbf16>
      tpu.vector_store %arg5[%c0_388, %439, %c0_389, %c0_390], %442 {strides = array<i32>} : memref<1x7x7x128xbf16, #tpu.memory_space<vmem>>, vector<1x1x7x128xbf16>,
    }
    %c7_i32_5 = arith.constant 7 : i32
    return
  }
  func.func @transform_0(%arg0: i32) -> (i32, i32, i32, i32) {
    %c0_i32 = arith.constant 0 : i32
    %c0_i32_0 = arith.constant 0 : i32
    %c0_i32_1 = arith.constant 0 : i32
    %c0_i32_2 = arith.constant 0 : i32
    return %arg0, %c0_i32, %c0_i32_0, %c0_i32_1 : i32, i32, i32, i32
  }
  func.func @transform_1(%arg0: i32) -> (i32, i32, i32) {
    %c0_i32 = arith.constant 0 : i32
    %c0_i32_0 = arith.constant 0 : i32
    %c0_i32_1 = arith.constant 0 : i32
    %c0_i32_2 = arith.constant 0 : i32
    return %c0_i32, %c0_i32_0, %c0_i32_1 : i32, i32, i32
  }
  func.func @transform_2(%arg0: i32) -> (i32, i32) {
    %c0_i32 = arith.constant 0 : i32
    %c0_i32_0 = arith.constant 0 : i32
    %c0_i32_1 = arith.constant 0 : i32
    return %c0_i32, %c0_i32_0 : i32, i32
  }
  func.func @transform_3(%arg0: i32) -> (i32, i32) {
    %c0_i32 = arith.constant 0 : i32
    %c0_i32_0 = arith.constant 0 : i32
    %c0_i32_1 = arith.constant 0 : i32
    return %c0_i32, %c0_i32_0 : i32, i32
  }
  func.func @transform_4(%arg0: i32) -> (i32, i32, i32, i32) {
    %c0_i32 = arith.constant 0 : i32
    %c0_i32_0 = arith.constant 0 : i32
    %c0_i32_1 = arith.constant 0 : i32
    %c0_i32_2 = arith.constant 0 : i32
    return %arg0, %c0_i32, %c0_i32_0, %c0_i32_1 : i32, i32, i32, i32
  }
}

module attributes {stable_mosaic.version = 11 : i64} {
  func.func @_fc_kernel(%arg0: i32, %arg1: memref<2x6272xbf16, #tpu.memory_space<vmem>>, %arg2: memref<6272x128xbf16, #tpu.memory_space<vmem>>, %arg3: memref<1x128xf32, #tpu.memory_space<vmem>>, %arg4: memref<2x128xf32, #tpu.memory_space<vmem>>) attributes {dimension_semantics = [#tpu.dimension_semantics<parallel>], iteration_bounds = array<i64: 1>, scalar_prefetch = 0 : i64, scratch_operands = 0 : i64, tpu.core_type = #tpu.core_type<tc>, window_params = [{transform_indices = @transform_0, window_bounds = array<i64: 2, 6272>}, {pipeline_mode = #tpu.pipeline_mode<synchronous>, transform_indices = @transform_1, window_bounds = array<i64: 6272, 128>}, {pipeline_mode = #tpu.pipeline_mode<synchronous>, transform_indices = @transform_2, window_bounds = array<i64: 1, 128>}, {transform_indices = @transform_3, window_bounds = array<i64: 2, 128>}]} {
    %c0 = arith.constant 0 : index
    %c0_0 = arith.constant 0 : index
    %0 = vector.load %arg1[%c0, %c0_0] : memref<2x6272xbf16, #tpu.memory_space<vmem>>, vector<2x6272xbf16>
    %c0_1 = arith.constant 0 : index
    %c0_2 = arith.constant 0 : index
    %1 = vector.load %arg2[%c0_1, %c0_2] : memref<6272x128xbf16, #tpu.memory_space<vmem>>, vector<6272x128xbf16>
    %cst = arith.constant dense<0.000000e+00> : vector<2x128xf32>
    %2 = tpu.matmul %0, %1, %cst {dimension_numbers = #tpu.dot_dimension_numbers<[1], [0], [0], [1], [0, 0, 1, 1], [], []>} : vector<2x6272xbf16>, vector<6272x128xbf16>, vector<2x128xf32> -> vector<2x128xf32>
    %c0_3 = arith.constant 0 : index
    %c0_4 = arith.constant 0 : index
    %3 = vector.load %arg3[%c0_3, %c0_4] : memref<1x128xf32, #tpu.memory_space<vmem>>, vector<1x128xf32>
    %4 = vector.broadcast %3 : vector<1x128xf32> to vector<2x128xf32>
    %5 = arith.addf %2, %4 : vector<2x128xf32>
    %c0_5 = arith.constant 0 : index
    %c0_6 = arith.constant 0 : index
    %6 = vector.load %arg4[%c0_5, %c0_6] : memref<2x128xf32, #tpu.memory_space<vmem>>, vector<2x128xf32>
    tpu.vector_store %arg4[%c0_5, %c0_6], %5 {strides = array<i32>} : memref<2x128xf32, #tpu.memory_space<vmem>>, vector<2x128xf32>,
    return
  }
  func.func @transform_0(%arg0: i32) -> (i32, i32) {
    %c0_i32 = arith.constant 0 : i32
    %c0_i32_0 = arith.constant 0 : i32
    return %arg0, %c0_i32 : i32, i32
  }
  func.func @transform_1(%arg0: i32) -> (i32, i32) {
    %c0_i32 = arith.constant 0 : i32
    %c0_i32_0 = arith.constant 0 : i32
    %c0_i32_1 = arith.constant 0 : i32
    return %c0_i32, %c0_i32_0 : i32, i32
  }
  func.func @transform_2(%arg0: i32) -> (i32, i32) {
    %c0_i32 = arith.constant 0 : i32
    %c0_i32_0 = arith.constant 0 : i32
    %c0_i32_1 = arith.constant 0 : i32
    return %c0_i32, %c0_i32_0 : i32, i32
  }
  func.func @transform_3(%arg0: i32) -> (i32, i32) {
    %c0_i32 = arith.constant 0 : i32
    %c0_i32_0 = arith.constant 0 : i32
    return %arg0, %c0_i32 : i32, i32
  }
}

</mosaic_0001>

<bundles_post_ra>
// kernel: convnet_forward.5
= control target key start
LH: loop header
LB: loop body
LE: loop exit
PB: predicated region body
PF: predicated region fallthrough
CT: control target
= control target key end

     0   :  { %s1514_s9 = smov 0   ;;  %s2104_s0 = inlined_call_operand.vmem [shape: bf16[2,32,32,1], index: 0, kind: input, shape index: {}]   ;;  %s2105_s1 = inlined_call_operand.vmem [shape: bf16[25,1,128], index: 1, kind: input, shape index: {}]   ;;  %s2106_s2 = inlined_call_operand.vmem [shape: f32[2,2,128], index: 2, kind: output, shape index: {}]  }
   0x1 LB: > { %s1233_s10 = sadd.s32 4294967295, %s1484_s9   ;;  %p1237_p0 = scmp.ge.s32.totalorder %s1484_s9, 1  ;;  %s1484_s9 = sphi %s1514_s9, %s12_s9  }
   0x2   : > { %p112_p1 = scmp.lt.s32.totalorder %s1484_s9, 3 }
   0x4   : > { %p113_p2 = pnand %p1237_p0, %p112_p1 }
   0x5   : > { %p133_p3 = scmp.lt.s32.totalorder (!%p113_p2), %s1233_s10, 1  ;;  %v1532_v0 = vmov (!%p113_p2), 0.0   ;;  %v1534_v1 = vmov (!%p113_p2), 0.0   ;;  %s1536_s19 = smov (!%p113_p2), 0  }
   0x6   : > { %116 = sbr.rel (%p113_p2) target bundleno = 273 (0x111), region = 28 }
   0xd   : > { %s2110_s10 = smov (!%p133_p3, %s1233_s10), 1 }
   0xe   : > { %s1305_s11 = sshll.u32 %s2110_s10, 9  ;;  %s1240_s12 = sshll.u32 %s2110_s10, 1 }
   0xf   : > { %s1525_s15 = scalar_lea.vmem %s2104_s0, %s1305_s11  ;;  %s1530_s18 = scalar_lea.vmem %s2106_s2, %s1240_s12 }
  0x10 LB: >> { %v1498_v2 = vmov 0   ;;  %s1306_s20 = sshll.u32 %s1496_s19, 4  ;;  %vm255_vm0 = vcmask 1045504   ;;  %vm293_vm1 = vcmask 1044480   ;;  %vm217_vm2 = vcmask 1046528   ;;  %s147_s19 = sadd.s32 1, %s1496_s19   ;;  %s1496_s19 = sphi %s1536_s19, %s147_s19   ;;  %v1492_v1 = vphi %v1534_v1, %v2108_v1   ;;  %v1488_v0 = vphi %v1532_v0, %v2107_v0  }
  0x11   : >> { %1375 = vset.pattern.permute.xlu1 %v1498_v2  ;;  %1364 = vset.pattern.permute.xlu0 %v1498_v2  ;;  %s1549_s21 = scalar_lea.vmem %s1525_s15, %s1306_s20  ;;  %vm331_vm3 = vcmask 1043456   ;;  %p144_p4 = scmp.ge.s32.totalorder %s147_s19, 28  }
  0x12   : >> { %v195_v3 = vld [vmem:[%s1549_s21 + $0xc] sm:$0x7]  ;;  %v233_v4 = vld [vmem:[%s1549_s21] sm:$0xe]  ;;  %v1250_v17 = vld [vmem:[%s1549_s21 + $0x18] sm:$0xff]  }
  0x13   : >> { %v1308_v5 = vld [vmem:[%s1549_s21] sm:$0xff]   ;;  %v198_v6 = vunpack.c.l.bf16 %v195_v3  ;;  %v236_v7 = vunpack.c.l.bf16 %v233_v4  ;;  %v271_v10 = vld [vmem:[%s1549_s21 + $0x8] sm:$0xff]   ;;  %v1253_v18 = vld [vmem:[%s1549_s21 + $0x1c] sm:$0x7]  ;;  %v359_v22 = vunpack.c.l.bf16 %v1250_v17  ;;  %v471_v32 = vunpack.c.h.bf16 %v1250_v17 }
  0x14   : >> { %v1309_v8 = vunpack.c.l.bf16 %v1308_v5  ;;  %v1310_v9 = vunpack.c.h.bf16 %v1308_v5  ;;  %v309_v11 = vld [vmem:[%s1549_s21] sm:$0xc]  ;;  %v156_v12 = vld [vmem:[%s1549_s21 + $0xc] sm:$0x3]  ;;  %v274_v13 = vunpack.c.h.bf16 %v271_v10  ;;  %v160_v15 = vunpack.c.l.bf16 %v271_v10  ;;  %v1327_v19 = vld [vmem:[%s1549_s21 + $0x10] sm:$0xff]  }
  0x15   : >> { %v312_v14 = vunpack.c.l.bf16 %v309_v11  ;;  %v161_v16 = vunpack.c.l.bf16 %v156_v12  ;;  %v1376_v20 = vpack.i.bf16 %v236_v7, %v198_v6  ;;  %v397_v23 = vunpack.c.l.bf16 %v1253_v18  ;;  %v1259_v28 = vld [vmem:[%s1549_s21 + $0x10] sm:$0xc]  ;;  %v1251_v29 = vld [vmem:[%s1549_s21 + $0x1c] sm:$0x3]  ;;  %v1264_v37 = vld [vmem:[%s1549_s21 + $0x28] sm:$0xff]  }
  0x16   : >> { %v1365_v21 = vpack.i.bf16 %v1310_v9, %v1309_v8  ;;  %v1313_v26 = vunpack.c.l.bf16 %v1327_v19  ;;  %v1314_v27 = vunpack.c.h.bf16 %v1327_v19  ;;  %v1255_v30 = vld [vmem:[%s1549_s21 + $0x10] sm:$0xe]  ;;  %v508_v34 = vunpack.c.l.bf16 %v1259_v28  ;;  %v1267_v38 = vld [vmem:[%s1549_s21 + $0x2c] sm:$0x7]  ;;  %v1328_v39 = vld [vmem:[%s1549_s21 + $0x20] sm:$0xff]  }
  0x17   : >> { %1377 = vperm.xlu1 %1375, %v1376_v20   ;;  %v1381_v24 = vpack.i.bf16 %v312_v14, %v274_v13  ;;  %v1370_v25 = vpack.i.bf16 %v161_v16, %v160_v15  ;;  %v1391_v31 = vpack.i.bf16 %v397_v23, %v359_v22  ;;  %v360_v35 = vunpack.c.l.bf16 %v1251_v29  ;;  %v1273_v46 = vld [vmem:[%s1549_s21 + $0x20] sm:$0xc]  ;;  %v1265_v47 = vld [vmem:[%s1549_s21 + $0x2c] sm:$0x3]  ;;  %v1278_v55 = vld [vmem:[%s1549_s21 + $0x38] sm:$0xff]  }
  0x18   : >> { %1366 = vperm.xlu0 %1364, %v1365_v21   ;;  %v1386_v33 = vpack.i.bf16 %v1314_v27, %v1313_v26  ;;  %v434_v36 = vunpack.c.l.bf16 %v1255_v30  ;;  %v554_v40 = vunpack.c.l.bf16 %v1264_v37  ;;  %v592_v41 = vunpack.c.l.bf16 %v1267_v38  ;;  %v1269_v48 = vld [vmem:[%s1549_s21 + $0x20] sm:$0xe]  ;;  %v1281_v56 = vld [vmem:[%s1549_s21 + $0x3c] sm:$0x7]  ;;  %v1329_v57 = vld [vmem:[%s1549_s21 + $0x30] sm:$0xff]  }
  0x19   : >> { %v1401_v42 = vpack.i.bf16 %v508_v34, %v471_v32  ;;  %v1317_v44 = vunpack.c.l.bf16 %v1328_v39  ;;  %v1318_v45 = vunpack.c.h.bf16 %v1328_v39  ;;  %v666_v50 = vunpack.c.h.bf16 %v1264_v37  ;;  %v1287_v2 = vld [vmem:[%s1549_s21 + $0x30] sm:$0xc]  ;;  %v1279_v3 = vld [vmem:[%s1549_s21 + $0x3c] sm:$0x3]  ;;  %v1292_v11 = vld [vmem:[%s1549_s21 + $0x48] sm:$0xff]  }
  0x1a   : >> { %v1396_v43 = vpack.i.bf16 %v360_v35, %v434_v36  ;;  %v1411_v49 = vpack.i.bf16 %v592_v41, %v554_v40  ;;  %v703_v52 = vunpack.c.l.bf16 %v1273_v46  ;;  %v555_v53 = vunpack.c.l.bf16 %v1265_v47  ;;  %v1283_v4 = vld [vmem:[%s1549_s21 + $0x30] sm:$0xe]  ;;  %v1295_v12 = vld [vmem:[%s1549_s21 + $0x4c] sm:$0x7]  ;;  %v1330_v13 = vld [vmem:[%s1549_s21 + $0x40] sm:$0xff]  }
  0x1b   : >> { %1382 = vperm.xlu1 %1375, %v1381_v24   ;;  %v1406_v51 = vpack.i.bf16 %v1318_v45, %v1317_v44  ;;  %v629_v54 = vunpack.c.l.bf16 %v1269_v48  ;;  %v749_v58 = vunpack.c.l.bf16 %v1278_v55  ;;  %v787_v59 = vunpack.c.l.bf16 %v1281_v56  ;;  %v1301_v20 = vld [vmem:[%s1549_s21 + $0x40] sm:$0xc]  ;;  %v1293_v21 = vld [vmem:[%s1549_s21 + $0x4c] sm:$0x3]  ;;  %v157_v36 = vld [vmem:[%s2105_s1] sm:$0x1] }
  0x1c   : >> { %1371 = vperm.xlu0 %1364, %v1370_v25   ;;  %v1421_v60 = vpack.i.bf16 %v703_v52, %v666_v50  ;;  %v1321_v62 = vunpack.c.l.bf16 %v1329_v57  ;;  %v1322_v63 = vunpack.c.h.bf16 %v1329_v57  ;;  %v861_v6 = vunpack.c.h.bf16 %v1278_v55  ;;  %v1297_v22 = vld [vmem:[%s1549_s21 + $0x40] sm:$0xe]  ;;  %v1246_v40 = vld [vmem:[%s2105_s1 + $0x4] sm:$0x1]  ;;  %v1252_v41 = vld [vmem:[%s2105_s1 + $0x5] sm:$0x1] }
  0x1d   : >> { %v1416_v61 = vpack.i.bf16 %v555_v53, %v629_v54  ;;  %v1431_v5 = vpack.i.bf16 %v787_v59, %v749_v58  ;;  %v898_v8 = vunpack.c.l.bf16 %v1287_v2  ;;  %v750_v9 = vunpack.c.l.bf16 %v1279_v3  ;;  %v1244_v34 = vld [vmem:[%s2105_s1 + $0x2] sm:$0x1]  ;;  %v1245_v35 = vld [vmem:[%s2105_s1 + $0x3] sm:$0x1]  ;;  %v1254_v44 = vld [vmem:[%s2105_s1 + $0x6] sm:$0x1] }
  0x1e   : >> { %v1426_v7 = vpack.i.bf16 %v1322_v63, %v1321_v62  ;;  %v824_v10 = vunpack.c.l.bf16 %v1283_v4  ;;  %v944_v14 = vunpack.c.l.bf16 %v1292_v11  ;;  %v982_v15 = vunpack.c.l.bf16 %v1295_v12  ;;  %v1256_v45 = vld [vmem:[%s2105_s1 + $0x7] sm:$0x1]  ;;  %v1258_v46 = vld [vmem:[%s2105_s1 + $0x8] sm:$0x1]  ;;  %v1260_v47 = vld [vmem:[%s2105_s1 + $0x9] sm:$0x1] }
  0x1f   : >> { %1392 = vperm.xlu1 %1375, %v1391_v31   ;;  %v1441_v16 = vpack.i.bf16 %v898_v8, %v861_v6  ;;  %v1325_v18 = vunpack.c.l.bf16 %v1330_v13  ;;  %v1326_v19 = vunpack.c.h.bf16 %v1330_v13  ;;  %v1056_v24 = vunpack.c.h.bf16 %v1292_v11  ;;  %v1266_v48 = vld [vmem:[%s2105_s1 + $0xa] sm:$0x1]  ;;  %v1270_v52 = vld [vmem:[%s2105_s1 + $0xc] sm:$0x1]  ;;  %v1272_v53 = vld [vmem:[%s2105_s1 + $0xd] sm:$0x1] }
  0x20   : >> { %1387 = vperm.xlu0 %1364, %v1386_v33   ;;  %v1436_v17 = vpack.i.bf16 %v750_v9, %v824_v10  ;;  %v1451_v23 = vpack.i.bf16 %v982_v15, %v944_v14  ;;  %v1093_v26 = vunpack.c.l.bf16 %v1301_v20  ;;  %v945_v27 = vunpack.c.l.bf16 %v1293_v21  ;;  %v1243_v33 = vld [vmem:[%s2105_s1 + $0x1] sm:$0x1]  ;;  %v1274_v54 = vld [vmem:[%s2105_s1 + $0xe] sm:$0x1]  ;;  %v1280_v59 = vld [vmem:[%s2105_s1 + $0xf] sm:$0x1] }
  0x21   : >> { %v1446_v25 = vpack.i.bf16 %v1326_v19, %v1325_v18  ;;  %v1019_v28 = vunpack.c.l.bf16 %v1297_v22  ;;  %v183_v31 = vlaneseq  ;;  %v199_v38 = vunpack.c.l.bf16 %v1243_v33  ;;  %v1286_v8 = vld [vmem:[%s2105_s1 + $0x12] sm:$0x1]  ;;  %v1288_v9 = vld [vmem:[%s2105_s1 + $0x13] sm:$0x1]  ;;  %v1294_v22 = vld [vmem:[%s2105_s1 + $0x14] sm:$0x1] }
  0x22   : >> { %v1461_v29 = vpack.i.bf16 %v1093_v26, %v1056_v24  ;;  %v237_v39 = vunpack.c.l.bf16 %v1244_v34  ;;  %v313_v55 = vunpack.c.l.bf16 %v1246_v40  ;;  %v361_v56 = vunpack.c.l.bf16 %v1252_v41 }
  0x23   : >> { %1402 = vperm.xlu1 %1375, %v1401_v42   ;;  %v1456_v30 = vpack.i.bf16 %v945_v27, %v1019_v28  ;;  %v184_v32 = vshrl.u32 %v183_v31, 7  ;;  %v275_v42 = vunpack.c.l.bf16 %v1245_v35  ;;  %v398_v57 = vunpack.c.l.bf16 %v1254_v44  ;;  %v1691_v27 = vld [vmem:[%s2105_s1 + $0x15] sm:$0x1]  ;;  %v1696_v28 = vld [vmem:[%s2105_s1 + $0x16] sm:$0x1] }
  0x24   : >> { %1397 = vperm.xlu0 %1364, %v1396_v43   ;;  %v162_v43 = vunpack.c.l.bf16 %v157_v36  ;;  %v435_v58 = vunpack.c.l.bf16 %v1256_v45  ;;  %v472_v2 = vunpack.c.l.bf16 %v1258_v46  ;;  %v509_v3 = vunpack.c.l.bf16 %v1260_v47 }
  0x25   : >> { %v1593_v37 = vsub.s32 0, %v184_v32  ;;  %v556_v4 = vunpack.c.l.bf16 %v1266_v48  ;;  %v630_v6 = vunpack.c.l.bf16 %v1270_v52  ;;  %v704_v10 = vunpack.c.l.bf16 %v1274_v54 }
  0x26   : >> { %v751_v11 = vunpack.c.l.bf16 %v1280_v59  ;;  %v862_v20 = vunpack.c.l.bf16 %v1286_v8  ;;  %v899_v21 = vunpack.c.l.bf16 %v1288_v9 }
  0x27   : >> { %1412 = vperm.xlu1 %1375, %v1411_v49   ;;  %v1268_v49 = vld [vmem:[%s2105_s1 + $0xb] sm:$0x1]  ;;  %v1620_v50 = vrot.slane %v199_v38, %v1593_v37  ;;  %v1644_v62 = vrot.slane %v275_v42, %v1593_v37  ;;  %v1647_v63 = vrot.slane %v162_v43, %v1593_v37  ;;  %v1656_v14 = vrot.slane %v313_v55, %v1593_v37 }
  0x28   : >> { %1407 = vperm.xlu0 %1364, %v1406_v51   ;;  %v1623_v51 = vrot.slane %v237_v39, %v1593_v37  ;;  %v1659_v15 = vrot.slane %v361_v56, %v1593_v37  ;;  %v1668_v18 = vrot.slane %v472_v2, %v1593_v37  ;;  %v1671_v19 = vrot.slane %v509_v3, %v1593_v37 }
  0x29   : >> { %v1699_v31 = vrot.slane %v704_v10, %v1593_v37  ;;  %v1702_v32 = vrot.slane %v751_v11, %v1593_v37  ;;  %v946_v39 = vunpack.c.l.bf16 %v1294_v22  ;;  %v1711_v40 = vrot.slane %v862_v20, %v1593_v37 }
  0x2a   : >> { %v1714_v41 = vrot.slane %v899_v21, %v1593_v37  ;;  %v983_v42 = vunpack.c.l.bf16 %v1691_v27  ;;  %v1020_v43 = vunpack.c.l.bf16 %v1696_v28 }
  0x2b   : >> { %1422 = vperm.xlu1 %1375, %v1421_v60   ;;  %v1282_v60 = vld [vmem:[%s2105_s1 + $0x10] sm:$0x1]  ;;  %v1729_v59 = vrot.slane %v946_v39, %v1593_v37 }
  0x2c   : >> { %1417 = vperm.xlu0 %1364, %v1416_v61   ;;  %v1284_v61 = vld [vmem:[%s2105_s1 + $0x11] sm:$0x1]  ;;  %v788_v12 = vunpack.c.l.bf16 %v1282_v60 }
  0x2d   : >> { %v825_v13 = vunpack.c.l.bf16 %v1284_v61 }
  0x2e   : >> { %v1705_v33 = vrot.slane %v788_v12, %v1593_v37 }
  0x2f   : >> { %1432 = vperm.xlu1 %1375, %v1431_v5   ;;  %v593_v5 = vunpack.c.l.bf16 %v1268_v49  ;;  %v1708_v34 = vrot.slane %v825_v13, %v1593_v37 }
  0x30   : >> { %1427 = vperm.xlu0 %1364, %v1426_v7   ;;  %v667_v7 = vunpack.c.l.bf16 %v1272_v53 }
  0x31   : >> { %v1680_v24 = vrot.slane %v593_v5, %v1593_v37 }
  0x32   : >> { %v1686_v26 = vrot.slane %v667_v7, %v1593_v37 }
  0x33   : >> { %1442 = vperm.xlu1 %1375, %v1441_v16   ;;  %v1662_v16 = vrot.slane %v398_v57, %v1593_v37 }
  0x34   : >> { %1437 = vperm.xlu0 %1364, %v1436_v17   ;;  %v1665_v17 = vrot.slane %v435_v58, %v1593_v37 }
  0x37   : >> { %1452 = vperm.xlu1 %1375, %v1451_v23   ;;  %v1677_v23 = vrot.slane %v556_v4, %v1593_v37 }
  0x38   : >> { %1447 = vperm.xlu0 %1364, %v1446_v25   ;;  %v1683_v25 = vrot.slane %v630_v6, %v1593_v37 }
  0x3b   : >> { %1462 = vperm.xlu1 %1375, %v1461_v29  }
  0x3c   : >> { %1457 = vperm.xlu0 %1364, %v1456_v30  }
  0x96   : >> { %v1378_v29 = vpop.permute.xlu1 %1377 }
  0x97   : >> { %v1367_v30 = vpop.permute.xlu0 %1366  ;;  %v1380_v35 = vunpack.i.h.bf16 %v1378_v29  ;;  %v1379_v36 = vunpack.i.l.bf16 %v1378_v29 }
  0x98   : >> { %v1369_v38 = vunpack.i.h.bf16 %v1367_v30  ;;  %v1368_v47 = vunpack.i.l.bf16 %v1367_v30 }
  0x99   : >> { %v247_v44 = vmul.f32 %v1380_v35, %v1623_v51  ;;  %v285_v45 = vmul.f32 %v1380_v35, %v1644_v62  ;;  %v212_v46 = vmul.f32 %v1379_v36, %v1620_v50  ;;  %v1722_v48 = vmul.f32 %v1379_v36, %v1623_v51 }
  0x9a   : >> { %v210_v49 = vmul.f32 %v1369_v38, %v1620_v50  ;;  %v248_v52 = vmul.f32 %v1369_v38, %v1623_v51  ;;  %v286_v53 = vmul.f32 %v1369_v38, %v1644_v62  ;;  %v1383_v54 = vpop.permute.xlu1 %1382  ;;  %v188_v58 = vmul.f32 %v1369_v38, %v1647_v63 }
  0x9b   : >> { %v1372_v55 = vpop.permute.xlu0 %1371  ;;  %v256_v56 = vrot.slane %v247_v44, 2  ;;  %v294_v57 = vrot.slane %v285_v45, 3  ;;  %v223_v60 = vrot.slane %v212_v46, 1  ;;  %v209_v4 = vmul.f32 %v1368_v47, %v1620_v50 }
  0x9c   : >> { %v219_v61 = vrot.slane %v210_v49, 1  ;;  %v257_v2 = vrot.slane %v248_v52, 2  ;;  %v295_v3 = vrot.slane %v286_v53, 3  ;;  %v1385_v5 = vunpack.i.h.bf16 %v1383_v54 }
  0x9d   : >> { %v1384_v6 = vunpack.i.l.bf16 %v1383_v54  ;;  %v1374_v7 = vunpack.i.h.bf16 %v1372_v55  ;;  %v261_v8 = vrot.slane %v1722_v48, 2  ;;  %v187_v10 = vmul.f32 %v1368_v47, %v1647_v63 }
  0x9e   : >> { %v258_v9 = vsel %vm255_vm0, %v256_v56, %v257_v2  ;;  %v1373_v11 = vunpack.i.l.bf16 %v1372_v55  ;;  %v218_v12 = vrot.slane %v209_v4, 1  ;;  %v323_v13 = vmul.f32 %v1385_v5, %v1656_v14  ;;  %v1393_v30 = vpop.permute.xlu1 %1392 }
  0x9f   : >> { %v1737_v20 = vmul.f32 %v1384_v6, %v1644_v62  ;;  %v1740_v21 = vmul.f32 %v1384_v6, %v1656_v14  ;;  %v296_v35 = vsel %vm293_vm1, %v294_v57, %v295_v3  ;;  %v324_v36 = vmul.f32 %v1369_v38, %v1656_v14 }
  0xa0   : >> { %v211_v22 = vmul.f32 %v1373_v11, %v1620_v50  ;;  %v249_v29 = vmul.f32 %v1373_v11, %v1623_v51  ;;  %v220_v39 = vsel %vm217_vm2, %v218_v12, %v219_v61  ;;  %v332_v44 = vrot.slane %v323_v13, 4 }
  0xa1   : >> { %v190_v45 = vmul.f32 %v1374_v7, %v1647_v63  ;;  %v189_v46 = vmul.f32 %v1373_v11, %v1647_v63  ;;  %v229_v47 = vadd.f32 %v220_v39, %v187_v10  ;;  %v299_v49 = vrot.slane %v1737_v20, 3 }
  0xa2   : >> { %v221_v52 = vrot.slane %v211_v22, 1  ;;  %v259_v53 = vrot.slane %v249_v29, 2  ;;  %v337_v50 = vrot.slane %v1740_v21, 4  ;;  %v287_v51 = vmul.f32 %v1373_v11, %v1644_v62 }
  0xa3   : >> { %v325_v54 = vmul.f32 %v1373_v11, %v1656_v14  ;;  %v1395_v55 = vunpack.i.h.bf16 %v1393_v30  ;;  %v267_v38 = vadd.f32 %v258_v9, %v229_v47  ;;  %v1394_v4 = vunpack.i.l.bf16 %v1393_v30 }
  0xa4   : >> { %v222_v56 = vsel %vm217_vm2, %v219_v61, %v221_v52  ;;  %v224_v57 = vsel %vm217_vm2, %v221_v52, %v223_v60  ;;  %v260_v6 = vsel %vm255_vm0, %v257_v2, %v259_v53  ;;  %v297_v7 = vrot.slane %v287_v51, 3  ;;  %v1388_v61 = vpop.permute.xlu0 %1387 }
  0xa5   : >> { %v230_v5 = vadd.f32 %v222_v56, %v188_v58  ;;  %v231_v63 = vadd.f32 %v224_v57, %v189_v46  ;;  %v335_v10 = vrot.slane %v325_v54, 4  ;;  %v1757_v12 = vmul.f32 %v1395_v55, %v1662_v16  ;;  %v1403_v57 = vpop.permute.xlu1 %1402 }
  0xa6   : >> { %v1760_v62 = vmul.f32 %v1395_v55, %v1665_v17  ;;  %v262_v14 = vsel %vm255_vm0, %v259_v53, %v261_v8  ;;  %v232_v9 = vadd.f32 %v223_v60, %v190_v45  ;;  %v298_v58 = vsel %vm293_vm1, %v295_v3, %v297_v7 }
  0xa7   : >> { %v268_v11 = vadd.f32 %v260_v6, %v230_v5  ;;  %v269_v13 = vadd.f32 %v262_v14, %v231_v63  ;;  %v421_v2 = vrot.slane %v1757_v12, 1  ;;  %v300_v29 = vsel %vm293_vm1, %v297_v7, %v299_v49 }
  0xa8   : >> { %v458_v22 = vrot.slane %v1760_v62, 2  ;;  %v338_v30 = vsel %vm331_vm3, %v335_v10, %v337_v50  ;;  %v410_v46 = vmul.f32 %v1394_v4, %v1662_v16  ;;  %v1776_v60 = vmul.f32 %v1394_v4, %v1665_v17 }
  0xa9   : >> { %v307_v39 = vadd.f32 %v300_v29, %v269_v13  ;;  %v1778_v3 = vunpack.i.h.bf16 %v1388_v61  ;;  %v1389_v45 = vunpack.i.l.bf16 %v1388_v61  ;;  %v305_v47 = vadd.f32 %v296_v35, %v267_v38 }
  0xaa   : >> { %v306_v52 = vadd.f32 %v298_v58, %v268_v11  ;;  %v333_v53 = vrot.slane %v324_v36, 4  ;;  %v388_v54 = vmul.f32 %v1394_v4, %v1659_v15  ;;  %v419_v55 = vrot.slane %v410_v46, 1 }
  0xab   : >> { %v345_v51 = vadd.f32 %v338_v30, %v307_v39  ;;  %v456_v56 = vrot.slane %v1776_v60, 2  ;;  %v387_v5 = vmul.f32 %v1778_v3, %v1659_v15  ;;  %v409_v63 = vmul.f32 %v1778_v3, %v1662_v16 }
  0xac   : >> { %v334_v6 = vsel %vm331_vm3, %v332_v44, %v333_v53  ;;  %v336_v7 = vsel %vm331_vm3, %v333_v53, %v335_v10  ;;  %v422_v36 = vsel %vm217_vm2, %v419_v55, %v421_v2  ;;  %v386_v14 = vmul.f32 %v1389_v45, %v1659_v15  ;;  %v1398_v53 = vpop.permute.xlu0 %1397 }
  0xad   : >> { %v392_v35 = vadd.f32 %v388_v54, %v345_v51  ;;  %v343_v38 = vadd.f32 %v334_v6, %v305_v47  ;;  %v417_v61 = vrot.slane %v409_v63, 1  ;;  %v344_v11 = vadd.f32 %v336_v7, %v306_v52 }
  0xae   : >> { %v408_v58 = vmul.f32 %v1389_v45, %v1662_v16  ;;  %v1405_v13 = vunpack.i.h.bf16 %v1403_v57  ;;  %v1404_v39 = vunpack.i.l.bf16 %v1403_v57  ;;  %v484_v44 = vmul.f32 %v1394_v4, %v1668_v18  ;;  %v1413_v57 = vpop.permute.xlu1 %1412 }
  0xaf   : >> { %v429_v29 = vadd.f32 %v422_v36, %v392_v35  ;;  %v390_v30 = vadd.f32 %v386_v14, %v343_v38  ;;  %v270_v10 = vadd.f32 %v261_v8, %v232_v9  ;;  %v459_v46 = vsel %vm255_vm0, %v456_v56, %v458_v22 }
  0xb0   : >> { %v391_v60 = vadd.f32 %v387_v5, %v344_v11  ;;  %v416_v47 = vrot.slane %v408_v58, 1  ;;  %v420_v52 = vsel %vm217_vm2, %v417_v61, %v419_v55  ;;  %v1801_v16 = vmul.f32 %v1405_v13, %v1671_v19 }
  0xb1   : >> { %v466_v51 = vadd.f32 %v459_v46, %v429_v29  ;;  %v1804_v45 = vmul.f32 %v1404_v39, %v1668_v18  ;;  %v493_v48 = vrot.slane %v484_v44, 3  ;;  %v521_v8 = vmul.f32 %v1394_v4, %v1671_v19 }
  0xb2   : >> { %v418_v54 = vsel %vm217_vm2, %v416_v47, %v417_v61  ;;  %v1809_v9 = vmul.f32 %v1404_v39, %v1671_v19  ;;  %v428_v63 = vadd.f32 %v420_v52, %v391_v60  ;;  %v1400_v55 = vunpack.i.h.bf16 %v1398_v53  ;;  %v1408_v60 = vpop.permute.xlu0 %1407 }
  0xb3   : >> { %v427_v5 = vadd.f32 %v418_v54, %v390_v30  ;;  %v495_v6 = vrot.slane %v1804_v45, 3  ;;  %v1399_v35 = vunpack.i.l.bf16 %v1398_v53  ;;  %v308_v36 = vadd.f32 %v299_v49, %v270_v10 }
  0xb4   : >> { %v532_v7 = vrot.slane %v1809_v9, 4  ;;  %v446_v38 = vmul.f32 %v1778_v3, %v1665_v17  ;;  %v389_v14 = vmul.f32 %v1400_v55, %v1659_v15  ;;  %v483_v61 = vmul.f32 %v1778_v3, %v1668_v18 }
  0xb5   : >> { %v496_v4 = vsel %vm293_vm1, %v493_v48, %v495_v6  ;;  %v1415_v11 = vunpack.i.h.bf16 %v1413_v57  ;;  %v530_v13 = vrot.slane %v521_v8, 4  ;;  %v346_v29 = vadd.f32 %v337_v50, %v308_v36 }
  0xb6   : >> { %v503_v58 = vadd.f32 %v496_v4, %v466_v51  ;;  %v445_v20 = vmul.f32 %v1399_v35, %v1665_v17  ;;  %v454_v49 = vrot.slane %v446_v38, 2  ;;  %v482_v30 = vmul.f32 %v1399_v35, %v1668_v18 }
  0xb7   : >> { %v491_v39 = vrot.slane %v483_v61, 3  ;;  %v1828_v44 = vmul.f32 %v1415_v11, %v1680_v24  ;;  %v533_v15 = vsel %vm331_vm3, %v530_v13, %v532_v7  ;;  %v393_v10 = vadd.f32 %v389_v14, %v346_v29 }
  0xb8   : >> { %v453_v46 = vrot.slane %v445_v20, 2  ;;  %v1836_v21 = vrot.slane %v983_v42, %v1593_v37  ;;  %v527_v17 = vrot.slane %v1801_v16, 4  ;;  %v540_v50 = vadd.f32 %v533_v15, %v503_v58 }
  0xb9   : >> { %v457_v18 = vsel %vm255_vm0, %v454_v49, %v456_v56  ;;  %v490_v47 = vrot.slane %v482_v30, 3  ;;  %v494_v52 = vsel %vm293_vm1, %v491_v39, %v493_v48  ;;  %v1843_v54 = vmul.f32 %v1415_v11, %v1683_v25 }
  0xba   : >> { %v455_v53 = vsel %vm255_vm0, %v453_v46, %v454_v49  ;;  %v465_v51 = vadd.f32 %v457_v18, %v428_v63  ;;  %v616_v55 = vrot.slane %v1828_v44, 1  ;;  %v1414_v27 = vunpack.i.l.bf16 %v1413_v57  ;;  %v1423_v57 = vpop.permute.xlu1 %1422 }
  0xbb   : >> { %v464_v8 = vadd.f32 %v455_v53, %v427_v5  ;;  %v1846_v42 = vunpack.i.h.bf16 %v1408_v60  ;;  %v430_v16 = vadd.f32 %v421_v2, %v393_v10  ;;  %v492_v56 = vsel %vm293_vm1, %v490_v47, %v491_v39  ;;  %v1418_v53 = vpop.permute.xlu0 %1417 }
  0xbc   : >> { %v1409_v35 = vunpack.i.l.bf16 %v1408_v60  ;;  %v520_v63 = vmul.f32 %v1778_v3, %v1671_v19  ;;  %v502_v36 = vadd.f32 %v494_v52, %v465_v51  ;;  %v583_v48 = vmul.f32 %v1414_v27, %v1677_v23 }
  0xbd   : >> { %v605_v38 = vmul.f32 %v1414_v27, %v1680_v24  ;;  %v1856_v5 = vmul.f32 %v1414_v27, %v1683_v25  ;;  %v653_v4 = vrot.slane %v1843_v54, 2  ;;  %v604_v12 = vmul.f32 %v1846_v42, %v1680_v24 }
  0xbe   : >> { %v501_v2 = vadd.f32 %v492_v56, %v464_v8  ;;  %v528_v14 = vrot.slane %v520_v63, 4  ;;  %v587_v61 = vadd.f32 %v583_v48, %v540_v50  ;;  %v603_v3 = vmul.f32 %v1409_v35, %v1680_v24 }
  0xbf   : >> { %v614_v11 = vrot.slane %v605_v38, 1  ;;  %v651_v19 = vrot.slane %v1856_v5, 2  ;;  %v612_v58 = vrot.slane %v604_v12, 1  ;;  %v1425_v49 = vunpack.i.h.bf16 %v1423_v57 }
  0xc0   : >> { %v529_v29 = vsel %vm331_vm3, %v527_v17, %v528_v14  ;;  %v531_v20 = vsel %vm331_vm3, %v528_v14, %v530_v13  ;;  %v582_v39 = vmul.f32 %v1846_v42, %v1677_v23  ;;  %v467_v46 = vadd.f32 %v458_v22, %v430_v16 }
  0xc1   : >> { %v617_v30 = vsel %vm217_vm2, %v614_v11, %v616_v55  ;;  %v538_v15 = vadd.f32 %v529_v29, %v501_v2  ;;  %v539_v10 = vadd.f32 %v531_v20, %v502_v36  ;;  %v581_v24 = vmul.f32 %v1409_v35, %v1677_v23  ;;  %v1911_v20 = vld [vmem:[%s2105_s1 + $0x17] sm:$0x1] }
  0xc2   : >> { %v624_v60 = vadd.f32 %v617_v30, %v587_v61  ;;  %v611_v50 = vrot.slane %v603_v3, 1  ;;  %v654_v13 = vsel %vm255_vm0, %v651_v19, %v653_v4  ;;  %v1424_v18 = vunpack.i.l.bf16 %v1423_v57  ;;  %v1433_v3 = vpop.permute.xlu1 %1432 }
  0xc3   : >> { %v586_v17 = vadd.f32 %v582_v39, %v539_v10  ;;  %v679_v47 = vmul.f32 %v1414_v27, %v1686_v26  ;;  %v615_v51 = vsel %vm217_vm2, %v612_v58, %v614_v11  ;;  %v585_v52 = vadd.f32 %v581_v24, %v538_v15  ;;  %v1428_v10 = vpop.permute.xlu0 %1427 }
  0xc4   : >> { %v1879_v8 = vmul.f32 %v1425_v49, %v1699_v31  ;;  %v1882_v62 = vmul.f32 %v1414_v27, %v1699_v31  ;;  %v661_v22 = vadd.f32 %v654_v13, %v624_v60  ;;  %v613_v16 = vsel %vm217_vm2, %v611_v50, %v612_v58 }
  0xc5   : >> { %v623_v56 = vadd.f32 %v615_v51, %v586_v17  ;;  %v1886_v35 = vmul.f32 %v1424_v18, %v1686_v26  ;;  %v688_v63 = vrot.slane %v679_v47, 3  ;;  %v1889_v36 = vmul.f32 %v1424_v18, %v1699_v31 }
  0xc6   : >> { %v1420_v48 = vunpack.i.h.bf16 %v1418_v53  ;;  %v1419_v38 = vunpack.i.l.bf16 %v1418_v53  ;;  %v504_v57 = vadd.f32 %v495_v6, %v467_v46  ;;  %v641_v27 = vmul.f32 %v1846_v42, %v1683_v25 }
  0xc7   : >> { %v690_v5 = vrot.slane %v1886_v35, 3  ;;  %v678_v12 = vmul.f32 %v1846_v42, %v1686_v26  ;;  %v725_v2 = vrot.slane %v1882_v62, 4  ;;  %v727_v14 = vrot.slane %v1889_v36, 4 }
  0xc8   : >> { %v640_v61 = vmul.f32 %v1419_v38, %v1683_v25  ;;  %v677_v11 = vmul.f32 %v1419_v38, %v1686_v26  ;;  %v584_v6 = vmul.f32 %v1420_v48, %v1677_v23  ;;  %v541_v58 = vadd.f32 %v532_v7, %v504_v57  ;;  %v1916_v25 = vld [vmem:[%s2105_s1 + $0x18] sm:$0x1] }
  0xc9   : >> { %v691_v45 = vsel %vm293_vm1, %v688_v63, %v690_v5  ;;  %v649_v29 = vrot.slane %v641_v27, 2  ;;  %v622_v26 = vadd.f32 %v613_v16, %v585_v52  ;;  %v686_v39 = vrot.slane %v678_v12, 3  ;;  %v1443_v12 = vpop.permute.xlu1 %1442 }
  0xca   : >> { %v698_v49 = vadd.f32 %v691_v45, %v661_v22  ;;  %v648_v30 = vrot.slane %v640_v61, 2  ;;  %v728_v23 = vsel %vm331_vm3, %v725_v2, %v727_v14  ;;  %v588_v9 = vadd.f32 %v584_v6, %v541_v58 }
  0xcb   : >> { %v685_v7 = vrot.slane %v677_v11, 3  ;;  %v1435_v15 = vunpack.i.h.bf16 %v1433_v3  ;;  %v652_v60 = vsel %vm255_vm0, %v649_v29, %v651_v19  ;;  %v1057_v24 = vunpack.c.l.bf16 %v1911_v20 }
  0xcc   : >> { %v735_v46 = vadd.f32 %v728_v23, %v698_v49  ;;  %v1094_v50 = vunpack.c.l.bf16 %v1916_v25  ;;  %v650_v13 = vsel %vm255_vm0, %v648_v30, %v649_v29  ;;  %v660_v17 = vadd.f32 %v652_v60, %v623_v56 }
  0xcd   : >> { %v1926_v18 = vmul.f32 %v1435_v15, %v1705_v33  ;;  %v1929_v47 = vmul.f32 %v1435_v15, %v1708_v34  ;;  %v659_v53 = vadd.f32 %v650_v13, %v622_v26  ;;  %v1434_v51 = vunpack.i.l.bf16 %v1433_v3 }
  0xce   : >> { %v1931_v52 = vunpack.i.h.bf16 %v1428_v10  ;;  %v1429_v62 = vunpack.i.l.bf16 %v1428_v10  ;;  %v722_v19 = vrot.slane %v1879_v8, 4  ;;  %v625_v22 = vadd.f32 %v616_v55, %v588_v9  ;;  %v1438_v10 = vpop.permute.xlu0 %1437 }
  0xcf   : >> { %v687_v16 = vsel %vm293_vm1, %v685_v7, %v686_v39  ;;  %v689_v56 = vsel %vm293_vm1, %v686_v39, %v688_v63  ;;  %v811_v48 = vrot.slane %v1926_v18, 1  ;;  %v778_v38 = vmul.f32 %v1434_v51, %v1702_v32 }
  0xd0   : >> { %v800_v57 = vmul.f32 %v1434_v51, %v1705_v33  ;;  %v1942_v27 = vmul.f32 %v1434_v51, %v1708_v34  ;;  %v697_v61 = vadd.f32 %v689_v56, %v660_v17  ;;  %v848_v8 = vrot.slane %v1929_v47, 2 }
  0xd1   : >> { %v799_v44 = vmul.f32 %v1931_v52, %v1705_v33  ;;  %v715_v55 = vmul.f32 %v1846_v42, %v1699_v31  ;;  %v782_v63 = vadd.f32 %v778_v38, %v735_v46  ;;  %v696_v3 = vadd.f32 %v687_v16, %v659_v53 }
  0xd2   : >> { %v809_v11 = vrot.slane %v800_v57, 1  ;;  %v798_v45 = vmul.f32 %v1429_v62, %v1705_v33  ;;  %v846_v6 = vrot.slane %v1942_v27, 2  ;;  %v1445_v29 = vunpack.i.h.bf16 %v1443_v12  ;;  %v1448_v28 = vpop.permute.xlu0 %1447 }
  0xd3   : >> { %v723_v58 = vrot.slane %v715_v55, 4  ;;  %v1444_v26 = vunpack.i.l.bf16 %v1443_v12  ;;  %v662_v49 = vadd.f32 %v653_v4, %v625_v22  ;;  %v777_v31 = vmul.f32 %v1931_v52, %v1702_v32 }
  0xd4   : >> { %v812_v30 = vsel %vm217_vm2, %v809_v11, %v811_v48  ;;  %v807_v42 = vrot.slane %v799_v44, 1  ;;  %v1961_v9 = vmul.f32 %v1434_v51, %v1711_v40  ;;  %v776_v54 = vmul.f32 %v1429_v62, %v1702_v32 }
  0xd5   : >> { %v819_v39 = vadd.f32 %v812_v30, %v782_v63  ;;  %v724_v23 = vsel %vm331_vm3, %v722_v19, %v723_v58  ;;  %v726_v33 = vsel %vm331_vm3, %v723_v58, %v725_v2  ;;  %v806_v4 = vrot.slane %v798_v45, 1 }
  0xd6   : >> { %v733_v7 = vadd.f32 %v724_v23, %v696_v3  ;;  %v734_v15 = vadd.f32 %v726_v33, %v697_v61  ;;  %v849_v46 = vsel %vm255_vm0, %v846_v6, %v848_v8  ;;  %v1968_v60 = vmul.f32 %v1445_v29, %v1714_v41  ;;  %v1453_v61 = vpop.permute.xlu1 %1452 }
  0xd7   : >> { %v1971_v13 = vmul.f32 %v1444_v26, %v1711_v40  ;;  %v1974_v2 = vmul.f32 %v1434_v51, %v1714_v41  ;;  %v856_v17 = vadd.f32 %v849_v46, %v819_v39  ;;  %v810_v53 = vsel %vm217_vm2, %v807_v42, %v809_v11 }
  0xd8   : >> { %v780_v19 = vadd.f32 %v776_v54, %v733_v7  ;;  %v1978_v62 = vmul.f32 %v1444_v26, %v1714_v41  ;;  %v883_v22 = vrot.slane %v1961_v9, 3  ;;  %v1439_v56 = vunpack.i.l.bf16 %v1438_v10 }
  0xd9   : >> { %v885_v16 = vrot.slane %v1971_v13, 3  ;;  %v699_v38 = vadd.f32 %v690_v5, %v662_v49  ;;  %v781_v57 = vadd.f32 %v777_v31, %v734_v15  ;;  %v808_v27 = vsel %vm217_vm2, %v806_v4, %v807_v42 }
  0xda   : >> { %v920_v51 = vrot.slane %v1974_v2, 4  ;;  %v1440_v12 = vunpack.i.h.bf16 %v1438_v10  ;;  %v922_v55 = vrot.slane %v1978_v62, 4  ;;  %v835_v63 = vmul.f32 %v1439_v56, %v1708_v34 }
  0xdb   : >> { %v886_v44 = vsel %vm293_vm1, %v883_v22, %v885_v16  ;;  %v836_v11 = vmul.f32 %v1931_v52, %v1708_v34  ;;  %v817_v35 = vadd.f32 %v808_v27, %v780_v19  ;;  %v736_v3 = vadd.f32 %v727_v14, %v699_v38 }
  0xdc   : >> { %v893_v5 = vadd.f32 %v886_v44, %v856_v17  ;;  %v872_v45 = vmul.f32 %v1439_v56, %v1711_v40  ;;  %v843_v58 = vrot.slane %v835_v63, 2  ;;  %v873_v26 = vmul.f32 %v1931_v52, %v1711_v40 }
  0xdd   : >> { %v844_v29 = vrot.slane %v836_v11, 2  ;;  %v1455_v49 = vunpack.i.h.bf16 %v1453_v61  ;;  %v818_v30 = vadd.f32 %v810_v53, %v781_v57  ;;  %v2001_v31 = vrot.slane %v1020_v43, %v1593_v37 }
  0xde   : >> { %v2003_v34 = vunpack.i.l.bf16 %v1453_v61  ;;  %v2008_v36 = vrot.slane %v1057_v24, %v1593_v37  ;;  %v923_v40 = vsel %vm331_vm3, %v920_v51, %v922_v55  ;;  %v779_v14 = vmul.f32 %v1440_v12, %v1702_v32 }
  0xdf   : >> { %v2017_v42 = vmul.f32 %v1455_v49, %v1836_v21  ;;  %v1103_v43 = vrot.slane %v1094_v50, %v1593_v37  ;;  %v917_v20 = vrot.slane %v1968_v60, 4  ;;  %v930_v24 = vadd.f32 %v923_v40, %v893_v5  ;;  %v1463_v37 = vpop.permute.xlu1 %1462 }
  0xe0   : >> { %v845_v39 = vsel %vm255_vm0, %v843_v58, %v844_v29  ;;  %v880_v23 = vrot.slane %v872_v45, 3  ;;  %v783_v33 = vadd.f32 %v779_v14, %v736_v3  ;;  %v847_v9 = vsel %vm255_vm0, %v844_v29, %v846_v6  ;;  %v1458_v29 = vpop.permute.xlu0 %1457 }
  0xe1   : >> { %v854_v7 = vadd.f32 %v845_v39, %v817_v35  ;;  %v881_v15 = vrot.slane %v873_v26, 3  ;;  %v855_v32 = vadd.f32 %v847_v9, %v818_v30  ;;  %v973_v54 = vmul.f32 %v2003_v34, %v1729_v59 }
  0xe2   : >> { %v995_v4 = vmul.f32 %v2003_v34, %v1836_v21  ;;  %v1450_v25 = vunpack.i.h.bf16 %v1448_v28  ;;  %v1006_v50 = vrot.slane %v2017_v42, 1  ;;  %v2031_v10 = vmul.f32 %v1455_v49, %v2001_v31 }
  0xe3   : >> { %v2035_v46 = vmul.f32 %v2003_v34, %v2001_v31  ;;  %v1449_v6 = vunpack.i.l.bf16 %v1448_v28  ;;  %v882_v60 = vsel %vm293_vm1, %v880_v23, %v881_v15  ;;  %v977_v17 = vadd.f32 %v973_v54, %v930_v24 }
  0xe4   : >> { %v1004_v53 = vrot.slane %v995_v4, 1  ;;  %v994_v19 = vmul.f32 %v1450_v25, %v1836_v21  ;;  %v884_v56 = vsel %vm293_vm1, %v881_v15, %v883_v22  ;;  %v910_v38 = vmul.f32 %v1931_v52, %v1714_v41 }
  0xe5   : >> { %v993_v57 = vmul.f32 %v1449_v6, %v1836_v21  ;;  %v1465_v27 = vunpack.i.h.bf16 %v1463_v37  ;;  %v820_v12 = vadd.f32 %v811_v48, %v783_v33  ;;  %v892_v61 = vadd.f32 %v884_v56, %v855_v32 }
  0xe6   : >> { %v891_v44 = vadd.f32 %v882_v60, %v854_v7  ;;  %v1464_v63 = vunpack.i.l.bf16 %v1463_v37  ;;  %v1043_v11 = vrot.slane %v2031_v10, 2  ;;  %v1007_v35 = vsel %vm217_vm2, %v1004_v53, %v1006_v50 }
  0xe7   : >> { %v1041_v22 = vrot.slane %v2035_v46, 2  ;;  %v918_v5 = vrot.slane %v910_v38, 4  ;;  %v1014_v3 = vadd.f32 %v1007_v35, %v977_v17  ;;  %v972_v41 = vmul.f32 %v1450_v25, %v1729_v59 }
  0xe8   : >> { %v1002_v21 = vrot.slane %v994_v19, 1  ;;  %v971_v52 = vmul.f32 %v1449_v6, %v1729_v59  ;;  %v1001_v45 = vrot.slane %v993_v57, 1  ;;  %v1104_v58 = vmul.f32 %v1465_v27, %v1103_v43 }
  0xe9   : >> { %v919_v18 = vsel %vm331_vm3, %v917_v20, %v918_v5  ;;  %v921_v48 = vsel %vm331_vm3, %v918_v5, %v920_v51  ;;  %v1069_v30 = vmul.f32 %v2003_v34, %v2008_v36  ;;  %v1070_v40 = vmul.f32 %v1464_v63, %v2008_v36 }
  0xea   : >> { %v928_v26 = vadd.f32 %v919_v18, %v891_v44  ;;  %v929_v49 = vadd.f32 %v921_v48, %v892_v61  ;;  %v857_v14 = vadd.f32 %v848_v8, %v820_v12  ;;  %v1044_v28 = vsel %vm255_vm0, %v1041_v22, %v1043_v11 }
  0xeb   : >> { %v1105_v2 = vmul.f32 %v1450_v25, %v1103_v43  ;;  %v1005_v51 = vsel %vm217_vm2, %v1002_v21, %v1004_v53  ;;  %v1459_v39 = vunpack.i.l.bf16 %v1458_v29  ;;  %v1051_v23 = vadd.f32 %v1044_v28, %v1014_v3 }
  0xec   : >> { %v975_v20 = vadd.f32 %v971_v52, %v928_v26  ;;  %v976_v24 = vadd.f32 %v972_v41, %v929_v49  ;;  %v1003_v33 = vsel %vm217_vm2, %v1001_v45, %v1002_v21  ;;  %v1112_v9 = vrot.slane %v1104_v58, 4 }
  0xed   : >> { %v1460_v7 = vunpack.i.h.bf16 %v1458_v29  ;;  %v1078_v15 = vrot.slane %v1069_v30, 3  ;;  %v1080_v32 = vrot.slane %v1070_v40, 3  ;;  %v1106_v47 = vmul.f32 %v2003_v34, %v1103_v43 }
  0xee   : >> { %v1107_v8 = vmul.f32 %v1464_v63, %v1103_v43  ;;  %v1113_v54 = vrot.slane %v1105_v2, 4  ;;  %v894_v4 = vadd.f32 %v885_v16, %v857_v14  ;;  %v1030_v37 = vmul.f32 %v1459_v39, %v2001_v31 }
  0xef   : >> { %v1031_v46 = vmul.f32 %v1450_v25, %v2001_v31  ;;  %v1012_v6 = vadd.f32 %v1003_v33, %v975_v20  ;;  %v1013_v60 = vadd.f32 %v1005_v51, %v976_v24  ;;  %v1067_v17 = vmul.f32 %v1459_v39, %v2008_v36 }
  0xf0   : >> { %v1068_v53 = vmul.f32 %v1450_v25, %v2008_v36  ;;  %v974_v19 = vmul.f32 %v1460_v7, %v1729_v59  ;;  %v931_v34 = vadd.f32 %v922_v55, %v894_v4  ;;  %v1038_v43 = vrot.slane %v1030_v37, 2 }
  0xf1   : >> { %v1039_v56 = vrot.slane %v1031_v46, 2  ;;  %v1081_v13 = vsel %vm293_vm1, %v1078_v15, %v1080_v32  ;;  %v1115_v16 = vrot.slane %v1106_v47, 4  ;;  %v1075_v38 = vrot.slane %v1067_v17, 3 }
  0xf2   : >> { %v1076_v57 = vrot.slane %v1068_v53, 3  ;;  %v1117_v27 = vrot.slane %v1107_v8, 4  ;;  %v978_v31 = vadd.f32 %v974_v19, %v931_v34  ;;  %v1088_v44 = vadd.f32 %v1081_v13, %v1051_v23 }
  0xf3   : >> { %v1040_v12 = vsel %vm255_vm0, %v1038_v43, %v1039_v56  ;;  %v1042_v61 = vsel %vm255_vm0, %v1039_v56, %v1041_v22  ;;  %v1114_v5 = vsel %vm331_vm3, %v1112_v9, %v1113_v54  ;;  %v1116_v22 = vsel %vm331_vm3, %v1113_v54, %v1115_v16 }
  0xf4   : >> { %v1049_v36 = vadd.f32 %v1040_v12, %v1012_v6  ;;  %v1050_v25 = vadd.f32 %v1042_v61, %v1013_v60  ;;  %v1015_v59 = vadd.f32 %v1006_v50, %v978_v31  ;;  %v1077_v62 = vsel %vm293_vm1, %v1075_v38, %v1076_v57 }
  0xf5   : >> { %v1079_v55 = vsel %vm293_vm1, %v1076_v57, %v1078_v15  ;;  %v1118_v3 = vsel %vm331_vm3, %v1115_v16, %v1117_v27 }
  0xf6   : >> { %v1086_v63 = vadd.f32 %v1077_v62, %v1049_v36  ;;  %v1087_v35 = vadd.f32 %v1079_v55, %v1050_v25  ;;  %v1052_v41 = vadd.f32 %v1043_v11, %v1015_v59  ;;  %v1125_v21 = vadd.f32 %v1118_v3, %v1088_v44 }
  0xf8   : >> { %v1123_v52 = vadd.f32 %v1114_v5, %v1086_v63  ;;  %v1124_v18 = vadd.f32 %v1116_v22, %v1087_v35  ;;  %v1089_v42 = vadd.f32 %v1080_v32, %v1052_v41  ;;  %v1140_v29 = vmul.f32 %v1125_v21, %v1125_v21 }
  0xfa   : >> { %v1127_v50 = vadd.f32 %v1124_v18, %v1123_v52  ;;  %v1138_v48 = vmul.f32 %v1123_v52, %v1123_v52  ;;  %v1139_v45 = vmul.f32 %v1124_v18, %v1124_v18  ;;  %v1126_v58 = vadd.f32 %v1117_v27, %v1089_v42 }
  0xfc   : >> { %v1128_v26 = vadd.f32 %v1127_v50, %v1125_v21  ;;  %v1142_v49 = vadd.f32 %v1139_v45, %v1138_v48  ;;  %v1129_v30 = vsel %vm331_vm3, %v1126_v58, 0.0  ;;  %v1141_v40 = vmul.f32 %v1126_v58, %v1126_v58 }
  0xfe   : >> { %v1130_v14 = vadd.f32 %v1129_v30, %v1128_v26  ;;  %v1143_v28 = vadd.f32 %v1142_v49, %v1140_v29  ;;  %v1144_v10 = vsel %vm331_vm3, %v1141_v40, 0.0 }
 0x100   : >> { %v1131_v11 = vrot.slane %v1130_v14, 4  ;;  %v1145_v2 = vadd.f32 %v1144_v10, %v1143_v28 }
 0x102   : >> { %v1132_v51 = vadd.f32 %v1131_v11, %v1130_v14  ;;  %v1146_v20 = vrot.slane %v1145_v2, 4 }
 0x104   : >> { %v1133_v24 = vrot.slane %v1132_v51, 2  ;;  %v1147_v39 = vadd.f32 %v1146_v20, %v1145_v2 }
 0x106   : >> { %v1134_v23 = vadd.f32 %v1133_v24, %v1132_v51  ;;  %v1148_v33 = vrot.slane %v1147_v39, 2 }
 0x108   : >> { %v1135_v9 = vrot.slane %v1134_v23, 1  ;;  %v1149_v7 = vadd.f32 %v1148_v33, %v1147_v39 }
 0x10a   : >> { %v1136_v15 = vadd.f32 %v1135_v9, %v1134_v23  ;;  %v1150_v32 = vrot.slane %v1149_v7, 1  ;;  %146 = sbr.rel (!%p144_p4) target bundleno = 16 (0x10), region = 94 }
 0x10c   : >> { %v1137_v47 = vadd.f32 %v1492_v1, %v1136_v15   ;;  %v1151_v8 = vadd.f32 %v1150_v32, %v1149_v7 }
 0x10e   : >> { %v1152_v54 = vadd.f32 %v1488_v0, %v1151_v8   ;;  %v2108_v1 = vmov %v1137_v47  ;;  %1153 = vst [vmem:[%s1530_s18] sm:$0x1] (%p144_p4), %v1137_v47 }
 0x110   : >> { %v2107_v0 = vmov %v1152_v54  ;;  %1154 = vst [vmem:[%s1530_s18 + $0x1] sm:$0x1] (%p144_p4), %v1152_v54 }
 0x111 PF: > { %s12_s9 = sadd.s32 1, %s1484_s9  }
 0x112   : > { %p9_p5 = scmp.ge.s32.totalorder %s12_s9, 4  }
 0x114   :  { %11 = sbr.rel (!%p9_p5) target bundleno = 1 (0x1), region = 105 }

// kernel: convnet_forward.6
= control target key start
LH: loop header
LB: loop body
LE: loop exit
PB: predicated region body
PF: predicated region fallthrough
CT: control target
= control target key end

     0   :  { %s2446_s15 = smov 0   ;;  %s3740_s0 = inlined_call_operand.vmem [shape: bf16[2,32,32,1], index: 0, kind: input, shape index: {}]   ;;  %s3741_s1 = inlined_call_operand.vmem [shape: bf16[25,1,128], index: 1, kind: input, shape index: {}]   ;;  %s3742_s2 = inlined_call_operand.vmem [shape: f32[1,128], index: 2, kind: input, shape index: {}]   ;;  %s3743_s3 = inlined_call_operand.vmem [shape: f32[1,128], index: 3, kind: input, shape index: {}]   ;;  %s3744_s4 = inlined_call_operand.vmem [shape: bf16[2,14,14,128], index: 4, kind: output, shape index: {}]  }
   0x1 LB: > { %s2069_s16 = sadd.s32 4294967295, %s2412_s15   ;;  %p2073_p0 = scmp.ge.s32.totalorder %s2412_s15, 1  ;;  %s2412_s15 = sphi %s2446_s15, %s14_s15  }
   0x2   : > { %p162_p1 = scmp.lt.s32.totalorder %s2412_s15, 3 }
   0x4   : > { %p163_p2 = pnand %p2073_p0, %p162_p1 }
   0x5   : > { %p188_p3 = scmp.lt.s32.totalorder (!%p163_p2), %s2069_s16, 1  ;;  %v2457_v0 = vld [vmem:[%s3742_s2] ss:$0 sm:$0xff] (!%p163_p2)  ;;  %v200_v2 = vlaneseq (!%p163_p2)  ;;  %v2418_v9 = vmov (!%p163_p2), 0.0   ;;  %s2486_s29 = smov (!%p163_p2), 0  }
   0x6   : > { %166 = sbr.rel (%p163_p2) target bundleno = 582 (0x246), region = 36  ;;  %3786 = vst [vmem:[#allocation2_spill] sm:$0xff] (!%p163_p2), %v2457_v0  ;;  %v2462_v1 = vld [vmem:[%s3743_s3] ss:$0 sm:$0xff] (!%p163_p2) }
   0x7   : > { %3787 = vst [vmem:[#allocation3_spill] sm:$0xff] (!%p163_p2), %v2462_v1  ;;  %v2464_v3 = vshrl.u32 (!%p163_p2), %v200_v2, 7  ;;  %v204_v4 = vand.u32 (!%p163_p2), 127, %v200_v2 }
   0x9   : > { %3788 = vst [vmem:[#allocation4_spill] sm:$0xff] (!%p163_p2), %v2464_v3  ;;  %v202_v5 = vadd.s32 (!%p163_p2), 8, %v2464_v3  ;;  %v205_v6 = vmul.u32 (!%p163_p2), 2, %v2464_v3 }
   0xb   : > { %v206_v7 = vmul.u32 (!%p163_p2), 2, %v202_v5  ;;  %vm207_vm0 = vcmp.eq.s32.totalorder (!%p163_p2), %v204_v4, %v205_v6  ;;  %v213_v8 = vadd.s32 (!%p163_p2), 1, %v205_v6 }
   0xc   : > { %v2478_v10 = vsel (!%p163_p2), %vm207_vm0, 1.0, %v2418_v9 }
   0xd   : > { %s3884_s16 = smov (!%p188_p3, %s2069_s16), 1  ;;  %3789 = vst [vmem:[#allocation5_spill] sm:$0xff] %v2478_v10  ;;  %vm208_vm1 = vcmp.eq.s32.totalorder %v204_v4, %v206_v7  ;;  %v214_v11 = vadd.s32 1, %v206_v7  ;;  %vm215_vm2 = vcmp.eq.s32.totalorder %v204_v4, %v213_v8 }
   0xe   : > { %s2171_s21 = sshll.u32 %s3884_s16, 9  ;;  %s2265_s22 = smul.u32 112, %s3884_s16  ;;  %v2480_v12 = vsel %vm208_vm1, 1.0, %v2418_v9  ;;  %v2482_v13 = vsel %vm215_vm2, 1.0, %v2418_v9 }
   0xf   : > { %s2471_s25 = scalar_lea.vmem %s3740_s0, %s2171_s21  ;;  %3790 = vst [vmem:[#allocation6_spill] sm:$0xff] %v2480_v12  ;;  %3791 = vst [vmem:[#allocation7_spill] sm:$0xff] %v2482_v13  ;;  %vm216_vm3 = vcmp.eq.s32.totalorder %v204_v4, %v214_v11 }
  0x10   : > { %s2476_s28 = scalar_lea.vmem %s3744_s4, %s2265_s22  ;;  %v2484_v14 = vsel %vm216_vm3, 1.0, %v2418_v9 }
  0x11   : > { %3792 = vst [vmem:[#allocation8_spill] sm:$0xff] %v2484_v14 }
  0x12 LB: >> { %v2419_v15 = vmov 0   ;;  %s2173_s30 = sshll.u32 %s2416_s29, 5  ;;  %v3793_v3 = vld [vmem:[#allocation4_spill] sm:$0xff]  ;;  %vm295_vm4 = vcmask 1046528   ;;  %vm333_vm5 = vcmask 1045504   ;;  %vm371_vm6 = vcmask 1044480   ;;  %s2416_s29 = sphi %s2486_s29, %s226_s29  }
  0x13   : >> { %2296 = vset.pattern.permute.xlu1 %v2419_v15  ;;  %2285 = vset.pattern.permute.xlu0 %v2419_v15  ;;  %s2493_s5 = scalar_lea.vmem %s2471_s25, %s2173_s30  ;;  %vm409_vm7 = vcmask 1043456   ;;  %vm1805_vm8 = vcmask 228352   ;;  %vm2420_vm9 = vmmov 1   ;;  %s2181_s12 = sshll.u32 %s2416_s29, 3 }
  0x14   : >> { %v2206_v16 = vld [vmem:[%s2493_s5 + $0x10] sm:$0xff]   ;;  %v2092_v17 = vld [vmem:[%s2493_s5 + $0x18] sm:$0xff]   ;;  %v2183_v18 = vld [vmem:[%s2493_s5] sm:$0xff]   ;;  %s1982_s13 = scalar_lea.vmem %s2476_s28, %s2181_s12  ;;  %s226_s29 = sadd.s32 1, %s2416_s29  }
  0x15   : >> { %v2189_v19 = vunpack.c.h.bf16 %v2206_v16  ;;  %v437_v20 = vunpack.c.l.bf16 %v2092_v17  ;;  %v2188_v21 = vunpack.c.l.bf16 %v2206_v16  ;;  %v2184_v22 = vunpack.c.l.bf16 %v2183_v18  ;;  %v311_v23 = vld [vmem:[%s2493_s5] sm:$0xe]  ;;  %v2097_v24 = vld [vmem:[%s2493_s5 + $0x10] sm:$0xe]  ;;  %v233_v25 = vld [vmem:[%s2493_s5 + $0x8] sm:$0xff]   ;;  %p223_p4 = scmp.ge.s32.totalorder %s226_s29, 14  }
  0x16   : >> { %v2185_v26 = vunpack.c.h.bf16 %v2183_v18  ;;  %v314_v27 = vunpack.c.l.bf16 %v311_v23  ;;  %v512_v28 = vunpack.c.l.bf16 %v2097_v24  ;;  %v238_v29 = vunpack.c.l.bf16 %v233_v25  ;;  %v387_v30 = vld [vmem:[%s2493_s5] sm:$0xc]  ;;  %v2101_v31 = vld [vmem:[%s2493_s5 + $0x10] sm:$0xc]  ;;  %v273_v33 = vld [vmem:[%s2493_s5 + $0xc] sm:$0x7] }
  0x17   : >> { %v2297_v32 = vpack.i.bf16 %v437_v20, %v2189_v19  ;;  %v2095_v34 = vld [vmem:[%s2493_s5 + $0x1c] sm:$0x7]  ;;  %v390_v37 = vunpack.c.l.bf16 %v387_v30  ;;  %v586_v38 = vunpack.c.l.bf16 %v2101_v31  ;;  %v276_v40 = vunpack.c.l.bf16 %v273_v33  ;;  %v234_v42 = vld [vmem:[%s2493_s5 + $0xc] sm:$0x3]  ;;  %v2112_v51 = vld [vmem:[%s2493_s5 + $0x20] sm:$0xe] }
  0x18   : >> { %v2286_v35 = vpack.i.bf16 %v2185_v26, %v2184_v22  ;;  %v2302_v36 = vpack.i.bf16 %v512_v28, %v314_v27  ;;  %v2291_v39 = vpack.i.bf16 %v2188_v21, %v238_v29  ;;  %v475_v41 = vunpack.c.l.bf16 %v2095_v34  ;;  %v2093_v43 = vld [vmem:[%s2493_s5 + $0x1c] sm:$0x3]  ;;  %v2107_v50 = vld [vmem:[%s2493_s5 + $0x28] sm:$0xff]   ;;  %v2207_v52 = vld [vmem:[%s2493_s5 + $0x20] sm:$0xff]  }
  0x19   : >> { %2298 = vperm.xlu1 %2296, %v2297_v32   ;;  %v2312_v44 = vpack.i.bf16 %v586_v38, %v390_v37  ;;  %v352_v45 = vunpack.c.h.bf16 %v233_v25  ;;  %v549_v46 = vunpack.c.h.bf16 %v2092_v17  ;;  %v239_v48 = vunpack.c.l.bf16 %v234_v42  ;;  %v2116_v59 = vld [vmem:[%s2493_s5 + $0x20] sm:$0xc]  ;;  %v2108_v60 = vld [vmem:[%s2493_s5 + $0x2c] sm:$0x3]  ;;  %v2122_v7 = vld [vmem:[%s2493_s5 + $0x38] sm:$0xff]  }
  0x1a   : >> { %2287 = vperm.xlu0 %2285, %v2286_v35   ;;  %v2307_v47 = vpack.i.bf16 %v475_v41, %v276_v40  ;;  %v438_v49 = vunpack.c.l.bf16 %v2093_v43  ;;  %v632_v54 = vunpack.c.l.bf16 %v2107_v50  ;;  %v707_v55 = vunpack.c.l.bf16 %v2112_v51  ;;  %v2110_v61 = vld [vmem:[%s2493_s5 + $0x2c] sm:$0x7]  ;;  %v2127_v8 = vld [vmem:[%s2493_s5 + $0x30] sm:$0xe]  ;;  %v2123_v21 = vld [vmem:[%s2493_s5 + $0x3c] sm:$0x3] }
  0x1b   : >> { %v2322_v53 = vpack.i.bf16 %v549_v46, %v352_v45  ;;  %v2192_v57 = vunpack.c.l.bf16 %v2207_v52  ;;  %v2193_v58 = vunpack.c.h.bf16 %v2207_v52  ;;  %v744_v63 = vunpack.c.h.bf16 %v2107_v50  ;;  %v2208_v9 = vld [vmem:[%s2493_s5 + $0x30] sm:$0xff]   ;;  %v2125_v22 = vld [vmem:[%s2493_s5 + $0x3c] sm:$0x7]  ;;  %v2137_v29 = vld [vmem:[%s2493_s5 + $0x48] sm:$0xff]  }
  0x1c   : >> { %v2317_v56 = vpack.i.bf16 %v438_v49, %v239_v48  ;;  %v2332_v62 = vpack.i.bf16 %v707_v55, %v632_v54  ;;  %v781_v2 = vunpack.c.l.bf16 %v2116_v59  ;;  %v633_v5 = vunpack.c.l.bf16 %v2108_v60  ;;  %v2131_v20 = vld [vmem:[%s2493_s5 + $0x30] sm:$0xc]  ;;  %v2142_v30 = vld [vmem:[%s2493_s5 + $0x40] sm:$0xe]  ;;  %v2140_v40 = vld [vmem:[%s2493_s5 + $0x4c] sm:$0x7] }
  0x1d   : >> { %2303 = vperm.xlu1 %2296, %v2302_v36   ;;  %v2327_v4 = vpack.i.bf16 %v2193_v58, %v2192_v57  ;;  %v670_v6 = vunpack.c.l.bf16 %v2110_v61  ;;  %v827_v15 = vunpack.c.l.bf16 %v2122_v7  ;;  %v902_v16 = vunpack.c.l.bf16 %v2127_v8  ;;  %v2209_v31 = vld [vmem:[%s2493_s5 + $0x40] sm:$0xff]   ;;  %v2155_v48 = vld [vmem:[%s2493_s5 + $0x50] sm:$0xe]  ;;  %v2154_v57 = vld [vmem:[%s2493_s5 + $0x5c] sm:$0x7] }
  0x1e   : >> { %2292 = vperm.xlu0 %2285, %v2291_v39   ;;  %v2342_v11 = vpack.i.bf16 %v744_v63, %v781_v2  ;;  %v2196_v18 = vunpack.c.l.bf16 %v2208_v9  ;;  %v2197_v19 = vunpack.c.h.bf16 %v2208_v9  ;;  %v939_v24 = vunpack.c.h.bf16 %v2122_v7  ;;  %v2146_v38 = vld [vmem:[%s2493_s5 + $0x40] sm:$0xc]  ;;  %v2138_v39 = vld [vmem:[%s2493_s5 + $0x4c] sm:$0x3]  ;;  %v2210_v49 = vld [vmem:[%s2493_s5 + $0x50] sm:$0xff]  }
  0x1f   : >> { %v2337_v17 = vpack.i.bf16 %v633_v5, %v670_v6  ;;  %v2352_v23 = vpack.i.bf16 %v902_v16, %v827_v15  ;;  %v976_v25 = vunpack.c.l.bf16 %v2131_v20  ;;  %v828_v27 = vunpack.c.l.bf16 %v2123_v21  ;;  %v2157_v60 = vld [vmem:[%s2493_s5 + $0x50] sm:$0xc]  ;;  %v235_v5 = vld [vmem:[%s3741_s1] sm:$0x1]  ;;  %v2084_v6 = vld [vmem:[%s3741_s1 + $0x1] sm:$0x1] }
  0x20   : >> { %v2347_v26 = vpack.i.bf16 %v2197_v19, %v2196_v18  ;;  %v865_v28 = vunpack.c.l.bf16 %v2125_v22  ;;  %v1022_v33 = vunpack.c.l.bf16 %v2137_v29  ;;  %v1097_v34 = vunpack.c.l.bf16 %v2142_v30  ;;  %v2085_v7 = vld [vmem:[%s3741_s1 + $0x2] sm:$0x1]  ;;  %v2086_v8 = vld [vmem:[%s3741_s1 + $0x3] sm:$0x1]  ;;  %v2098_v9 = vld [vmem:[%s3741_s1 + $0x7] sm:$0x1] }
  0x21   : >> { %2313 = vperm.xlu1 %2296, %v2312_v44   ;;  %v2362_v32 = vpack.i.bf16 %v939_v24, %v976_v25  ;;  %v2200_v36 = vunpack.c.l.bf16 %v2209_v31  ;;  %v2201_v37 = vunpack.c.h.bf16 %v2209_v31  ;;  %v1134_v42 = vunpack.c.h.bf16 %v2137_v29  ;;  %v2094_v15 = vld [vmem:[%s3741_s1 + $0x5] sm:$0x1]  ;;  %v2096_v18 = vld [vmem:[%s3741_s1 + $0x6] sm:$0x1]  ;;  %v2087_v19 = vld [vmem:[%s3741_s1 + $0x4] sm:$0x1] }
  0x22   : >> { %2308 = vperm.xlu0 %2285, %v2307_v47   ;;  %v2357_v35 = vpack.i.bf16 %v828_v27, %v865_v28  ;;  %v2372_v41 = vpack.i.bf16 %v1097_v34, %v1022_v33  ;;  %v1171_v43 = vunpack.c.l.bf16 %v2146_v38  ;;  %v1023_v45 = vunpack.c.l.bf16 %v2138_v39  ;;  %v2152_v47 = vld [vmem:[%s2493_s5 + $0x58] sm:$0xff]   ;;  %v2102_v22 = vld [vmem:[%s3741_s1 + $0x9] sm:$0x1]  ;;  %v2113_v27 = vld [vmem:[%s3741_s1 + $0xc] sm:$0x1] }
  0x23   : >> { %v2367_v44 = vpack.i.bf16 %v2201_v37, %v2200_v36  ;;  %v1060_v46 = vunpack.c.l.bf16 %v2140_v40  ;;  %v1615_v51 = vunpack.c.l.bf16 %v2152_v47  ;;  %v1676_v52 = vunpack.c.l.bf16 %v2155_v48  ;;  %v2115_v28 = vld [vmem:[%s3741_s1 + $0xd] sm:$0x1]  ;;  %v2109_v33 = vld [vmem:[%s3741_s1 + $0xa] sm:$0x1]  ;;  %v2111_v34 = vld [vmem:[%s3741_s1 + $0xb] sm:$0x1] }
  0x24   : >> { %v2382_v50 = vpack.i.bf16 %v1134_v42, %v1171_v43  ;;  %v2204_v54 = vunpack.c.l.bf16 %v2210_v49  ;;  %v2205_v55 = vunpack.c.h.bf16 %v2210_v49  ;;  %v1736_v63 = vunpack.c.l.bf16 %v2157_v60  ;;  %v2117_v39 = vld [vmem:[%s3741_s1 + $0xe] sm:$0x1]  ;;  %v2128_v40 = vld [vmem:[%s3741_s1 + $0x11] sm:$0x1]  ;;  %v2132_v48 = vld [vmem:[%s3741_s1 + $0x13] sm:$0x1] }
  0x25   : >> { %2323 = vperm.xlu1 %2296, %v2322_v53   ;;  %v2377_v53 = vpack.i.bf16 %v1023_v45, %v1060_v46  ;;  %v2392_v58 = vpack.i.bf16 %v1676_v52, %v1615_v51  ;;  %v240_v16 = vunpack.c.l.bf16 %v235_v5  ;;  %v277_v20 = vunpack.c.l.bf16 %v2084_v6  ;;  %v2124_v46 = vld [vmem:[%s3741_s1 + $0xf] sm:$0x1]  ;;  %v2141_v60 = vld [vmem:[%s3741_s1 + $0x15] sm:$0x1]  ;;  %vm2250_vm10 = vmpackc.low %vm409_vm7, %vm2420_vm9 }
  0x26   : >> { %2318 = vperm.xlu0 %2285, %v2317_v56   ;;  %v2153_v56 = vld [vmem:[%s2493_s5 + $0x5c] sm:$0x3]  ;;  %v2387_v59 = vpack.i.bf16 %v2205_v55, %v2204_v54  ;;  %v315_v21 = vunpack.c.l.bf16 %v2085_v7  ;;  %v513_v24 = vunpack.c.l.bf16 %v2098_v9  ;;  %v476_v29 = vunpack.c.l.bf16 %v2096_v18  ;;  %v2145_v54 = vld [vmem:[%s3741_s1 + $0x17] sm:$0x1]  ;;  %v2139_v55 = vld [vmem:[%s3741_s1 + $0x14] sm:$0x1] }
  0x27   : >> { %v1616_v61 = vunpack.c.l.bf16 %v2153_v56  ;;  %v391_v30 = vunpack.c.l.bf16 %v2087_v19  ;;  %v708_v37 = vunpack.c.l.bf16 %v2113_v27  ;;  %v745_v38 = vunpack.c.l.bf16 %v2115_v28 }
  0x28   : >> { %v634_v51 = vunpack.c.l.bf16 %v2109_v33  ;;  %v671_v52 = vunpack.c.l.bf16 %v2111_v34  ;;  %v977_v5 = vunpack.c.l.bf16 %v2132_v48  ;;  %v1135_v7 = vunpack.c.l.bf16 %v2145_v54 }
  0x29   : >> { %2333 = vperm.xlu1 %2296, %v2332_v62   ;;  %v1646_v62 = vunpack.c.l.bf16 %v2154_v57  ;;  %v782_v57 = vunpack.c.l.bf16 %v2117_v39 }
  0x2a   : >> { %2328 = vperm.xlu0 %2285, %v2327_v4   ;;  %v1706_v4 = vunpack.c.h.bf16 %v2152_v47  ;;  %v2126_v47 = vld [vmem:[%s3741_s1 + $0x10] sm:$0x1] }
  0x2b   : >> { %v2397_v2 = vpack.i.bf16 %v1616_v61, %v1646_v62  ;;  %v2147_v61 = vld [vmem:[%s3741_s1 + $0x18] sm:$0x1] }
  0x2c   : >> { %v1172_v18 = vunpack.c.l.bf16 %v2147_v61 }
  0x2d   : >> { %2343 = vperm.xlu1 %2296, %v2342_v11   ;;  %v2100_v11 = vld [vmem:[%s3741_s1 + $0x8] sm:$0x1] }
  0x2e   : >> { %2338 = vperm.xlu0 %2285, %v2337_v17   ;;  %v2553_v17 = vsub.s32 0, %v3793_v3  ;;  %v550_v25 = vunpack.c.l.bf16 %v2100_v11 }
  0x30   : >> { %v2571_v31 = vrot.slane %v240_v16, %v2553_v17  ;;  %v2583_v36 = vrot.slane %v315_v21, %v2553_v17  ;;  %v2598_v43 = vrot.slane %v513_v24, %v2553_v17  ;;  %v2616_v49 = vrot.slane %v476_v29, %v2553_v17 }
  0x31   : >> { %2353 = vperm.xlu1 %2296, %v2352_v23   ;;  %v353_v23 = vunpack.c.l.bf16 %v2086_v8  ;;  %v2640_v62 = vrot.slane %v708_v37, %v2553_v17  ;;  %v1024_v8 = vunpack.c.l.bf16 %v2139_v55  ;;  %v2646_v11 = vrot.slane %v634_v51, %v2553_v17 }
  0x32   : >> { %2348 = vperm.xlu0 %2285, %v2347_v26   ;;  %v439_v26 = vunpack.c.l.bf16 %v2094_v15  ;;  %v2649_v15 = vrot.slane %v671_v52, %v2553_v17  ;;  %v1061_v16 = vunpack.c.l.bf16 %v2141_v60  ;;  %v2654_v21 = vrot.slane %v782_v57, %v2553_v17 }
  0x33   : >> { %v2595_v42 = vrot.slane %v353_v23, %v2553_v17  ;;  %v2671_v28 = vrot.slane %v977_v5, %v2553_v17  ;;  %v2691_v39 = vrot.slane %v1172_v18, %v2553_v17 }
  0x34   : >> { %v2604_v45 = vrot.slane %v439_v26, %v2553_v17 }
  0x35   : >> { %2363 = vperm.xlu1 %2296, %v2362_v32   ;;  %v587_v32 = vunpack.c.l.bf16 %v2102_v22  ;;  %3799 = vst [vmem:[#allocation14_spill] sm:$0xff] %v2671_v28  ;;  %3804 = vst [vmem:[#allocation19_spill] sm:$0xff] %v2691_v39 }
  0x36   : >> { %2358 = vperm.xlu0 %2285, %v2357_v35   ;;  %v2580_v35 = vrot.slane %v277_v20, %v2553_v17 }
  0x37   : >> { %v2631_v56 = vrot.slane %v587_v32, %v2553_v17  ;;  %v2680_v32 = vrot.slane %v1024_v8, %v2553_v17 }
  0x39   : >> { %2373 = vperm.xlu1 %2296, %v2372_v41   ;;  %v2130_v41 = vld [vmem:[%s3741_s1 + $0x12] sm:$0x1]  ;;  %3794 = vst [vmem:[#allocation9_spill] sm:$0xff] %v2631_v56  ;;  %3802 = vst [vmem:[#allocation17_spill] sm:$0xff] %v2680_v32 }
  0x3a   : >> { %2368 = vperm.xlu0 %2285, %v2367_v44   ;;  %v2601_v44 = vrot.slane %v550_v25, %v2553_v17 }
  0x3d   : >> { %2383 = vperm.xlu1 %2296, %v2382_v50   ;;  %v2619_v50 = vrot.slane %v391_v30, %v2553_v17  ;;  %v2677_v30 = vrot.slane %v1135_v7, %v2553_v17 }
  0x3e   : >> { %2378 = vperm.xlu0 %2285, %v2377_v53   ;;  %v2143_v53 = vld [vmem:[%s3741_s1 + $0x16] sm:$0x1] }
  0x3f   : >> { %v1098_v6 = vunpack.c.l.bf16 %v2143_v53  ;;  %3801 = vst [vmem:[#allocation16_spill] sm:$0xff] %v2677_v30 }
  0x41   : >> { %2393 = vperm.xlu1 %2296, %v2392_v58   ;;  %v903_v58 = vunpack.c.l.bf16 %v2128_v40  ;;  %v2674_v29 = vrot.slane %v1098_v6, %v2553_v17 }
  0x42   : >> { %2388 = vperm.xlu0 %2285, %v2387_v59   ;;  %v940_v59 = vunpack.c.l.bf16 %v2130_v41 }
  0x43   : >> { %v2657_v22 = vrot.slane %v903_v58, %v2553_v17  ;;  %3800 = vst [vmem:[#allocation15_spill] sm:$0xff] %v2674_v29 }
  0x44   : >> { %v2660_v23 = vrot.slane %v940_v59, %v2553_v17 }
  0x45   : >> { %1739 = vperm.xlu1 %2296, %v1736_v63   ;;  %v2643_v63 = vrot.slane %v745_v38, %v2553_v17  ;;  %3795 = vst [vmem:[#allocation10_spill] sm:$0xff] %v2657_v22  ;;  %v2688_v38 = vrot.slane %v1061_v16, %v2553_v17 }
  0x46   : >> { %2398 = vperm.xlu0 %2285, %v2397_v2   ;;  %v829_v2 = vunpack.c.l.bf16 %v2124_v46  ;;  %3796 = vst [vmem:[#allocation11_spill] sm:$0xff] %v2660_v23 }
  0x47   : >> { %3803 = vst [vmem:[#allocation18_spill] sm:$0xff] %v2688_v38 }
  0x48   : >> { %v2665_v26 = vrot.slane %v829_v2, %v2553_v17 }
  0x4a   : >> { %1709 = vperm.xlu0 %2285, %v1706_v4   ;;  %v866_v4 = vunpack.c.l.bf16 %v2126_v47  ;;  %3797 = vst [vmem:[#allocation12_spill] sm:$0xff] %v2665_v26 }
  0x4c   : >> { %v2668_v27 = vrot.slane %v866_v4, %v2553_v17 }
  0x4e   : >> { %3798 = vst [vmem:[#allocation13_spill] sm:$0xff] %v2668_v27 }
  0x98   : >> { %v2299_v9 = vpop.permute.xlu1 %2298 }
  0x99   : >> { %v2651_v19 = vunpack.i.l.bf16 %v2299_v9  ;;  %v2288_v20 = vpop.permute.xlu0 %2287  ;;  %v2693_v40 = vunpack.i.h.bf16 %v2299_v9 }
  0x9a   : >> { %v2662_v24 = vunpack.i.h.bf16 %v2288_v20  ;;  %v2289_v25 = vunpack.i.l.bf16 %v2288_v20 }
  0x9b   : >> { %v2697_v47 = vmul.f32 %v2651_v19, %v2580_v35  ;;  %v2706_v17 = vmul.f32 %v2651_v19, %v2616_v49  ;;  %v2730_v6 = vmul.f32 %v2651_v19, %v2598_v43  ;;  %v2734_v7 = vmul.f32 %v2651_v19, %v2601_v44 }
  0x9c   : >> { %v2684_v33 = vmul.f32 %v2662_v24, %v2580_v35  ;;  %v287_v34 = vmul.f32 %v2289_v25, %v2580_v35  ;;  %v2304_v37 = vpop.permute.xlu1 %2303  ;;  %v2702_v53 = vmul.f32 %v2662_v24, %v2583_v36  ;;  %v2716_v57 = vmul.f32 %v2662_v24, %v2595_v42 }
  0x9d   : >> { %v2306_v41 = vunpack.i.h.bf16 %v2304_v37  ;;  %v2305_v46 = vunpack.i.l.bf16 %v2304_v37  ;;  %v2293_v48 = vpop.permute.xlu0 %2292  ;;  %v265_v4 = vmul.f32 %v2289_v25, %v2571_v31  ;;  %v2738_v8 = vmul.f32 %v2662_v24, %v2571_v31 }
  0x9e   : >> { %v3745_v51 = vrot.slane %v2684_v33, 1  ;;  %v296_v52 = vrot.slane %v287_v34, 1  ;;  %v2295_v58 = vunpack.i.h.bf16 %v2293_v48  ;;  %v3748_v34 = vrot.slane %v2702_v53, 2 }
  0x9f   : >> { %v2709_v54 = vmul.f32 %v2306_v41, %v2598_v43  ;;  %v2712_v55 = vmul.f32 %v2306_v41, %v2601_v44  ;;  %v1236_v60 = vmul.f32 %v2306_v41, %v2583_v36  ;;  %v325_v61 = vmul.f32 %v2305_v46, %v2583_v36 }
  0xa0   : >> { %v298_v59 = vsel %vm295_vm4, %v296_v52, %v3745_v51  ;;  %v363_v2 = vmul.f32 %v2305_v46, %v2595_v42  ;;  %v2726_v5 = vmul.f32 %v2306_v41, %v2595_v42  ;;  %v1213_v37 = vmul.f32 %v2295_v58, %v2580_v35  ;;  %v2314_v3 = vpop.permute.xlu1 %2313 }
  0xa1   : >> { %v334_v9 = vrot.slane %v325_v61, 2  ;;  %v307_v20 = vadd.f32 %v298_v59, %v265_v4  ;;  %v531_v25 = vrot.slane %v2709_v54, 2  ;;  %v568_v41 = vrot.slane %v2712_v55, 3  ;;  %v2309_v0 = vpop.permute.xlu0 %2308 }
  0xa2   : >> { %v372_v16 = vrot.slane %v363_v2, 3  ;;  %v1244_v46 = vrot.slane %v1236_v60, 2  ;;  %v3747_v52 = vrot.slane %v2716_v57, 3  ;;  %v486_v51 = vmul.f32 %v2295_v58, %v2616_v49 }
  0xa3   : >> { %v1267_v61 = vrot.slane %v2726_v5, 3  ;;  %v336_v59 = vsel %vm333_vm5, %v334_v9, %v3748_v34  ;;  %v464_v54 = vmul.f32 %v2295_v58, %v2604_v45  ;;  %v1221_v2 = vrot.slane %v1213_v37, 1 }
  0xa4   : >> { %v374_v4 = vsel %vm371_vm6, %v372_v16, %v3747_v52  ;;  %v1205_v55 = vmul.f32 %v2295_v58, %v2571_v31  ;;  %v2756_v60 = vunpack.i.l.bf16 %v2293_v48  ;;  %v598_v18 = vmul.f32 %v2651_v19, %v2631_v56 }
  0xa5   : >> { %v3805_v5 = vrot.slane %v2697_v47, 1  ;;  %v2766_v37 = vmul.f32 %v2693_v40, %v2631_v56  ;;  %v2770_v16 = vmul.f32 %v2651_v19, %v2583_v36  ;;  %v345_v48 = vadd.f32 %v336_v59, %v307_v20  ;;  %v2319_v23 = vpop.permute.xlu0 %2318 }
  0xa6   : >> { %v494_v58 = vrot.slane %v486_v51, 1  ;;  %v2774_v52 = vmul.f32 %v2651_v19, %v2595_v42  ;;  %v1283_v34 = vmul.f32 %v2651_v19, %v2619_v50  ;;  %v2782_v9 = vmul.f32 %v2693_v40, %v2619_v50 }
  0xa7   : >> { %v1223_v14 = vsel %vm295_vm4, %v1221_v2, %v3805_v5  ;;  %3806 = vst [vmem:[#allocation20_spill] sm:$0xff] %v2766_v37  ;;  %v2316_v12 = vunpack.i.h.bf16 %v2314_v3  ;;  %v606_v10 = vrot.slane %v598_v18, 4  ;;  %v2315_v20 = vunpack.i.l.bf16 %v2314_v3 }
  0xa8   : >> { %3807 = vst [vmem:[#allocation21_spill] sm:$0xff] %v2782_v9  ;;  %v1232_v13 = vadd.f32 %v1223_v14, %v1205_v55  ;;  %v2786_v51 = vmul.f32 %v2662_v24, %v2619_v50  ;;  %v3756_v1 = vrot.slane %v2770_v16, 2  ;;  %v383_v39 = vadd.f32 %v374_v4, %v345_v48 }
  0xa9   : >> { %v597_v2 = vmul.f32 %v2316_v12, %v2631_v56  ;;  %v1282_v5 = vmul.f32 %v2316_v12, %v2619_v50  ;;  %v1291_v38 = vrot.slane %v1283_v34, 4  ;;  %v401_v14 = vmul.f32 %v2315_v20, %v2619_v50 }
  0xaa   : >> { %v3759_v3 = vrot.slane %v2782_v9, 4  ;;  %v3757_v24 = vrot.slane %v2786_v51, 4  ;;  %v1246_v55 = vsel %vm333_vm5, %v1244_v46, %v3756_v1  ;;  %v2799_v12 = vunpack.i.h.bf16 %v2309_v0 }
  0xab   : >> { %v605_v18 = vrot.slane %v597_v2, 4  ;;  %v1290_v59 = vrot.slane %v1282_v5, 4  ;;  %v410_v30 = vrot.slane %v401_v14, 4  ;;  %v1255_v29 = vadd.f32 %v1246_v55, %v1232_v13 }
  0xac   : >> { %v3808_v4 = vrot.slane %v2766_v37, 4  ;;  %v3809_v48 = vrot.slane %v2706_v17, 1  ;;  %v525_v20 = vmul.f32 %v2693_v40, %v2598_v43  ;;  %v2310_v32 = vunpack.i.l.bf16 %v2309_v0 }
  0xad   : >> { %v412_v46 = vsel %vm409_vm7, %v410_v30, %v3757_v24  ;;  %v3810_v13 = vrot.slane %v2730_v6, 2  ;;  %v3811_v14 = vrot.slane %v2734_v7, 3  ;;  %v2827_v0 = vsel %vm409_vm7, %v1291_v38, %v3759_v3 }
  0xae   : >> { %v2804_v34 = vsel %vm409_vm7, %v606_v10, %v3808_v4  ;;  %v496_v2 = vsel %vm295_vm4, %v494_v58, %v3809_v48  ;;  %v2822_v4 = vmul.f32 %v2799_v12, %v2598_v43  ;;  %v607_v58 = vsel %vm409_vm7, %v605_v18, %v606_v10 }
  0xaf   : >> { %v533_v5 = vsel %vm333_vm5, %v531_v25, %v3810_v13  ;;  %v570_v55 = vsel %vm371_vm6, %v568_v41, %v3811_v14  ;;  %v421_v30 = vadd.f32 %v412_v46, %v383_v39  ;;  %v3812_v48 = vrot.slane %v2774_v52, 3  ;;  %v2324_v39 = vpop.permute.xlu1 %2323 }
  0xb0   : >> { %v1292_v13 = vsel %vm409_vm7, %v1290_v59, %v1291_v38  ;;  %v289_v41 = vmul.f32 %v2756_v60, %v2580_v35  ;;  %v2837_v14 = vmul.f32 %v2310_v32, %v2580_v35  ;;  %v534_v28 = vrot.slane %v525_v20, 2 }
  0xb1   : >> { %v1269_v25 = vsel %vm371_vm6, %v1267_v61, %v3812_v48  ;;  %v468_v24 = vadd.f32 %v464_v54, %v421_v30  ;;  %v327_v3 = vmul.f32 %v2756_v60, %v2583_v36  ;;  %v2842_v10 = vmul.f32 %v2310_v32, %v2583_v36 }
  0xb2   : >> { %v1278_v1 = vadd.f32 %v1269_v25, %v1255_v29  ;;  %v3761_v61 = vrot.slane %v2822_v4, 2  ;;  %v267_v29 = vmul.f32 %v2756_v60, %v2571_v31  ;;  %v299_v38 = vrot.slane %v289_v41, 1 }
  0xb3   : >> { %v3760_v59 = vrot.slane %v2837_v14, 1  ;;  %v505_v18 = vadd.f32 %v496_v2, %v468_v24  ;;  %v337_v46 = vrot.slane %v327_v3, 2  ;;  %v2851_v20 = vmul.f32 %v2693_v40, %v2601_v44 }
  0xb4   : >> { %v3813_v32 = vrot.slane %v2684_v33, 1  ;;  %v2861_v25 = vmul.f32 %v2693_v40, %v2595_v42  ;;  %v2863_v24 = vunpack.i.h.bf16 %v2324_v39  ;;  %v2867_v2 = vmul.f32 %v2799_v12, %v2616_v49 }
  0xb5   : >> { %v302_v48 = vsel %vm295_vm4, %v299_v38, %v3760_v59  ;;  %v542_v3 = vadd.f32 %v533_v5, %v505_v18  ;;  %v2870_v54 = vadd.f32 %v1292_v13, %v1278_v1  ;;  %v2879_v59 = vmul.f32 %v2799_v12, %v2583_v36 }
  0xb6   : >> { %v300_v30 = vsel %vm295_vm4, %v3813_v32, %v299_v38  ;;  %v309_v33 = vadd.f32 %v302_v48, %v267_v29  ;;  %v3814_v32 = vrot.slane %v2730_v6, 2  ;;  %v2885_v18 = vsel %vm333_vm5, %v534_v28, %v3761_v61 }
  0xb7   : >> { %v308_v41 = vadd.f32 %v300_v30, %v2738_v8  ;;  %v465_v1 = vmul.f32 %v2651_v19, %v2604_v45  ;;  %v466_v6 = vmul.f32 %v2693_v40, %v2604_v45  ;;  %v3765_v8 = vrot.slane %v2861_v25, 3 }
  0xb8   : >> { %v2875_v38 = vsel %vm333_vm5, %v3814_v32, %v534_v28  ;;  %v579_v13 = vadd.f32 %v570_v55, %v542_v3  ;;  %v3815_v29 = vrot.slane %v2702_v53, 2  ;;  %v3816_v48 = vrot.slane %v2842_v10, 2 }
  0xb9   : >> { %v2900_v28 = vmul.f32 %v2863_v24, %v2601_v44  ;;  %v2325_v26 = vunpack.i.l.bf16 %v2324_v39  ;;  %v365_v27 = vmul.f32 %v2756_v60, %v2595_v42  ;;  %v3817_v55 = vrot.slane %v2851_v20, 3 }
  0xba   : >> { %v338_v30 = vsel %vm333_vm5, %v3815_v29, %v337_v46  ;;  %v340_v32 = vsel %vm333_vm5, %v337_v46, %v3816_v48  ;;  %v3818_v53 = vrot.slane %v2734_v7, 3  ;;  %v2913_v46 = vmul.f32 %v2863_v24, %v2631_v56 }
  0xbb   : >> { %v346_v61 = vadd.f32 %v338_v30, %v308_v41  ;;  %v347_v5 = vadd.f32 %v340_v32, %v309_v33  ;;  %v403_v29 = vmul.f32 %v2756_v60, %v2619_v50  ;;  %v488_v39 = vmul.f32 %v2693_v40, %v2616_v49 }
  0xbc   : >> { %v2909_v3 = vsel %vm371_vm6, %v3818_v53, %v3817_v55  ;;  %3819 = vst [vmem:[#allocation22_spill] sm:$0xff] %v2913_v46  ;;  %v3820_v41 = vrot.slane %v2774_v52, 3  ;;  %v366_v7 = vmul.f32 %v2325_v26, %v2595_v42  ;;  %v375_v30 = vrot.slane %v365_v27, 3 }
  0xbd   : >> { %v2926_v48 = vmul.f32 %v2325_v26, %v2619_v50  ;;  %v2928_v32 = vadd.f32 %v607_v58, %v579_v13  ;;  %v2933_v60 = vmul.f32 %v2863_v24, %v2595_v42  ;;  %v413_v53 = vrot.slane %v403_v29, 4 }
  0xbe   : >> { %v1271_v33 = vsel %vm371_vm6, %v3820_v41, %v3765_v8  ;;  %v3821_v52 = vrot.slane %v2716_v57, 3  ;;  %v377_v8 = vrot.slane %v366_v7, 3  ;;  %v1215_v26 = vmul.f32 %v2693_v40, %v2580_v35 }
  0xbf   : >> { %v415_v27 = vrot.slane %v2926_v48, 4  ;;  %v497_v13 = vrot.slane %v488_v39, 1  ;;  %v1206_v55 = vmul.f32 %v2651_v19, %v2571_v31  ;;  %v1238_v42 = vmul.f32 %v2693_v40, %v2583_v36 }
  0xc0   : >> { %v376_v41 = vsel %vm371_vm6, %v3821_v52, %v375_v30  ;;  %v378_v29 = vsel %vm371_vm6, %v375_v30, %v377_v8  ;;  %v3822_v57 = vrot.slane %v2786_v51, 4  ;;  %v1224_v7 = vrot.slane %v1215_v26, 1 }
  0xc1   : >> { %v384_v58 = vadd.f32 %v376_v41, %v346_v61  ;;  %v2321_v22 = vunpack.i.h.bf16 %v2319_v23  ;;  %v385_v48 = vadd.f32 %v378_v29, %v347_v5  ;;  %v1247_v37 = vrot.slane %v1238_v42, 2  ;;  %v2334_v41 = vpop.permute.xlu1 %2333 }
  0xc2   : >> { %v414_v52 = vsel %vm409_vm7, %v3822_v57, %v413_v53  ;;  %v2320_v46 = vunpack.i.l.bf16 %v2319_v23  ;;  %v1272_v61 = vrot.slane %v2933_v60, 3  ;;  %v416_v39 = vsel %vm409_vm7, %v413_v53, %v415_v27 }
  0xc3   : >> { %v422_v9 = vadd.f32 %v414_v52, %v384_v58  ;;  %v3823_v19 = vrot.slane %v2697_v47, 1  ;;  %v499_v30 = vrot.slane %v2867_v2, 1  ;;  %v423_v51 = vadd.f32 %v416_v39, %v385_v48 }
  0xc4   : >> { %v3824_v26 = vrot.slane %v2706_v17, 1  ;;  %v3825_v23 = vrot.slane %v2770_v16, 2  ;;  %v1208_v53 = vmul.f32 %v2321_v22, %v2571_v31  ;;  %v268_v47 = vmul.f32 %v2320_v46, %v2571_v31 }
  0xc5   : >> { %v1225_v36 = vsel %vm295_vm4, %v3823_v19, %v1224_v7  ;;  %v469_v56 = vadd.f32 %v465_v1, %v422_v9  ;;  %v1216_v29 = vmul.f32 %v2799_v12, %v2580_v35  ;;  %v470_v57 = vadd.f32 %v466_v6, %v423_v51 }
  0xc6   : >> { %v498_v5 = vsel %vm295_vm4, %v3824_v26, %v497_v13  ;;  %v1233_v58 = vadd.f32 %v1225_v36, %v1206_v55  ;;  %v1248_v42 = vsel %vm333_vm5, %v3825_v23, %v1247_v37  ;;  %v2336_v9 = vunpack.i.h.bf16 %v2334_v41 }
  0xc7   : >> { %v506_v48 = vadd.f32 %v498_v5, %v469_v56  ;;  %v3826_v17 = vrot.slane %v2837_v14, 1  ;;  %v500_v16 = vsel %vm295_vm4, %v497_v13, %v499_v30  ;;  %v1226_v55 = vrot.slane %v1216_v29, 1  ;;  %v2999_v5 = vpop.permute.xlu1 %2343 }
  0xc8   : >> { %v1256_v52 = vadd.f32 %v1248_v42, %v1233_v58  ;;  %v1249_v39 = vrot.slane %v2879_v59, 2  ;;  %v2973_v46 = vmul.f32 %v2863_v24, %v2619_v50  ;;  %v507_v35 = vadd.f32 %v500_v16, %v470_v57 }
  0xc9   : >> { %v310_v1 = vadd.f32 %v3826_v17, %v268_v47  ;;  %v543_v12 = vadd.f32 %v2875_v38, %v506_v48  ;;  %v3827_v56 = vrot.slane %v2900_v28, 3  ;;  %v3828_v14 = vrot.slane %v2851_v20, 3 }
  0xca   : >> { %v1279_v19 = vadd.f32 %v1271_v33, %v1256_v52  ;;  %v3829_v13 = vrot.slane %v2861_v25, 3  ;;  %v1207_v50 = vmul.f32 %v2693_v40, %v2571_v31  ;;  %v3830_v24 = vrot.slane %v2842_v10, 2  ;;  %v2329_v33 = vpop.permute.xlu0 %2328 }
  0xcb   : >> { %v2981_v6 = vsel %vm371_vm6, %v3828_v14, %v3827_v56  ;;  %v467_v36 = vmul.f32 %v2321_v22, %v2604_v45  ;;  %v1227_v20 = vsel %vm295_vm4, %v1224_v7, %v1226_v55  ;;  %v1235_v51 = vadd.f32 %v1226_v55, %v1208_v53 }
  0xcc   : >> { %v2988_v59 = vsel %vm371_vm6, %v3829_v13, %v1272_v61  ;;  %v348_v38 = vadd.f32 %v3830_v24, %v310_v1  ;;  %v2997_v26 = vmul.f32 %v2336_v9, %v2640_v62  ;;  %v1250_v58 = vsel %vm333_vm5, %v1247_v37, %v1249_v39 }
  0xcd   : >> { %v3003_v23 = vmul.f32 %v2336_v9, %v2643_v63  ;;  %v3005_v31 = vunpack.i.l.bf16 %v2334_v41  ;;  %v3008_v40 = vadd.f32 %v2827_v0, %v1279_v19  ;;  %v3011_v22 = vadd.f32 %v2885_v18, %v507_v35 }
  0xce   : >> { %v386_v25 = vadd.f32 %v377_v8, %v348_v38  ;;  %v580_v10 = vadd.f32 %v2909_v3, %v543_v12  ;;  %v3014_v7 = vunpack.i.h.bf16 %v2329_v33  ;;  %v1234_v53 = vadd.f32 %v1227_v20, %v1207_v50 }
  0xcf   : >> { %v2330_v8 = vunpack.i.l.bf16 %v2329_v33  ;;  %v2346_v37 = vunpack.i.h.bf16 %v2999_v5  ;;  %v3017_v47 = vadd.f32 %v1249_v39, %v1235_v51  ;;  %v726_v41 = vrot.slane %v2997_v26, 2 }
  0xd0   : >> { %v424_v42 = vadd.f32 %v415_v27, %v386_v25  ;;  %v682_v0 = vmul.f32 %v3014_v7, %v2649_v15  ;;  %v3024_v18 = vmul.f32 %v3014_v7, %v2616_v49  ;;  %v3027_v3 = vmul.f32 %v2336_v9, %v2598_v43 }
  0xd1   : >> { %v3030_v27 = vmul.f32 %v2336_v9, %v2601_v44  ;;  %v681_v57 = vmul.f32 %v2330_v8, %v2649_v15  ;;  %v659_v52 = vmul.f32 %v2330_v8, %v2646_v11  ;;  %v1305_v48 = vmul.f32 %v2330_v8, %v2604_v45 }
  0xd2   : >> { %v471_v29 = vadd.f32 %v467_v36, %v424_v42  ;;  %v1313_v17 = vmul.f32 %v2330_v8, %v2616_v49  ;;  %v3037_v1 = vmul.f32 %v2346_v37, %v2643_v63  ;;  %v3039_v16 = vadd.f32 %v1250_v58, %v1234_v53 }
  0xd3   : >> { %v763_v55 = vrot.slane %v3003_v23, 3  ;;  %v690_v39 = vrot.slane %v682_v0, 1  ;;  %v689_v19 = vrot.slane %v681_v57, 1  ;;  %v1322_v9 = vrot.slane %v3024_v18, 1 }
  0xd4   : >> { %v663_v35 = vadd.f32 %v659_v52, %v2928_v32  ;;  %v1321_v12 = vrot.slane %v1313_v17, 1  ;;  %v2345_v56 = vunpack.i.l.bf16 %v2999_v5  ;;  %v508_v14 = vadd.f32 %v499_v30, %v471_v29 }
  0xd5   : >> { %v1344_v13 = vrot.slane %v3027_v3, 2  ;;  %v1367_v50 = vrot.slane %v3030_v27, 3  ;;  %v617_v24 = vadd.f32 %v2804_v34, %v580_v10  ;;  %v1309_v38 = vadd.f32 %v1305_v48, %v2870_v54  ;;  %v3832_v3 = vld [vmem:[#allocation9_spill] sm:$0xff] }
  0xd6   : >> { %v768_v33 = vrot.slane %v3037_v1, 3  ;;  %v3053_v36 = vmul.f32 %v2346_v37, %v2601_v44  ;;  %v660_v32 = vmul.f32 %v3014_v7, %v2646_v11  ;;  %v691_v20 = vsel %vm295_vm4, %v689_v19, %v690_v39 }
  0xd7   : >> { %v3060_v2 = vmul.f32 %v3005_v31, %v2649_v15  ;;  %v719_v30 = vmul.f32 %v3014_v7, %v2640_v62  ;;  %v3066_v34 = vmul.f32 %v3005_v31, %v2640_v62  ;;  %v700_v54 = vadd.f32 %v691_v20, %v663_v35 }
  0xd8   : >> { %v1323_v51 = vsel %vm295_vm4, %v1321_v12, %v1322_v9  ;;  %v664_v26 = vadd.f32 %v660_v32, %v617_v24  ;;  %v756_v5 = vmul.f32 %v3014_v7, %v2643_v63  ;;  %v757_v23 = vmul.f32 %v3005_v31, %v2643_v63 }
  0xd9   : >> { %v692_v25 = vrot.slane %v3060_v2, 1  ;;  %v727_v58 = vrot.slane %v719_v30, 2  ;;  %v792_v10 = vmul.f32 %v2345_v56, %v2654_v21  ;;  %v3831_v42 = vrot.slane %v2822_v4, 2 }
  0xda   : >> { %v3080_v8 = vmul.f32 %v2346_v37, %v2654_v21  ;;  %v729_v0 = vrot.slane %v3066_v34, 2  ;;  %v793_v18 = vmul.f32 %v3014_v7, %v2654_v21  ;;  %v3771_v29 = vrot.slane %v3053_v36, 3 }
  0xdb   : >> { %v3077_v53 = vadd.f32 %v3831_v42, %v508_v14  ;;  %v3087_v57 = vmul.f32 %v2346_v37, %v3832_v3  ;;  %v693_v52 = vsel %vm295_vm4, %v690_v39, %v692_v25  ;;  %v764_v4 = vrot.slane %v756_v5, 3 }
  0xdc   : >> { %v1332_v48 = vadd.f32 %v1323_v51, %v1309_v38  ;;  %v701_v17 = vadd.f32 %v693_v52, %v664_v26  ;;  %v728_v19 = vsel %vm333_vm5, %v726_v41, %v727_v58  ;;  %v3095_v35 = vmul.f32 %v3005_v31, %v2654_v21 }
  0xdd   : >> { %v737_v12 = vadd.f32 %v728_v19, %v700_v54  ;;  %v766_v14 = vrot.slane %v757_v23, 3  ;;  %v800_v24 = vrot.slane %v792_v10, 4  ;;  %v1306_v37 = vmul.f32 %v3014_v7, %v2604_v45 }
  0xde   : >> { %v730_v32 = vsel %vm333_vm5, %v727_v58, %v729_v0  ;;  %v801_v39 = vrot.slane %v793_v18, 4  ;;  %v3104_v38 = vmul.f32 %v3005_v31, %v2616_v49  ;;  %v1337_v41 = vmul.f32 %v3014_v7, %v2598_v43 }
  0xdf   : >> { %v765_v20 = vsel %vm371_vm6, %v763_v55, %v764_v4  ;;  %v1310_v30 = vadd.f32 %v1306_v37, %v3008_v40  ;;  %v3112_v54 = vmul.f32 %v3005_v31, %v2598_v43  ;;  %v1360_v51 = vmul.f32 %v3014_v7, %v2601_v44 }
  0xe0   : >> { %v738_v26 = vadd.f32 %v730_v32, %v701_v17  ;;  %v803_v5 = vrot.slane %v3095_v35, 4  ;;  %v1324_v58 = vrot.slane %v3104_v38, 1  ;;  %v1345_v23 = vrot.slane %v1337_v41, 2 }
  0xe1   : >> { %v774_v10 = vadd.f32 %v765_v20, %v737_v12  ;;  %v1347_v42 = vrot.slane %v3112_v54, 2  ;;  %v3121_v55 = vmul.f32 %v3005_v31, %v2601_v44  ;;  %v1368_v40 = vrot.slane %v1360_v51, 3  ;;  %v3833_v20 = vld [vmem:[#allocation22_spill] sm:$0xff] }
  0xe2   : >> { %v1325_v18 = vsel %vm295_vm4, %v1322_v9, %v1324_v58  ;;  %v1346_v52 = vsel %vm333_vm5, %v1344_v13, %v1345_v23  ;;  %v1382_v17 = vmul.f32 %v2345_v56, %v3832_v3  ;;  %v1383_v19 = vmul.f32 %v3014_v7, %v3832_v3 }
  0xe3   : >> { %v767_v12 = vsel %vm371_vm6, %v764_v4, %v766_v14  ;;  %v3134_v37 = vsel %vm371_vm6, %v766_v14, %v768_v33  ;;  %v1333_v44 = vadd.f32 %v1325_v18, %v1310_v30  ;;  %v1355_v32 = vadd.f32 %v1346_v52, %v1332_v48  ;;  %v2339_v30 = vpop.permute.xlu0 %2338 }
  0xe4   : >> { %v802_v41 = vsel %vm409_vm7, %v800_v24, %v801_v39  ;;  %v1348_v9 = vsel %vm333_vm5, %v1345_v23, %v1347_v42  ;;  %v1370_v56 = vrot.slane %v3121_v55, 3  ;;  %v3143_v7 = vmul.f32 %v3005_v31, %v3832_v3 }
  0xe5   : >> { %v775_v13 = vadd.f32 %v767_v12, %v738_v26  ;;  %v804_v4 = vsel %vm409_vm7, %v801_v39, %v803_v5  ;;  %v1356_v14 = vadd.f32 %v1348_v9, %v1333_v44  ;;  %v610_v48 = vrot.slane %v3833_v20, 4 }
  0xe6   : >> { %v3149_v24 = vadd.f32 %v802_v41, %v774_v10  ;;  %v1369_v51 = vsel %vm371_vm6, %v1367_v50, %v1368_v40  ;;  %v1390_v23 = vrot.slane %v1382_v17, 4  ;;  %v1391_v55 = vrot.slane %v1383_v19, 4  ;;  %v3834_v41 = vld [vmem:[#allocation20_spill] sm:$0xff] }
  0xe7   : >> { %v1371_v3 = vsel %vm371_vm6, %v1368_v40, %v1370_v56  ;;  %v1378_v18 = vadd.f32 %v1369_v51, %v1355_v32  ;;  %v3774_v26 = vrot.slane %v3143_v7, 4  ;;  %v661_v39 = vmul.f32 %v3005_v31, %v2646_v11 }
  0xe8   : >> { %v1379_v52 = vadd.f32 %v1371_v3, %v1356_v14  ;;  %v1295_v12 = vrot.slane %v2973_v46, 4  ;;  %v2341_v44 = vunpack.i.h.bf16 %v2339_v30  ;;  %v2340_v10 = vunpack.i.l.bf16 %v2339_v30 }
  0xe9   : >> { %v3835_v9 = vrot.slane %v3834_v41, 4  ;;  %v1307_v50 = vmul.f32 %v3005_v31, %v2604_v45  ;;  %v581_v40 = vadd.f32 %v2981_v6, %v3011_v22  ;;  %v3836_v17 = vrot.slane %v2900_v28, 3  ;;  %v3837_v22 = vld [vmem:[#allocation21_spill] sm:$0xff] }
  0xea   : >> { %v662_v32 = vmul.f32 %v2341_v44, %v2646_v11  ;;  %v1308_v46 = vmul.f32 %v2341_v44, %v2604_v45  ;;  %v684_v14 = vmul.f32 %v2340_v10, %v2649_v15  ;;  %v721_v20 = vmul.f32 %v2340_v10, %v2640_v62 }
  0xeb   : >> { %v611_v27 = vsel %vm409_vm7, %v3835_v9, %v610_v48  ;;  %v582_v19 = vadd.f32 %v3836_v17, %v3077_v53  ;;  %v1280_v31 = vadd.f32 %v2988_v59, %v3039_v16  ;;  %v1281_v6 = vadd.f32 %v1272_v61, %v3017_v47 }
  0xec   : >> { %v618_v30 = vadd.f32 %v611_v27, %v581_v40  ;;  %v3838_v28 = vrot.slane %v3837_v22, 4  ;;  %v694_v3 = vrot.slane %v684_v14, 1  ;;  %v1316_v45 = vmul.f32 %v2340_v10, %v2616_v49  ;;  %v2354_v40 = vpop.permute.xlu1 %2353 }
  0xed   : >> { %v619_v51 = vadd.f32 %v610_v48, %v582_v19  ;;  %v1339_v44 = vmul.f32 %v2340_v10, %v2598_v43  ;;  %v1304_v48 = vadd.f32 %v1295_v12, %v1281_v6  ;;  %v731_v60 = vrot.slane %v721_v20, 2  ;;  %v2349_v19 = vpop.permute.xlu0 %2348 }
  0xee   : >> { %v1296_v53 = vsel %vm409_vm7, %v3838_v28, %v1295_v12  ;;  %v665_v41 = vadd.f32 %v661_v39, %v618_v30  ;;  %v695_v59 = vsel %vm295_vm4, %v692_v25, %v694_v3  ;;  %v1326_v61 = vrot.slane %v1316_v45, 1 }
  0xef   : >> { %v666_v9 = vadd.f32 %v662_v32, %v619_v51  ;;  %v1303_v27 = vadd.f32 %v1296_v53, %v1280_v31  ;;  %v1349_v47 = vrot.slane %v1339_v44, 2  ;;  %v1392_v16 = vsel %vm409_vm7, %v1390_v23, %v1391_v55  ;;  %v3841_v51 = vld [vmem:[#allocation13_spill] sm:$0xff]  ;;  %v3842_v53 = vld [vmem:[#allocation12_spill] sm:$0xff] }
  0xf0   : >> { %v1394_v49 = vsel %vm409_vm7, %v1391_v55, %v3774_v26  ;;  %v702_v17 = vadd.f32 %v695_v59, %v665_v41  ;;  %v1312_v43 = vadd.f32 %v1308_v46, %v1304_v48  ;;  %v1327_v12 = vsel %vm295_vm4, %v1324_v58, %v1326_v61 }
  0xf1   : >> { %v703_v39 = vadd.f32 %v694_v3, %v666_v9  ;;  %v1311_v10 = vadd.f32 %v1307_v50, %v1303_v27  ;;  %v2356_v2 = vunpack.i.h.bf16 %v2354_v40  ;;  %v812_v25 = vadd.f32 %v804_v4, %v775_v13  ;;  %v3839_v4 = vld [vmem:[#allocation10_spill] sm:$0xff] }
  0xf2   : >> { %v3196_v32 = vsel %vm371_vm6, %v1370_v56, %v3771_v29  ;;  %v1401_v23 = vadd.f32 %v1392_v16, %v1378_v18  ;;  %v3198_v14 = vadd.f32 %v1394_v49, %v1379_v52  ;;  %v732_v55 = vsel %vm333_vm5, %v729_v0, %v731_v60  ;;  %v3211_v18 = vpop.permute.xlu1 %2363  ;;  %v3840_v0 = vld [vmem:[#allocation11_spill] sm:$0xff] }
  0xf3   : >> { %v1334_v50 = vadd.f32 %v1327_v12, %v1311_v10  ;;  %v1350_v38 = vsel %vm333_vm5, %v1347_v42, %v1349_v47  ;;  %v3206_v58 = vunpack.i.l.bf16 %v2354_v40  ;;  %v1335_v13 = vadd.f32 %v1326_v61, %v1312_v43 }
  0xf4   : >> { %v913_v46 = vmul.f32 %v2356_v2, %v3839_v4  ;;  %v3209_v20 = vunpack.i.h.bf16 %v2349_v19  ;;  %v2350_v56 = vunpack.i.l.bf16 %v2349_v19  ;;  %v3213_v52 = vadd.f32 %v732_v55, %v702_v17 }
  0xf5   : >> { %v3215_v34 = vadd.f32 %v731_v60, %v703_v39  ;;  %v950_v30 = vmul.f32 %v2356_v2, %v3840_v0  ;;  %v3219_v54 = vmul.f32 %v2356_v2, %v2640_v62  ;;  %v3222_v42 = vmul.f32 %v2356_v2, %v2643_v63 }
  0xf6   : >> { %v877_v31 = vmul.f32 %v3209_v20, %v3841_v51  ;;  %v3228_v6 = vmul.f32 %v3209_v20, %v2649_v15  ;;  %v876_v22 = vmul.f32 %v2350_v56, %v3841_v51  ;;  %v3231_v28 = vadd.f32 %v1350_v38, %v1334_v50 }
  0xf7   : >> { %v854_v3 = vmul.f32 %v2350_v56, %v3842_v53  ;;  %v1413_v45 = vmul.f32 %v2350_v56, %v2649_v15  ;;  %v2366_v44 = vunpack.i.h.bf16 %v3211_v18  ;;  %v3236_v41 = vadd.f32 %v1349_v47, %v1335_v13 }
  0xf8   : >> { %v921_v9 = vrot.slane %v913_v46, 2  ;;  %v885_v27 = vrot.slane %v877_v31, 1  ;;  %v884_v48 = vrot.slane %v876_v22, 1  ;;  %v958_v40 = vrot.slane %v950_v30, 3 }
  0xf9   : >> { %v1444_v59 = vrot.slane %v3219_v54, 2  ;;  %v858_v60 = vadd.f32 %v854_v3, %v3149_v24  ;;  %v1405_v61 = vmul.f32 %v2350_v56, %v2646_v11  ;;  %v1467_v16 = vrot.slane %v3222_v42, 3 }
  0xfa   : >> { %v1422_v49 = vrot.slane %v3228_v6, 1  ;;  %v2365_v17 = vunpack.i.l.bf16 %v3211_v18  ;;  %v855_v47 = vmul.f32 %v3209_v20, %v3842_v53  ;;  %v1421_v39 = vrot.slane %v1413_v45, 1  ;;  %v3843_v18 = vld [vmem:[#allocation14_spill] sm:$0xff] }
  0xfb   : >> { %v1409_v43 = vadd.f32 %v1405_v61, %v1401_v23  ;;  %v3247_v10 = vmul.f32 %v2366_v44, %v3840_v0  ;;  %v3251_v12 = vmul.f32 %v3206_v58, %v3841_v51  ;;  %v886_v24 = vsel %vm295_vm4, %v884_v48, %v885_v27 }
  0xfc   : >> { %v3255_v2 = vmul.f32 %v2366_v44, %v2643_v63  ;;  %v859_v19 = vadd.f32 %v855_v47, %v812_v25  ;;  %v914_v55 = vmul.f32 %v3209_v20, %v3839_v4  ;;  %v895_v50 = vadd.f32 %v886_v24, %v858_v60 }
  0xfd   : >> { %v3772_v23 = vrot.slane %v3251_v12, 1  ;;  %v3262_v38 = vmul.f32 %v3206_v58, %v3839_v4  ;;  %v951_v13 = vmul.f32 %v3209_v20, %v3840_v0  ;;  %v952_v56 = vmul.f32 %v3206_v58, %v3840_v0 }
  0xfe   : >> { %v922_v46 = vrot.slane %v914_v55, 2  ;;  %v987_v30 = vmul.f32 %v2365_v17, %v3843_v18  ;;  %v988_v25 = vmul.f32 %v3209_v20, %v3843_v18  ;;  %v3272_v54 = vmul.f32 %v2366_v44, %v3843_v18 }
  0xff   : >> { %v3275_v31 = vmul.f32 %v2366_v44, %v2654_v21  ;;  %v888_v6 = vsel %vm295_vm4, %v885_v27, %v3772_v23  ;;  %v3773_v22 = vrot.slane %v3262_v38, 2  ;;  %v1423_v3 = vsel %vm295_vm4, %v1421_v39, %v1422_v49 }
 0x100   : >> { %v963_v45 = vrot.slane %v3247_v10, 3  ;;  %v896_v48 = vadd.f32 %v888_v6, %v859_v19  ;;  %v959_v60 = vrot.slane %v951_v13, 3  ;;  %v1432_v61 = vadd.f32 %v1423_v3, %v1409_v43 }
 0x101   : >> { %v923_v24 = vsel %vm333_vm5, %v921_v9, %v922_v46  ;;  %v3287_v44 = vmul.f32 %v3206_v58, %v3843_v18  ;;  %v961_v29 = vrot.slane %v952_v56, 3  ;;  %v995_v27 = vrot.slane %v987_v30, 4 }
 0x102   : >> { %v932_v55 = vadd.f32 %v923_v24, %v895_v50  ;;  %v996_v23 = vrot.slane %v988_v25, 4  ;;  %v925_v39 = vsel %vm333_vm5, %v922_v46, %v3773_v22  ;;  %v1406_v19 = vmul.f32 %v3209_v20, %v2646_v11 }
 0x103   : >> { %v3296_v43 = vmul.f32 %v3206_v58, %v2649_v15  ;;  %v1437_v9 = vmul.f32 %v3209_v20, %v2640_v62  ;;  %v933_v13 = vadd.f32 %v925_v39, %v896_v48  ;;  %v960_v50 = vsel %vm371_vm6, %v958_v40, %v959_v60 }
 0x104   : >> { %v3303_v56 = vmul.f32 %v3206_v58, %v2640_v62  ;;  %v1460_v46 = vmul.f32 %v3209_v20, %v2643_v63  ;;  %v998_v30 = vrot.slane %v3287_v44, 4  ;;  %v1410_v25 = vadd.f32 %v1406_v19, %v3198_v14 }
 0x105   : >> { %v1424_v6 = vrot.slane %v3296_v43, 1  ;;  %v1445_v3 = vrot.slane %v1437_v9, 2  ;;  %v969_v24 = vadd.f32 %v960_v50, %v932_v55  ;;  %v3313_v40 = vmul.f32 %v3206_v58, %v2643_v63 }
 0x106   : >> { %v1447_v22 = vrot.slane %v3303_v56, 2  ;;  %v1468_v48 = vrot.slane %v1460_v46, 3  ;;  %v1482_v26 = vmul.f32 %v2365_v17, %v2654_v21  ;;  %v1483_v14 = vmul.f32 %v3209_v20, %v2654_v21  ;;  %v3851_v56 = vld [vmem:[#allocation18_spill] sm:$0xff] }
 0x107   : >> { %v1425_v39 = vsel %vm295_vm4, %v1422_v49, %v1424_v6  ;;  %v1446_v47 = vsel %vm333_vm5, %v1444_v59, %v1445_v3  ;;  %v962_v55 = vsel %vm371_vm6, %v959_v60, %v961_v29  ;;  %v3326_v19 = vsel %vm371_vm6, %v961_v29, %v963_v45 }
 0x108   : >> { %v1433_v63 = vadd.f32 %v1425_v39, %v1410_v25  ;;  %v1455_v9 = vadd.f32 %v1446_v47, %v1432_v61  ;;  %v997_v50 = vsel %vm409_vm7, %v995_v27, %v996_v23  ;;  %v1448_v59 = vsel %vm333_vm5, %v1445_v3, %v1447_v22  ;;  %v2359_v47 = vpop.permute.xlu0 %2358 }
 0x109   : >> { %v1470_v49 = vrot.slane %v3313_v40, 3  ;;  %v3335_v20 = vmul.f32 %v3206_v58, %v2654_v21  ;;  %v970_v17 = vadd.f32 %v962_v55, %v933_v13  ;;  %v999_v29 = vsel %vm409_vm7, %v996_v23, %v998_v30 }
 0x10a   : >> { %v1456_v60 = vadd.f32 %v1448_v59, %v1433_v63  ;;  %v805_v61 = vrot.slane %v3080_v8, 4  ;;  %v3341_v27 = vadd.f32 %v997_v50, %v969_v24  ;;  %v1469_v46 = vsel %vm371_vm6, %v1467_v16, %v1468_v48 }
 0x10b   : >> { %v1490_v25 = vrot.slane %v1482_v26, 4  ;;  %v1491_v3 = vrot.slane %v1483_v14, 4  ;;  %v1471_v21 = vsel %vm371_vm6, %v1468_v48, %v1470_v49  ;;  %v1478_v40 = vadd.f32 %v1469_v46, %v1455_v9 }
 0x10c   : >> { %v856_v13 = vmul.f32 %v3206_v58, %v3842_v53  ;;  %v1395_v23 = vrot.slane %v3087_v57, 4  ;;  %v1479_v39 = vadd.f32 %v1471_v21, %v1456_v60  ;;  %v1493_v8 = vrot.slane %v3335_v20, 4  ;;  %v2374_v21 = vpop.permute.xlu1 %2373 }
 0x10d   : >> { %v2361_v55 = vunpack.i.h.bf16 %v2359_v47  ;;  %v2360_v24 = vunpack.i.l.bf16 %v2359_v47  ;;  %v806_v42 = vsel %vm409_vm7, %v803_v5, %v805_v61  ;;  %v1407_v26 = vmul.f32 %v3206_v58, %v2646_v11 }
 0x10e   : >> { %v776_v16 = vadd.f32 %v3134_v37, %v3213_v52  ;;  %v777_v48 = vadd.f32 %v768_v33, %v3215_v34  ;;  %v3844_v57 = vrot.slane %v3143_v7, 4  ;;  %v1380_v58 = vadd.f32 %v3196_v32, %v3231_v28 }
 0x10f   : >> { %v857_v63 = vmul.f32 %v2361_v55, %v3842_v53  ;;  %v879_v35 = vmul.f32 %v2360_v24, %v3841_v51  ;;  %v916_v5 = vmul.f32 %v2360_v24, %v3839_v4  ;;  %v3845_v37 = vrot.slane %v3053_v36, 3 }
 0x110   : >> { %v1396_v14 = vsel %vm409_vm7, %v3844_v57, %v1395_v23  ;;  %v813_v9 = vadd.f32 %v806_v42, %v776_v16  ;;  %v814_v50 = vadd.f32 %v805_v61, %v777_v48  ;;  %v1408_v33 = vmul.f32 %v2361_v55, %v2646_v11  ;;  %v2369_v16 = vpop.permute.xlu0 %2368 }
 0x111   : >> { %v1381_v1 = vadd.f32 %v3845_v37, %v3236_v41  ;;  %v889_v7 = vrot.slane %v879_v35, 1  ;;  %v1416_v52 = vmul.f32 %v2360_v24, %v2649_v15  ;;  %v1439_v34 = vmul.f32 %v2360_v24, %v2640_v62 }
 0x112   : >> { %v860_v59 = vadd.f32 %v856_v13, %v813_v9  ;;  %v861_v60 = vadd.f32 %v857_v63, %v814_v50  ;;  %v1403_v47 = vadd.f32 %v1396_v14, %v1380_v58  ;;  %v3846_v61 = vrot.slane %v3251_v12, 1  ;;  %v3849_v63 = vld [vmem:[#allocation15_spill] sm:$0xff]  ;;  %v3850_v9 = vld [vmem:[#allocation16_spill] sm:$0xff] }
 0x113   : >> { %v1404_v46 = vadd.f32 %v1395_v23, %v1381_v1  ;;  %v926_v28 = vrot.slane %v916_v5, 2  ;;  %v1426_v42 = vrot.slane %v1416_v52, 1  ;;  %v1449_v36 = vrot.slane %v1439_v34, 2  ;;  %v2384_v5 = vpop.permute.xlu1 %2383  ;;  %v3852_v1 = vld [vmem:[#allocation17_spill] sm:$0xff] }
 0x114   : >> { %v890_v32 = vsel %vm295_vm4, %v3846_v61, %v889_v7  ;;  %v3378_v41 = vadd.f32 %v999_v29, %v970_v17  ;;  %v1492_v11 = vsel %vm409_vm7, %v1490_v25, %v1491_v3  ;;  %v1411_v15 = vadd.f32 %v1407_v26, %v1403_v47 }
 0x115   : >> { %v897_v55 = vadd.f32 %v890_v32, %v860_v59  ;;  %v1494_v62 = vsel %vm409_vm7, %v1491_v3, %v1493_v8  ;;  %v898_v13 = vadd.f32 %v889_v7, %v861_v60  ;;  %v1412_v23 = vadd.f32 %v1408_v33, %v1404_v46 }
 0x116   : >> { %v2376_v24 = vunpack.i.h.bf16 %v2374_v21  ;;  %v3847_v12 = vrot.slane %v3255_v2, 3  ;;  %v1501_v57 = vadd.f32 %v1492_v11, %v1478_v40  ;;  %v3389_v17 = vadd.f32 %v1494_v62, %v1479_v39 }
 0x117   : >> { %v1427_v29 = vsel %vm295_vm4, %v1424_v6, %v1426_v42  ;;  %v3848_v25 = vrot.slane %v3262_v38, 2  ;;  %v1450_v14 = vsel %vm333_vm5, %v1447_v22, %v1449_v36  ;;  %v3403_v40 = vunpack.i.l.bf16 %v2374_v21 }
 0x118   : >> { %v3387_v48 = vsel %vm371_vm6, %v1470_v49, %v3847_v12  ;;  %v1434_v26 = vadd.f32 %v1427_v29, %v1411_v15  ;;  %v1108_v35 = vmul.f32 %v2376_v24, %v3849_v63  ;;  %v3405_v39 = vunpack.i.h.bf16 %v2369_v16 }
 0x119   : >> { %v927_v3 = vsel %vm333_vm5, %v3848_v25, %v926_v28  ;;  %v2370_v43 = vunpack.i.l.bf16 %v2369_v16  ;;  %v3407_v6 = vadd.f32 %v926_v28, %v898_v13  ;;  %v1435_v38 = vadd.f32 %v1426_v42, %v1412_v23  ;;  %v3854_v23 = vld [vmem:[#allocation19_spill] sm:$0xff] }
 0x11a   : >> { %v3401_v49 = vadd.f32 %v927_v3, %v897_v55  ;;  %v1145_v50 = vmul.f32 %v2376_v24, %v3850_v9  ;;  %v3411_v58 = vmul.f32 %v2376_v24, %v3839_v4  ;;  %v3414_v22 = vmul.f32 %v2376_v24, %v3840_v0 }
 0x11b   : >> { %v3418_v37 = vmul.f32 %v3405_v39, %v3851_v56  ;;  %v1049_v33 = vmul.f32 %v2370_v43, %v3852_v1  ;;  %v1071_v7 = vmul.f32 %v2370_v43, %v3851_v56  ;;  %v3422_v52 = vadd.f32 %v1450_v14, %v1434_v26 }
 0x11c   : >> { %v1116_v34 = vrot.slane %v1108_v35, 2  ;;  %v2386_v59 = vunpack.i.h.bf16 %v2384_v5  ;;  %v3426_v60 = vmul.f32 %v3405_v39, %v3849_v63  ;;  %v2385_v61 = vunpack.i.l.bf16 %v2384_v5 }
 0x11d   : >> { %v3778_v47 = vrot.slane %v3418_v37, 1  ;;  %v1053_v46 = vadd.f32 %v1049_v33, %v3341_v27  ;;  %v1079_v21 = vrot.slane %v1071_v7, 1  ;;  %v1458_v32 = vadd.f32 %v1449_v36, %v1435_v38  ;;  %v2394_v7 = vpop.permute.xlu1 %2393 }
 0x11e   : >> { %v1153_v28 = vrot.slane %v1145_v50, 3  ;;  %v1505_v11 = vmul.f32 %v2370_v43, %v3842_v53  ;;  %v3436_v15 = vmul.f32 %v2386_v59, %v3850_v9  ;;  %v3775_v62 = vrot.slane %v3426_v60, 2 }
 0x11f   : >> { %v1081_v55 = vsel %vm295_vm4, %v1079_v21, %v3778_v47  ;;  %v3441_v27 = vmul.f32 %v3405_v39, %v3850_v9  ;;  %v3444_v36 = vmul.f32 %v2370_v43, %v3841_v51  ;;  %v3447_v24 = vmul.f32 %v2386_v59, %v3854_v23 }
 0x120   : >> { %v1090_v13 = vadd.f32 %v1081_v55, %v1053_v46  ;;  %v3450_v16 = vmul.f32 %v2386_v59, %v3840_v0  ;;  %v1118_v12 = vsel %vm333_vm5, %v1116_v34, %v3775_v62  ;;  %v3457_v29 = vmul.f32 %v3403_v40, %v3850_v9 }
 0x121   : >> { %3853 = vst [vmem:[#allocation9_spill] sm:$0xff] %v3441_v27  ;;  %v3776_v25 = vrot.slane %v3441_v27, 3  ;;  %v1182_v3 = vmul.f32 %v2385_v61, %v3854_v23  ;;  %v3464_v35 = vmul.f32 %v3405_v39, %v3854_v23  ;;  %v3468_v43 = vmul.f32 %v3403_v40, %v3840_v0 }
 0x122   : >> { %3855 = vst [vmem:[#allocation22_spill] sm:$0xff] %v3457_v29  ;;  %v1127_v14 = vadd.f32 %v1118_v12, %v1090_v13  ;;  %v3470_v5 = vadd.f32 %v1505_v11, %v1501_v57  ;;  %v3782_v38 = vrot.slane %v3436_v15, 3  ;;  %v3474_v50 = vmul.f32 %v2385_v61, %v3843_v18  ;;  %v2379_v13 = vpop.permute.xlu0 %2378 }
 0x123   : >> { %3856 = vst [vmem:[#allocation20_spill] sm:$0xff] %v3464_v35  ;;  %v1000_v33 = vrot.slane %v3272_v54, 4  ;;  %v3780_v34 = vrot.slane %v3450_v16, 3  ;;  %v1155_v46 = vsel %vm371_vm6, %v1153_v28, %v3776_v25  ;;  %v1190_v21 = vrot.slane %v1182_v3, 4 }
 0x124   : >> { %v3484_v57 = vmul.f32 %v2386_v59, %v3843_v18  ;;  %v3777_v11 = vrot.slane %v3457_v29, 3  ;;  %v1164_v61 = vadd.f32 %v1155_v46, %v1127_v14  ;;  %v3779_v54 = vrot.slane %v3464_v35, 4 }
 0x125   : >> { %v3781_v12 = vrot.slane %v3468_v43, 3  ;;  %v3491_v62 = vmul.f32 %v3403_v40, %v3851_v56  ;;  %v1495_v28 = vrot.slane %v3275_v31, 4  ;;  %v1001_v14 = vsel %vm409_vm7, %v998_v30, %v1000_v33 }
 0x126   : >> { %v3499_v59 = vsel %vm371_vm6, %v3777_v11, %v3782_v38  ;;  %v1051_v46 = vmul.f32 %v3403_v40, %v3852_v1  ;;  %v1192_v31 = vsel %vm409_vm7, %v1190_v21, %v3779_v54  ;;  %v3519_v11 = vmul.f32 %v3403_v40, %v3849_v63 }
 0x127   : >> { %v3515_v25 = vsel %vm371_vm6, %v3781_v12, %v3780_v34  ;;  %v2381_v44 = vunpack.i.h.bf16 %v2379_v13  ;;  %v1201_v30 = vadd.f32 %v1192_v31, %v1164_v61  ;;  %v3523_v47 = vmul.f32 %v3403_v40, %v3841_v51 }
 0x128   : >> { %v2380_v55 = vunpack.i.l.bf16 %v2379_v13  ;;  %v971_v21 = vadd.f32 %v3326_v19, %v3401_v49  ;;  %v1496_v34 = vsel %vm409_vm7, %v1493_v8, %v1495_v28  ;;  %v1507_v3 = vmul.f32 %v3403_v40, %v3842_v53 }
 0x129   : >> { %v972_v61 = vadd.f32 %v963_v45, %v3407_v6  ;;  %v1052_v31 = vmul.f32 %v2381_v44, %v3852_v1  ;;  %v1480_v20 = vadd.f32 %v3387_v48, %v3422_v52  ;;  %v3857_v8 = vrot.slane %v3255_v2, 3 }
 0x12a   : >> { %v1008_v12 = vadd.f32 %v1001_v14, %v971_v21  ;;  %v1074_v13 = vmul.f32 %v2380_v55, %v3851_v56  ;;  %v1111_v19 = vmul.f32 %v2380_v55, %v3849_v63  ;;  %v1516_v42 = vmul.f32 %v2380_v55, %v3841_v51 }
 0x12b   : >> { %v1009_v49 = vadd.f32 %v1000_v33, %v972_v61  ;;  %v1481_v26 = vadd.f32 %v3857_v8, %v1458_v32  ;;  %v1524_v10 = vrot.slane %v3523_v47, 1  ;;  %v3547_v45 = vmul.f32 %v3403_v40, %v3839_v4 }
 0x12c   : >> { %v1508_v6 = vmul.f32 %v2381_v44, %v3842_v53  ;;  %v1084_v14 = vrot.slane %v1074_v13, 1  ;;  %v1503_v33 = vadd.f32 %v1496_v34, %v1480_v20  ;;  %v1526_v38 = vrot.slane %v1516_v42, 1 }
 0x12d   : >> { %v1056_v21 = vadd.f32 %v1052_v31, %v1009_v49  ;;  %v1504_v61 = vadd.f32 %v1495_v28, %v1481_v26  ;;  %v1055_v48 = vadd.f32 %v1051_v46, %v1008_v12  ;;  %v1121_v52 = vrot.slane %v1111_v19, 2  ;;  %v2389_v28 = vpop.permute.xlu0 %2388  ;;  %v3859_v46 = vld [vmem:[#allocation2_spill] sm:$0xff] }
 0x12e   : >> { %v1539_v2 = vmul.f32 %v2380_v55, %v3839_v4  ;;  %v2396_v32 = vunpack.i.h.bf16 %v2394_v7  ;;  %v1119_v8 = vrot.slane %v3519_v11, 2  ;;  %v1511_v47 = vadd.f32 %v1507_v3, %v1503_v33  ;;  %v3874_v11 = vld [vmem:[#allocation9_spill] sm:$0xff] }
 0x12f   : >> { %v1093_v54 = vadd.f32 %v1084_v14, %v1056_v21  ;;  %v1512_v35 = vadd.f32 %v1508_v6, %v1504_v61  ;;  %v1527_v27 = vsel %vm295_vm4, %v1524_v10, %v1526_v38  ;;  %v1547_v42 = vrot.slane %v3547_v45, 2 }
 0x130   : >> { %v1549_v29 = vrot.slane %v1539_v2, 2  ;;  %v1682_v44 = vmul.f32 %v2396_v32, %v3849_v63  ;;  %v3555_v31 = vmul.f32 %v2396_v32, %v3850_v9  ;;  %v3858_v26 = vrot.slane %v3491_v62, 1 }
 0x131   : >> { %v1130_v55 = vadd.f32 %v1121_v52, %v1093_v54  ;;  %v1534_v12 = vadd.f32 %v1527_v27, %v1511_v47  ;;  %v3562_v3 = vmul.f32 %v3859_v46, %v1201_v30  ;;  %v3569_v19 = vsel %vm333_vm5, %v1119_v8, %v1121_v52 }
 0x132   : >> { %v1085_v34 = vsel %vm295_vm4, %v3858_v26, %v1084_v14  ;;  %v1535_v49 = vadd.f32 %v1526_v38, %v1512_v35  ;;  %v1550_v20 = vsel %vm333_vm5, %v1547_v42, %v1549_v29  ;;  %v1690_v45 = vrot.slane %v1682_v44, 2 }
 0x133   : >> { %v3564_v13 = vadd.f32 %v1085_v34, %v1055_v48  ;;  %v1720_v6 = vrot.slane %v3555_v31, 3  ;;  %v3573_v14 = vunpack.i.l.bf16 %v2394_v7  ;;  %v3860_v27 = vrot.slane %v3436_v15, 3 }
 0x134   : >> { %v1584_v30 = vmul.f32 %v3403_v40, %v3843_v18  ;;  %v2391_v21 = vunpack.i.h.bf16 %v2389_v28  ;;  %v1514_v33 = vmul.f32 %v3405_v39, %v3841_v51  ;;  %v1557_v61 = vadd.f32 %v1550_v20, %v1534_v12 }
 0x135   : >> { %v3577_v54 = vadd.f32 %v3860_v27, %v1130_v55  ;;  %v1506_v35 = vmul.f32 %v3405_v39, %v3842_v53  ;;  %v1537_v38 = vmul.f32 %v3405_v39, %v3839_v4  ;;  %v1560_v7 = vmul.f32 %v3405_v39, %v3840_v0 }
 0x136   : >> { %v3590_v15 = vmul.f32 %v2391_v21, %v3851_v56  ;;  %v3593_v48 = vmul.f32 %v2391_v21, %v3849_v63  ;;  %v2390_v52 = vunpack.i.l.bf16 %v2389_v28  ;;  %v1583_v51 = vmul.f32 %v3405_v39, %v3843_v18 }
 0x137   : >> { %v1558_v2 = vadd.f32 %v1549_v29, %v1535_v49  ;;  %v1510_v32 = vadd.f32 %v1506_v35, %v3389_v17  ;;  %v1522_v53 = vrot.slane %v1514_v33, 1  ;;  %v1545_v47 = vrot.slane %v1537_v38, 2  ;;  %v1740_v17 = vpop.permute.xlu1 %1739 }
 0x138   : >> { %v1593_v44 = vrot.slane %v1584_v30, 4  ;;  %v1638_v4 = vmul.f32 %v2391_v21, %v3852_v1  ;;  %v1691_v0 = vrot.slane %v3593_v48, 2  ;;  %v3601_v31 = vmul.f32 %v2391_v21, %v3850_v9 }
 0x139   : >> { %v1661_v26 = vrot.slane %v3590_v15, 1  ;;  %v3861_v34 = vrot.slane %v3444_v36, 1  ;;  %v1525_v18 = vsel %vm295_vm4, %v1522_v53, %v1524_v10  ;;  %v1568_v29 = vrot.slane %v1560_v7, 3 }
 0x13a   : >> { %v1533_v28 = vadd.f32 %v1525_v18, %v1510_v32  ;;  %v1591_v49 = vrot.slane %v1583_v51, 4  ;;  %v1637_v20 = vmul.f32 %v2390_v52, %v3852_v1  ;;  %v1692_v27 = vsel %vm333_vm5, %v1690_v45, %v1691_v0 }
 0x13b   : >> { %v1523_v55 = vsel %vm295_vm4, %v3861_v34, %v1522_v53  ;;  %v3862_v30 = vrot.slane %v3411_v58, 2  ;;  %v1548_v33 = vsel %vm333_vm5, %v1545_v47, %v1547_v42  ;;  %v1652_v10 = vmul.f32 %v2390_v52, %v3851_v56  ;;  %v2399_v42 = vpop.permute.xlu0 %2398 }
 0x13c   : >> { %v1532_v12 = vadd.f32 %v1523_v55, %v3470_v5  ;;  %v1556_v38 = vadd.f32 %v1548_v33, %v1533_v28  ;;  %v1721_v5 = vrot.slane %v3601_v31, 3  ;;  %v1742_v7 = vmul.f32 %v1740_v17, %v3854_v23 }
 0x13d   : >> { %v1546_v36 = vsel %vm333_vm5, %v3862_v30, %v1545_v47  ;;  %v3863_v15 = vrot.slane %v3414_v22, 3  ;;  %v3864_v45 = vrot.slane %v3468_v43, 3  ;;  %v1660_v32 = vrot.slane %v1652_v10, 1 }
 0x13e   : >> { %v1555_v35 = vadd.f32 %v1546_v36, %v1532_v12  ;;  %v3627_v53 = vmul.f32 %v2391_v21, %v3854_v23  ;;  %v3865_v34 = vrot.slane %v3474_v50, 4  ;;  %v1595_v18 = vrot.slane %v3484_v57, 4 }
 0x13f   : >> { %v1569_v51 = vsel %vm371_vm6, %v3863_v15, %v1568_v29  ;;  %v1571_v58 = vsel %vm371_vm6, %v1568_v29, %v3864_v45  ;;  %v1594_v22 = vsel %vm409_vm7, %v1591_v49, %v1593_v44  ;;  %v1750_v17 = vrot.slane %v1742_v7, 4 }
 0x140   : >> { %v1578_v52 = vadd.f32 %v1569_v51, %v1555_v35  ;;  %v1579_v47 = vadd.f32 %v1571_v58, %v1556_v38  ;;  %v1592_v55 = vsel %vm409_vm7, %v3865_v34, %v1591_v49  ;;  %v1639_v43 = vmul.f32 %v3573_v14, %v3852_v1 }
 0x141   : >> { %v1654_v29 = vmul.f32 %v3573_v14, %v3851_v56  ;;  %v1722_v28 = vsel %vm371_vm6, %v1720_v6, %v1721_v5  ;;  %v2401_v50 = vunpack.i.h.bf16 %v2399_v42  ;;  %v1662_v30 = vsel %vm295_vm4, %v1660_v32, %v1661_v26 }
 0x142   : >> { %v1601_v21 = vadd.f32 %v1592_v55, %v1578_v52  ;;  %v1602_v12 = vadd.f32 %v1594_v22, %v1579_v47  ;;  %v1751_v57 = vrot.slane %v3627_v53, 4  ;;  %v2400_v36 = vunpack.i.l.bf16 %v2399_v42 }
 0x143   : >> { %v1580_v49 = vadd.f32 %v3515_v25, %v1557_v61  ;;  %v1596_v10 = vsel %vm409_vm7, %v1593_v44, %v1595_v18  ;;  %v1663_v35 = vrot.slane %v1654_v29, 1  ;;  %v1684_v38 = vmul.f32 %v3573_v14, %v3849_v63  ;;  %v1710_v44 = vpop.permute.xlu0 %1709 }
 0x144   : >> { %v1641_v33 = vadd.f32 %v1637_v20, %v1601_v21  ;;  %v1752_v7 = vsel %vm409_vm7, %v1750_v17, %v1751_v57  ;;  %v3866_v6 = vrot.slane %v3450_v16, 3  ;;  %v1655_v45 = vmul.f32 %v2400_v36, %v3851_v56 }
 0x145   : >> { %v1603_v51 = vadd.f32 %v1596_v10, %v1580_v49  ;;  %v1642_v58 = vadd.f32 %v1638_v4, %v1602_v12  ;;  %v1640_v25 = vmul.f32 %v2401_v50, %v3852_v1  ;;  %v1685_v61 = vmul.f32 %v2400_v36, %v3849_v63 }
 0x146   : >> { %v1581_v15 = vadd.f32 %v3866_v6, %v1558_v2  ;;  %v1671_v32 = vadd.f32 %v1662_v30, %v1641_v33  ;;  %v1665_v52 = vrot.slane %v1655_v45, 1  ;;  %v1714_v47 = vmul.f32 %v3573_v14, %v3850_v9 }
 0x147   : >> { %v1643_v42 = vadd.f32 %v1639_v43, %v1603_v51  ;;  %v1693_v55 = vrot.slane %v1684_v38, 2  ;;  %v1664_v16 = vsel %vm295_vm4, %v1661_v26, %v1663_v35  ;;  %v1695_v2 = vrot.slane %v1685_v61, 2 }
 0x148   : >> { %v1604_v20 = vadd.f32 %v1595_v18, %v1581_v15  ;;  %v1701_v34 = vadd.f32 %v1692_v27, %v1671_v32  ;;  %v1666_v56 = vsel %vm295_vm4, %v1663_v35, %v1665_v52  ;;  %v1744_v4 = vmul.f32 %v3573_v14, %v3854_v23 }
 0x149   : >> { %v1715_v63 = vmul.f32 %v1710_v44, %v3850_v9  ;;  %v1673_v18 = vadd.f32 %v1666_v56, %v1643_v42  ;;  %v1723_v43 = vrot.slane %v1714_v47, 3  ;;  %v3867_v29 = vrot.slane %v3447_v24, 4  ;;  %v3872_v42 = vld [vmem:[#allocation22_spill] sm:$0xff] }
 0x14a   : >> { %v1644_v22 = vadd.f32 %v1640_v25, %v1604_v20  ;;  %v1731_v17 = vadd.f32 %v1722_v28, %v1701_v34  ;;  %v1696_v12 = vsel %vm333_vm5, %v1693_v55, %v1695_v2  ;;  %v1745_v50 = vmul.f32 %v1710_v44, %v3854_v23  ;;  %v3871_v25 = vld [vmem:[#allocation3_spill] sm:$0xff] }
 0x14b   : >> { %v1204_v21 = vadd.f32 %v3867_v29, %v3577_v54  ;;  %v1725_v26 = vrot.slane %v1715_v63, 3  ;;  %v1672_v36 = vadd.f32 %v1664_v16, %v1642_v58  ;;  %v1703_v49 = vadd.f32 %v1696_v12, %v1673_v18  ;;  %v3876_v16 = vld [vmem:[#allocation20_spill] sm:$0xff] }
 0x14c   : >> { %v1674_v27 = vadd.f32 %v1665_v52, %v1644_v22  ;;  %v1761_v30 = vadd.f32 %v1752_v7, %v1731_v17  ;;  %v1050_v14 = vmul.f32 %v3405_v39, %v3852_v1  ;;  %v1753_v9 = vrot.slane %v1744_v4, 4  ;;  %v3879_v17 = vld [vmem:[#allocation5_spill] sm:$0xff] }
 0x14d   : >> { %v1726_v33 = vsel %vm371_vm6, %v1723_v43, %v1725_v26  ;;  %v1755_v10 = vrot.slane %v1745_v50, 4  ;;  %v1129_v54 = vadd.f32 %v3569_v19, %v3564_v13  ;;  %v1774_v38 = vmul.f32 %v3859_v46, %v1204_v21  ;;  %2231 = vmatprep.mubr.msk.f32.mxu0 %vm1805_vm8, %v3879_v17 }
 0x14e   : >> { %v1704_v28 = vadd.f32 %v1695_v2, %v1674_v27  ;;  %v1733_v35 = vadd.f32 %v1726_v33, %v1703_v49  ;;  %v1054_v6 = vadd.f32 %v1050_v14, %v3378_v41  ;;  %v1694_v7 = vsel %vm333_vm5, %v1691_v0, %v1693_v55 }
 0x14f   : >> { %v1756_v39 = vsel %vm409_vm7, %v1753_v9, %v1755_v10  ;;  %v3868_v1 = vrot.slane %v3491_v62, 1  ;;  %v3869_v51 = vrot.slane %v3418_v37, 1  ;;  %v1789_v13 = vmul.f32 %v3859_v46, %v1761_v30 }
 0x150   : >> { %v1734_v15 = vadd.f32 %v1725_v26, %v1704_v28  ;;  %v1724_v19 = vsel %vm371_vm6, %v1721_v5, %v1723_v43  ;;  %v1763_v41 = vadd.f32 %v1756_v39, %v1733_v35  ;;  %v3870_v0 = vrot.slane %v3426_v60, 2  ;;  %v3882_v39 = vld [vmem:[#allocation8_spill] sm:$0xff] }
 0x151   : >> { %v1083_v45 = vsel %vm295_vm4, %v3869_v51, %v3868_v1  ;;  %v1184_v37 = vmul.f32 %v3403_v40, %v3854_v23  ;;  %v1702_v62 = vadd.f32 %v1694_v7, %v1672_v36  ;;  %v1784_v61 = vadd.f32 %v3871_v25, %v1774_v38 }
 0x152   : >> { %v1091_v58 = vadd.f32 %v1083_v45, %v1054_v6  ;;  %v1764_v48 = vadd.f32 %v1755_v10, %v1734_v15  ;;  %v1120_v32 = vsel %vm333_vm5, %v3870_v0, %v1119_v8  ;;  %v1791_v44 = vmul.f32 %v3859_v46, %v1763_v41  ;;  %v3881_v15 = vld [vmem:[#allocation6_spill] sm:$0xff] }
 0x153   : >> { %v1166_v5 = vadd.f32 %v3499_v59, %v1129_v54  ;;  %v3873_v52 = vrot.slane %v3872_v42, 3  ;;  %v3875_v47 = vrot.slane %v3874_v11, 3  ;;  %v1193_v8 = vrot.slane %v1184_v37, 4 }
 0x154   : >> { %v1128_v31 = vadd.f32 %v1120_v32, %v1091_v58  ;;  %v1792_v20 = vmul.f32 %v3859_v46, %v1764_v48  ;;  %v1732_v34 = vadd.f32 %v1724_v19, %v1702_v62  ;;  %v1793_v40 = vadd.f32 %v3871_v25, %v1789_v13 }
 0x155   : >> { %v1157_v60 = vsel %vm371_vm6, %v3875_v47, %v3873_v52  ;;  %v1754_v55 = vsel %vm409_vm7, %v1751_v57, %v1753_v9  ;;  %v3877_v2 = vrot.slane %v3876_v16, 4  ;;  %v3878_v4 = vmov %v3867_v29  ;;  %v3880_v29 = vld [vmem:[#allocation7_spill] sm:$0xff] }
 0x156   : >> { %v1165_v23 = vadd.f32 %v1157_v60, %v1128_v31  ;;  %v1796_v59 = vadd.f32 %v3871_v25, %v1792_v20  ;;  %v1762_v56 = vadd.f32 %v1754_v55, %v1732_v34  ;;  %v1196_v63 = vsel %vm409_vm7, %v1193_v8, %v3878_v4  ;;  %2242 = vmatprep.mubr.msk.f32.mxu1 %vm1805_vm8, %v3880_v29 }
 0x157   : >> { %v1194_v22 = vsel %vm409_vm7, %v3877_v2, %v1193_v8  ;;  %v1781_v53 = vadd.f32 %v3871_v25, %v3562_v3  ;;  %v1795_v57 = vadd.f32 %v3871_v25, %v1791_v44  ;;  %v1203_v43 = vadd.f32 %v1196_v63, %v1166_v5 }
 0x158   : >> { %v1202_v18 = vadd.f32 %v1194_v22, %v1165_v23  ;;  %v1788_v21 = vmax.f32 %v1784_v61, 0.0  ;;  %v1790_v27 = vmul.f32 %v3859_v46, %v1762_v56  ;;  %v1797_v12 = vmax.f32 %v1793_v40, 0.0 }
 0x159   : >> { %v1800_v24 = vmax.f32 %v1796_v59, 0.0  ;;  %v1773_v50 = vmul.f32 %v3859_v46, %v1203_v43  ;;  %v1785_v36 = vmax.f32 %v1781_v53, 0.0  ;;  %v1799_v3 = vmax.f32 %v1795_v57, 0.0 }
 0x15a   : >> { %v1772_v26 = vmul.f32 %v3859_v46, %v1202_v18  ;;  %v1794_v30 = vadd.f32 %v3871_v25, %v1790_v27 }
 0x15b   : >> { %v1783_v14 = vadd.f32 %v3871_v25, %v1773_v50  ;;  %v1804_v28 = vmax.f32 %v1788_v21, %v1800_v24  ;;  %v1801_v10 = vmax.f32 %v1785_v36, %v1797_v12 }
 0x15c   : >> { %v1782_v49 = vadd.f32 %v3871_v25, %v1772_v26  ;;  %v1798_v9 = vmax.f32 %v1794_v30, 0.0 }
 0x15d   : >> { %v1787_v54 = vmax.f32 %v1783_v14, 0.0 }
 0x15e   : >> { %v1786_v33 = vmax.f32 %v1782_v49, 0.0 }
 0x15f   : >> { %v1803_v38 = vmax.f32 %v1787_v54, %v1799_v3 }
 0x160   : >> { %v1802_v35 = vmax.f32 %v1786_v33, %v1798_v9 }
 0x161   : >> { %v2249_v7 = vpack.c.bf16 %v1804_v28, %v1803_v38 }
 0x162   : >> { %v2245_v6 = vpack.c.bf16 %v1802_v35, %v1801_v10 }
 0x164   : >> { %2246 = vmatprep.subr.bf16.mxu0 %v2245_v6  ;;  %2256 = vmatprep.subr.bf16.mxu1 %v2245_v6 }
 0x165   : >> { %2248 = vmatpush3.bf16.msra.mxu0 %v2245_v6  ;;  %2258 = vmatpush3.bf16.msra.mxu1 %v2245_v6 }
 0x166   : >> { %2251 = vmatprep.subr.msk.bf16.mxu0 %vm2250_vm10, %v2249_v7  ;;  %2261 = vmatprep.subr.msk.bf16.mxu1 %vm2250_vm10, %v2249_v7 }
 0x169   : >> { %2254 = vmatpush3.bf16.msk.msra.mxu0 %vm2250_vm10, %v2249_v7  ;;  %2264 = vmatpush3.bf16.msk.msra.mxu1 %vm2250_vm10, %v2249_v7 }
 0x16c   : >> { %2232 = vmatmul.mubr.msk.f32.vlgmr.msra.gmra.mrb[0].mxu0 %vm1805_vm8, %v3881_v15  ;;  %2243 = vmatmul.mubr.msk.f32.vlgmr.msra.gmra.mrb[0].mxu1 %vm1805_vm8, %v3882_v39 }
 0x23f   : >> { %v2233_v1 = vpop.f32.mrb[0].mxu0  ;;  %v2244_v51 = vpop.f32.mrb[0].mxu1  ;;  %225 = sbr.rel (!%p223_p4) target bundleno = 18 (0x12), region = 104 }
 0x240   : >> { %v1972_v45 = vmax.f32 %v2233_v1, %v2244_v51  ;;  %v1881_v13 = vpop.f32.mrb[1].mxu0  ;;  %v1962_v19 = vpop.f32.mrb[1].mxu1 }
 0x241   : >> { %v1971_v41 = vmax.f32 %v1881_v13, %v1962_v19 }
 0x242   : >> { %v2180_v58 = vpack.c.bf16 %v1972_v45, %v1972_v45 }
 0x243   : >> { %v2179_v48 = vpack.c.bf16 %v1971_v41, %v1971_v41 }
 0x244   : >> { %1984 = vst [vmem:[%s1982_s13 + $0x4] sm:$0x7] %v2180_v58 }
 0x245   : >> { %1983 = vst [vmem:[%s1982_s13] sm:$0xf] %v2179_v48 }
 0x246 PF: > { %s14_s15 = sadd.s32 1, %s2412_s15  }
 0x247   : > { %p11_p5 = scmp.ge.s32.totalorder %s14_s15, 4  }
 0x249   :  { %13 = sbr.rel (!%p11_p5) target bundleno = 1 (0x1), region = 115 }

// kernel: convnet_forward.7
= control target key start
LH: loop header
LB: loop body
LE: loop exit
PB: predicated region body
PF: predicated region fallthrough
CT: control target
= control target key end

     0   :  { %s2518_s9 = smov 0   ;;  %s2838_s0 = inlined_call_operand.vmem [shape: bf16[2,18,18,16], index: 0, kind: input, shape index: {}]   ;;  %s2839_s1 = inlined_call_operand.vmem [shape: bf16[25,16,128], index: 1, kind: input, shape index: {}]   ;;  %s2840_s2 = inlined_call_operand.vmem [shape: f32[2,2,128], index: 2, kind: output, shape index: {}]  }
   0x1 LB: > { %s1914_s10 = sadd.s32 4294967295, %s2487_s9   ;;  %p1918_p0 = scmp.ge.s32.totalorder %s2487_s9, 1  ;;  %s2487_s9 = sphi %s2518_s9, %s12_s9  }
   0x2   : > { %p112_p1 = scmp.lt.s32.totalorder %s2487_s9, 3 }
   0x4   : > { %p113_p2 = pnand %p1918_p0, %p112_p1 }
   0x5   : > { %p133_p3 = scmp.lt.s32.totalorder (!%p113_p2), %s1914_s10, 1  ;;  %v2536_v0 = vmov (!%p113_p2), 0.0   ;;  %v2538_v1 = vmov (!%p113_p2), 0.0   ;;  %s2540_s19 = smov (!%p113_p2), 0  }
   0x6   : > { %116 = sbr.rel (%p113_p2) target bundleno = 406 (0x196), region = 28 }
   0xd   : > { %s2844_s10 = smov (!%p133_p3, %s1914_s10), 1 }
   0xe   : > { %s2379_s11 = smul.u32 216, %s2844_s10  ;;  %s1920_s12 = sshll.u32 %s2844_s10, 1 }
   0xf   : > { %s2529_s15 = scalar_lea.vmem %s2840_s2, %s1920_s12 }
  0x10   : > { %s2534_s18 = scalar_lea.vmem %s2838_s0, %s2379_s11 }
  0x11 LB: >> { %v2414_v2 = vld [vmem:[%s2839_s1 + $0x60] sm:$0xff]   ;;  %v2501_v3 = vmov 0.0   ;;  %vm2502_vm0 = vmmov 0   ;;  %s2084_s22 = smul.u32 12, %s2499_s19  ;;  %v2418_v4 = vld [vmem:[%s2839_s1 + $0x8] sm:$0xff]   ;;  %vm180_vm1 = vcmask 130048   ;;  %s2499_s19 = sphi %s2540_s19, %s148_s19   ;;  %v2495_v1 = vphi %v2538_v1, %v2842_v1   ;;  %v2491_v0 = vphi %v2536_v0, %v2841_v0  }
  0x12   : >> { %2207 = vmatprep.subr.bf16.mxu0 %v2501_v3  ;;  %2135 = vmatprep.subr.bf16.mxu1 %v2501_v3  ;;  %v2417_v8 = vld [vmem:[%s2839_s1 + $0x68] sm:$0xff]   ;;  %v2420_v25 = vld [vmem:[%s2839_s1] sm:$0xff]   ;;  %vm352_vm2 = vsmask.f32 6400  ;;  %v2423_v32 = vld [vmem:[%s2839_s1 + $0x70] sm:$0xff]   ;;  %vm425_vm3 = vcmask 1045504  }
  0x13   : >> { %2208 = vmatpush3.bf16.msra.mxu0 %v2414_v2  ;;  %2209 = vmatprep.mubr.msk.bf16.mxu0 %vm2502_vm0, %v2501_v3  ;;  %s2566_s25 = scalar_lea.vmem %s2534_s18, %s2084_s22  ;;  %v2425_v37 = vld [vmem:[%s2839_s1 + $0x10] sm:$0xff]   ;;  %v2427_v44 = vld [vmem:[%s2839_s1 + $0x78] sm:$0xff]   ;;  %s148_s19 = sadd.s32 1, %s2499_s19  }
  0x14   : >> { %2213 = vmatprep.subr.bf16.mxu0 %v2501_v3  ;;  %2137 = vmatprep.mubr.msk.bf16.mxu1 %vm2502_vm0, %v2501_v3  ;;  %v2569_v5 = vld [vmem:[%s2566_s25 + $0x18] sm:$0xf]  ;;  %v1987_v6 = vld [vmem:[%s2566_s25 + $0x1c] sm:$0xf]  ;;  %v154_v11 = vld [vmem:[%s2566_s25] sm:$0xf] }
  0x15   : >> { %v1993_v7 = vld [vmem:[%s2566_s25 + $0x18] sm:$0xe]  ;;  %2136 = vmatpush3.bf16.msra.mxu1 %v2418_v4  ;;  %v2577_v9 = vcombine.low %v2569_v5, %v1987_v6  ;;  %v158_v12 = vld [vmem:[%s2566_s25 + $0x4] sm:$0xf]  ;;  %v2000_v15 = vld [vmem:[%s2566_s25 + $0x1c] sm:$0xf] }
  0x16   : >> { %v1996_v10 = vcombine.low %v1993_v7, %v1987_v6  ;;  %2141 = vmatprep.subr.bf16.mxu1 %v2501_v3  ;;  %v1999_v13 = vld [vmem:[%s2566_s25 + $0x18] sm:$0xe]  ;;  %v1924_v14 = vcombine.low %v154_v11, %v158_v12  ;;  %v2422_v18 = vld [vmem:[%s2566_s25 + $0x20] ss:$0 sps:$4 sm:$0x11]   ;;  %p145_p4 = scmp.ge.s32.totalorder %s148_s19, 14  }
  0x17   : >> { %v2004_v17 = vcombine.low %v1999_v13, %v2000_v15  ;;  %v1029_v24 = vshll.u32 %v2422_v18, 16  ;;  %v155_v33 = vld [vmem:[%s2566_s25 + $0x4] sm:$0x7]  ;;  %v2008_v34 = vld [vmem:[%s2566_s25 + $0x18] sm:$0xc]  ;;  %v1093_v40 = vrot.slane %v2422_v18, 2 }
  0x18   : >> { %v953_v16 = vrot.slane %v1996_v10, 1  ;;  %v168_v19 = vshrl.u32 %v1924_v14, 16  ;;  %v170_v20 = vshll.u32 %v1924_v14, 16  ;;  %v1927_v35 = vcombine.low %v154_v11, %v155_v33  ;;  %v278_v38 = vld [vmem:[%s2566_s25] sm:$0xe]  ;;  %v2429_v48 = vld [vmem:[%s2839_s1 + $0x18] sm:$0xff]  }
  0x19   : >> { %v1021_v21 = vshrl.u32 %v2004_v17, 16  ;;  %v1024_v22 = vshll.u32 %v2004_v17, 16  ;;  %v1031_v30 = vrot.slane %v1029_v24, 2  ;;  %v2011_v36 = vcombine.low %v2008_v34, %v2000_v15  ;;  %v338_v41 = vld [vmem:[%s2566_s25] sm:$0xe] }
  0x1a   : >> { %2210 = vmatmul.mubr.msk.bf16.vlgmr.msra.gmra.mrb[0].mxu0 %vm180_vm1, %v953_v16  ;;  %v172_v23 = vrot.slane %v170_v20, 1  ;;  %v2615_v42 = vld [vmem:[%s2566_s25 + $0x4] sm:$0xf]  ;;  %v1932_v45 = vcombine.low %v278_v38, %v158_v12  ;;  %v2624_v47 = vld [vmem:[%s2566_s25 + $0x8] ss:$0 sps:$4 sm:$0x11]  }
  0x1b   : >> { %2214 = vmatpush3.bf16.msra.mxu0 %v2417_v8  ;;  %2215 = vmatprep.mubr.msk.bf16.mxu0 %vm2502_vm0, %v2501_v3  ;;  %v1023_v26 = vrot.slane %v1021_v21, 1  ;;  %v1026_v27 = vrot.slane %v1024_v22, 2  ;;  %v1092_v39 = vrot.slane %v2011_v36, 2  ;;  %v1937_v46 = vcombine.low %v338_v41, %v2615_v42  ;;  %v1965_v51 = vld [vmem:[%s2566_s25 + $0xc] sm:$0xe]  ;;  %v2432_v11 = vld [vmem:[%s2839_s1 + $0x80] sm:$0xff]  }
  0x1c   : >> { %2219 = vmatprep.subr.bf16.mxu0 %v2501_v3  ;;  %v173_v28 = vor.u32 %v172_v23, %v168_v19  ;;  %v285_v49 = vrot.slane %v1932_v45, 1  ;;  %v2634_v52 = vld [vmem:[%s2566_s25 + $0x10] sm:$0xf]  ;;  %v2639_v55 = vld [vmem:[%s2566_s25 + $0x14] ss:$0 sps:$4 sm:$0x11]  }
  0x1d   : >> { %v1027_v29 = vor.u32 %v1026_v27, %v1023_v26  ;;  %v1094_v43 = vsel %vm425_vm3, %v1092_v39, %v1093_v40  ;;  %v354_v50 = vshrl.u32 %v1937_v46, 16  ;;  %v357_v53 = vshll.u32 %v1937_v46, 16  ;;  %v2014_v56 = vld [vmem:[%s2566_s25 + $0x24] sm:$0xf]  ;;  %v2015_v57 = vld [vmem:[%s2566_s25 + $0x28] sm:$0x7] }
  0x1e   : >> { %2138 = vmatmul.mubr.msk.bf16.vlgmr.msra.gmra.mrb[0].mxu1 %vm180_vm1, %v173_v28  ;;  %v1970_v54 = vcombine.low %v1965_v51, %v2634_v52  ;;  %v696_v60 = vshll.u32 %v2639_v55, 16  ;;  %v2646_v61 = vld [vmem:[%s2566_s25 + $0x28] sm:$0xf]  ;;  %v362_v63 = vshll.u32 %v2624_v47, 16  ;;  %v2018_v8 = vcombine.low %v2014_v56, %v2015_v57  ;;  %v2067_v13 = vld [vmem:[%s2566_s25 + $0x30] sm:$0xe] }
  0x1f   : >> { %2142 = vmatpush3.bf16.msra.mxu1 %v2420_v25  ;;  %2143 = vmatprep.mubr.msk.bf16.mxu1 %vm2502_vm0, %v2501_v3  ;;  %v1032_v31 = vsel %vm352_vm2, %v1027_v29, %v1031_v30  ;;  %v356_v62 = vrot.slane %v354_v50, 1  ;;  %v359_v2 = vrot.slane %v357_v53, 2  ;;  %v2024_v10 = vcombine.low %v2014_v56, %v2646_v61  ;;  %v2661_v17 = vld [vmem:[%s2566_s25 + $0x34] sm:$0xf]  ;;  %v2435_v25 = vld [vmem:[%s2839_s1 + $0x20] sm:$0xff]   ;;  %v2436_v36 = vld [vmem:[%s2839_s1 + $0x88] sm:$0xff]  }
  0x20   : >> { %2147 = vmatprep.subr.bf16.mxu1 %v2501_v3  ;;  %v688_v58 = vshrl.u32 %v1970_v54, 16  ;;  %v691_v59 = vshll.u32 %v1970_v54, 16  ;;  %v698_v7 = vrot.slane %v696_v60, 2  ;;  %v364_v15 = vrot.slane %v362_v63, 2  ;;  %v418_v26 = vld [vmem:[%s2566_s25] sm:$0xc] }
  0x21   : >> { %v360_v14 = vor.u32 %v359_v2, %v356_v62  ;;  %v2072_v18 = vcombine.low %v2067_v13, %v2661_v17  ;;  %v2665_v19 = vld [vmem:[%s2566_s25 + $0x38] ss:$0 sps:$4 sm:$0x11]   ;;  %v1223_v20 = vshll.u32 %v2024_v10, 16  ;;  %v1221_v30 = vshrl.u32 %v2024_v10, 16  ;;  %v2438_v41 = vld [vmem:[%s2839_s1 + $0x28] sm:$0xff]  }
  0x22   : >> { %v690_v4 = vrot.slane %v688_v58, 1  ;;  %v693_v6 = vrot.slane %v691_v59, 2  ;;  %v1695_v23 = vshll.u32 %v2665_v19, 16  ;;  %v1943_v33 = vcombine.low %v418_v26, %v2615_v42  ;;  %v2027_v39 = vld [vmem:[%s2566_s25 + $0x24] sm:$0xe]  ;;  %v2447_v13 = vld [vmem:[%s2839_s1 + $0x38] sm:$0xff]  }
  0x23   : >> { %v1687_v21 = vshrl.u32 %v2072_v18, 16  ;;  %v1690_v22 = vshll.u32 %v2072_v18, 16  ;;  %v365_v24 = vsel %vm352_vm2, %v360_v14, %v364_v15  ;;  %v427_v38 = vrot.slane %v2624_v47, 2  ;;  %v2033_v42 = vld [vmem:[%s2566_s25 + $0x24] sm:$0xe] }
  0x24   : >> { %v694_v12 = vor.u32 %v693_v6, %v690_v4  ;;  %v1697_v29 = vrot.slane %v1695_v23, 2  ;;  %v1946_v47 = vld [vmem:[%s2566_s25 + $0xc] sm:$0xf]  ;;  %v1953_v54 = vld [vmem:[%s2566_s25 + $0x10] sm:$0xf]  ;;  %v2446_v6 = vld [vmem:[%s2839_s1 + $0x98] sm:$0xff]  }
  0x25   : >> { %v1689_v27 = vrot.slane %v1687_v21, 1  ;;  %v1692_v28 = vrot.slane %v1690_v22, 2  ;;  %v2445_v50 = vld [vmem:[%s2566_s25 + $0x2c] ss:$0 sps:$4 sm:$0x11]   ;;  %v1956_v57 = vcombine.low %v1946_v47, %v1953_v54  ;;  %v2449_v21 = vld [vmem:[%s2839_s1 + $0xa0] sm:$0xff]  }
  0x26   : >> { %2216 = vmatmul.mubr.msk.bf16.vlgmr.msra.gmra.mrb[0].mxu0 %vm180_vm1, %v1032_v31  ;;  %v2658_v16 = vsel %vm352_vm2, %v694_v12, %v698_v7  ;;  %v1225_v31 = vrot.slane %v1223_v20, 1  ;;  %v1362_v60 = vshll.u32 %v2445_v50, 16  ;;  %v2042_v10 = vld [vmem:[%s2566_s25 + $0x24] sm:$0xc]  ;;  %v1426_v15 = vrot.slane %v2445_v50, 2 }
  0x27   : >> { %2220 = vmatpush3.bf16.msra.mxu0 %v2423_v32  ;;  %2221 = vmatprep.mubr.msk.bf16.mxu0 %vm2502_vm0, %v2501_v3  ;;  %v1693_v32 = vor.u32 %v1692_v28, %v1689_v27  ;;  %v557_v2 = vshll.u32 %v1956_v57, 16  ;;  %v555_v7 = vshrl.u32 %v1956_v57, 16  ;;  %v1959_v18 = vld [vmem:[%s2566_s25 + $0xc] sm:$0xe]  ;;  %v2049_v26 = vld [vmem:[%s2566_s25 + $0x34] sm:$0x7] }
  0x28   : >> { %2225 = vmatprep.subr.bf16.mxu0 %v2501_v3  ;;  %v1364_v63 = vrot.slane %v1362_v60, 2  ;;  %v1962_v22 = vcombine.low %v1959_v18, %v1953_v54  ;;  %v2055_v27 = vld [vmem:[%s2566_s25 + $0x34] sm:$0xf]  ;;  %v2467_v50 = vld [vmem:[%s2839_s1 + $0xc0] sm:$0xff]  }
  0x29   : >> { %v2683_v34 = vsel %vm352_vm2, %v1693_v32, %v1697_v29  ;;  %v2457_v32 = vld [vmem:[%s2839_s1 + $0x48] sm:$0xff]  }
  0x2a   : >> { %2144 = vmatmul.mubr.msk.bf16.vlgmr.msra.gmra.mrb[0].mxu1 %vm180_vm1, %v1927_v35  ;;  %v1226_v35 = vor.u32 %v1225_v31, %v1221_v30  ;;  %v620_v23 = vrot.slane %v1962_v22, 1  ;;  %v2454_v30 = vld [vmem:[%s2839_s1 + $0xa8] sm:$0xff]  }
  0x2b   : >> { %2148 = vmatpush3.bf16.msra.mxu1 %v2425_v37  ;;  %2149 = vmatprep.mubr.msk.bf16.mxu1 %vm2502_vm0, %v2501_v3  ;;  %v426_v37 = vrot.slane %v1943_v33, 2  ;;  %v1974_v33 = vld [vmem:[%s2566_s25 + $0xc] sm:$0xc] }
  0x2c   : >> { %2153 = vmatprep.subr.bf16.mxu1 %v2501_v3 }
  0x2d   : >> { %v428_v40 = vsel %vm425_vm3, %v426_v37, %v427_v38  ;;  %v1977_v37 = vcombine.low %v1974_v33, %v2634_v52 }
  0x32   : >> { %2222 = vmatmul.mubr.msk.bf16.vlgmr.msra.gmra.mrb[0].mxu0 %vm180_vm1, %v1094_v43  ;;  %v2034_v43 = vld [vmem:[%s2566_s25 + $0x28] sm:$0xf] }
  0x33   : >> { %2226 = vmatpush3.bf16.msra.mxu0 %v2427_v44  ;;  %2227 = vmatprep.mubr.msk.bf16.mxu0 %vm2502_vm0, %v2501_v3  ;;  %v2030_v44 = vcombine.low %v2027_v39, %v2646_v61  ;;  %v2038_v45 = vcombine.low %v2033_v42, %v2034_v43  ;;  %v2443_v61 = vld [vmem:[%s2839_s1 + $0x30] sm:$0xff]   ;;  %v2045_v12 = vcombine.low %v2042_v10, %v2034_v43 }
  0x34   : >> { %2231 = vmatprep.subr.bf16.mxu0 %v2501_v3  ;;  %v2458_v39 = vld [vmem:[%s2839_s1 + $0xb0] sm:$0xff]  }
  0x35   : >> { %v1286_v46 = vrot.slane %v2030_v44, 1  ;;  %v1354_v51 = vshrl.u32 %v2038_v45, 16  ;;  %v1357_v53 = vshll.u32 %v2038_v45, 16  ;;  %v1425_v14 = vrot.slane %v2045_v12, 2  ;;  %v2460_v42 = vld [vmem:[%s2839_s1 + $0x50] sm:$0xff]   ;;  %v2462_v44 = vld [vmem:[%s2839_s1 + $0xb8] sm:$0xff]  }
  0x36   : >> { %2150 = vmatmul.mubr.msk.bf16.vlgmr.msra.gmra.mrb[0].mxu1 %vm180_vm1, %v285_v49  ;;  %v2440_v49 = vld [vmem:[%s2839_s1 + $0x90] sm:$0xff]   ;;  %v1981_v45 = vld [vmem:[%s2566_s25 + $0x1c] sm:$0x7] }
  0x37   : >> { %2154 = vmatpush3.bf16.msra.mxu1 %v2429_v48  ;;  %2155 = vmatprep.mubr.msk.bf16.mxu1 %vm2502_vm0, %v2501_v3  ;;  %v1947_v48 = vld [vmem:[%s2566_s25 + $0x10] sm:$0x7]  ;;  %v1356_v58 = vrot.slane %v1354_v51, 1  ;;  %v1359_v59 = vrot.slane %v1357_v53, 2  ;;  %v1427_v20 = vsel %vm425_vm3, %v1425_v14, %v1426_v15 }
  0x38   : >> { %2159 = vmatprep.subr.bf16.mxu1 %v2501_v3  ;;  %v1950_v56 = vcombine.low %v1946_v47, %v1947_v48  ;;  %v2464_v47 = vld [vmem:[%s2839_s1 + $0x58] sm:$0xff]   ;;  %v890_v48 = vshll.u32 %v2577_v9, 16  ;;  %v2076_v51 = vld [vmem:[%s2566_s25 + $0x30] sm:$0xc] }
  0x39   : >> { %v1360_v62 = vor.u32 %v1359_v59, %v1356_v58  ;;  %v2079_v54 = vcombine.low %v2076_v51, %v2661_v17 }
  0x3b   : >> { %v1365_v4 = vsel %vm352_vm2, %v1360_v62, %v1364_v63 }
  0x3e   : >> { %2228 = vmatmul.mubr.msk.bf16.vlgmr.msra.gmra.mrb[0].mxu0 %vm180_vm1, %v2018_v8  ;;  %v559_v8 = vrot.slane %v557_v2, 1 }
  0x3f   : >> { %2232 = vmatpush3.bf16.msra.mxu0 %v2432_v11  ;;  %2233 = vmatprep.mubr.msk.bf16.mxu0 %vm2502_vm0, %v2501_v3 }
  0x40   : >> { %2237 = vmatprep.subr.bf16.mxu0 %v2501_v3  ;;  %v560_v11 = vor.u32 %v559_v8, %v555_v7 }
  0x42   : >> { %2156 = vmatmul.mubr.msk.bf16.vlgmr.msra.gmra.mrb[0].mxu1 %vm180_vm1, %v365_v24  ;;  %v2451_v24 = vld [vmem:[%s2839_s1 + $0x40] sm:$0xff]  }
  0x43   : >> { %2160 = vmatpush3.bf16.msra.mxu1 %v2435_v25  ;;  %2161 = vmatprep.mubr.msk.bf16.mxu1 %vm2502_vm0, %v2501_v3  ;;  %v2048_v25 = vld [vmem:[%s2566_s25 + $0x30] sm:$0xf] }
  0x44   : >> { %2165 = vmatprep.subr.bf16.mxu1 %v2501_v3  ;;  %v2052_v28 = vcombine.low %v2048_v25, %v2049_v26  ;;  %v2058_v29 = vcombine.low %v2048_v25, %v2055_v27 }
  0x46   : >> { %v1556_v31 = vshll.u32 %v2058_v29, 16 }
  0x4a   : >> { %2234 = vmatmul.mubr.msk.bf16.vlgmr.msra.gmra.mrb[0].mxu0 %vm180_vm1, %v1226_v35  ;;  %v1554_v35 = vshrl.u32 %v2058_v29, 16 }
  0x4b   : >> { %2238 = vmatpush3.bf16.msra.mxu0 %v2436_v36  ;;  %2239 = vmatprep.mubr.msk.bf16.mxu0 %vm2502_vm0, %v2501_v3  ;;  %v1558_v36 = vrot.slane %v1556_v31, 1 }
  0x4c   : >> { %2243 = vmatprep.subr.bf16.mxu0 %v2501_v3 }
  0x4d   : >> { %v1559_v38 = vor.u32 %v1558_v36, %v1554_v35 }
  0x4e   : >> { %2162 = vmatmul.mubr.msk.bf16.vlgmr.msra.gmra.mrb[0].mxu1 %vm180_vm1, %v428_v40  ;;  %v759_v40 = vrot.slane %v1977_v37, 2 }
  0x4f   : >> { %2166 = vmatpush3.bf16.msra.mxu1 %v2438_v41  ;;  %2167 = vmatprep.mubr.msk.bf16.mxu1 %vm2502_vm0, %v2501_v3  ;;  %v760_v41 = vrot.slane %v2639_v55, 2 }
  0x50   : >> { %2171 = vmatprep.subr.bf16.mxu1 %v2501_v3 }
  0x51   : >> { %v761_v52 = vsel %vm425_vm3, %v759_v40, %v760_v41 }
  0x56   : >> { %2240 = vmatmul.mubr.msk.bf16.vlgmr.msra.gmra.mrb[0].mxu0 %vm180_vm1, %v1286_v46  ;;  %v1984_v46 = vcombine.low %v2569_v5, %v1981_v45  ;;  %v892_v5 = vrot.slane %v890_v48, 1 }
  0x57   : >> { %2244 = vmatpush3.bf16.msra.mxu0 %v2440_v49  ;;  %2245 = vmatprep.mubr.msk.bf16.mxu0 %vm2502_vm0, %v2501_v3  ;;  %v888_v49 = vshrl.u32 %v2577_v9, 16  ;;  %v1759_v9 = vrot.slane %v2665_v19, 2 }
  0x58   : >> { %2249 = vmatprep.subr.bf16.mxu0 %v2501_v3 }
  0x59   : >> { %v893_v53 = vor.u32 %v892_v5, %v888_v49 }
  0x5a   : >> { %2168 = vmatmul.mubr.msk.bf16.vlgmr.msra.gmra.mrb[0].mxu1 %vm180_vm1, %v1950_v56  ;;  %v1758_v56 = vrot.slane %v2079_v54, 2 }
  0x5b   : >> { %2172 = vmatpush3.bf16.msra.mxu1 %v2443_v61  ;;  %2173 = vmatprep.mubr.msk.bf16.mxu1 %vm2502_vm0, %v2501_v3 }
  0x5c   : >> { %2177 = vmatprep.subr.bf16.mxu1 %v2501_v3  ;;  %v1760_v57 = vsel %vm425_vm3, %v1758_v56, %v1759_v9 }
  0x62   : >> { %2246 = vmatmul.mubr.msk.bf16.vlgmr.msra.gmra.mrb[0].mxu0 %vm180_vm1, %v1365_v4 }
  0x63   : >> { %2250 = vmatpush3.bf16.msra.mxu0 %v2446_v6  ;;  %2251 = vmatprep.mubr.msk.bf16.mxu0 %vm2502_vm0, %v2501_v3 }
  0x64   : >> { %2255 = vmatprep.subr.bf16.mxu0 %v2501_v3 }
  0x66   : >> { %2174 = vmatmul.mubr.msk.bf16.vlgmr.msra.gmra.mrb[0].mxu1 %vm180_vm1, %v560_v11 }
  0x67   : >> { %2178 = vmatpush3.bf16.msra.mxu1 %v2447_v13  ;;  %2179 = vmatprep.mubr.msk.bf16.mxu1 %vm2502_vm0, %v2501_v3 }
  0x68   : >> { %2183 = vmatprep.subr.bf16.mxu1 %v2501_v3 }
  0x6e   : >> { %2252 = vmatmul.mubr.msk.bf16.vlgmr.msra.gmra.mrb[0].mxu0 %vm180_vm1, %v1427_v20 }
  0x6f   : >> { %2256 = vmatpush3.bf16.msra.mxu0 %v2449_v21  ;;  %2257 = vmatprep.mubr.msk.bf16.mxu0 %vm2502_vm0, %v2501_v3 }
  0x70   : >> { %2261 = vmatprep.subr.bf16.mxu0 %v2501_v3 }
  0x72   : >> { %2180 = vmatmul.mubr.msk.bf16.vlgmr.msra.gmra.mrb[0].mxu1 %vm180_vm1, %v620_v23 }
  0x73   : >> { %2184 = vmatpush3.bf16.msra.mxu1 %v2451_v24  ;;  %2185 = vmatprep.mubr.msk.bf16.mxu1 %vm2502_vm0, %v2501_v3 }
  0x74   : >> { %2189 = vmatprep.subr.bf16.mxu1 %v2501_v3 }
  0x7a   : >> { %2258 = vmatmul.mubr.msk.bf16.vlgmr.msra.gmra.mrb[0].mxu0 %vm180_vm1, %v2052_v28 }
  0x7b   : >> { %2262 = vmatpush3.bf16.msra.mxu0 %v2454_v30  ;;  %2263 = vmatprep.mubr.msk.bf16.mxu0 %vm2502_vm0, %v2501_v3 }
  0x7c   : >> { %2267 = vmatprep.subr.bf16.mxu0 %v2501_v3 }
  0x7e   : >> { %2186 = vmatmul.mubr.msk.bf16.vlgmr.msra.gmra.mrb[0].mxu1 %vm180_vm1, %v2658_v16  ;;  %v2061_v16 = vld [vmem:[%s2566_s25 + $0x30] sm:$0xe] }
  0x7f   : >> { %2190 = vmatpush3.bf16.msra.mxu1 %v2457_v32  ;;  %2191 = vmatprep.mubr.msk.bf16.mxu1 %vm2502_vm0, %v2501_v3  ;;  %v2064_v43 = vcombine.low %v2061_v16, %v2055_v27 }
  0x80   : >> { %2195 = vmatprep.subr.bf16.mxu1 %v2501_v3 }
  0x81   : >> { %v1619_v55 = vrot.slane %v2064_v43, 1 }
  0x86   : >> { %2264 = vmatmul.mubr.msk.bf16.vlgmr.msra.gmra.mrb[0].mxu0 %vm180_vm1, %v1559_v38 }
  0x87   : >> { %2268 = vmatpush3.bf16.msra.mxu0 %v2458_v39  ;;  %2269 = vmatprep.mubr.msk.bf16.mxu0 %vm2502_vm0, %v2501_v3 }
  0x88   : >> { %2273 = vmatprep.subr.bf16.mxu0 %v2501_v3 }
  0x8a   : >> { %2192 = vmatmul.mubr.msk.bf16.vlgmr.msra.gmra.mrb[0].mxu1 %vm180_vm1, %v761_v52 }
  0x8b   : >> { %2196 = vmatpush3.bf16.msra.mxu1 %v2460_v42  ;;  %2197 = vmatprep.mubr.msk.bf16.mxu1 %vm2502_vm0, %v2501_v3 }
  0x8c   : >> { %2201 = vmatprep.subr.bf16.mxu1 %v2501_v3 }
  0x92   : >> { %2270 = vmatmul.mubr.msk.bf16.vlgmr.msra.gmra.mrb[0].mxu0 %vm180_vm1, %v1619_v55 }
  0x93   : >> { %2274 = vmatpush3.bf16.msra.mxu0 %v2462_v44  ;;  %2275 = vmatprep.mubr.msk.bf16.mxu0 %vm2502_vm0, %v2501_v3 }
  0x94   : >> { %2279 = vmatprep.subr.bf16.mxu0 %v2501_v3 }
  0x96   : >> { %2198 = vmatmul.mubr.msk.bf16.vlgmr.msra.gmra.mrb[0].mxu1 %vm180_vm1, %v1984_v46 }
  0x97   : >> { %2202 = vmatpush3.bf16.msra.mxu1 %v2464_v47  ;;  %2203 = vmatprep.mubr.msk.bf16.mxu1 %vm2502_vm0, %v2501_v3 }
  0x9e   : >> { %2276 = vmatmul.mubr.msk.bf16.vlgmr.msra.gmra.mrb[0].mxu0 %vm180_vm1, %v2683_v34 }
  0x9f   : >> { %2280 = vmatpush3.bf16.msra.mxu0 %v2467_v50  ;;  %2281 = vmatprep.mubr.msk.bf16.mxu0 %vm2502_vm0, %v2501_v3 }
  0xa2   : >> { %2204 = vmatmul.mubr.msk.bf16.vlgmr.msra.gmra.mrb[0].mxu1 %vm180_vm1, %v893_v53 }
  0xaa   : >> { %2282 = vmatmul.mubr.msk.bf16.vlgmr.msra.gmra.mrb[0].mxu0 %vm180_vm1, %v1760_v57 }
 0x175   : >> { %v937_v58 = vpop.f32.mrb[0].mxu1 }
 0x176   : >> { %v2205_v59 = vpop.f32.mrb[1].mxu1 }
 0x177   : >> { %v940_v60 = vpop.f32.mrb[2].mxu1 }
 0x178   : >> { %v2206_v34 = vpop.f32.mrb[3].mxu1 }
 0x17d   : >> { %v1804_v61 = vpop.f32.mrb[0].mxu0 }
 0x17e   : >> { %v2285_v62 = vadd.f32 %v1804_v61, %v937_v58  ;;  %v2283_v63 = vpop.f32.mrb[1].mxu0 }
 0x17f   : >> { %v1807_v2 = vpop.f32.mrb[2].mxu0 }
 0x180   : >> { %v2286_v3 = vadd.f32 %v1807_v2, %v940_v60  ;;  %v2284_v4 = vpop.f32.mrb[3].mxu0  ;;  %v1823_v7 = vmul.f32 %v2285_v62, %v2285_v62 }
 0x182   : >> { %v1814_v17 = vsel %vm425_vm3, %v2286_v3, 0.0  ;;  %v1824_v6 = vmul.f32 %v2286_v3, %v2286_v3 }
 0x183   : >> { %v1815_v8 = vadd.f32 %v2285_v62, %v1814_v17 }
 0x184   : >> { %v1825_v19 = vsel %vm425_vm3, %v1824_v6, 0.0 }
 0x185   : >> { %v1816_v10 = vrot.slane %v1815_v8, 4  ;;  %v1826_v11 = vadd.f32 %v1825_v19, %v1823_v7 }
 0x187   : >> { %v1817_v12 = vadd.f32 %v1816_v10, %v1815_v8  ;;  %v1827_v13 = vrot.slane %v1826_v11, 4 }
 0x189   : >> { %v1818_v14 = vrot.slane %v1817_v12, 2  ;;  %v1828_v15 = vadd.f32 %v1827_v13, %v1826_v11 }
 0x18b   : >> { %v1819_v18 = vadd.f32 %v1818_v14, %v1817_v12  ;;  %v1829_v20 = vrot.slane %v1828_v15, 2 }
 0x18d   : >> { %v1820_v21 = vrot.slane %v1819_v18, 1  ;;  %v1830_v22 = vadd.f32 %v1829_v20, %v1828_v15 }
 0x18f   : >> { %v1821_v23 = vadd.f32 %v1820_v21, %v1819_v18  ;;  %v1831_v24 = vrot.slane %v1830_v22, 1  ;;  %147 = sbr.rel (!%p145_p4) target bundleno = 17 (0x11), region = 94 }
 0x191   : >> { %v1822_v25 = vadd.f32 %v2495_v1, %v1821_v23   ;;  %v1832_v26 = vadd.f32 %v1831_v24, %v1830_v22 }
 0x193   : >> { %v1833_v27 = vadd.f32 %v2491_v0, %v1832_v26   ;;  %v2842_v1 = vmov %v1822_v25  ;;  %1834 = vst [vmem:[%s2529_s15] sm:$0x1] (%p145_p4), %v1822_v25 }
 0x195   : >> { %v2841_v0 = vmov %v1833_v27  ;;  %1835 = vst [vmem:[%s2529_s15 + $0x1] sm:$0x1] (%p145_p4), %v1833_v27 }
 0x196 PF: > { %s12_s9 = sadd.s32 1, %s2487_s9  }
 0x197   : > { %p9_p5 = scmp.ge.s32.totalorder %s12_s9, 4  }
 0x199   :  { %11 = sbr.rel (!%p9_p5) target bundleno = 1 (0x1), region = 105 }

// kernel: convnet_forward.8
= control target key start
LH: loop header
LB: loop body
LE: loop exit
PB: predicated region body
PF: predicated region fallthrough
CT: control target
= control target key end

     0   :  { %s4278_s15 = smov 0   ;;  %s4757_s0 = inlined_call_operand.vmem [shape: bf16[2,18,18,16], index: 0, kind: input, shape index: {}]   ;;  %s4758_s1 = inlined_call_operand.vmem [shape: bf16[25,16,128], index: 1, kind: input, shape index: {}]   ;;  %s4759_s2 = inlined_call_operand.vmem [shape: f32[1,128], index: 2, kind: input, shape index: {}]   ;;  %s4760_s3 = inlined_call_operand.vmem [shape: f32[1,128], index: 3, kind: input, shape index: {}]   ;;  %s4761_s4 = inlined_call_operand.vmem [shape: bf16[2,7,7,128], index: 4, kind: output, shape index: {}]  }
   0x1 LB: > { %s3297_s16 = sadd.s32 4294967295, %s4242_s15   ;;  %p3301_p0 = scmp.ge.s32.totalorder %s4242_s15, 1  ;;  %s4242_s15 = sphi %s4278_s15, %s14_s15  }
   0x2   : > { %p162_p1 = scmp.lt.s32.totalorder %s4242_s15, 3 }
   0x4   : > { %p163_p2 = pnand %p3301_p0, %p162_p1 }
   0x5   : > { %p188_p3 = scmp.lt.s32.totalorder (!%p163_p2), %s3297_s16, 1  ;;  %v4289_v0 = vld [vmem:[%s4759_s2] ss:$0 sm:$0xff] (!%p163_p2)  ;;  %v201_v2 = vlaneseq (!%p163_p2)  ;;  %v4248_v7 = vmov (!%p163_p2), 0.0   ;;  %s4310_s29 = smov (!%p163_p2), 0  }
   0x6   : > { %166 = sbr.rel (%p163_p2) target bundleno = 764 (0x2fc), region = 36  ;;  %v4294_v1 = vld [vmem:[%s4760_s3] ss:$0 sm:$0xff] (!%p163_p2) }
   0x7   : > { %v202_v3 = vshrl.u32 (!%p163_p2), %v201_v2, 7  ;;  %v204_v4 = vand.u32 (!%p163_p2), 127, %v201_v2 }
   0x9   : > { %v205_v5 = vmul.u32 (!%p163_p2), 2, %v202_v3 }
   0xb   : > { %vm206_vm0 = vcmp.eq.s32.totalorder (!%p163_p2), %v204_v4, %v205_v5  ;;  %v209_v6 = vadd.s32 (!%p163_p2), 1, %v205_v5 }
   0xc   : > { %v4306_v8 = vsel (!%p163_p2), %vm206_vm0, 1.0, %v4248_v7 }
   0xd   : > { %s4763_s16 = smov (!%p188_p3, %s3297_s16), 1  ;;  %vm210_vm1 = vcmp.eq.s32.totalorder %v204_v4, %v209_v6 }
   0xe   : > { %s4148_s21 = smul.u32 216, %s4763_s16  ;;  %v4308_v9 = vsel %vm210_vm1, 1.0, %v4248_v7 }
   0xf   : > { %s4149_s22 = smul.u32 28, %s4763_s16 }
  0x10   : > { %s4299_s25 = scalar_lea.vmem %s4757_s0, %s4148_s21 }
  0x11   : > { %s4304_s28 = scalar_lea.vmem %s4761_s4, %s4149_s22 }
  0x12 LB: >> { %v4171_v10 = vld [vmem:[%s4758_s1 + $0x8] sm:$0xff]   ;;  %v4249_v11 = vmov 0.0   ;;  %s3527_s6 = smul.u32 24, %s4246_s29  ;;  %vm4250_vm2 = vmmov 0   ;;  %vm249_vm3 = vcmask 130048   ;;  %v4174_v24 = vld [vmem:[%s4758_s1] sm:$0xff]   ;;  %s4246_s29 = sphi %s4310_s29, %s218_s29  }
  0x13   : >> { %3634 = vmatprep.subr.bf16.mxu0 %v4249_v11  ;;  %3784 = vmatprep.subr.bf16.mxu1 %v4249_v11  ;;  %v4177_v31 = vld [vmem:[%s4758_s1 + $0x10] sm:$0xff]   ;;  %v4180_v46 = vld [vmem:[%s4758_s1 + $0x18] sm:$0xff]   ;;  %vm421_vm4 = vsmask.f32 6400  ;;  %v4185_v62 = vld [vmem:[%s4758_s1 + $0x20] sm:$0xff]   ;;  %vm494_vm5 = vcmask 1045504  }
  0x14   : >> { %3635 = vmatpush3.bf16.msra.mxu0 %v4171_v10  ;;  %3785 = vmatpush3.bf16.msra.mxu1 %v4171_v10  ;;  %s4326_s7 = scalar_lea.vmem %s4299_s25, %s3527_s6  ;;  %vm4252_vm6 = vmmov 1   ;;  %vm3052_vm8 = vcmask 113664   ;;  %vm3207_vm9 = vcmask 1043456   ;;  %vm3208_vm10 = vsmask.f32 3328 }
  0x15   : >> { %3636 = vmatprep.mubr.msk.bf16.mxu0 %vm4250_vm2, %v4249_v11  ;;  %3786 = vmatprep.mubr.msk.bf16.mxu1 %vm4250_vm2, %v4249_v11  ;;  %v223_v12 = vld [vmem:[%s4326_s7] sm:$0xf]  ;;  %v227_v13 = vld [vmem:[%s4326_s7 + $0x4] sm:$0xf]  ;;  %v3335_v14 = vld [vmem:[%s4326_s7 + $0xc] sm:$0xf] }
  0x16   : >> { %3640 = vmatprep.subr.bf16.mxu0 %v4249_v11  ;;  %3790 = vmatprep.subr.bf16.mxu1 %v4249_v11  ;;  %v3311_v15 = vcombine.low %v223_v12, %v227_v13  ;;  %v3342_v16 = vld [vmem:[%s4326_s7 + $0x10] sm:$0xf]  ;;  %v224_v27 = vld [vmem:[%s4326_s7 + $0x4] sm:$0x7]  ;;  %v347_v32 = vld [vmem:[%s4326_s7] sm:$0xe] }
  0x17   : >> { %v3345_v17 = vcombine.low %v3335_v14, %v3342_v16  ;;  %v3336_v28 = vld [vmem:[%s4326_s7 + $0x10] sm:$0x7]  ;;  %v3314_v29 = vcombine.low %v223_v12, %v224_v27  ;;  %v3348_v33 = vld [vmem:[%s4326_s7 + $0xc] sm:$0xe]  ;;  %v407_v34 = vld [vmem:[%s4326_s7] sm:$0xe]  ;;  %v3319_v36 = vcombine.low %v347_v32, %v227_v13 }
  0x18   : >> { %v237_v18 = vshrl.u32 %v3311_v15, 16  ;;  %v239_v19 = vshll.u32 %v3311_v15, 16  ;;  %v4350_v30 = vcombine.low %v3335_v14, %v3336_v28  ;;  %v408_v35 = vld [vmem:[%s4326_s7 + $0x4] sm:$0xf]  ;;  %v3354_v37 = vld [vmem:[%s4326_s7 + $0xc] sm:$0xe]  ;;  %v3351_v38 = vcombine.low %v3348_v33, %v3342_v16  ;;  %vm3950_vm7 = vmpackc.low %vm494_vm5, %vm4252_vm6 }
  0x19   : >> { %v624_v20 = vshrl.u32 %v3345_v17, 16  ;;  %v626_v21 = vshll.u32 %v3345_v17, 16  ;;  %v3324_v39 = vcombine.low %v407_v34, %v408_v35  ;;  %v3355_v40 = vld [vmem:[%s4326_s7 + $0x10] sm:$0xf]  ;;  %v354_v41 = vrot.slane %v3319_v36, 1  ;;  %v4188_v14 = vld [vmem:[%s4758_s1 + $0x28] sm:$0xff]   ;;  %vm3209_vm11 = vmand %vm3207_vm9, %vm3208_vm10 }
  0x1a   : >> { %v241_v22 = vrot.slane %v239_v19, 1  ;;  %v4370_v42 = vrot.slane %v3351_v38, 1  ;;  %v4182_v43 = vld [vmem:[%s4326_s7 + $0x8] ss:$0 sps:$4 sm:$0x11]   ;;  %v3359_v45 = vcombine.low %v3354_v37, %v3355_v40  ;;  %v4192_v27 = vld [vmem:[%s4758_s1 + $0x38] sm:$0xff]  }
  0x1b   : >> { %v628_v23 = vrot.slane %v626_v21, 1  ;;  %v423_v44 = vshrl.u32 %v3324_v39, 16  ;;  %v426_v47 = vshll.u32 %v3324_v39, 16  ;;  %v4184_v48 = vld [vmem:[%s4326_s7 + $0x14] ss:$0 sps:$4 sm:$0x11]  }
  0x1c   : >> { %v242_v25 = vor.u32 %v241_v22, %v237_v18  ;;  %v757_v49 = vshrl.u32 %v3359_v45, 16  ;;  %v760_v50 = vshll.u32 %v3359_v45, 16  ;;  %v431_v53 = vshll.u32 %v4182_v43, 16  ;;  %v487_v2 = vld [vmem:[%s4326_s7] sm:$0xc]  ;;  %v4191_v21 = vld [vmem:[%s4758_s1 + $0x30] sm:$0xff]  }
  0x1d   : >> { %v4337_v26 = vor.u32 %v628_v23, %v624_v20  ;;  %v425_v51 = vrot.slane %v423_v44, 1  ;;  %v428_v52 = vrot.slane %v426_v47, 2  ;;  %v765_v54 = vshll.u32 %v4184_v48, 16  ;;  %v3363_v3 = vld [vmem:[%s4326_s7 + $0xc] sm:$0xc]  ;;  %v4194_v33 = vld [vmem:[%s4758_s1 + $0x40] sm:$0xff]  }
  0x1e   : >> { %3637 = vmatmul.mubr.msk.bf16.vlgmr.msra.gmra.mrb[0].mxu0 %vm249_vm3, %v242_v25  ;;  %v759_v55 = vrot.slane %v757_v49, 1  ;;  %v762_v56 = vrot.slane %v760_v50, 2  ;;  %v433_v58 = vrot.slane %v431_v53, 2  ;;  %v3330_v4 = vcombine.low %v487_v2, %v408_v35  ;;  %v3371_v16 = vld [vmem:[%s4326_s7 + $0x18] sm:$0xf] }
  0x1f   : >> { %3787 = vmatmul.mubr.msk.bf16.vlgmr.msra.gmra.mrb[0].mxu1 %vm249_vm3, %v4337_v26  ;;  %3641 = vmatpush3.bf16.msra.mxu0 %v4174_v24  ;;  %v429_v57 = vor.u32 %v428_v52, %v425_v51  ;;  %v767_v60 = vrot.slane %v765_v54, 2  ;;  %v3366_v5 = vcombine.low %v3363_v3, %v3355_v40  ;;  %v496_v7 = vrot.slane %v4182_v43, 2  ;;  %v3372_v17 = vld [vmem:[%s4326_s7 + $0x1c] sm:$0x7]  ;;  %v3384_v28 = vld [vmem:[%s4326_s7 + $0x18] sm:$0xe] }
  0x20   : >> { %3791 = vmatpush3.bf16.msra.mxu1 %v4174_v24  ;;  %3642 = vmatprep.mubr.msk.bf16.mxu0 %vm4250_vm2, %v4249_v11  ;;  %v763_v59 = vor.u32 %v762_v56, %v759_v55  ;;  %v495_v6 = vrot.slane %v3330_v4, 2  ;;  %v829_v12 = vrot.slane %v4184_v48, 2  ;;  %v3378_v18 = vld [vmem:[%s4326_s7 + $0x1c] sm:$0xf]  ;;  %v4423_v19 = vcombine.low %v3371_v16, %v3372_v17  ;;  %v3399_v44 = vld [vmem:[%s4326_s7 + $0x18] sm:$0xc] }
  0x21   : >> { %3792 = vmatprep.mubr.msk.bf16.mxu1 %vm4250_vm2, %v4249_v11  ;;  %3646 = vmatprep.subr.bf16.mxu0 %v4249_v11  ;;  %v434_v61 = vsel %vm421_vm4, %v429_v57, %v433_v58  ;;  %v828_v10 = vrot.slane %v3366_v5, 2  ;;  %v3381_v20 = vcombine.low %v3371_v16, %v3378_v18  ;;  %v4196_v34 = vld [vmem:[%s4326_s7 + $0x20] ss:$0 sps:$4 sm:$0x11]   ;;  %v4199_v48 = vld [vmem:[%s4758_s1 + $0x50] sm:$0xff]   ;;  %v4202_v55 = vld [vmem:[%s4758_s1 + $0x58] sm:$0xff]  }
  0x22   : >> { %3796 = vmatprep.subr.bf16.mxu1 %v4249_v11  ;;  %v4391_v63 = vsel %vm421_vm4, %v763_v59, %v767_v60  ;;  %v497_v13 = vsel %vm494_vm5, %v495_v6, %v496_v7  ;;  %v1098_v39 = vshll.u32 %v4196_v34, 16  ;;  %v1162_v47 = vrot.slane %v4196_v34, 2  ;;  %v3407_v50 = vld [vmem:[%s4326_s7 + $0x24] sm:$0xf]  ;;  %v3408_v51 = vld [vmem:[%s4326_s7 + $0x28] sm:$0x7] }
  0x23   : >> { %v4409_v15 = vsel %vm494_vm5, %v828_v10, %v829_v12  ;;  %v959_v22 = vshll.u32 %v3381_v20, 16  ;;  %v957_v23 = vshrl.u32 %v3381_v20, 16  ;;  %v3414_v52 = vld [vmem:[%s4326_s7 + $0x28] sm:$0xf]  ;;  %v4508_v53 = vcombine.low %v3407_v50, %v3408_v51  ;;  %v4203_v60 = vld [vmem:[%s4758_s1 + $0x60] sm:$0xff]   ;;  %v4208_v17 = vld [vmem:[%s4758_s1 + $0x70] sm:$0xff]  }
  0x24   : >> { %v3417_v54 = vcombine.low %v3407_v50, %v3414_v52  ;;  %v4205_v5 = vld [vmem:[%s4758_s1 + $0x68] sm:$0xff]   ;;  %v4219_v51 = vld [vmem:[%s4758_s1 + $0x98] sm:$0xff]  }
  0x25   : >> { %v961_v24 = vrot.slane %v959_v22, 1  ;;  %v4207_v6 = vld [vmem:[%s4326_s7 + $0x2c] ss:$0 sps:$4 sm:$0x11]  }
  0x26   : >> { %v1292_v56 = vshll.u32 %v3417_v54, 16  ;;  %v1290_v57 = vshrl.u32 %v3417_v54, 16  ;;  %v1495_v22 = vrot.slane %v4207_v6, 2 }
  0x27   : >> { %v4438_v25 = vor.u32 %v961_v24, %v957_v23  ;;  %v4210_v23 = vld [vmem:[%s4758_s1 + $0x78] sm:$0xff]  }
  0x28   : >> { %v1294_v58 = vrot.slane %v1292_v56, 1 }
  0x2a   : >> { %3643 = vmatmul.mubr.msk.bf16.vlgmr.msra.gmra.mrb[0].mxu0 %vm249_vm3, %v3314_v29  ;;  %v3390_v29 = vld [vmem:[%s4326_s7 + $0x18] sm:$0xe]  ;;  %v4523_v59 = vor.u32 %v1294_v58, %v1290_v57  ;;  %v4221_v57 = vld [vmem:[%s4758_s1 + $0xa0] sm:$0xff]  }
  0x2b   : >> { %3793 = vmatmul.mubr.msk.bf16.vlgmr.msra.gmra.mrb[0].mxu1 %vm249_vm3, %v4350_v30  ;;  %3647 = vmatpush3.bf16.msra.mxu0 %v4177_v31 }
  0x2c   : >> { %3797 = vmatpush3.bf16.msra.mxu1 %v4177_v31  ;;  %3648 = vmatprep.mubr.msk.bf16.mxu0 %vm4250_vm2, %v4249_v11  ;;  %v3387_v31 = vcombine.low %v3384_v28, %v3378_v18  ;;  %v3450_v28 = vld [vmem:[%s4326_s7 + $0x34] sm:$0xf] }
  0x2d   : >> { %3798 = vmatprep.mubr.msk.bf16.mxu1 %vm4250_vm2, %v4249_v11  ;;  %3652 = vmatprep.subr.bf16.mxu0 %v4249_v11 }
  0x2e   : >> { %3802 = vmatprep.subr.bf16.mxu1 %v4249_v11  ;;  %v4456_v32 = vrot.slane %v3387_v31, 1  ;;  %v4213_v31 = vld [vmem:[%s4758_s1 + $0x80] sm:$0xff]  }
  0x36   : >> { %3649 = vmatmul.mubr.msk.bf16.vlgmr.msra.gmra.mrb[0].mxu0 %vm249_vm3, %v354_v41  ;;  %v1100_v41 = vrot.slane %v1098_v39, 2 }
  0x37   : >> { %3799 = vmatmul.mubr.msk.bf16.vlgmr.msra.gmra.mrb[0].mxu1 %vm249_vm3, %v4370_v42  ;;  %3653 = vmatpush3.bf16.msra.mxu0 %v4180_v46 }
  0x38   : >> { %3803 = vmatpush3.bf16.msra.mxu1 %v4180_v46  ;;  %3654 = vmatprep.mubr.msk.bf16.mxu0 %vm4250_vm2, %v4249_v11 }
  0x39   : >> { %3804 = vmatprep.mubr.msk.bf16.mxu1 %vm4250_vm2, %v4249_v11  ;;  %3658 = vmatprep.subr.bf16.mxu0 %v4249_v11 }
  0x3a   : >> { %3808 = vmatprep.subr.bf16.mxu1 %v4249_v11 }
  0x42   : >> { %3655 = vmatmul.mubr.msk.bf16.vlgmr.msra.gmra.mrb[0].mxu0 %vm249_vm3, %v434_v61  ;;  %v3420_v61 = vld [vmem:[%s4326_s7 + $0x24] sm:$0xe] }
  0x43   : >> { %3805 = vmatmul.mubr.msk.bf16.vlgmr.msra.gmra.mrb[0].mxu1 %vm249_vm3, %v4391_v63  ;;  %3659 = vmatpush3.bf16.msra.mxu0 %v4185_v62  ;;  %v3423_v2 = vcombine.low %v3420_v61, %v3414_v52  ;;  %v3503_v61 = vld [vmem:[%s4326_s7 + $0x40] sm:$0xf] }
  0x44   : >> { %3809 = vmatpush3.bf16.msra.mxu1 %v4185_v62  ;;  %3660 = vmatprep.mubr.msk.bf16.mxu0 %vm4250_vm2, %v4249_v11  ;;  %v3426_v62 = vld [vmem:[%s4326_s7 + $0x24] sm:$0xe] }
  0x45   : >> { %3810 = vmatprep.mubr.msk.bf16.mxu1 %vm4250_vm2, %v4249_v11  ;;  %3664 = vmatprep.subr.bf16.mxu0 %v4249_v11  ;;  %v4541_v4 = vrot.slane %v3423_v2, 1  ;;  %v4224_v2 = vld [vmem:[%s4758_s1 + $0xa8] sm:$0xff]  }
  0x46   : >> { %3814 = vmatprep.subr.bf16.mxu1 %v4249_v11 }
  0x4e   : >> { %3661 = vmatmul.mubr.msk.bf16.vlgmr.msra.gmra.mrb[0].mxu0 %vm249_vm3, %v497_v13 }
  0x4f   : >> { %3811 = vmatmul.mubr.msk.bf16.vlgmr.msra.gmra.mrb[0].mxu1 %vm249_vm3, %v4409_v15  ;;  %3665 = vmatpush3.bf16.msra.mxu0 %v4188_v14 }
  0x50   : >> { %3815 = vmatpush3.bf16.msra.mxu1 %v4188_v14  ;;  %3666 = vmatprep.mubr.msk.bf16.mxu0 %vm4250_vm2, %v4249_v11  ;;  %v1431_v14 = vshll.u32 %v4207_v6, 16 }
  0x51   : >> { %3816 = vmatprep.mubr.msk.bf16.mxu1 %vm4250_vm2, %v4249_v11  ;;  %3670 = vmatprep.subr.bf16.mxu0 %v4249_v11 }
  0x52   : >> { %3820 = vmatprep.subr.bf16.mxu1 %v4249_v11  ;;  %v1433_v16 = vrot.slane %v1431_v14, 2 }
  0x5a   : >> { %3667 = vmatmul.mubr.msk.bf16.vlgmr.msra.gmra.mrb[0].mxu0 %vm249_vm3, %v4350_v30  ;;  %v3391_v30 = vld [vmem:[%s4326_s7 + $0x1c] sm:$0xf] }
  0x5b   : >> { %3817 = vmatmul.mubr.msk.bf16.vlgmr.msra.gmra.mrb[0].mxu1 %vm249_vm3, %v4423_v19  ;;  %3671 = vmatpush3.bf16.msra.mxu0 %v4191_v21  ;;  %v3402_v45 = vcombine.low %v3399_v44, %v3391_v30 }
  0x5c   : >> { %3821 = vmatpush3.bf16.msra.mxu1 %v4191_v21  ;;  %3672 = vmatprep.mubr.msk.bf16.mxu0 %vm4250_vm2, %v4249_v11 }
  0x5d   : >> { %3822 = vmatprep.mubr.msk.bf16.mxu1 %vm4250_vm2, %v4249_v11  ;;  %3676 = vmatprep.subr.bf16.mxu0 %v4249_v11  ;;  %v1161_v46 = vrot.slane %v3402_v45, 2 }
  0x5e   : >> { %3826 = vmatprep.subr.bf16.mxu1 %v4249_v11 }
  0x5f   : >> { %v4493_v49 = vsel %vm494_vm5, %v1161_v46, %v1162_v47 }
  0x66   : >> { %3673 = vmatmul.mubr.msk.bf16.vlgmr.msra.gmra.mrb[0].mxu0 %vm249_vm3, %v4337_v26  ;;  %v3395_v26 = vcombine.low %v3390_v29, %v3391_v30 }
  0x67   : >> { %3823 = vmatmul.mubr.msk.bf16.vlgmr.msra.gmra.mrb[0].mxu1 %vm249_vm3, %v4438_v25  ;;  %3677 = vmatpush3.bf16.msra.mxu0 %v4192_v27 }
  0x68   : >> { %3827 = vmatpush3.bf16.msra.mxu1 %v4192_v27  ;;  %3678 = vmatprep.mubr.msk.bf16.mxu0 %vm4250_vm2, %v4249_v11  ;;  %v1090_v35 = vshrl.u32 %v3395_v26, 16  ;;  %v1093_v36 = vshll.u32 %v3395_v26, 16  ;;  %v3444_v27 = vld [vmem:[%s4326_s7 + $0x34] sm:$0x7] }
  0x69   : >> { %3828 = vmatprep.mubr.msk.bf16.mxu1 %vm4250_vm2, %v4249_v11  ;;  %3682 = vmatprep.subr.bf16.mxu0 %v4249_v11 }
  0x6a   : >> { %3832 = vmatprep.subr.bf16.mxu1 %v4249_v11  ;;  %v1092_v37 = vrot.slane %v1090_v35, 1  ;;  %v1095_v38 = vrot.slane %v1093_v36, 2  ;;  %v4214_v35 = vld [vmem:[%s4758_s1 + $0x88] sm:$0xff]   ;;  %v3456_v36 = vld [vmem:[%s4326_s7 + $0x30] sm:$0xe] }
  0x6b   : >> { %v3459_v39 = vcombine.low %v3456_v36, %v3450_v28 }
  0x6c   : >> { %v1096_v40 = vor.u32 %v1095_v38, %v1092_v37  ;;  %v3462_v37 = vld [vmem:[%s4326_s7 + $0x30] sm:$0xe]  ;;  %v3463_v38 = vld [vmem:[%s4326_s7 + $0x34] sm:$0xf] }
  0x6e   : >> { %v4476_v43 = vsel %vm421_vm4, %v1096_v40, %v1100_v41  ;;  %v3467_v40 = vcombine.low %v3462_v37, %v3463_v38  ;;  %v4626_v41 = vrot.slane %v3459_v39, 1 }
  0x70   : >> { %v1756_v44 = vshrl.u32 %v3467_v40, 16  ;;  %v1759_v45 = vshll.u32 %v3467_v40, 16 }
  0x72   : >> { %3679 = vmatmul.mubr.msk.bf16.vlgmr.msra.gmra.mrb[0].mxu0 %vm249_vm3, %v4370_v42  ;;  %v4197_v42 = vld [vmem:[%s4758_s1 + $0x48] sm:$0xff]   ;;  %v1758_v46 = vrot.slane %v1756_v44, 1  ;;  %v1761_v47 = vrot.slane %v1759_v45, 2 }
  0x73   : >> { %3829 = vmatmul.mubr.msk.bf16.vlgmr.msra.gmra.mrb[0].mxu1 %vm249_vm3, %v4456_v32  ;;  %3683 = vmatpush3.bf16.msra.mxu0 %v4194_v33 }
  0x74   : >> { %3833 = vmatpush3.bf16.msra.mxu1 %v4194_v33  ;;  %3684 = vmatprep.mubr.msk.bf16.mxu0 %vm4250_vm2, %v4249_v11 }
  0x75   : >> { %3834 = vmatprep.mubr.msk.bf16.mxu1 %vm4250_vm2, %v4249_v11  ;;  %3688 = vmatprep.subr.bf16.mxu0 %v4249_v11 }
  0x76   : >> { %3838 = vmatprep.subr.bf16.mxu1 %v4249_v11 }
  0x7e   : >> { %3685 = vmatmul.mubr.msk.bf16.vlgmr.msra.gmra.mrb[0].mxu0 %vm249_vm3, %v4391_v63  ;;  %v3427_v63 = vld [vmem:[%s4326_s7 + $0x28] sm:$0xf] }
  0x7f   : >> { %3835 = vmatmul.mubr.msk.bf16.vlgmr.msra.gmra.mrb[0].mxu1 %vm249_vm3, %v4476_v43  ;;  %3689 = vmatpush3.bf16.msra.mxu0 %v4197_v42  ;;  %v3431_v3 = vcombine.low %v3426_v62, %v3427_v63 }
  0x80   : >> { %3839 = vmatpush3.bf16.msra.mxu1 %v4197_v42  ;;  %3690 = vmatprep.mubr.msk.bf16.mxu0 %vm4250_vm2, %v4249_v11  ;;  %v4216_v42 = vld [vmem:[%s4758_s1 + $0x90] sm:$0xff]  }
  0x81   : >> { %3840 = vmatprep.mubr.msk.bf16.mxu1 %vm4250_vm2, %v4249_v11  ;;  %3694 = vmatprep.subr.bf16.mxu0 %v4249_v11  ;;  %v1423_v7 = vshrl.u32 %v3431_v3, 16  ;;  %v1426_v10 = vshll.u32 %v3431_v3, 16 }
  0x82   : >> { %3844 = vmatprep.subr.bf16.mxu1 %v4249_v11 }
  0x83   : >> { %v1425_v12 = vrot.slane %v1423_v7, 1  ;;  %v1428_v13 = vrot.slane %v1426_v10, 2  ;;  %v4225_v7 = vld [vmem:[%s4758_s1 + $0xb0] sm:$0xff]   ;;  %v3506_v10 = vld [vmem:[%s4326_s7 + $0x3c] sm:$0xe] }
  0x84   : >> { %v3507_v14 = vcombine.low %v3506_v10, %v3503_v61 }
  0x8a   : >> { %3691 = vmatmul.mubr.msk.bf16.vlgmr.msra.gmra.mrb[0].mxu0 %vm249_vm3, %v4409_v15  ;;  %v1429_v15 = vor.u32 %v1428_v13, %v1425_v12  ;;  %v3509_v12 = vld [vmem:[%s4326_s7 + $0x3c] sm:$0xe]  ;;  %v3510_v13 = vld [vmem:[%s4326_s7 + $0x40] sm:$0xf] }
  0x8b   : >> { %3841 = vmatmul.mubr.msk.bf16.vlgmr.msra.gmra.mrb[0].mxu1 %vm249_vm3, %v4493_v49  ;;  %3695 = vmatpush3.bf16.msra.mxu0 %v4199_v48 }
  0x8c   : >> { %3845 = vmatpush3.bf16.msra.mxu1 %v4199_v48  ;;  %3696 = vmatprep.mubr.msk.bf16.mxu0 %vm4250_vm2, %v4249_v11  ;;  %v4561_v18 = vsel %vm421_vm4, %v1429_v15, %v1433_v16  ;;  %v3512_v15 = vcombine.low %v3509_v12, %v3510_v13  ;;  %v2856_v16 = vrot.slane %v3507_v14, 1 }
  0x8d   : >> { %3846 = vmatprep.mubr.msk.bf16.mxu1 %vm4250_vm2, %v4249_v11  ;;  %3700 = vmatprep.subr.bf16.mxu0 %v4249_v11 }
  0x8e   : >> { %3850 = vmatprep.subr.bf16.mxu1 %v4249_v11 }
  0x96   : >> { %3697 = vmatmul.mubr.msk.bf16.vlgmr.msra.gmra.mrb[0].mxu0 %vm249_vm3, %v4423_v19  ;;  %v3435_v19 = vld [vmem:[%s4326_s7 + $0x24] sm:$0xc] }
  0x97   : >> { %3847 = vmatmul.mubr.msk.bf16.vlgmr.msra.gmra.mrb[0].mxu1 %vm249_vm3, %v4508_v53  ;;  %3701 = vmatpush3.bf16.msra.mxu0 %v4202_v55  ;;  %v3438_v20 = vcombine.low %v3435_v19, %v3427_v63  ;;  %v2915_v19 = vshrl.u32 %v3512_v15, 16 }
  0x98   : >> { %3851 = vmatpush3.bf16.msra.mxu1 %v4202_v55  ;;  %3702 = vmatprep.mubr.msk.bf16.mxu0 %vm4250_vm2, %v4249_v11 }
  0x99   : >> { %3852 = vmatprep.mubr.msk.bf16.mxu1 %vm4250_vm2, %v4249_v11  ;;  %3706 = vmatprep.subr.bf16.mxu0 %v4249_v11  ;;  %v1494_v21 = vrot.slane %v3438_v20, 2  ;;  %v2918_v20 = vshll.u32 %v3512_v15, 16 }
  0x9a   : >> { %3856 = vmatprep.subr.bf16.mxu1 %v4249_v11 }
  0x9b   : >> { %v4578_v24 = vsel %vm494_vm5, %v1494_v21, %v1495_v22  ;;  %v2917_v21 = vrot.slane %v2915_v19, 1  ;;  %v2920_v22 = vrot.slane %v2918_v20, 2 }
  0xa2   : >> { %3703 = vmatmul.mubr.msk.bf16.vlgmr.msra.gmra.mrb[0].mxu0 %vm249_vm3, %v4438_v25  ;;  %v3443_v25 = vld [vmem:[%s4326_s7 + $0x30] sm:$0xf] }
  0xa3   : >> { %3853 = vmatmul.mubr.msk.bf16.vlgmr.msra.gmra.mrb[0].mxu1 %vm249_vm3, %v4523_v59  ;;  %3707 = vmatpush3.bf16.msra.mxu0 %v4203_v60  ;;  %v4593_v29 = vcombine.low %v3443_v25, %v3444_v27  ;;  %v3453_v30 = vcombine.low %v3443_v25, %v3450_v28  ;;  %v4230_v27 = vld [vmem:[%s4758_s1 + $0xc0] sm:$0xff]  }
  0xa4   : >> { %3857 = vmatpush3.bf16.msra.mxu1 %v4203_v60  ;;  %3708 = vmatprep.mubr.msk.bf16.mxu0 %vm4250_vm2, %v4249_v11  ;;  %v3500_v60 = vld [vmem:[%s4326_s7 + $0x40] sm:$0x7] }
  0xa5   : >> { %3858 = vmatprep.mubr.msk.bf16.mxu1 %vm4250_vm2, %v4249_v11  ;;  %3712 = vmatprep.subr.bf16.mxu0 %v4249_v11  ;;  %v1625_v26 = vshll.u32 %v3453_v30, 16 }
  0xa6   : >> { %3862 = vmatprep.subr.bf16.mxu1 %v4249_v11 }
  0xa7   : >> { %v1627_v33 = vrot.slane %v1625_v26, 1 }
  0xae   : >> { %3709 = vmatmul.mubr.msk.bf16.vlgmr.msra.gmra.mrb[0].mxu0 %vm249_vm3, %v4456_v32  ;;  %v1623_v32 = vshrl.u32 %v3453_v30, 16 }
  0xaf   : >> { %3859 = vmatmul.mubr.msk.bf16.vlgmr.msra.gmra.mrb[0].mxu1 %vm249_vm3, %v4541_v4  ;;  %3713 = vmatpush3.bf16.msra.mxu0 %v4205_v5 }
  0xb0   : >> { %3863 = vmatpush3.bf16.msra.mxu1 %v4205_v5  ;;  %3714 = vmatprep.mubr.msk.bf16.mxu0 %vm4250_vm2, %v4249_v11  ;;  %v4608_v34 = vor.u32 %v1627_v33, %v1623_v32  ;;  %v4251_v33 = vmov 0.0|0.0  }
  0xb1   : >> { %3864 = vmatprep.mubr.msk.bf16.mxu1 %vm4250_vm2, %v4249_v11  ;;  %3718 = vmatprep.subr.bf16.mxu0 %v4249_v11 }
  0xb2   : >> { %3868 = vmatprep.subr.bf16.mxu1 %v4249_v11 }
  0xba   : >> { %3715 = vmatmul.mubr.msk.bf16.vlgmr.msra.gmra.mrb[0].mxu0 %vm249_vm3, %v4476_v43  ;;  %v4218_v43 = vld [vmem:[%s4326_s7 + $0x38] ss:$0 sps:$4 sm:$0x11]  }
  0xbb   : >> { %3865 = vmatmul.mubr.msk.bf16.vlgmr.msra.gmra.mrb[0].mxu1 %vm249_vm3, %v4561_v18  ;;  %3719 = vmatpush3.bf16.msra.mxu0 %v4208_v17  ;;  %v1764_v48 = vshll.u32 %v4218_v43, 16  ;;  %v1828_v56 = vrot.slane %v4218_v43, 2 }
  0xbc   : >> { %3869 = vmatpush3.bf16.msra.mxu1 %v4208_v17  ;;  %3720 = vmatprep.mubr.msk.bf16.mxu0 %vm4250_vm2, %v4249_v11  ;;  %v4227_v17 = vld [vmem:[%s4758_s1 + $0xb8] sm:$0xff]  }
  0xbd   : >> { %3870 = vmatprep.mubr.msk.bf16.mxu1 %vm4250_vm2, %v4249_v11  ;;  %3724 = vmatprep.subr.bf16.mxu0 %v4249_v11  ;;  %v1766_v50 = vrot.slane %v1764_v48, 2 }
  0xbe   : >> { %3874 = vmatprep.subr.bf16.mxu1 %v4249_v11 }
  0xc6   : >> { %3721 = vmatmul.mubr.msk.bf16.vlgmr.msra.gmra.mrb[0].mxu0 %vm249_vm3, %v4493_v49  ;;  %v1762_v49 = vor.u32 %v1761_v47, %v1758_v46 }
  0xc7   : >> { %3871 = vmatmul.mubr.msk.bf16.vlgmr.msra.gmra.mrb[0].mxu1 %vm249_vm3, %v4578_v24  ;;  %3725 = vmatpush3.bf16.msra.mxu0 %v4210_v23 }
  0xc8   : >> { %3875 = vmatpush3.bf16.msra.mxu1 %v4210_v23  ;;  %3726 = vmatprep.mubr.msk.bf16.mxu0 %vm4250_vm2, %v4249_v11  ;;  %v4646_v52 = vsel %vm421_vm4, %v1762_v49, %v1766_v50 }
  0xc9   : >> { %3876 = vmatprep.mubr.msk.bf16.mxu1 %vm4250_vm2, %v4249_v11  ;;  %3730 = vmatprep.subr.bf16.mxu0 %v4249_v11 }
  0xca   : >> { %3880 = vmatprep.subr.bf16.mxu1 %v4249_v11 }
  0xd2   : >> { %3727 = vmatmul.mubr.msk.bf16.vlgmr.msra.gmra.mrb[0].mxu0 %vm249_vm3, %v4508_v53  ;;  %v3471_v53 = vld [vmem:[%s4326_s7 + $0x30] sm:$0xc] }
  0xd3   : >> { %3877 = vmatmul.mubr.msk.bf16.vlgmr.msra.gmra.mrb[0].mxu1 %vm249_vm3, %v4593_v29  ;;  %3731 = vmatpush3.bf16.msra.mxu0 %v4213_v31  ;;  %v3474_v54 = vcombine.low %v3471_v53, %v3463_v38 }
  0xd4   : >> { %3881 = vmatpush3.bf16.msra.mxu1 %v4213_v31  ;;  %3732 = vmatprep.mubr.msk.bf16.mxu0 %vm4250_vm2, %v4249_v11 }
  0xd5   : >> { %3882 = vmatprep.mubr.msk.bf16.mxu1 %vm4250_vm2, %v4249_v11  ;;  %3736 = vmatprep.subr.bf16.mxu0 %v4249_v11  ;;  %v1827_v55 = vrot.slane %v3474_v54, 2 }
  0xd6   : >> { %3886 = vmatprep.subr.bf16.mxu1 %v4249_v11 }
  0xd7   : >> { %v4663_v58 = vsel %vm494_vm5, %v1827_v55, %v1828_v56 }
  0xde   : >> { %3733 = vmatmul.mubr.msk.bf16.vlgmr.msra.gmra.mrb[0].mxu0 %vm249_vm3, %v4523_v59  ;;  %v3499_v59 = vld [vmem:[%s4326_s7 + $0x3c] sm:$0xf] }
  0xdf   : >> { %3883 = vmatmul.mubr.msk.bf16.vlgmr.msra.gmra.mrb[0].mxu1 %vm249_vm3, %v4608_v34  ;;  %3737 = vmatpush3.bf16.msra.mxu0 %v4214_v35  ;;  %v3501_v62 = vcombine.low %v3499_v59, %v3500_v60  ;;  %v3504_v63 = vcombine.low %v3499_v59, %v3503_v61 }
  0xe0   : >> { %3887 = vmatpush3.bf16.msra.mxu1 %v4214_v35  ;;  %3738 = vmatprep.mubr.msk.bf16.mxu0 %vm4250_vm2, %v4249_v11 }
  0xe1   : >> { %3888 = vmatprep.mubr.msk.bf16.mxu1 %vm4250_vm2, %v4249_v11  ;;  %3742 = vmatprep.subr.bf16.mxu0 %v4249_v11  ;;  %v2802_v3 = vshll.u32 %v3504_v63, 16 }
  0xe2   : >> { %3892 = vmatprep.subr.bf16.mxu1 %v4249_v11 }
  0xe3   : >> { %v2804_v5 = vrot.slane %v2802_v3, 1 }
  0xea   : >> { %3739 = vmatmul.mubr.msk.bf16.vlgmr.msra.gmra.mrb[0].mxu0 %vm249_vm3, %v4541_v4  ;;  %v2800_v4 = vshrl.u32 %v3504_v63, 16 }
  0xeb   : >> { %3889 = vmatmul.mubr.msk.bf16.vlgmr.msra.gmra.mrb[0].mxu1 %vm249_vm3, %v4626_v41  ;;  %3743 = vmatpush3.bf16.msra.mxu0 %v4216_v42 }
  0xec   : >> { %3893 = vmatpush3.bf16.msra.mxu1 %v4216_v42  ;;  %3744 = vmatprep.mubr.msk.bf16.mxu0 %vm4250_vm2, %v4249_v11  ;;  %v2805_v6 = vor.u32 %v2804_v5, %v2800_v4 }
  0xed   : >> { %3894 = vmatprep.mubr.msk.bf16.mxu1 %vm4250_vm2, %v4249_v11  ;;  %3748 = vmatprep.subr.bf16.mxu0 %v4249_v11 }
  0xee   : >> { %3898 = vmatprep.subr.bf16.mxu1 %v4249_v11 }
  0xf6   : >> { %3745 = vmatmul.mubr.msk.bf16.vlgmr.msra.gmra.mrb[0].mxu0 %vm249_vm3, %v4561_v18  ;;  %v4229_v18 = vld [vmem:[%s4326_s7 + $0x44] ss:$0 sps:$4 sm:$0x11]  }
  0xf7   : >> { %3895 = vmatmul.mubr.msk.bf16.vlgmr.msra.gmra.mrb[0].mxu1 %vm249_vm3, %v4646_v52  ;;  %3749 = vmatpush3.bf16.msra.mxu0 %v4219_v51  ;;  %v2923_v23 = vshll.u32 %v4229_v18, 16  ;;  %v2978_v26 = vrot.slane %v4229_v18, 2 }
  0xf8   : >> { %3899 = vmatpush3.bf16.msra.mxu1 %v4219_v51  ;;  %3750 = vmatprep.mubr.msk.bf16.mxu0 %vm4250_vm2, %v4249_v11 }
  0xf9   : >> { %3900 = vmatprep.mubr.msk.bf16.mxu1 %vm4250_vm2, %v4249_v11  ;;  %3754 = vmatprep.subr.bf16.mxu0 %v4249_v11  ;;  %v2925_v25 = vrot.slane %v2923_v23, 2 }
  0xfa   : >> { %3904 = vmatprep.subr.bf16.mxu1 %v4249_v11 }
 0x102   : >> { %3751 = vmatmul.mubr.msk.bf16.vlgmr.msra.gmra.mrb[0].mxu0 %vm249_vm3, %v4578_v24  ;;  %v2921_v24 = vor.u32 %v2920_v22, %v2917_v21 }
 0x103   : >> { %3901 = vmatmul.mubr.msk.bf16.vlgmr.msra.gmra.mrb[0].mxu1 %vm249_vm3, %v4663_v58  ;;  %3755 = vmatpush3.bf16.msra.mxu0 %v4221_v57 }
 0x104   : >> { %3905 = vmatpush3.bf16.msra.mxu1 %v4221_v57  ;;  %3756 = vmatprep.mubr.msk.bf16.mxu0 %vm4250_vm2, %v4249_v11  ;;  %v2926_v28 = vsel %vm421_vm4, %v2921_v24, %v2925_v25 }
 0x105   : >> { %3906 = vmatprep.mubr.msk.bf16.mxu1 %vm4250_vm2, %v4249_v11  ;;  %3760 = vmatprep.subr.bf16.mxu0 %v4249_v11 }
 0x106   : >> { %3910 = vmatprep.subr.bf16.mxu1 %v4249_v11 }
 0x10e   : >> { %3757 = vmatmul.mubr.msk.bf16.vlgmr.msra.gmra.mrb[0].mxu0 %vm249_vm3, %v4593_v29  ;;  %v3515_v29 = vld [vmem:[%s4326_s7 + $0x3c] sm:$0xc]  ;;  %s3524_s7 = sshll.u32 %s4246_s29, 2  ;;  %s218_s29 = sadd.s32 1, %s4246_s29  }
 0x10f   : >> { %3907 = vmatmul.mubr.msk.bf16.vlgmr.msra.gmra.mrb[0].mxu1 %vm249_vm3, %v3501_v62  ;;  %3761 = vmatpush3.bf16.msra.mxu0 %v4224_v2  ;;  %v3516_v30 = vcombine.low %v3515_v29, %v3510_v13  ;;  %s3206_s14 = scalar_lea.vmem %s4304_s28, %s3524_s7  ;;  %p215_p4 = scmp.ge.s32.totalorder %s218_s29, 7  }
 0x110   : >> { %3911 = vmatpush3.bf16.msra.mxu1 %v4224_v2  ;;  %3762 = vmatprep.mubr.msk.bf16.mxu0 %vm4250_vm2, %v4249_v11  ;;  %v3210_v61 = vld [vmem:[%s3206_s14] sm:$0xf] }
 0x111   : >> { %3912 = vmatprep.mubr.msk.bf16.mxu1 %vm4250_vm2, %v4249_v11  ;;  %3766 = vmatprep.subr.bf16.mxu0 %v4249_v11  ;;  %v2977_v31 = vrot.slane %v3516_v30, 2 }
 0x112   : >> { %3916 = vmatprep.subr.bf16.mxu1 %v4249_v11 }
 0x113   : >> { %v2979_v32 = vsel %vm494_vm5, %v2977_v31, %v2978_v26 }
 0x11a   : >> { %3763 = vmatmul.mubr.msk.bf16.vlgmr.msra.gmra.mrb[0].mxu0 %vm249_vm3, %v4608_v34 }
 0x11b   : >> { %3913 = vmatmul.mubr.msk.bf16.vlgmr.msra.gmra.mrb[0].mxu1 %vm249_vm3, %v2805_v6  ;;  %3767 = vmatpush3.bf16.msra.mxu0 %v4225_v7 }
 0x11c   : >> { %3917 = vmatpush3.bf16.msra.mxu1 %v4225_v7  ;;  %3768 = vmatprep.mubr.msk.bf16.mxu0 %vm4250_vm2, %v4249_v11 }
 0x11d   : >> { %3918 = vmatprep.mubr.msk.bf16.mxu1 %vm4250_vm2, %v4249_v11  ;;  %3772 = vmatprep.subr.bf16.mxu0 %v4249_v11 }
 0x11e   : >> { %3922 = vmatprep.subr.bf16.mxu1 %v4249_v11 }
 0x126   : >> { %3769 = vmatmul.mubr.msk.bf16.vlgmr.msra.gmra.mrb[0].mxu0 %vm249_vm3, %v4626_v41 }
 0x127   : >> { %3919 = vmatmul.mubr.msk.bf16.vlgmr.msra.gmra.mrb[0].mxu1 %vm249_vm3, %v2856_v16  ;;  %3773 = vmatpush3.bf16.msra.mxu0 %v4227_v17 }
 0x128   : >> { %3923 = vmatpush3.bf16.msra.mxu1 %v4227_v17  ;;  %3774 = vmatprep.mubr.msk.bf16.mxu0 %vm4250_vm2, %v4249_v11 }
 0x129   : >> { %3924 = vmatprep.mubr.msk.bf16.mxu1 %vm4250_vm2, %v4249_v11  ;;  %3778 = vmatprep.subr.bf16.mxu0 %v4249_v11 }
 0x12a   : >> { %3928 = vmatprep.subr.bf16.mxu1 %v4249_v11 }
 0x132   : >> { %3775 = vmatmul.mubr.msk.bf16.vlgmr.msra.gmra.mrb[0].mxu0 %vm249_vm3, %v4646_v52 }
 0x133   : >> { %3925 = vmatmul.mubr.msk.bf16.vlgmr.msra.gmra.mrb[0].mxu1 %vm249_vm3, %v2926_v28  ;;  %3779 = vmatpush3.bf16.msra.mxu0 %v4230_v27 }
 0x134   : >> { %3929 = vmatpush3.bf16.msra.mxu1 %v4230_v27  ;;  %3780 = vmatprep.mubr.msk.bf16.mxu0 %vm4250_vm2, %v4249_v11 }
 0x135   : >> { %3930 = vmatprep.mubr.msk.bf16.mxu1 %vm4250_vm2, %v4249_v11  ;;  %3948 = vmatprep.subr.bf16.mxu0 %v4251_v33 }
 0x136   : >> { %3952 = vmatprep.subr.bf16.mxu1 %v4251_v33 }
 0x13e   : >> { %3781 = vmatmul.mubr.msk.bf16.vlgmr.msra.gmra.mrb[0].mxu0 %vm249_vm3, %v4663_v58 }
 0x13f   : >> { %3931 = vmatmul.mubr.msk.bf16.vlgmr.msra.gmra.mrb[0].mxu1 %vm249_vm3, %v2979_v32  ;;  %3938 = vmatprep.mubr.msk.f32.mxu0 %vm4250_vm2, %v4249_v11 }
 0x140   : >> { %3945 = vmatprep.mubr.msk.f32.mxu1 %vm4250_vm2, %v4249_v11 }
 0x211   : >> { %v1873_v34 = vpop.f32.mrb[0].mxu0 }
 0x212   : >> { %v3032_v35 = vmul.f32 %v4289_v0, %v1873_v34  ;;  %v3017_v36 = vpop.f32.mrb[0].mxu1  ;;  %v3782_v37 = vpop.f32.mrb[1].mxu0 }
 0x213   : >> { %v3044_v38 = vmul.f32 %v4289_v0, %v3017_v36  ;;  %v3932_v39 = vpop.f32.mrb[1].mxu1  ;;  %v1876_v40 = vpop.f32.mrb[2].mxu0 }
 0x214   : >> { %v3040_v41 = vadd.f32 %v4294_v1, %v3032_v35  ;;  %v3033_v42 = vmul.f32 %v4289_v0, %v1876_v40  ;;  %v3020_v43 = vpop.f32.mrb[2].mxu1  ;;  %v3783_v44 = vpop.f32.mrb[3].mxu0 }
 0x215   : >> { %v3046_v11 = vadd.f32 %v4294_v1, %v3044_v38  ;;  %v3045_v45 = vmul.f32 %v4289_v0, %v3020_v43  ;;  %v3933_v46 = vpop.f32.mrb[3].mxu1 }
 0x216   : >> { %v3042_v47 = vmax.f32 %v3040_v41, 0.0  ;;  %v3041_v48 = vadd.f32 %v4294_v1, %v3033_v42 }
 0x217   : >> { %v3048_v49 = vmax.f32 %v3046_v11, 0.0  ;;  %v3047_v50 = vadd.f32 %v4294_v1, %v3045_v45 }
 0x218   : >> { %v3043_v51 = vmax.f32 %v3041_v48, 0.0 }
 0x219   : >> { %v3050_v52 = vmax.f32 %v3042_v47, %v3048_v49  ;;  %v3049_v53 = vmax.f32 %v3047_v50, 0.0 }
 0x21b   : >> { %v3051_v54 = vmax.f32 %v3043_v51, %v3049_v53 }
 0x21d   : >> { %v3949_v55 = vpack.c.bf16 %v3051_v54, %v3050_v52 }
 0x21f   : >> { %3951 = vmatpush3.bf16.msk.msra.mxu0 %vm3950_vm7, %v3949_v55  ;;  %3955 = vmatpush3.bf16.msk.msra.mxu1 %vm3950_vm7, %v3949_v55 }
 0x222   : >> { %3939 = vmatmul.mubr.msk.f32.vlgmr.msra.gmra.mrb[4].mxu0 %vm3052_vm8, %v4306_v8  ;;  %3946 = vmatmul.mubr.msk.f32.vlgmr.msra.gmra.mrb[4].mxu1 %vm3052_vm8, %v4308_v9 }
 0x2f5   : >> { %v3126_v56 = vpop.f32.mrb[4].mxu0  ;;  %v3199_v57 = vpop.f32.mrb[4].mxu1  ;;  %217 = sbr.rel (!%p215_p4) target bundleno = 18 (0x12), region = 104 }
 0x2f6   : >> { %v3203_v58 = vmax.f32 %v3126_v56, %v3199_v57  ;;  %v3940_v59 = vpop.f32.mrb[5].mxu0  ;;  %v3947_v60 = vpop.f32.mrb[5].mxu1 }
 0x2f8   : >> { %v3204_v62 = vpack.c.bf16 %v3203_v58, %v3203_v58 }
 0x2fa   : >> { %v3211_v63 = vsel %vm3209_vm11, %v3204_v62, %v3210_v61 }
 0x2fb   : >> { %3212 = vst [vmem:[%s3206_s14] sm:$0xf] %v3211_v63 }
 0x2fc PF: > { %s14_s15 = sadd.s32 1, %s4242_s15  }
 0x2fd   : > { %p11_p5 = scmp.ge.s32.totalorder %s14_s15, 4  }
 0x2ff   :  { %13 = sbr.rel (!%p11_p5) target bundleno = 1 (0x1), region = 115 }

// kernel: convnet_forward.9
= control target key start
LH: loop header
LB: loop body
LE: loop exit
PB: predicated region body
PF: predicated region fallthrough
CT: control target
= control target key end

     0   :  { %v825_v27 = vlaneseq  ;;  %v5922_v35 = vmov 1966171168   ;;  %s7239_s0 = inlined_call_operand.vmem [shape: bf16[2,6272], index: 0, kind: input, shape index: {}]   ;;  %s7240_s1 = inlined_call_operand.vmem [shape: bf16[6272,128], index: 1, kind: input, shape index: {}]   ;;  %s7241_s2 = inlined_call_operand.vmem [shape: f32[1,128], index: 2, kind: input, shape index: {}]   ;;  %s7242_s3 = inlined_call_operand.hbm [shape: f32[2,128], index: 3, kind: output, shape index: {}]  }
   0x1   :  { %v5500_v0 = vld [vmem:[%s7240_s1 + $0x40] sm:$0xff]   ;;  %v5504_v4 = vld [vmem:[%s7240_s1 + $0x48] sm:$0xff]   ;;  %v5508_v8 = vld [vmem:[%s7240_s1 + $0x50] sm:$0xff]   ;;  %v823_v36 = vunpack.c.l.s4 %v5922_v35 }
   0x2   :  { %v5501_v1 = vld [vmem:[%s7240_s1] sm:$0xff]   ;;  %4939 = vmatprep.subr.bf16.mxu0 %v5500_v0  ;;  %v5505_v5 = vld [vmem:[%s7240_s1 + $0x8] sm:$0xff]   ;;  %v5509_v9 = vld [vmem:[%s7240_s1 + $0x10] sm:$0xff]   ;;  %v826_v32 = vshrl.u32 %v825_v27, 7 }
   0x3   :  { %v5502_v2 = vld [vmem:[%s7240_s1 + $0xc0] sm:$0xff]   ;;  %4940 = vmatpush3.bf16.msra.mxu0 %v5501_v1  ;;  %v5506_v6 = vld [vmem:[%s7240_s1 + $0xc8] sm:$0xff]   ;;  %v5510_v10 = vld [vmem:[%s7240_s1 + $0xd0] sm:$0xff]   ;;  %v824_v39 = vunpack.c.0.s8 %v823_v36 }
   0x4   :  { %v5503_v3 = vld [vmem:[%s7240_s1 + $0x80] sm:$0xff]   ;;  %4961 = vmatprep.subr.bf16.mxu1 %v5502_v2  ;;  %4941 = vmatprep.subr.bf16.mxu0 %v5504_v4  ;;  %v5507_v7 = vld [vmem:[%s7240_s1 + $0x88] sm:$0xff]   ;;  %v5511_v11 = vld [vmem:[%s7240_s1 + $0x90] sm:$0xff]  }
   0x5   :  { %4962 = vmatpush3.bf16.msra.mxu1 %v5503_v3  ;;  %v5512_v12 = vld [vmem:[%s7240_s1 + $0x58] sm:$0xff]   ;;  %v5516_v16 = vld [vmem:[%s7240_s1 + $0x60] sm:$0xff]   ;;  %v5520_v20 = vld [vmem:[%s7240_s1 + $0x68] sm:$0xff]   ;;  %v6051_v41 = vsub.s32 %v824_v39, %v826_v32 }
   0x6   :  { %4963 = vmatprep.subr.bf16.mxu1 %v5506_v6  ;;  %v5513_v13 = vld [vmem:[%s7240_s1 + $0x18] sm:$0xff]   ;;  %v5517_v17 = vld [vmem:[%s7240_s1 + $0x20] sm:$0xff]   ;;  %v5521_v21 = vld [vmem:[%s7240_s1 + $0x28] sm:$0xff]  }
   0x7   :  { %4942 = vmatpush3.bf16.msra.mxu0 %v5505_v5  ;;  %v5514_v14 = vld [vmem:[%s7240_s1 + $0xd8] sm:$0xff]   ;;  %v5518_v18 = vld [vmem:[%s7240_s1 + $0xe0] sm:$0xff]   ;;  %v5522_v22 = vld [vmem:[%s7240_s1 + $0xe8] sm:$0xff]  }
   0x8   :  { %4943 = vmatprep.subr.bf16.mxu0 %v5508_v8  ;;  %v5515_v15 = vld [vmem:[%s7240_s1 + $0x98] sm:$0xff]   ;;  %v5519_v19 = vld [vmem:[%s7240_s1 + $0xa0] sm:$0xff]   ;;  %v5523_v23 = vld [vmem:[%s7240_s1 + $0xa8] sm:$0xff]  }
   0x9   :  { %4964 = vmatpush3.bf16.msra.mxu1 %v5507_v7  ;;  %v5524_v24 = vld [vmem:[%s7240_s1 + $0x70] sm:$0xff]   ;;  %v5528_v29 = vld [vmem:[%s7240_s1 + $0x78] sm:$0xff]   ;;  %v16_v33 = vld [vmem:[%s7239_s0] sm:$0xff] }
   0xa   :  { %4965 = vmatprep.subr.bf16.mxu1 %v5510_v10  ;;  %v5525_v25 = vld [vmem:[%s7240_s1 + $0x30] sm:$0xff]   ;;  %v5529_v30 = vld [vmem:[%s7240_s1 + $0x38] sm:$0xff]   ;;  %v5533_v37 = vld [vmem:[%s7240_s1 + $0x140] sm:$0xff]   ;;  %v821_v38 = vcombine.high %v16_v33, %v16_v33  ;;  %v828_v42 = vrot.slane %v16_v33, %v6051_v41 }
   0xb   :  { %4944 = vmatpush3.bf16.msra.mxu0 %v5509_v9  ;;  %v5526_v26 = vld [vmem:[%s7240_s1 + $0xf0] sm:$0xff]   ;;  %v5530_v31 = vld [vmem:[%s7240_s1 + $0xf8] sm:$0xff]   ;;  %v5535_v40 = vld [vmem:[%s7240_s1 + $0x1c0] sm:$0xff]  }
   0xc   :  { %4945 = vmatprep.subr.bf16.mxu0 %v5512_v12  ;;  %v5527_v28 = vld [vmem:[%s7240_s1 + $0xb0] sm:$0xff]   ;;  %v5532_v34 = vld [vmem:[%s7240_s1 + $0xb8] sm:$0xff]   ;;  %v6055_v43 = vrot.slane %v821_v38, %v6051_v41  ;;  %v836_v44 = vcombine.high %v828_v42, %v828_v42  ;;  %v844_v45 = vrot.slane %v828_v42, %v6051_v41  ;;  %v5534_v47 = vld [vmem:[%s7240_s1 + $0x100] sm:$0xff]  }
   0xd   :  { %4966 = vmatpush3.bf16.msra.mxu1 %v5511_v11  ;;  %v5536_v49 = vld [vmem:[%s7240_s1 + $0x180] sm:$0xff]   ;;  %v5537_v52 = vld [vmem:[%s7240_s1 + $0x148] sm:$0xff]   ;;  %v5541_v58 = vld [vmem:[%s7240_s1 + $0x150] sm:$0xff]  }
   0xe   :  { %4967 = vmatprep.subr.bf16.mxu1 %v5514_v14  ;;  %v837_v46 = vcombine.high %v6055_v43, %v6055_v43  ;;  %v858_v48 = vrot.slane %v836_v44, %v6051_v41  ;;  %v866_v51 = vcombine.high %v844_v45, %v844_v45  ;;  %v5538_v54 = vld [vmem:[%s7240_s1 + $0x108] sm:$0xff]   ;;  %v5542_v59 = vld [vmem:[%s7240_s1 + $0x110] sm:$0xff]   ;;  %v5545_v62 = vld [vmem:[%s7240_s1 + $0x158] sm:$0xff]  }
   0xf   :  { %4946 = vmatpush3.bf16.msra.mxu0 %v5513_v13  ;;  %v5539_v55 = vld [vmem:[%s7240_s1 + $0x1c8] sm:$0xff]   ;;  %v5543_v60 = vld [vmem:[%s7240_s1 + $0x1d0] sm:$0xff]   ;;  %v5546_v63 = vld [vmem:[%s7240_s1 + $0x118] sm:$0xff]  }
  0x10   :  { %4947 = vmatprep.subr.bf16.mxu0 %v5516_v16  ;;  %v865_v50 = vrot.slane %v837_v46, %v6051_v41  ;;  %3562 = vmatprep.mubr.bf16.mxu0 %v858_v48  ;;  %v868_v53 = vcombine.high %v858_v48, %v858_v48  ;;  %v5540_v57 = vld [vmem:[%s7240_s1 + $0x188] sm:$0xff]   ;;  %v5544_v61 = vld [vmem:[%s7240_s1 + $0x190] sm:$0xff]   ;;  %v5547_v0 = vld [vmem:[%s7240_s1 + $0x1d8] sm:$0xff]  }
  0x11   :  { %4968 = vmatpush3.bf16.msra.mxu1 %v5515_v15  ;;  %v5548_v1 = vld [vmem:[%s7240_s1 + $0x198] sm:$0xff]   ;;  %v5549_v2 = vld [vmem:[%s7240_s1 + $0x160] sm:$0xff]   ;;  %v5553_v6 = vld [vmem:[%s7240_s1 + $0x168] sm:$0xff]  }
  0x12   :  { %4969 = vmatprep.subr.bf16.mxu1 %v5518_v18  ;;  %v869_v56 = vcombine.high %v865_v50, %v865_v50  ;;  %3602 = vmatprep.mubr.bf16.mxu1 %v868_v53  ;;  %v5550_v3 = vld [vmem:[%s7240_s1 + $0x120] sm:$0xff]   ;;  %v5554_v7 = vld [vmem:[%s7240_s1 + $0x128] sm:$0xff]   ;;  %v5557_v10 = vld [vmem:[%s7240_s1 + $0x170] sm:$0xff]   ;;  %v851_v18 = vrot.slane %v6055_v43, %v6051_v41 }
  0x13   :  { %4948 = vmatpush3.bf16.msra.mxu0 %v5517_v17  ;;  %v5551_v4 = vld [vmem:[%s7240_s1 + $0x1e0] sm:$0xff]   ;;  %v5555_v8 = vld [vmem:[%s7240_s1 + $0x1e8] sm:$0xff]   ;;  %v5558_v11 = vld [vmem:[%s7240_s1 + $0x130] sm:$0xff]  }
  0x14   :  { %4949 = vmatprep.subr.bf16.mxu0 %v5520_v20  ;;  %v5552_v5 = vld [vmem:[%s7240_s1 + $0x1a0] sm:$0xff]   ;;  %v5556_v9 = vld [vmem:[%s7240_s1 + $0x1a8] sm:$0xff]   ;;  %v5559_v12 = vld [vmem:[%s7240_s1 + $0x1f0] sm:$0xff]  }
  0x15   :  { %4970 = vmatpush3.bf16.msra.mxu1 %v5519_v19  ;;  %v5560_v13 = vld [vmem:[%s7240_s1 + $0x1b0] sm:$0xff]   ;;  %v5561_v14 = vld [vmem:[%s7240_s1 + $0x178] sm:$0xff]   ;;  %v5565_v19 = vld [vmem:[%s7240_s1 + $0x240] sm:$0xff]  }
  0x16   :  { %4971 = vmatprep.subr.bf16.mxu1 %v5522_v22  ;;  %v5562_v15 = vld [vmem:[%s7240_s1 + $0x138] sm:$0xff]   ;;  %v5566_v20 = vld [vmem:[%s7240_s1 + $0x200] sm:$0xff]   ;;  %v5572_v27 = vld [vmem:[%s7240_s1 + $0x288] sm:$0xff]  }
  0x17   :  { %4950 = vmatpush3.bf16.msra.mxu0 %v5521_v21  ;;  %v5563_v16 = vld [vmem:[%s7240_s1 + $0x1f8] sm:$0xff]   ;;  %v5567_v21 = vld [vmem:[%s7240_s1 + $0x2c0] sm:$0xff]   ;;  %v5586_v42 = vld [vmem:[%s7240_s1 + $0x228] sm:$0xff]  }
  0x18   :  { %4951 = vmatprep.subr.bf16.mxu0 %v5524_v24  ;;  %v5564_v17 = vld [vmem:[%s7240_s1 + $0x1b8] sm:$0xff]   ;;  %v5568_v22 = vld [vmem:[%s7240_s1 + $0x280] sm:$0xff]   ;;  %v5569_v24 = vld [vmem:[%s7240_s1 + $0x248] sm:$0xff]  }
  0x19   :  { %4972 = vmatpush3.bf16.msra.mxu1 %v5523_v23  ;;  %v867_v23 = vcombine.high %v851_v18, %v851_v18  ;;  %v5577_v32 = vld [vmem:[%s7240_s1 + $0x258] sm:$0xff]   ;;  %v5581_v36 = vld [vmem:[%s7240_s1 + $0x260] sm:$0xff]   ;;  %v5587_v43 = vld [vmem:[%s7240_s1 + $0x2e8] sm:$0xff]  }
  0x1a   :  { %4973 = vmatprep.subr.bf16.mxu1 %v5526_v26  ;;  %v5571_v26 = vld [vmem:[%s7240_s1 + $0x2c8] sm:$0xff]   ;;  %v5578_v33 = vld [vmem:[%s7240_s1 + $0x218] sm:$0xff]   ;;  %v5583_v38 = vld [vmem:[%s7240_s1 + $0x2e0] sm:$0xff]  }
  0x1b   :  { %4952 = vmatpush3.bf16.msra.mxu0 %v5525_v25  ;;  %v5570_v25 = vld [vmem:[%s7240_s1 + $0x208] sm:$0xff]   ;;  %v5580_v35 = vld [vmem:[%s7240_s1 + $0x298] sm:$0xff]   ;;  %v5584_v39 = vld [vmem:[%s7240_s1 + $0x2a0] sm:$0xff]  }
  0x1c   :  { %4953 = vmatprep.subr.bf16.mxu0 %v5528_v29  ;;  %v5574_v29 = vld [vmem:[%s7240_s1 + $0x210] sm:$0xff]   ;;  %v5588_v44 = vld [vmem:[%s7240_s1 + $0x2a8] sm:$0xff]  }
  0x1d   :  { %4974 = vmatpush3.bf16.msra.mxu1 %v5527_v28  ;;  %v5573_v28 = vld [vmem:[%s7240_s1 + $0x250] sm:$0xff]   ;;  %v17_v46 = vld [vmem:[%s7239_s0 + $0x8] sm:$0xff] }
  0x1e   :  { %4975 = vmatprep.subr.bf16.mxu1 %v5530_v31  ;;  %v5576_v31 = vld [vmem:[%s7240_s1 + $0x290] sm:$0xff]   ;;  %v877_v48 = vrot.slane %v17_v46, %v6051_v41 }
  0x1f   :  { %4954 = vmatpush3.bf16.msra.mxu0 %v5529_v30  ;;  %v5575_v30 = vld [vmem:[%s7240_s1 + $0x2d0] sm:$0xff]  }
  0x20   :  { %4983 = vmatprep.subr.bf16.mxu0 %v5533_v37  ;;  %v5582_v37 = vld [vmem:[%s7240_s1 + $0x220] sm:$0xff]  }
  0x21   :  { %4976 = vmatpush3.bf16.msra.mxu1 %v5532_v34  ;;  %v5579_v34 = vld [vmem:[%s7240_s1 + $0x2d8] sm:$0xff]  }
  0x22   :  { %5005 = vmatprep.subr.bf16.mxu1 %v5535_v40  ;;  %3563 = vmatmul.mubr.bf16.vlgmr.msra.gmra.mrb[0].mxu0 %v844_v45  ;;  %v5585_v40 = vld [vmem:[%s7240_s1 + $0x268] sm:$0xff]   ;;  %v5589_v45 = vld [vmem:[%s7240_s1 + $0x270] sm:$0xff]  }
  0x23   :  { %4984 = vmatpush3.bf16.msra.mxu0 %v5534_v47  ;;  %3642 = vmatprep.mubr.bf16.mxu0 %v865_v50  ;;  %v5590_v47 = vld [vmem:[%s7240_s1 + $0x230] sm:$0xff]  }
  0x24   :  { %3603 = vmatmul.mubr.bf16.vlgmr.msra.gmra.mrb[0].mxu1 %v866_v51  ;;  %4985 = vmatprep.subr.bf16.mxu0 %v5537_v52  ;;  %v5591_v50 = vld [vmem:[%s7240_s1 + $0x2f0] sm:$0xff]   ;;  %v885_v52 = vcombine.high %v877_v48, %v877_v48 }
  0x25   :  { %5006 = vmatpush3.bf16.msra.mxu1 %v5536_v49  ;;  %3682 = vmatprep.mubr.bf16.mxu1 %v869_v56  ;;  %v870_v49 = vcombine.high %v17_v46, %v17_v46  ;;  %v5592_v51 = vld [vmem:[%s7240_s1 + $0x2b0] sm:$0xff]  }
  0x26   :  { %5007 = vmatprep.subr.bf16.mxu1 %v5539_v55  ;;  %v5594_v55 = vld [vmem:[%s7240_s1 + $0x238] sm:$0xff]   ;;  %v907_v56 = vrot.slane %v885_v52, %v6051_v41  ;;  %v5640_v46 = vld [vmem:[%s7240_s1 + $0x4d0] sm:$0xff]   ;;  %v5646_v52 = vld [vmem:[%s7240_s1 + $0x460] sm:$0xff]  }
  0x27   :  { %4986 = vmatpush3.bf16.msra.mxu0 %v5538_v54  ;;  %v6243_v53 = vrot.slane %v870_v49, %v6051_v41  ;;  %v5593_v54 = vld [vmem:[%s7240_s1 + $0x278] sm:$0xff]  }
  0x28   :  { %4987 = vmatprep.subr.bf16.mxu0 %v5541_v58  ;;  %v5595_v58 = vld [vmem:[%s7240_s1 + $0x2f8] sm:$0xff]  }
  0x29   :  { %5008 = vmatpush3.bf16.msra.mxu1 %v5540_v57  ;;  %v886_v57 = vcombine.high %v6243_v53, %v6243_v53  ;;  %v5643_v49 = vld [vmem:[%s7240_s1 + $0x418] sm:$0xff]  }
  0x2a   :  { %5009 = vmatprep.subr.bf16.mxu1 %v5543_v60  ;;  %v917_v60 = vcombine.high %v907_v56, %v907_v56 }
  0x2b   :  { %4988 = vmatpush3.bf16.msra.mxu0 %v5542_v59  ;;  %v5596_v59 = vld [vmem:[%s7240_s1 + $0x2b8] sm:$0xff]  }
  0x2c   :  { %4989 = vmatprep.subr.bf16.mxu0 %v5545_v62  ;;  %v5597_v62 = vld [vmem:[%s7240_s1 + $0x340] sm:$0xff]  }
  0x2d   :  { %5010 = vmatpush3.bf16.msra.mxu1 %v5544_v61  ;;  %v893_v61 = vrot.slane %v877_v48, %v6051_v41  ;;  %v5642_v48 = vld [vmem:[%s7240_s1 + $0x458] sm:$0xff]  }
  0x2e   :  { %5011 = vmatprep.subr.bf16.mxu1 %v5547_v0  ;;  %v914_v0 = vrot.slane %v886_v57, %v6051_v41  ;;  %v5651_v57 = vld [vmem:[%s7240_s1 + $0x428] sm:$0xff]  }
  0x2f   :  { %4990 = vmatpush3.bf16.msra.mxu0 %v5546_v63  ;;  %v5598_v63 = vld [vmem:[%s7240_s1 + $0x300] sm:$0xff]  }
  0x30   :  { %4991 = vmatprep.subr.bf16.mxu0 %v5549_v2  ;;  %v5600_v2 = vld [vmem:[%s7240_s1 + $0x380] sm:$0xff]  }
  0x31   :  { %5012 = vmatpush3.bf16.msra.mxu1 %v5548_v1  ;;  %v5599_v1 = vld [vmem:[%s7240_s1 + $0x3c0] sm:$0xff]  }
  0x32   :  { %5013 = vmatprep.subr.bf16.mxu1 %v5551_v4  ;;  %v5601_v4 = vld [vmem:[%s7240_s1 + $0x348] sm:$0xff]  }
  0x33   :  { %4992 = vmatpush3.bf16.msra.mxu0 %v5550_v3  ;;  %v915_v3 = vcombine.high %v893_v61, %v893_v61 }
  0x34   :  { %4993 = vmatprep.subr.bf16.mxu0 %v5553_v6  ;;  %v918_v6 = vcombine.high %v914_v0, %v914_v0 }
  0x35   :  { %5014 = vmatpush3.bf16.msra.mxu1 %v5552_v5  ;;  %v5602_v5 = vld [vmem:[%s7240_s1 + $0x308] sm:$0xff]  }
  0x36   :  { %5015 = vmatprep.subr.bf16.mxu1 %v5555_v8  ;;  %v5604_v8 = vld [vmem:[%s7240_s1 + $0x388] sm:$0xff]  }
  0x37   :  { %4994 = vmatpush3.bf16.msra.mxu0 %v5554_v7  ;;  %v5603_v7 = vld [vmem:[%s7240_s1 + $0x3c8] sm:$0xff]  }
  0x38   :  { %4995 = vmatprep.subr.bf16.mxu0 %v5557_v10  ;;  %v5606_v10 = vld [vmem:[%s7240_s1 + $0x310] sm:$0xff]  }
  0x39   :  { %5016 = vmatpush3.bf16.msra.mxu1 %v5556_v9  ;;  %v5605_v9 = vld [vmem:[%s7240_s1 + $0x350] sm:$0xff]  }
  0x3a   :  { %5017 = vmatprep.subr.bf16.mxu1 %v5559_v12  ;;  %v5608_v12 = vld [vmem:[%s7240_s1 + $0x390] sm:$0xff]  }
  0x3b   :  { %4996 = vmatpush3.bf16.msra.mxu0 %v5558_v11  ;;  %v5607_v11 = vld [vmem:[%s7240_s1 + $0x3d0] sm:$0xff]  }
  0x3c   :  { %4997 = vmatprep.subr.bf16.mxu0 %v5561_v14  ;;  %v5610_v14 = vld [vmem:[%s7240_s1 + $0x318] sm:$0xff]  }
  0x3d   :  { %5018 = vmatpush3.bf16.msra.mxu1 %v5560_v13  ;;  %v5609_v13 = vld [vmem:[%s7240_s1 + $0x358] sm:$0xff]  }
  0x3e   :  { %5019 = vmatprep.subr.bf16.mxu1 %v5563_v16  ;;  %v5612_v16 = vld [vmem:[%s7240_s1 + $0x398] sm:$0xff]  }
  0x3f   :  { %4998 = vmatpush3.bf16.msra.mxu0 %v5562_v15  ;;  %v5611_v15 = vld [vmem:[%s7240_s1 + $0x3d8] sm:$0xff]  }
  0x40   :  { %5027 = vmatprep.subr.bf16.mxu0 %v5565_v19  ;;  %v5615_v19 = vld [vmem:[%s7240_s1 + $0x3e0] sm:$0xff]  }
  0x41   :  { %5020 = vmatpush3.bf16.msra.mxu1 %v5564_v17  ;;  %v5613_v17 = vld [vmem:[%s7240_s1 + $0x360] sm:$0xff]  }
  0x42   :  { %3643 = vmatmul.mubr.bf16.vlgmr.msra.gmra.mrb[4].mxu0 %v851_v18  ;;  %5049 = vmatprep.subr.bf16.mxu1 %v5567_v21  ;;  %v5614_v18 = vld [vmem:[%s7240_s1 + $0x320] sm:$0xff]   ;;  %v5617_v21 = vld [vmem:[%s7240_s1 + $0x368] sm:$0xff]  }
  0x43   :  { %5028 = vmatpush3.bf16.msra.mxu0 %v5566_v20  ;;  %3722 = vmatprep.mubr.bf16.mxu0 %v907_v56  ;;  %v5616_v20 = vld [vmem:[%s7240_s1 + $0x3a0] sm:$0xff]   ;;  %v5650_v56 = vld [vmem:[%s7240_s1 + $0x468] sm:$0xff]  }
  0x44   :  { %3683 = vmatmul.mubr.bf16.vlgmr.msra.gmra.mrb[4].mxu1 %v867_v23  ;;  %5029 = vmatprep.subr.bf16.mxu0 %v5569_v24  ;;  %v5619_v23 = vld [vmem:[%s7240_s1 + $0x3e8] sm:$0xff]  }
  0x45   :  { %5050 = vmatpush3.bf16.msra.mxu1 %v5568_v22  ;;  %3762 = vmatprep.mubr.bf16.mxu1 %v917_v60  ;;  %v5618_v22 = vld [vmem:[%s7240_s1 + $0x328] sm:$0xff]   ;;  %v5654_v60 = vld [vmem:[%s7240_s1 + $0x470] sm:$0xff]  }
  0x46   :  { %5051 = vmatprep.subr.bf16.mxu1 %v5571_v26  ;;  %v5620_v24 = vld [vmem:[%s7240_s1 + $0x3a8] sm:$0xff]   ;;  %v5622_v26 = vld [vmem:[%s7240_s1 + $0x330] sm:$0xff]  }
  0x47   :  { %5030 = vmatpush3.bf16.msra.mxu0 %v5570_v25  ;;  %v5621_v25 = vld [vmem:[%s7240_s1 + $0x370] sm:$0xff]  }
  0x48   :  { %5031 = vmatprep.subr.bf16.mxu0 %v5573_v28  ;;  %v5624_v28 = vld [vmem:[%s7240_s1 + $0x3b0] sm:$0xff]  }
  0x49   :  { %5052 = vmatpush3.bf16.msra.mxu1 %v5572_v27  ;;  %v5623_v27 = vld [vmem:[%s7240_s1 + $0x3f0] sm:$0xff]  }
  0x4a   :  { %5053 = vmatprep.subr.bf16.mxu1 %v5575_v30  ;;  %v5626_v30 = vld [vmem:[%s7240_s1 + $0x338] sm:$0xff]  }
  0x4b   :  { %5032 = vmatpush3.bf16.msra.mxu0 %v5574_v29  ;;  %v5625_v29 = vld [vmem:[%s7240_s1 + $0x378] sm:$0xff]  }
  0x4c   :  { %5033 = vmatprep.subr.bf16.mxu0 %v5577_v32  ;;  %v5629_v32 = vld [vmem:[%s7240_s1 + $0x3b8] sm:$0xff]  }
  0x4d   :  { %5054 = vmatpush3.bf16.msra.mxu1 %v5576_v31  ;;  %v5627_v31 = vld [vmem:[%s7240_s1 + $0x3f8] sm:$0xff]  }
  0x4e   :  { %5055 = vmatprep.subr.bf16.mxu1 %v5579_v34  ;;  %v5630_v34 = vld [vmem:[%s7240_s1 + $0x440] sm:$0xff]  }
  0x4f   :  { %5034 = vmatpush3.bf16.msra.mxu0 %v5578_v33  ;;  %v900_v33 = vrot.slane %v6243_v53, %v6051_v41  ;;  %v5647_v53 = vld [vmem:[%s7240_s1 + $0x420] sm:$0xff]  }
  0x50   :  { %5035 = vmatprep.subr.bf16.mxu0 %v5581_v36  ;;  %v5632_v36 = vld [vmem:[%s7240_s1 + $0x4c0] sm:$0xff]  }
  0x51   :  { %5056 = vmatpush3.bf16.msra.mxu1 %v5580_v35  ;;  %v5631_v35 = vld [vmem:[%s7240_s1 + $0x400] sm:$0xff]  }
  0x52   :  { %5057 = vmatprep.subr.bf16.mxu1 %v5583_v38  ;;  %v916_v38 = vcombine.high %v900_v33, %v900_v33 }
  0x53   :  { %5036 = vmatpush3.bf16.msra.mxu0 %v5582_v37  ;;  %v5633_v37 = vld [vmem:[%s7240_s1 + $0x480] sm:$0xff]  }
  0x54   :  { %5037 = vmatprep.subr.bf16.mxu0 %v5585_v40  ;;  %v5635_v40 = vld [vmem:[%s7240_s1 + $0x408] sm:$0xff]  }
  0x55   :  { %5058 = vmatpush3.bf16.msra.mxu1 %v5584_v39  ;;  %v5634_v39 = vld [vmem:[%s7240_s1 + $0x448] sm:$0xff]  }
  0x56   :  { %5059 = vmatprep.subr.bf16.mxu1 %v5587_v43  ;;  %v5637_v43 = vld [vmem:[%s7240_s1 + $0x488] sm:$0xff]  }
  0x57   :  { %5038 = vmatpush3.bf16.msra.mxu0 %v5586_v42  ;;  %v5636_v42 = vld [vmem:[%s7240_s1 + $0x4c8] sm:$0xff]  }
  0x58   :  { %5039 = vmatprep.subr.bf16.mxu0 %v5589_v45  ;;  %v5639_v45 = vld [vmem:[%s7240_s1 + $0x410] sm:$0xff]  }
  0x59   :  { %5060 = vmatpush3.bf16.msra.mxu1 %v5588_v44  ;;  %v5638_v44 = vld [vmem:[%s7240_s1 + $0x450] sm:$0xff]  }
  0x5a   :  { %5061 = vmatprep.subr.bf16.mxu1 %v5591_v50  ;;  %v5644_v50 = vld [vmem:[%s7240_s1 + $0x4d8] sm:$0xff]  }
  0x5b   :  { %5040 = vmatpush3.bf16.msra.mxu0 %v5590_v47  ;;  %v5641_v47 = vld [vmem:[%s7240_s1 + $0x490] sm:$0xff]  }
  0x5c   :  { %5041 = vmatprep.subr.bf16.mxu0 %v5593_v54  ;;  %v5648_v54 = vld [vmem:[%s7240_s1 + $0x4e0] sm:$0xff]  }
  0x5d   :  { %5062 = vmatpush3.bf16.msra.mxu1 %v5592_v51  ;;  %v5645_v51 = vld [vmem:[%s7240_s1 + $0x498] sm:$0xff]  }
  0x5e   :  { %5063 = vmatprep.subr.bf16.mxu1 %v5595_v58  ;;  %v5652_v58 = vld [vmem:[%s7240_s1 + $0x4e8] sm:$0xff]  }
  0x5f   :  { %5042 = vmatpush3.bf16.msra.mxu0 %v5594_v55  ;;  %v5649_v55 = vld [vmem:[%s7240_s1 + $0x4a0] sm:$0xff]  }
  0x60   :  { %5071 = vmatprep.subr.bf16.mxu0 %v5597_v62  ;;  %v5655_v62 = vld [vmem:[%s7240_s1 + $0x430] sm:$0xff]  }
  0x61   :  { %5064 = vmatpush3.bf16.msra.mxu1 %v5596_v59  ;;  %v5653_v59 = vld [vmem:[%s7240_s1 + $0x4a8] sm:$0xff]  }
  0x62   :  { %3723 = vmatmul.mubr.bf16.vlgmr.msra.gmra.mrb[8].mxu0 %v893_v61  ;;  %5093 = vmatprep.subr.bf16.mxu1 %v5599_v1  ;;  %v18_v61 = vld [vmem:[%s7239_s0 + $0x10] sm:$0xff] }
  0x63   :  { %5072 = vmatpush3.bf16.msra.mxu0 %v5598_v63  ;;  %3802 = vmatprep.mubr.bf16.mxu0 %v914_v0  ;;  %v926_v63 = vrot.slane %v18_v61, %v6051_v41  ;;  %v919_v0 = vcombine.high %v18_v61, %v18_v61  ;;  %v5656_v1 = vld [vmem:[%s7240_s1 + $0x4f0] sm:$0xff]  }
  0x64   :  { %3763 = vmatmul.mubr.bf16.vlgmr.msra.gmra.mrb[8].mxu1 %v915_v3  ;;  %5073 = vmatprep.subr.bf16.mxu0 %v5601_v4  ;;  %v5705_v61 = vld [vmem:[%s7240_s1 + $0x6d0] sm:$0xff]  }
  0x65   :  { %5094 = vmatpush3.bf16.msra.mxu1 %v5600_v2  ;;  %3842 = vmatprep.mubr.bf16.mxu1 %v918_v6  ;;  %v5657_v2 = vld [vmem:[%s7240_s1 + $0x4b0] sm:$0xff]   ;;  %v934_v3 = vcombine.high %v926_v63, %v926_v63  ;;  %v6449_v4 = vrot.slane %v919_v0, %v6051_v41  ;;  %v5659_v6 = vld [vmem:[%s7240_s1 + $0x438] sm:$0xff]  }
  0x66   :  { %5095 = vmatprep.subr.bf16.mxu1 %v5603_v7  ;;  %v5708_v0 = vld [vmem:[%s7240_s1 + $0x618] sm:$0xff]  }
  0x67   :  { %5074 = vmatpush3.bf16.msra.mxu0 %v5602_v5  ;;  %v5658_v5 = vld [vmem:[%s7240_s1 + $0x478] sm:$0xff]   ;;  %v956_v7 = vrot.slane %v934_v3, %v6051_v41  ;;  %v5711_v3 = vld [vmem:[%s7240_s1 + $0x660] sm:$0xff]  }
  0x68   :  { %5075 = vmatprep.subr.bf16.mxu0 %v5605_v9  ;;  %v5660_v9 = vld [vmem:[%s7240_s1 + $0x4f8] sm:$0xff]  }
  0x69   :  { %5096 = vmatpush3.bf16.msra.mxu1 %v5604_v8  ;;  %v935_v8 = vcombine.high %v6449_v4, %v6449_v4 }
  0x6a   :  { %5097 = vmatprep.subr.bf16.mxu1 %v5607_v11  ;;  %v966_v11 = vcombine.high %v956_v7, %v956_v7 }
  0x6b   :  { %5076 = vmatpush3.bf16.msra.mxu0 %v5606_v10  ;;  %v5661_v10 = vld [vmem:[%s7240_s1 + $0x4b8] sm:$0xff]  }
  0x6c   :  { %5077 = vmatprep.subr.bf16.mxu0 %v5609_v13  ;;  %v5662_v13 = vld [vmem:[%s7240_s1 + $0x540] sm:$0xff]  }
  0x6d   :  { %5098 = vmatpush3.bf16.msra.mxu1 %v5608_v12  ;;  %v942_v12 = vrot.slane %v926_v63, %v6051_v41  ;;  %v5707_v63 = vld [vmem:[%s7240_s1 + $0x658] sm:$0xff]  }
  0x6e   :  { %5099 = vmatprep.subr.bf16.mxu1 %v5611_v15  ;;  %v963_v15 = vrot.slane %v935_v8, %v6051_v41  ;;  %v5716_v8 = vld [vmem:[%s7240_s1 + $0x628] sm:$0xff]  }
  0x6f   :  { %5078 = vmatpush3.bf16.msra.mxu0 %v5610_v14  ;;  %v5663_v14 = vld [vmem:[%s7240_s1 + $0x500] sm:$0xff]  }
  0x70   :  { %5079 = vmatprep.subr.bf16.mxu0 %v5613_v17  ;;  %v5665_v17 = vld [vmem:[%s7240_s1 + $0x580] sm:$0xff]  }
  0x71   :  { %5100 = vmatpush3.bf16.msra.mxu1 %v5612_v16  ;;  %v5664_v16 = vld [vmem:[%s7240_s1 + $0x5c0] sm:$0xff]  }
  0x72   :  { %5101 = vmatprep.subr.bf16.mxu1 %v5615_v19  ;;  %v5666_v19 = vld [vmem:[%s7240_s1 + $0x548] sm:$0xff]  }
  0x73   :  { %5080 = vmatpush3.bf16.msra.mxu0 %v5614_v18  ;;  %v964_v18 = vcombine.high %v942_v12, %v942_v12 }
  0x74   :  { %5081 = vmatprep.subr.bf16.mxu0 %v5617_v21  ;;  %v967_v21 = vcombine.high %v963_v15, %v963_v15 }
  0x75   :  { %5102 = vmatpush3.bf16.msra.mxu1 %v5616_v20  ;;  %v5667_v20 = vld [vmem:[%s7240_s1 + $0x508] sm:$0xff]  }
  0x76   :  { %5103 = vmatprep.subr.bf16.mxu1 %v5619_v23  ;;  %v5669_v23 = vld [vmem:[%s7240_s1 + $0x588] sm:$0xff]  }
  0x77   :  { %5082 = vmatpush3.bf16.msra.mxu0 %v5618_v22  ;;  %v5668_v22 = vld [vmem:[%s7240_s1 + $0x5c8] sm:$0xff]  }
  0x78   :  { %5083 = vmatprep.subr.bf16.mxu0 %v5621_v25  ;;  %v5671_v25 = vld [vmem:[%s7240_s1 + $0x510] sm:$0xff]  }
  0x79   :  { %5104 = vmatpush3.bf16.msra.mxu1 %v5620_v24  ;;  %v5670_v24 = vld [vmem:[%s7240_s1 + $0x550] sm:$0xff]  }
  0x7a   :  { %5105 = vmatprep.subr.bf16.mxu1 %v5623_v27  ;;  %v5673_v27 = vld [vmem:[%s7240_s1 + $0x590] sm:$0xff]  }
  0x7b   :  { %5084 = vmatpush3.bf16.msra.mxu0 %v5622_v26  ;;  %v5672_v26 = vld [vmem:[%s7240_s1 + $0x5d0] sm:$0xff]  }
  0x7c   :  { %5085 = vmatprep.subr.bf16.mxu0 %v5625_v29  ;;  %v5675_v29 = vld [vmem:[%s7240_s1 + $0x518] sm:$0xff]  }
  0x7d   :  { %5106 = vmatpush3.bf16.msra.mxu1 %v5624_v28  ;;  %v5674_v28 = vld [vmem:[%s7240_s1 + $0x558] sm:$0xff]  }
  0x7e   :  { %5107 = vmatprep.subr.bf16.mxu1 %v5627_v31  ;;  %v5677_v31 = vld [vmem:[%s7240_s1 + $0x598] sm:$0xff]  }
  0x7f   :  { %5086 = vmatpush3.bf16.msra.mxu0 %v5626_v30  ;;  %v5676_v30 = vld [vmem:[%s7240_s1 + $0x5d8] sm:$0xff]  }
  0x80   :  { %5115 = vmatprep.subr.bf16.mxu0 %v5630_v34  ;;  %v5680_v34 = vld [vmem:[%s7240_s1 + $0x5e0] sm:$0xff]  }
  0x81   :  { %5108 = vmatpush3.bf16.msra.mxu1 %v5629_v32  ;;  %v5678_v32 = vld [vmem:[%s7240_s1 + $0x560] sm:$0xff]  }
  0x82   :  { %3803 = vmatmul.mubr.bf16.vlgmr.msra.gmra.mrb[12].mxu0 %v900_v33  ;;  %5137 = vmatprep.subr.bf16.mxu1 %v5632_v36  ;;  %v5679_v33 = vld [vmem:[%s7240_s1 + $0x520] sm:$0xff]   ;;  %v5682_v36 = vld [vmem:[%s7240_s1 + $0x568] sm:$0xff]  }
  0x83   :  { %5116 = vmatpush3.bf16.msra.mxu0 %v5631_v35  ;;  %3882 = vmatprep.mubr.bf16.mxu0 %v956_v7  ;;  %v5681_v35 = vld [vmem:[%s7240_s1 + $0x5a0] sm:$0xff]   ;;  %v5715_v7 = vld [vmem:[%s7240_s1 + $0x668] sm:$0xff]  }
  0x84   :  { %3843 = vmatmul.mubr.bf16.vlgmr.msra.gmra.mrb[12].mxu1 %v916_v38  ;;  %5117 = vmatprep.subr.bf16.mxu0 %v5634_v39  ;;  %v5684_v38 = vld [vmem:[%s7240_s1 + $0x5e8] sm:$0xff]  }
  0x85   :  { %5138 = vmatpush3.bf16.msra.mxu1 %v5633_v37  ;;  %3922 = vmatprep.mubr.bf16.mxu1 %v966_v11  ;;  %v5683_v37 = vld [vmem:[%s7240_s1 + $0x528] sm:$0xff]   ;;  %v5719_v11 = vld [vmem:[%s7240_s1 + $0x670] sm:$0xff]  }
  0x86   :  { %5139 = vmatprep.subr.bf16.mxu1 %v5636_v42  ;;  %v5685_v39 = vld [vmem:[%s7240_s1 + $0x5a8] sm:$0xff]   ;;  %v5687_v42 = vld [vmem:[%s7240_s1 + $0x530] sm:$0xff]  }
  0x87   :  { %5118 = vmatpush3.bf16.msra.mxu0 %v5635_v40  ;;  %v5686_v40 = vld [vmem:[%s7240_s1 + $0x570] sm:$0xff]  }
  0x88   :  { %5119 = vmatprep.subr.bf16.mxu0 %v5638_v44  ;;  %v5689_v44 = vld [vmem:[%s7240_s1 + $0x5b0] sm:$0xff]  }
  0x89   :  { %5140 = vmatpush3.bf16.msra.mxu1 %v5637_v43  ;;  %v5688_v43 = vld [vmem:[%s7240_s1 + $0x5f0] sm:$0xff]  }
  0x8a   :  { %5141 = vmatprep.subr.bf16.mxu1 %v5640_v46  ;;  %v5691_v46 = vld [vmem:[%s7240_s1 + $0x538] sm:$0xff]  }
  0x8b   :  { %5120 = vmatpush3.bf16.msra.mxu0 %v5639_v45  ;;  %v5690_v45 = vld [vmem:[%s7240_s1 + $0x578] sm:$0xff]  }
  0x8c   :  { %5121 = vmatprep.subr.bf16.mxu0 %v5642_v48  ;;  %v5694_v48 = vld [vmem:[%s7240_s1 + $0x5b8] sm:$0xff]  }
  0x8d   :  { %5142 = vmatpush3.bf16.msra.mxu1 %v5641_v47  ;;  %v5692_v47 = vld [vmem:[%s7240_s1 + $0x5f8] sm:$0xff]  }
  0x8e   :  { %5143 = vmatprep.subr.bf16.mxu1 %v5644_v50  ;;  %v5695_v50 = vld [vmem:[%s7240_s1 + $0x640] sm:$0xff]  }
  0x8f   :  { %5122 = vmatpush3.bf16.msra.mxu0 %v5643_v49  ;;  %v949_v49 = vrot.slane %v6449_v4, %v6051_v41  ;;  %v5712_v4 = vld [vmem:[%s7240_s1 + $0x620] sm:$0xff]  }
  0x90   :  { %5123 = vmatprep.subr.bf16.mxu0 %v5646_v52  ;;  %v5697_v52 = vld [vmem:[%s7240_s1 + $0x6c0] sm:$0xff]  }
  0x91   :  { %5144 = vmatpush3.bf16.msra.mxu1 %v5645_v51  ;;  %v5696_v51 = vld [vmem:[%s7240_s1 + $0x600] sm:$0xff]  }
  0x92   :  { %5145 = vmatprep.subr.bf16.mxu1 %v5648_v54  ;;  %v965_v54 = vcombine.high %v949_v49, %v949_v49 }
  0x93   :  { %5124 = vmatpush3.bf16.msra.mxu0 %v5647_v53  ;;  %v5698_v53 = vld [vmem:[%s7240_s1 + $0x680] sm:$0xff]  }
  0x94   :  { %5125 = vmatprep.subr.bf16.mxu0 %v5650_v56  ;;  %v5700_v56 = vld [vmem:[%s7240_s1 + $0x608] sm:$0xff]  }
  0x95   :  { %5146 = vmatpush3.bf16.msra.mxu1 %v5649_v55  ;;  %v5699_v55 = vld [vmem:[%s7240_s1 + $0x648] sm:$0xff]  }
  0x96   :  { %5147 = vmatprep.subr.bf16.mxu1 %v5652_v58  ;;  %v5702_v58 = vld [vmem:[%s7240_s1 + $0x688] sm:$0xff]  }
  0x97   :  { %5126 = vmatpush3.bf16.msra.mxu0 %v5651_v57  ;;  %v5701_v57 = vld [vmem:[%s7240_s1 + $0x6c8] sm:$0xff]  }
  0x98   :  { %5127 = vmatprep.subr.bf16.mxu0 %v5654_v60  ;;  %v5704_v60 = vld [vmem:[%s7240_s1 + $0x610] sm:$0xff]  }
  0x99   :  { %5148 = vmatpush3.bf16.msra.mxu1 %v5653_v59  ;;  %v5703_v59 = vld [vmem:[%s7240_s1 + $0x650] sm:$0xff]  }
  0x9a   :  { %5149 = vmatprep.subr.bf16.mxu1 %v5656_v1  ;;  %v5709_v1 = vld [vmem:[%s7240_s1 + $0x6d8] sm:$0xff]  }
  0x9b   :  { %5128 = vmatpush3.bf16.msra.mxu0 %v5655_v62  ;;  %v5706_v62 = vld [vmem:[%s7240_s1 + $0x690] sm:$0xff]  }
  0x9c   :  { %5129 = vmatprep.subr.bf16.mxu0 %v5658_v5  ;;  %v5713_v5 = vld [vmem:[%s7240_s1 + $0x6e0] sm:$0xff]  }
  0x9d   :  { %5150 = vmatpush3.bf16.msra.mxu1 %v5657_v2  ;;  %v5710_v2 = vld [vmem:[%s7240_s1 + $0x698] sm:$0xff]  }
  0x9e   :  { %5151 = vmatprep.subr.bf16.mxu1 %v5660_v9  ;;  %v5717_v9 = vld [vmem:[%s7240_s1 + $0x6e8] sm:$0xff]  }
  0x9f   :  { %5130 = vmatpush3.bf16.msra.mxu0 %v5659_v6  ;;  %v5714_v6 = vld [vmem:[%s7240_s1 + $0x6a0] sm:$0xff]  }
  0xa0   :  { %5159 = vmatprep.subr.bf16.mxu0 %v5662_v13  ;;  %v5721_v13 = vld [vmem:[%s7240_s1 + $0x6f0] sm:$0xff]  }
  0xa1   :  { %5152 = vmatpush3.bf16.msra.mxu1 %v5661_v10  ;;  %v5718_v10 = vld [vmem:[%s7240_s1 + $0x6a8] sm:$0xff]  }
  0xa2   :  { %3883 = vmatmul.mubr.bf16.vlgmr.msra.gmra.mrb[16].mxu0 %v942_v12  ;;  %5181 = vmatprep.subr.bf16.mxu1 %v5664_v16  ;;  %v19_v12 = vld [vmem:[%s7239_s0 + $0x18] sm:$0xff]  ;;  %v5720_v16 = vld [vmem:[%s7240_s1 + $0x630] sm:$0xff]  }
  0xa3   :  { %5160 = vmatpush3.bf16.msra.mxu0 %v5663_v14  ;;  %3962 = vmatprep.mubr.bf16.mxu0 %v963_v15  ;;  %v975_v14 = vrot.slane %v19_v12, %v6051_v41  ;;  %v968_v15 = vcombine.high %v19_v12, %v19_v12  ;;  %v5759_v12 = vld [vmem:[%s7240_s1 + $0x7b8] sm:$0xff]  }
  0xa4   :  { %3923 = vmatmul.mubr.bf16.vlgmr.msra.gmra.mrb[16].mxu1 %v964_v18  ;;  %5161 = vmatprep.subr.bf16.mxu0 %v5666_v19 }
  0xa5   :  { %5182 = vmatpush3.bf16.msra.mxu1 %v5665_v17  ;;  %4002 = vmatprep.mubr.bf16.mxu1 %v967_v21  ;;  %v5723_v17 = vld [vmem:[%s7240_s1 + $0x678] sm:$0xff]   ;;  %v983_v18 = vcombine.high %v975_v14, %v975_v14  ;;  %v6655_v19 = vrot.slane %v968_v15, %v6051_v41  ;;  %v5761_v15 = vld [vmem:[%s7240_s1 + $0x800] sm:$0xff]  }
  0xa6   :  { %5183 = vmatprep.subr.bf16.mxu1 %v5668_v22  ;;  %v5725_v21 = vld [vmem:[%s7240_s1 + $0x6f8] sm:$0xff]  }
  0xa7   :  { %5162 = vmatpush3.bf16.msra.mxu0 %v5667_v20  ;;  %v5722_v20 = vld [vmem:[%s7240_s1 + $0x6b0] sm:$0xff]   ;;  %v1005_v22 = vrot.slane %v983_v18, %v6051_v41 }
  0xa8   :  { %5163 = vmatprep.subr.bf16.mxu0 %v5670_v24  ;;  %v5724_v24 = vld [vmem:[%s7240_s1 + $0x638] sm:$0xff]  }
  0xa9   :  { %5184 = vmatpush3.bf16.msra.mxu1 %v5669_v23  ;;  %v984_v23 = vcombine.high %v6655_v19, %v6655_v19 }
  0xaa   :  { %5185 = vmatprep.subr.bf16.mxu1 %v5672_v26  ;;  %v5727_v26 = vld [vmem:[%s7240_s1 + $0x740] sm:$0xff]  }
  0xab   :  { %5164 = vmatpush3.bf16.msra.mxu0 %v5671_v25  ;;  %v991_v25 = vrot.slane %v975_v14, %v6051_v41  ;;  %v5760_v14 = vld [vmem:[%s7240_s1 + $0x840] sm:$0xff]  }
  0xac   :  { %5165 = vmatprep.subr.bf16.mxu0 %v5674_v28  ;;  %v5726_v28 = vld [vmem:[%s7240_s1 + $0x6b8] sm:$0xff]  }
  0xad   :  { %5186 = vmatpush3.bf16.msra.mxu1 %v5673_v27  ;;  %v1015_v27 = vcombine.high %v1005_v22, %v1005_v22 }
  0xae   :  { %5187 = vmatprep.subr.bf16.mxu1 %v5676_v30  ;;  %v5729_v30 = vld [vmem:[%s7240_s1 + $0x7c0] sm:$0xff]  }
  0xaf   :  { %5166 = vmatpush3.bf16.msra.mxu0 %v5675_v29  ;;  %v1012_v29 = vrot.slane %v984_v23, %v6051_v41  ;;  %v5768_v23 = vld [vmem:[%s7240_s1 + $0x850] sm:$0xff]  }
  0xb0   :  { %5167 = vmatprep.subr.bf16.mxu0 %v5678_v32  ;;  %v1013_v32 = vcombine.high %v991_v25, %v991_v25 }
  0xb1   :  { %5188 = vmatpush3.bf16.msra.mxu1 %v5677_v31  ;;  %v5728_v31 = vld [vmem:[%s7240_s1 + $0x700] sm:$0xff]  }
  0xb2   :  { %5189 = vmatprep.subr.bf16.mxu1 %v5680_v34  ;;  %v5730_v34 = vld [vmem:[%s7240_s1 + $0x780] sm:$0xff]  }
  0xb3   :  { %5168 = vmatpush3.bf16.msra.mxu0 %v5679_v33  ;;  %v5731_v33 = vld [vmem:[%s7240_s1 + $0x748] sm:$0xff]  }
  0xb4   :  { %5169 = vmatprep.subr.bf16.mxu0 %v5682_v36  ;;  %v5733_v36 = vld [vmem:[%s7240_s1 + $0x7c8] sm:$0xff]  }
  0xb5   :  { %5190 = vmatpush3.bf16.msra.mxu1 %v5681_v35  ;;  %v1016_v35 = vcombine.high %v1012_v29, %v1012_v29 }
  0xb6   :  { %5191 = vmatprep.subr.bf16.mxu1 %v5684_v38  ;;  %v5735_v38 = vld [vmem:[%s7240_s1 + $0x750] sm:$0xff]  }
  0xb7   :  { %5170 = vmatpush3.bf16.msra.mxu0 %v5683_v37  ;;  %v5732_v37 = vld [vmem:[%s7240_s1 + $0x708] sm:$0xff]  }
  0xb8   :  { %5171 = vmatprep.subr.bf16.mxu0 %v5686_v40  ;;  %v5737_v40 = vld [vmem:[%s7240_s1 + $0x7d0] sm:$0xff]  }
  0xb9   :  { %5192 = vmatpush3.bf16.msra.mxu1 %v5685_v39  ;;  %v5734_v39 = vld [vmem:[%s7240_s1 + $0x788] sm:$0xff]  }
  0xba   :  { %5193 = vmatprep.subr.bf16.mxu1 %v5688_v43  ;;  %v5739_v43 = vld [vmem:[%s7240_s1 + $0x758] sm:$0xff]  }
  0xbb   :  { %5172 = vmatpush3.bf16.msra.mxu0 %v5687_v42  ;;  %v5736_v42 = vld [vmem:[%s7240_s1 + $0x710] sm:$0xff]  }
  0xbc   :  { %5173 = vmatprep.subr.bf16.mxu0 %v5690_v45  ;;  %v5740_v45 = vld [vmem:[%s7240_s1 + $0x718] sm:$0xff]  }
  0xbd   :  { %5194 = vmatpush3.bf16.msra.mxu1 %v5689_v44  ;;  %v5738_v44 = vld [vmem:[%s7240_s1 + $0x790] sm:$0xff]  }
  0xbe   :  { %5195 = vmatprep.subr.bf16.mxu1 %v5692_v47  ;;  %v5742_v47 = vld [vmem:[%s7240_s1 + $0x798] sm:$0xff]  }
  0xbf   :  { %5174 = vmatpush3.bf16.msra.mxu0 %v5691_v46  ;;  %v5741_v46 = vld [vmem:[%s7240_s1 + $0x7d8] sm:$0xff]  }
  0xc0   :  { %5203 = vmatprep.subr.bf16.mxu0 %v5695_v50  ;;  %v5745_v50 = vld [vmem:[%s7240_s1 + $0x7e0] sm:$0xff]  }
  0xc1   :  { %5196 = vmatpush3.bf16.msra.mxu1 %v5694_v48  ;;  %v5743_v48 = vld [vmem:[%s7240_s1 + $0x760] sm:$0xff]  }
  0xc2   :  { %3963 = vmatmul.mubr.bf16.vlgmr.msra.gmra.mrb[20].mxu0 %v949_v49  ;;  %5225 = vmatprep.subr.bf16.mxu1 %v5697_v52  ;;  %v5744_v49 = vld [vmem:[%s7240_s1 + $0x720] sm:$0xff]   ;;  %v5747_v52 = vld [vmem:[%s7240_s1 + $0x768] sm:$0xff]  }
  0xc3   :  { %5204 = vmatpush3.bf16.msra.mxu0 %v5696_v51  ;;  %4042 = vmatprep.mubr.bf16.mxu0 %v1005_v22  ;;  %v5746_v51 = vld [vmem:[%s7240_s1 + $0x7a0] sm:$0xff]   ;;  %v5767_v22 = vld [vmem:[%s7240_s1 + $0x888] sm:$0xff]  }
  0xc4   :  { %4003 = vmatmul.mubr.bf16.vlgmr.msra.gmra.mrb[20].mxu1 %v965_v54  ;;  %5205 = vmatprep.subr.bf16.mxu0 %v5699_v55  ;;  %v5749_v54 = vld [vmem:[%s7240_s1 + $0x7e8] sm:$0xff]  }
  0xc5   :  { %5226 = vmatpush3.bf16.msra.mxu1 %v5698_v53  ;;  %4082 = vmatprep.mubr.bf16.mxu1 %v1015_v27  ;;  %v5748_v53 = vld [vmem:[%s7240_s1 + $0x728] sm:$0xff]   ;;  %v5772_v27 = vld [vmem:[%s7240_s1 + $0x858] sm:$0xff]  }
  0xc6   :  { %5227 = vmatprep.subr.bf16.mxu1 %v5701_v57  ;;  %v5750_v55 = vld [vmem:[%s7240_s1 + $0x7a8] sm:$0xff]   ;;  %v5751_v57 = vld [vmem:[%s7240_s1 + $0x770] sm:$0xff]  }
  0xc7   :  { %5206 = vmatpush3.bf16.msra.mxu0 %v5700_v56  ;;  %v4545_v56 = vld [vmem:[%s7241_s2] ss:$0 sm:$0xff] }
  0xc8   :  { %5207 = vmatprep.subr.bf16.mxu0 %v5703_v59  ;;  %v5752_v59 = vld [vmem:[%s7240_s1 + $0x730] sm:$0xff]  }
  0xc9   :  { %5228 = vmatpush3.bf16.msra.mxu1 %v5702_v58 }
  0xca   :  { %5229 = vmatprep.subr.bf16.mxu1 %v5705_v61  ;;  %v5753_v61 = vld [vmem:[%s7240_s1 + $0x7f0] sm:$0xff]  }
  0xcb   :  { %5208 = vmatpush3.bf16.msra.mxu0 %v5704_v60 }
  0xcc   :  { %5209 = vmatprep.subr.bf16.mxu0 %v5707_v63 }
  0xcd   :  { %5230 = vmatpush3.bf16.msra.mxu1 %v5706_v62 }
  0xce   :  { %5231 = vmatprep.subr.bf16.mxu1 %v5709_v1  ;;  %v5754_v1 = vld [vmem:[%s7240_s1 + $0x7b0] sm:$0xff]  }
  0xcf   :  { %5210 = vmatpush3.bf16.msra.mxu0 %v5708_v0 }
  0xd0   :  { %5211 = vmatprep.subr.bf16.mxu0 %v5711_v3 }
  0xd1   :  { %5232 = vmatpush3.bf16.msra.mxu1 %v5710_v2  ;;  %v5755_v2 = vld [vmem:[%s7240_s1 + $0x778] sm:$0xff]  }
  0xd2   :  { %5233 = vmatprep.subr.bf16.mxu1 %v5713_v5 }
  0xd3   :  { %5212 = vmatpush3.bf16.msra.mxu0 %v5712_v4 }
  0xd4   :  { %5213 = vmatprep.subr.bf16.mxu0 %v5715_v7  ;;  %v5756_v7 = vld [vmem:[%s7240_s1 + $0x738] sm:$0xff]  }
  0xd5   :  { %5234 = vmatpush3.bf16.msra.mxu1 %v5714_v6 }
  0xd6   :  { %5235 = vmatprep.subr.bf16.mxu1 %v5717_v9  ;;  %v5757_v9 = vld [vmem:[%s7240_s1 + $0x7f8] sm:$0xff]  }
  0xd7   :  { %5214 = vmatpush3.bf16.msra.mxu0 %v5716_v8 }
  0xd8   :  { %5215 = vmatprep.subr.bf16.mxu0 %v5719_v11 }
  0xd9   :  { %5236 = vmatpush3.bf16.msra.mxu1 %v5718_v10 }
  0xda   :  { %5237 = vmatprep.subr.bf16.mxu1 %v5721_v13  ;;  %v998_v13 = vrot.slane %v6655_v19, %v6051_v41  ;;  %v5764_v19 = vld [vmem:[%s7240_s1 + $0x848] sm:$0xff]  }
  0xdb   :  { %5216 = vmatpush3.bf16.msra.mxu0 %v5720_v16  ;;  %v5762_v16 = vld [vmem:[%s7240_s1 + $0x8c0] sm:$0xff]  }
  0xdc   :  { %5217 = vmatprep.subr.bf16.mxu0 %v5723_v17  ;;  %v5763_v17 = vld [vmem:[%s7240_s1 + $0x880] sm:$0xff]   ;;  %v1014_v18 = vcombine.high %v998_v13, %v998_v13 }
  0xdd   :  { %5238 = vmatpush3.bf16.msra.mxu1 %v5722_v20  ;;  %v5765_v20 = vld [vmem:[%s7240_s1 + $0x808] sm:$0xff]  }
  0xde   :  { %5239 = vmatprep.subr.bf16.mxu1 %v5725_v21  ;;  %v5766_v21 = vld [vmem:[%s7240_s1 + $0x8c8] sm:$0xff]  }
  0xdf   :  { %5218 = vmatpush3.bf16.msra.mxu0 %v5724_v24  ;;  %v5769_v24 = vld [vmem:[%s7240_s1 + $0x810] sm:$0xff]  }
  0xe0   :  { %5247 = vmatprep.subr.bf16.mxu0 %v5727_v26  ;;  %v5771_v26 = vld [vmem:[%s7240_s1 + $0x890] sm:$0xff]  }
  0xe1   :  { %5240 = vmatpush3.bf16.msra.mxu1 %v5726_v28  ;;  %v5773_v28 = vld [vmem:[%s7240_s1 + $0x818] sm:$0xff]  }
  0xe2   :  { %4043 = vmatmul.mubr.bf16.vlgmr.msra.gmra.mrb[24].mxu0 %v991_v25  ;;  %5269 = vmatprep.subr.bf16.mxu1 %v5729_v30  ;;  %v5770_v25 = vld [vmem:[%s7240_s1 + $0x8d0] sm:$0xff]   ;;  %v5775_v30 = vld [vmem:[%s7240_s1 + $0x898] sm:$0xff]  }
  0xe3   :  { %5248 = vmatpush3.bf16.msra.mxu0 %v5728_v31  ;;  %4122 = vmatprep.mubr.bf16.mxu0 %v1012_v29  ;;  %v5774_v29 = vld [vmem:[%s7240_s1 + $0x8d8] sm:$0xff]   ;;  %v5776_v31 = vld [vmem:[%s7240_s1 + $0x860] sm:$0xff]  }
  0xe4   :  { %4083 = vmatmul.mubr.bf16.vlgmr.msra.gmra.mrb[24].mxu1 %v1013_v32  ;;  %5249 = vmatprep.subr.bf16.mxu0 %v5731_v33  ;;  %v5777_v32 = vld [vmem:[%s7240_s1 + $0x820] sm:$0xff]  }
  0xe5   :  { %5270 = vmatpush3.bf16.msra.mxu1 %v5730_v34  ;;  %4162 = vmatprep.mubr.bf16.mxu1 %v1016_v35  ;;  %v5778_v33 = vld [vmem:[%s7240_s1 + $0x8e0] sm:$0xff]   ;;  %v5780_v35 = vld [vmem:[%s7240_s1 + $0x868] sm:$0xff]  }
  0xe6   :  { %5271 = vmatprep.subr.bf16.mxu1 %v5733_v36  ;;  %v5779_v34 = vld [vmem:[%s7240_s1 + $0x8a0] sm:$0xff]   ;;  %v5781_v36 = vld [vmem:[%s7240_s1 + $0x828] sm:$0xff]  }
  0xe7   :  { %5250 = vmatpush3.bf16.msra.mxu0 %v5732_v37  ;;  %v5782_v37 = vld [vmem:[%s7240_s1 + $0x8e8] sm:$0xff]  }
  0xe8   :  { %5251 = vmatprep.subr.bf16.mxu0 %v5735_v38  ;;  %v5783_v38 = vld [vmem:[%s7240_s1 + $0x8a8] sm:$0xff]  }
  0xe9   :  { %5272 = vmatpush3.bf16.msra.mxu1 %v5734_v39  ;;  %v5784_v39 = vld [vmem:[%s7240_s1 + $0x870] sm:$0xff]  }
  0xea   :  { %5273 = vmatprep.subr.bf16.mxu1 %v5737_v40 }
  0xeb   :  { %5252 = vmatpush3.bf16.msra.mxu0 %v5736_v42  ;;  %v5785_v42 = vld [vmem:[%s7240_s1 + $0x830] sm:$0xff]  }
  0xec   :  { %5253 = vmatprep.subr.bf16.mxu0 %v5739_v43  ;;  %v5786_v43 = vld [vmem:[%s7240_s1 + $0x8f0] sm:$0xff]  }
  0xed   :  { %5274 = vmatpush3.bf16.msra.mxu1 %v5738_v44 }
  0xee   :  { %5275 = vmatprep.subr.bf16.mxu1 %v5741_v46 }
  0xef   :  { %5254 = vmatpush3.bf16.msra.mxu0 %v5740_v45  ;;  %v20_v45 = vld [vmem:[%s7239_s0 + $0x20] sm:$0xff] }
  0xf0   :  { %5255 = vmatprep.subr.bf16.mxu0 %v5743_v48 }
  0xf1   :  { %5276 = vmatpush3.bf16.msra.mxu1 %v5742_v47 }
  0xf2   :  { %5277 = vmatprep.subr.bf16.mxu1 %v5745_v50  ;;  %v5788_v50 = vld [vmem:[%s7240_s1 + $0x878] sm:$0xff]  }
  0xf3   :  { %5256 = vmatpush3.bf16.msra.mxu0 %v5744_v49  ;;  %v5787_v49 = vld [vmem:[%s7240_s1 + $0x8b0] sm:$0xff]  }
  0xf4   :  { %5257 = vmatprep.subr.bf16.mxu0 %v5747_v52  ;;  %v1017_v52 = vcombine.high %v20_v45, %v20_v45 }
  0xf5   :  { %v4955_v58 = vpop.f32.mrb[0].mxu0  ;;  %5278 = vmatpush3.bf16.msra.mxu1 %v5746_v51  ;;  %v1024_v51 = vrot.slane %v20_v45, %v6051_v41 }
  0xf6   :  { %v4956_v60 = vpop.f32.mrb[1].mxu0  ;;  %5279 = vmatprep.subr.bf16.mxu1 %v5749_v54 }
  0xf7   :  { %v4957_v62 = vadd.f32 %v4956_v60, %v4955_v58  ;;  %v4958_v63 = vpop.f32.mrb[2].mxu0  ;;  %v4977_v0 = vpop.f32.mrb[0].mxu1  ;;  %5258 = vmatpush3.bf16.msra.mxu0 %v5748_v53  ;;  %v1032_v58 = vcombine.high %v1024_v51, %v1024_v51  ;;  %v5790_v60 = vld [vmem:[%s7240_s1 + $0x8f8] sm:$0xff]  }
  0xf8   :  { %v4959_v3 = vpop.f32.mrb[3].mxu0  ;;  %v4978_v4 = vpop.f32.mrb[1].mxu1  ;;  %5259 = vmatprep.subr.bf16.mxu0 %v5751_v57  ;;  %v5789_v57 = vld [vmem:[%s7240_s1 + $0x838] sm:$0xff]  }
  0xf9   :  { %v3565_v5 = vadd.f32 %v4957_v62, %v4545_v56  ;;  %v4979_v6 = vadd.f32 %v4978_v4, %v4977_v0  ;;  %5280 = vmatpush3.bf16.msra.mxu1 %v5750_v55  ;;  %v4980_v8 = vpop.f32.mrb[2].mxu1  ;;  %v6876_v62 = vrot.slane %v1017_v52, %v6051_v41  ;;  %v1054_v0 = vrot.slane %v1032_v58, %v6051_v41  ;;  %v5792_v3 = vld [vmem:[%s7240_s1 + $0x940] sm:$0xff]   ;;  %v5824_v52 = vld [vmem:[%s7240_s1 + $0x9b8] sm:$0xff]  }
  0xfa   :  { %5281 = vmatprep.subr.bf16.mxu1 %v5753_v61  ;;  %v4981_v10 = vpop.f32.mrb[3].mxu1 }
  0xfb   :  { %v6770_v11 = vadd.f32 %v4979_v6, %v3565_v5  ;;  %5260 = vmatpush3.bf16.msra.mxu0 %v5752_v59  ;;  %v1033_v4 = vcombine.high %v6876_v62, %v6876_v62  ;;  %v1064_v5 = vcombine.high %v1054_v0, %v1054_v0  ;;  %v5793_v6 = vld [vmem:[%s7240_s1 + $0x900] sm:$0xff]  }
  0xfc   :  { %5261 = vmatprep.subr.bf16.mxu0 %v5755_v2  ;;  %v1040_v2 = vrot.slane %v1024_v51, %v6051_v41 }
  0xfd   :  { %5282 = vmatpush3.bf16.msra.mxu1 %v5754_v1  ;;  %v5791_v1 = vld [vmem:[%s7240_s1 + $0x8b8] sm:$0xff]   ;;  %v1061_v8 = vrot.slane %v1033_v4, %v6051_v41 }
  0xfe   :  { %5283 = vmatprep.subr.bf16.mxu1 %v5757_v9  ;;  %v5795_v9 = vld [vmem:[%s7240_s1 + $0x980] sm:$0xff]   ;;  %v1062_v10 = vcombine.high %v1040_v2, %v1040_v2  ;;  %v5838_v4 = vld [vmem:[%s7240_s1 + $0xa18] sm:$0xff]  }
  0xff   :  { %5262 = vmatpush3.bf16.msra.mxu0 %v5756_v7  ;;  %v5794_v7 = vld [vmem:[%s7240_s1 + $0x9c0] sm:$0xff]  }
 0x100   :  { %5291 = vmatprep.subr.bf16.mxu0 %v5760_v14  ;;  %v5798_v14 = vld [vmem:[%s7240_s1 + $0x9c8] sm:$0xff]  }
 0x101   :  { %5284 = vmatpush3.bf16.msra.mxu1 %v5759_v12  ;;  %v5797_v12 = vld [vmem:[%s7240_s1 + $0x908] sm:$0xff]  }
 0x102   :  { %4123 = vmatmul.mubr.bf16.vlgmr.msra.gmra.mrb[28].mxu0 %v998_v13  ;;  %5313 = vmatprep.subr.bf16.mxu1 %v5762_v16  ;;  %v1065_v13 = vcombine.high %v1061_v8, %v1061_v8  ;;  %v5800_v16 = vld [vmem:[%s7240_s1 + $0x950] sm:$0xff]  }
 0x103   :  { %5292 = vmatpush3.bf16.msra.mxu0 %v5761_v15  ;;  %4202 = vmatprep.mubr.bf16.mxu0 %v1054_v0  ;;  %v5799_v15 = vld [vmem:[%s7240_s1 + $0x988] sm:$0xff]   ;;  %v5834_v0 = vld [vmem:[%s7240_s1 + $0xa10] sm:$0xff]  }
 0x104   :  { %4163 = vmatmul.mubr.bf16.vlgmr.msra.gmra.mrb[28].mxu1 %v1014_v18  ;;  %5293 = vmatprep.subr.bf16.mxu0 %v5764_v19  ;;  %v5802_v18 = vld [vmem:[%s7240_s1 + $0x9d0] sm:$0xff]  }
 0x105   :  { %5314 = vmatpush3.bf16.msra.mxu1 %v5763_v17  ;;  %4242 = vmatprep.mubr.bf16.mxu1 %v1064_v5  ;;  %v5801_v17 = vld [vmem:[%s7240_s1 + $0x910] sm:$0xff]   ;;  %v5839_v5 = vld [vmem:[%s7240_s1 + $0xad8] sm:$0xff]  }
 0x106   :  { %5315 = vmatprep.subr.bf16.mxu1 %v5766_v21  ;;  %v5803_v19 = vld [vmem:[%s7240_s1 + $0x990] sm:$0xff]   ;;  %v5805_v21 = vld [vmem:[%s7240_s1 + $0x918] sm:$0xff]  }
 0x107   :  { %5294 = vmatpush3.bf16.msra.mxu0 %v5765_v20  ;;  %v5804_v20 = vld [vmem:[%s7240_s1 + $0x958] sm:$0xff]  }
 0x108   :  { %5295 = vmatprep.subr.bf16.mxu0 %v5768_v23  ;;  %v5807_v23 = vld [vmem:[%s7240_s1 + $0x998] sm:$0xff]  }
 0x109   :  { %5316 = vmatpush3.bf16.msra.mxu1 %v5767_v22  ;;  %v5806_v22 = vld [vmem:[%s7240_s1 + $0x9d8] sm:$0xff]  }
 0x10a   :  { %5317 = vmatprep.subr.bf16.mxu1 %v5770_v25  ;;  %v5809_v25 = vld [vmem:[%s7240_s1 + $0x920] sm:$0xff]  }
 0x10b   :  { %5296 = vmatpush3.bf16.msra.mxu0 %v5769_v24  ;;  %v5808_v24 = vld [vmem:[%s7240_s1 + $0x960] sm:$0xff]  }
 0x10c   :  { %5297 = vmatprep.subr.bf16.mxu0 %v5772_v27  ;;  %v5811_v27 = vld [vmem:[%s7240_s1 + $0x9a0] sm:$0xff]  }
 0x10d   :  { %5318 = vmatpush3.bf16.msra.mxu1 %v5771_v26  ;;  %v5810_v26 = vld [vmem:[%s7240_s1 + $0x9e0] sm:$0xff]  }
 0x10e   :  { %5319 = vmatprep.subr.bf16.mxu1 %v5774_v29  ;;  %v5813_v29 = vld [vmem:[%s7240_s1 + $0x928] sm:$0xff]  }
 0x10f   :  { %5298 = vmatpush3.bf16.msra.mxu0 %v5773_v28  ;;  %v5812_v28 = vld [vmem:[%s7240_s1 + $0x968] sm:$0xff]  }
 0x110   :  { %5299 = vmatprep.subr.bf16.mxu0 %v5776_v31  ;;  %v5815_v31 = vld [vmem:[%s7240_s1 + $0x9a8] sm:$0xff]  }
 0x111   :  { %5320 = vmatpush3.bf16.msra.mxu1 %v5775_v30  ;;  %v5814_v30 = vld [vmem:[%s7240_s1 + $0x9e8] sm:$0xff]  }
 0x112   :  { %5321 = vmatprep.subr.bf16.mxu1 %v5778_v33 }
 0x113   :  { %5300 = vmatpush3.bf16.msra.mxu0 %v5777_v32  ;;  %v5816_v32 = vld [vmem:[%s7240_s1 + $0x970] sm:$0xff]  }
 0x114   :  { %5301 = vmatprep.subr.bf16.mxu0 %v5780_v35 }
 0x115   :  { %v4999_v40 = vpop.f32.mrb[4].mxu0  ;;  %5322 = vmatpush3.bf16.msra.mxu1 %v5779_v34  ;;  %v5817_v34 = vld [vmem:[%s7240_s1 + $0x930] sm:$0xff]  }
 0x116   :  { %v5000_v44 = vpop.f32.mrb[5].mxu0  ;;  %5323 = vmatprep.subr.bf16.mxu1 %v5782_v37 }
 0x117   :  { %v5001_v46 = vadd.f32 %v5000_v44, %v4999_v40  ;;  %v5002_v47 = vpop.f32.mrb[6].mxu0  ;;  %v5021_v48 = vpop.f32.mrb[4].mxu1  ;;  %5302 = vmatpush3.bf16.msra.mxu0 %v5781_v36  ;;  %v5818_v36 = vld [vmem:[%s7240_s1 + $0x9f0] sm:$0xff]  }
 0x118   :  { %v5003_v53 = vpop.f32.mrb[7].mxu0  ;;  %v5022_v54 = vpop.f32.mrb[5].mxu1  ;;  %5303 = vmatprep.subr.bf16.mxu0 %v5784_v39  ;;  %v5819_v40 = vld [vmem:[%s7240_s1 + $0x9b0] sm:$0xff]   ;;  %v5821_v47 = vld [vmem:[%s7240_s1 + $0x938] sm:$0xff]  }
 0x119   :  { %v3645_v55 = vadd.f32 %v5001_v46, %v6770_v11  ;;  %v5023_v56 = vadd.f32 %v5022_v54, %v5021_v48  ;;  %5324 = vmatpush3.bf16.msra.mxu1 %v5783_v38  ;;  %v5024_v59 = vpop.f32.mrb[6].mxu1  ;;  %v5796_v11 = vld [vmem:[%s7240_s1 + $0x948] sm:$0xff]   ;;  %v1047_v53 = vrot.slane %v6876_v62, %v6051_v41  ;;  %v5825_v54 = vld [vmem:[%s7240_s1 + $0xa40] sm:$0xff]  }
 0x11a   :  { %5325 = vmatprep.subr.bf16.mxu1 %v5786_v43  ;;  %v5025_v61 = vpop.f32.mrb[7].mxu1  ;;  %v5829_v59 = vld [vmem:[%s7240_s1 + $0xa48] sm:$0xff]  }
 0x11b   :  { %v6878_v63 = vadd.f32 %v5023_v56, %v3645_v55  ;;  %5304 = vmatpush3.bf16.msra.mxu0 %v5785_v42  ;;  %v5820_v42 = vld [vmem:[%s7240_s1 + $0x978] sm:$0xff]   ;;  %v5826_v55 = vld [vmem:[%s7240_s1 + $0xa00] sm:$0xff]   ;;  %v1063_v58 = vcombine.high %v1047_v53, %v1047_v53  ;;  %v5831_v61 = vld [vmem:[%s7240_s1 + $0xac8] sm:$0xff]  }
 0x11c   :  { %5305 = vmatprep.subr.bf16.mxu0 %v5788_v50  ;;  %v5827_v56 = vld [vmem:[%s7240_s1 + $0xac0] sm:$0xff]   ;;  %v5832_v62 = vld [vmem:[%s7240_s1 + $0xa88] sm:$0xff]  }
 0x11d   :  { %5326 = vmatpush3.bf16.msra.mxu1 %v5787_v49  ;;  %v5822_v49 = vld [vmem:[%s7240_s1 + $0x9f8] sm:$0xff]  }
 0x11e   :  { %5327 = vmatprep.subr.bf16.mxu1 %v5790_v60  ;;  %v5830_v60 = vld [vmem:[%s7240_s1 + $0xa08] sm:$0xff]  }
 0x11f   :  { %5306 = vmatpush3.bf16.msra.mxu0 %v5789_v57  ;;  %v5828_v57 = vld [vmem:[%s7240_s1 + $0xa80] sm:$0xff]  }
 0x120   :  { %5335 = vmatprep.subr.bf16.mxu0 %v5792_v3  ;;  %v5837_v3 = vld [vmem:[%s7240_s1 + $0xa58] sm:$0xff]  }
 0x121   :  { %5328 = vmatpush3.bf16.msra.mxu1 %v5791_v1  ;;  %v5835_v1 = vld [vmem:[%s7240_s1 + $0xad0] sm:$0xff]  }
 0x122   :  { %4203 = vmatmul.mubr.bf16.vlgmr.msra.gmra.mrb[32].mxu0 %v1040_v2  ;;  %5357 = vmatprep.subr.bf16.mxu1 %v5794_v7  ;;  %v5836_v2 = vld [vmem:[%s7240_s1 + $0xa90] sm:$0xff]   ;;  %v5841_v7 = vld [vmem:[%s7240_s1 + $0xa60] sm:$0xff]  }
 0x123   :  { %5336 = vmatpush3.bf16.msra.mxu0 %v5793_v6  ;;  %4282 = vmatprep.mubr.bf16.mxu0 %v1061_v8  ;;  %v5840_v6 = vld [vmem:[%s7240_s1 + $0xa98] sm:$0xff]   ;;  %v5842_v8 = vld [vmem:[%s7240_s1 + $0xa20] sm:$0xff]  }
 0x124   :  { %4243 = vmatmul.mubr.bf16.vlgmr.msra.gmra.mrb[32].mxu1 %v1062_v10  ;;  %5337 = vmatprep.subr.bf16.mxu0 %v5796_v11  ;;  %v5844_v10 = vld [vmem:[%s7240_s1 + $0xaa0] sm:$0xff]   ;;  %v5845_v11 = vld [vmem:[%s7240_s1 + $0xa68] sm:$0xff]  }
 0x125   :  { %5358 = vmatpush3.bf16.msra.mxu1 %v5795_v9  ;;  %4322 = vmatprep.mubr.bf16.mxu1 %v1065_v13  ;;  %v5843_v9 = vld [vmem:[%s7240_s1 + $0xae0] sm:$0xff]   ;;  %v5847_v13 = vld [vmem:[%s7240_s1 + $0xae8] sm:$0xff]  }
 0x126   :  { %5359 = vmatprep.subr.bf16.mxu1 %v5798_v14  ;;  %v5848_v14 = vld [vmem:[%s7240_s1 + $0xaa8] sm:$0xff]  }
 0x127   :  { %5338 = vmatpush3.bf16.msra.mxu0 %v5797_v12  ;;  %v5846_v12 = vld [vmem:[%s7240_s1 + $0xa28] sm:$0xff]  }
 0x128   :  { %5339 = vmatprep.subr.bf16.mxu0 %v5800_v16 }
 0x129   :  { %5360 = vmatpush3.bf16.msra.mxu1 %v5799_v15  ;;  %v5849_v15 = vld [vmem:[%s7240_s1 + $0xa70] sm:$0xff]  }
 0x12a   :  { %5361 = vmatprep.subr.bf16.mxu1 %v5802_v18 }
 0x12b   :  { %5340 = vmatpush3.bf16.msra.mxu0 %v5801_v17  ;;  %v5850_v17 = vld [vmem:[%s7240_s1 + $0xa30] sm:$0xff]  }
 0x12c   :  { %5341 = vmatprep.subr.bf16.mxu0 %v5804_v20 }
 0x12d   :  { %5362 = vmatpush3.bf16.msra.mxu1 %v5803_v19  ;;  %v5851_v19 = vld [vmem:[%s7240_s1 + $0xaf0] sm:$0xff]  }
 0x12e   :  { %5363 = vmatprep.subr.bf16.mxu1 %v5806_v22 }
 0x12f   :  { %5342 = vmatpush3.bf16.msra.mxu0 %v5805_v21 }
 0x130   :  { %5343 = vmatprep.subr.bf16.mxu0 %v5808_v24  ;;  %v21_v24 = vld [vmem:[%s7239_s0 + $0x28] sm:$0xff] }
 0x131   :  { %5364 = vmatpush3.bf16.msra.mxu1 %v5807_v23  ;;  %v5853_v23 = vld [vmem:[%s7240_s1 + $0xa78] sm:$0xff]  }
 0x132   :  { %5365 = vmatprep.subr.bf16.mxu1 %v5810_v26 }
 0x133   :  { %5344 = vmatpush3.bf16.msra.mxu0 %v5809_v25 }
 0x134   :  { %5345 = vmatprep.subr.bf16.mxu0 %v5812_v28  ;;  %v1066_v28 = vcombine.high %v21_v24, %v21_v24 }
 0x135   :  { %v5043_v33 = vpop.f32.mrb[8].mxu0  ;;  %5366 = vmatpush3.bf16.msra.mxu1 %v5811_v27  ;;  %v1073_v27 = vrot.slane %v21_v24, %v6051_v41 }
 0x136   :  { %v5044_v35 = vpop.f32.mrb[9].mxu0  ;;  %5367 = vmatprep.subr.bf16.mxu1 %v5814_v30 }
 0x137   :  { %v5045_v37 = vadd.f32 %v5044_v35, %v5043_v33  ;;  %v5046_v38 = vpop.f32.mrb[10].mxu0  ;;  %v5065_v39 = vpop.f32.mrb[8].mxu1  ;;  %5346 = vmatpush3.bf16.msra.mxu0 %v5813_v29  ;;  %v5855_v33 = vld [vmem:[%s7240_s1 + $0xaf8] sm:$0xff]  }
 0x138   :  { %v5047_v43 = vpop.f32.mrb[11].mxu0  ;;  %v5066_v44 = vpop.f32.mrb[9].mxu1  ;;  %5347 = vmatprep.subr.bf16.mxu0 %v5816_v32  ;;  %v5854_v38 = vld [vmem:[%s7240_s1 + $0xa38] sm:$0xff]  }
 0x139   :  { %v3725_v45 = vadd.f32 %v5045_v37, %v6878_v63  ;;  %v5067_v46 = vadd.f32 %v5066_v44, %v5065_v39  ;;  %5368 = vmatpush3.bf16.msra.mxu1 %v5815_v31  ;;  %v5068_v48 = vpop.f32.mrb[10].mxu1  ;;  %v5833_v63 = vld [vmem:[%s7240_s1 + $0xa50] sm:$0xff]   ;;  %v5856_v44 = vld [vmem:[%s7240_s1 + $0xab8] sm:$0xff]  }
 0x13a   :  { %5369 = vmatprep.subr.bf16.mxu1 %v5818_v36  ;;  %v5069_v50 = vpop.f32.mrb[11].mxu1  ;;  %v5852_v31 = vld [vmem:[%s7240_s1 + $0xab0] sm:$0xff]   ;;  %v7085_v36 = vrot.slane %v1066_v28, %v6051_v41  ;;  %v5858_v48 = vld [vmem:[%s7240_s1 + $0xb00] sm:$0xff]   ;;  %v5889_v28 = vld [vmem:[%s7240_s1 + $0xbb8] sm:$0xff]  }
 0x13b   :  { %v6982_v51 = vadd.f32 %v5067_v46, %v3725_v45  ;;  %5348 = vmatpush3.bf16.msra.mxu0 %v5817_v34  ;;  %v1081_v34 = vcombine.high %v1073_v27, %v1073_v27  ;;  %v5859_v46 = vld [vmem:[%s7240_s1 + $0xbc0] sm:$0xff]   ;;  %v5861_v50 = vld [vmem:[%s7240_s1 + $0xb48] sm:$0xff]  }
 0x13c   :  { %5349 = vmatprep.subr.bf16.mxu0 %v5820_v42  ;;  %v5857_v42 = vld [vmem:[%s7240_s1 + $0xb40] sm:$0xff]   ;;  %v1082_v43 = vcombine.high %v7085_v36, %v7085_v36 }
 0x13d   :  { %5370 = vmatpush3.bf16.msra.mxu1 %v5819_v40  ;;  %v1103_v39 = vrot.slane %v1081_v34, %v6051_v41  ;;  %v1089_v40 = vrot.slane %v1073_v27, %v6051_v41  ;;  %v1096_v27 = vrot.slane %v7085_v36, %v6051_v41 }
 0x13e   :  { %5371 = vmatprep.subr.bf16.mxu1 %v5822_v49 }
 0x13f   :  { %5350 = vmatpush3.bf16.msra.mxu0 %v5821_v47  ;;  %v1113_v45 = vcombine.high %v1103_v39, %v1103_v39  ;;  %v1110_v47 = vrot.slane %v1082_v43, %v6051_v41  ;;  %v1111_v49 = vcombine.high %v1089_v40, %v1089_v40 }
 0x140   :  { %5379 = vmatprep.subr.bf16.mxu0 %v5825_v54  ;;  %v5862_v54 = vld [vmem:[%s7240_s1 + $0xb08] sm:$0xff]  }
 0x141   :  { %5372 = vmatpush3.bf16.msra.mxu1 %v5824_v52  ;;  %v1114_v52 = vcombine.high %v1110_v47, %v1110_v47 }
 0x142   :  { %4283 = vmatmul.mubr.bf16.vlgmr.msra.gmra.mrb[36].mxu0 %v1047_v53  ;;  %5401 = vmatprep.subr.bf16.mxu1 %v5827_v56  ;;  %v5863_v53 = vld [vmem:[%s7240_s1 + $0xbc8] sm:$0xff]  }
 0x143   :  { %5380 = vmatpush3.bf16.msra.mxu0 %v5826_v55  ;;  %4362 = vmatprep.mubr.bf16.mxu0 %v1103_v39  ;;  %v5865_v55 = vld [vmem:[%s7240_s1 + $0xb50] sm:$0xff]   ;;  %v5864_v56 = vld [vmem:[%s7240_s1 + $0xb88] sm:$0xff]  }
 0x144   :  { %4323 = vmatmul.mubr.bf16.vlgmr.msra.gmra.mrb[36].mxu1 %v1063_v58  ;;  %5381 = vmatprep.subr.bf16.mxu0 %v5829_v59  ;;  %v5866_v58 = vld [vmem:[%s7240_s1 + $0xb10] sm:$0xff]   ;;  %v5869_v59 = vld [vmem:[%s7240_s1 + $0xb58] sm:$0xff]  }
 0x145   :  { %5402 = vmatpush3.bf16.msra.mxu1 %v5828_v57  ;;  %4402 = vmatprep.mubr.bf16.mxu1 %v1113_v45  ;;  %v5867_v57 = vld [vmem:[%s7240_s1 + $0xbd0] sm:$0xff]  }
 0x146   :  { %5403 = vmatprep.subr.bf16.mxu1 %v5831_v61  ;;  %v5871_v61 = vld [vmem:[%s7240_s1 + $0xbd8] sm:$0xff]  }
 0x147   :  { %5382 = vmatpush3.bf16.msra.mxu0 %v5830_v60  ;;  %v5868_v60 = vld [vmem:[%s7240_s1 + $0xb90] sm:$0xff]  }
 0x148   :  { %5383 = vmatprep.subr.bf16.mxu0 %v5833_v63  ;;  %v5873_v63 = vld [vmem:[%s7240_s1 + $0xb60] sm:$0xff]  }
 0x149   :  { %5404 = vmatpush3.bf16.msra.mxu1 %v5832_v62  ;;  %v5870_v62 = vld [vmem:[%s7240_s1 + $0xb18] sm:$0xff]  }
 0x14a   :  { %5405 = vmatprep.subr.bf16.mxu1 %v5835_v1  ;;  %v5875_v1 = vld [vmem:[%s7240_s1 + $0xbe0] sm:$0xff]  }
 0x14b   :  { %5384 = vmatpush3.bf16.msra.mxu0 %v5834_v0  ;;  %v5872_v0 = vld [vmem:[%s7240_s1 + $0xb98] sm:$0xff]  }
 0x14c   :  { %5385 = vmatprep.subr.bf16.mxu0 %v5837_v3  ;;  %v5877_v3 = vld [vmem:[%s7240_s1 + $0xb68] sm:$0xff]  }
 0x14d   :  { %5406 = vmatpush3.bf16.msra.mxu1 %v5836_v2  ;;  %v5874_v2 = vld [vmem:[%s7240_s1 + $0xb20] sm:$0xff]  }
 0x14e   :  { %5407 = vmatprep.subr.bf16.mxu1 %v5839_v5  ;;  %v5879_v5 = vld [vmem:[%s7240_s1 + $0xbe8] sm:$0xff]  }
 0x14f   :  { %5386 = vmatpush3.bf16.msra.mxu0 %v5838_v4  ;;  %v5876_v4 = vld [vmem:[%s7240_s1 + $0xba0] sm:$0xff]  }
 0x150   :  { %5387 = vmatprep.subr.bf16.mxu0 %v5841_v7  ;;  %v5881_v7 = vld [vmem:[%s7240_s1 + $0xb70] sm:$0xff]  }
 0x151   :  { %5408 = vmatpush3.bf16.msra.mxu1 %v5840_v6  ;;  %v5878_v6 = vld [vmem:[%s7240_s1 + $0xb28] sm:$0xff]  }
 0x152   :  { %5409 = vmatprep.subr.bf16.mxu1 %v5843_v9  ;;  %v5880_v9 = vld [vmem:[%s7240_s1 + $0xba8] sm:$0xff]  }
 0x153   :  { %5388 = vmatpush3.bf16.msra.mxu0 %v5842_v8 }
 0x154   :  { %5389 = vmatprep.subr.bf16.mxu0 %v5845_v11  ;;  %v5883_v11 = vld [vmem:[%s7240_s1 + $0xbf0] sm:$0xff]  }
 0x155   :  { %v5087_v16 = vpop.f32.mrb[12].mxu0  ;;  %5410 = vmatpush3.bf16.msra.mxu1 %v5844_v10 }
 0x156   :  { %v5088_v18 = vpop.f32.mrb[13].mxu0  ;;  %5411 = vmatprep.subr.bf16.mxu1 %v5847_v13 }
 0x157   :  { %v5089_v20 = vadd.f32 %v5088_v18, %v5087_v16  ;;  %v5090_v21 = vpop.f32.mrb[14].mxu0  ;;  %v5109_v22 = vpop.f32.mrb[12].mxu1  ;;  %5390 = vmatpush3.bf16.msra.mxu0 %v5846_v12  ;;  %v5885_v16 = vld [vmem:[%s7240_s1 + $0xb78] sm:$0xff]  }
 0x158   :  { %v5091_v25 = vpop.f32.mrb[15].mxu0  ;;  %v5110_v26 = vpop.f32.mrb[13].mxu1  ;;  %5391 = vmatprep.subr.bf16.mxu0 %v5849_v15  ;;  %v5882_v15 = vld [vmem:[%s7240_s1 + $0xb30] sm:$0xff]  }
 0x159   :  { %v3805_v29 = vadd.f32 %v5089_v20, %v6982_v51  ;;  %v5111_v30 = vadd.f32 %v5110_v26, %v5109_v22  ;;  %5412 = vmatpush3.bf16.msra.mxu1 %v5848_v14  ;;  %v5112_v32 = vpop.f32.mrb[14].mxu1  ;;  %v5860_v51 = vld [vmem:[%s7240_s1 + $0xb80] sm:$0xff]   ;;  %v5884_v21 = vld [vmem:[%s7240_s1 + $0xbb0] sm:$0xff]   ;;  %v5886_v26 = vld [vmem:[%s7240_s1 + $0xb38] sm:$0xff]  }
 0x15a   :  { %5413 = vmatprep.subr.bf16.mxu1 %v5851_v19  ;;  %v5113_v35 = vpop.f32.mrb[15].mxu1 }
 0x15b   :  { %v7087_v37 = vadd.f32 %v5111_v30, %v3805_v29  ;;  %5392 = vmatpush3.bf16.msra.mxu0 %v5850_v17  ;;  %v5890_v29 = vld [vmem:[%s7240_s1 + $0xc00] sm:$0xff]   ;;  %v5923_v30 = vmov 0.0  }
 0x15c   :  { %5393 = vmatprep.subr.bf16.mxu0 %v5853_v23  ;;  %v5887_v23 = vld [vmem:[%s7240_s1 + $0xbf8] sm:$0xff]  }
 0x15d   :  { %5414 = vmatpush3.bf16.msra.mxu1 %v5852_v31  ;;  %v1112_v31 = vcombine.high %v1096_v27, %v1096_v27 }
 0x15e   :  { %5415 = vmatprep.subr.bf16.mxu1 %v5855_v33 }
 0x15f   :  { %5394 = vmatpush3.bf16.msra.mxu0 %v5854_v38 }
 0x160   :  { %5423 = vmatprep.subr.bf16.mxu0 %v5857_v42 }
 0x161   :  { %5416 = vmatpush3.bf16.msra.mxu1 %v5856_v44 }
 0x162   :  { %4363 = vmatmul.mubr.bf16.vlgmr.msra.gmra.mrb[40].mxu0 %v1089_v40  ;;  %5445 = vmatprep.subr.bf16.mxu1 %v5859_v46 }
 0x163   :  { %5424 = vmatpush3.bf16.msra.mxu0 %v5858_v48  ;;  %4442 = vmatprep.mubr.bf16.mxu0 %v1110_v47 }
 0x164   :  { %4403 = vmatmul.mubr.bf16.vlgmr.msra.gmra.mrb[40].mxu1 %v1111_v49  ;;  %5425 = vmatprep.subr.bf16.mxu0 %v5861_v50 }
 0x165   :  { %5446 = vmatpush3.bf16.msra.mxu1 %v5860_v51  ;;  %4482 = vmatprep.mubr.bf16.mxu1 %v1114_v52 }
 0x166   :  { %5447 = vmatprep.subr.bf16.mxu1 %v5863_v53 }
 0x167   :  { %5426 = vmatpush3.bf16.msra.mxu0 %v5862_v54 }
 0x168   :  { %5427 = vmatprep.subr.bf16.mxu0 %v5865_v55 }
 0x169   :  { %5448 = vmatpush3.bf16.msra.mxu1 %v5864_v56 }
 0x16a   :  { %5449 = vmatprep.subr.bf16.mxu1 %v5867_v57 }
 0x16b   :  { %5428 = vmatpush3.bf16.msra.mxu0 %v5866_v58 }
 0x16c   :  { %5429 = vmatprep.subr.bf16.mxu0 %v5869_v59 }
 0x16d   :  { %5450 = vmatpush3.bf16.msra.mxu1 %v5868_v60 }
 0x16e   :  { %5451 = vmatprep.subr.bf16.mxu1 %v5871_v61 }
 0x16f   :  { %5430 = vmatpush3.bf16.msra.mxu0 %v5870_v62 }
 0x170   :  { %5431 = vmatprep.subr.bf16.mxu0 %v5873_v63 }
 0x171   :  { %5452 = vmatpush3.bf16.msra.mxu1 %v5872_v0 }
 0x172   :  { %5453 = vmatprep.subr.bf16.mxu1 %v5875_v1 }
 0x173   :  { %5432 = vmatpush3.bf16.msra.mxu0 %v5874_v2 }
 0x174   :  { %5433 = vmatprep.subr.bf16.mxu0 %v5877_v3 }
 0x175   :  { %v5131_v8 = vpop.f32.mrb[16].mxu0  ;;  %5454 = vmatpush3.bf16.msra.mxu1 %v5876_v4 }
 0x176   :  { %v5132_v10 = vpop.f32.mrb[17].mxu0  ;;  %5455 = vmatprep.subr.bf16.mxu1 %v5879_v5 }
 0x177   :  { %v5133_v12 = vadd.f32 %v5132_v10, %v5131_v8  ;;  %v5134_v13 = vpop.f32.mrb[18].mxu0  ;;  %v5153_v14 = vpop.f32.mrb[16].mxu1  ;;  %5434 = vmatpush3.bf16.msra.mxu0 %v5878_v6 }
 0x178   :  { %v5135_v17 = vpop.f32.mrb[19].mxu0  ;;  %v5154_v18 = vpop.f32.mrb[17].mxu1  ;;  %5435 = vmatprep.subr.bf16.mxu0 %v5881_v7 }
 0x179   :  { %v3885_v19 = vadd.f32 %v5133_v12, %v7087_v37  ;;  %v5155_v20 = vadd.f32 %v5154_v18, %v5153_v14  ;;  %5456 = vmatpush3.bf16.msra.mxu1 %v5880_v9  ;;  %v5156_v22 = vpop.f32.mrb[18].mxu1 }
 0x17a   :  { %5457 = vmatprep.subr.bf16.mxu1 %v5883_v11  ;;  %v5157_v24 = vpop.f32.mrb[19].mxu1 }
 0x17b   :  { %v3925_v25 = vadd.f32 %v5155_v20, %v3885_v19  ;;  %5436 = vmatpush3.bf16.msra.mxu0 %v5882_v15 }
 0x17c   :  { %5437 = vmatprep.subr.bf16.mxu0 %v5885_v16 }
 0x17d   :  { %5458 = vmatpush3.bf16.msra.mxu1 %v5884_v21 }
 0x17e   :  { %5459 = vmatprep.subr.bf16.mxu1 %v5887_v23 }
 0x17f   :  { %5438 = vmatpush3.bf16.msra.mxu0 %v5886_v26 }
 0x180   :  { %5476 = vmatprep.subr.bf16.mxu0 %v5923_v30 }
 0x181   :  { %5460 = vmatpush3.bf16.msra.mxu1 %v5889_v28 }
 0x182   :  { %8 = vsyncpa [#allocation3], 0  ;;  %4443 = vmatmul.mubr.bf16.vlgmr.msra.gmra.mrb[44].mxu0 %v1096_v27  ;;  %v5891_v32 = vld [vmem:[%s7240_s1 + $0xc08] sm:$0xff]   ;;  %vm5924_vm0 = vmmov 0   ;;  %v5892_v33 = vld [vmem:[%s7240_s1 + $0xc10] sm:$0xff]  }
 0x183   :  { %5477 = vmatpush3.bf16.msra.mxu0 %v5890_v29  ;;  %5492 = vmatprep.mubr.msk.bf16.mxu0 %vm5924_vm0, %v5923_v30  ;;  %v5893_v34 = vld [vmem:[%s7240_s1 + $0xc18] sm:$0xff]   ;;  %v5894_v35 = vld [vmem:[%s7240_s1 + $0xc20] sm:$0xff]   ;;  %v5895_v36 = vld [vmem:[%s7240_s1 + $0xc28] sm:$0xff]  }
 0x184   :  { %4483 = vmatmul.mubr.bf16.vlgmr.msra.gmra.mrb[44].mxu1 %v1112_v31  ;;  %5478 = vmatprep.subr.bf16.mxu0 %v5923_v30  ;;  %v5896_v43 = vld [vmem:[%s7240_s1 + $0xc30] sm:$0xff]   ;;  %v5897_v51 = vld [vmem:[%s7240_s1 + $0xc38] sm:$0xff]  }
 0x185   :  { %v4546_v52 = vld.sshfl [vmem:[%s7239_s0 + $0x30] sm:$0x1 pattern:$0x75316420]  ;;  %s5925_s0 = smov [#allocation2]  }
 0x186   :  { %v1128_v53 = vrot.slane %v4546_v52, %v6051_v41  ;;  %s4537_s1 = sshll.u32 %s5925_s0, 4  ;;  %s4538_s1 = int_to_ptr.vmem [resolvable:$true] %s4537_s1 }
 0x187   :  { %5479 = vmatpush3.bf16.msra.mxu0 %v5891_v32  ;;  %s5898_s18 = scalar_lea.vmem %s4538_s1, 32  ;;  %p5903_p1 = scmp.lt.s32.totalorder %s4538_s1, %s4538_s1 }
 0x188   :  { %5480 = vmatprep.subr.bf16.mxu0 %v5923_v30  ;;  %p5899_p0 = scmp.ne.s32.totalorder %s4538_s1, %s5898_s18  ;;  %p5904_p2 = scmp.lt.s32.totalorder %s5898_s18, %s5898_s18 }
 0x18a   :  { %p5905_p3 = por %p5904_p2, %p5903_p1 }
 0x18b   :  { %5481 = vmatpush3.bf16.msra.mxu0 %v5892_v33 }
 0x18c   :  { %5482 = vmatprep.subr.bf16.mxu0 %v5923_v30  ;;  %p5906_p4 = pnand %p5905_p3, %p5899_p0 }
 0x18f   :  { %5483 = vmatpush3.bf16.msra.mxu0 %v5893_v34 }
 0x190   :  { %5484 = vmatprep.subr.bf16.mxu0 %v5923_v30 }
 0x193   :  { %5485 = vmatpush3.bf16.msra.mxu0 %v5894_v35 }
 0x194   :  { %5486 = vmatprep.subr.bf16.mxu0 %v5923_v30 }
 0x195   :  { %v5175_v37 = vpop.f32.mrb[20].mxu0 }
 0x196   :  { %v5176_v38 = vpop.f32.mrb[21].mxu0 }
 0x197   :  { %v5177_v39 = vadd.f32 %v5176_v38, %v5175_v37  ;;  %v5178_v40 = vpop.f32.mrb[22].mxu0  ;;  %v5197_v42 = vpop.f32.mrb[20].mxu1  ;;  %5487 = vmatpush3.bf16.msra.mxu0 %v5895_v36 }
 0x198   :  { %v5179_v44 = vpop.f32.mrb[23].mxu0  ;;  %v5198_v45 = vpop.f32.mrb[21].mxu1  ;;  %5488 = vmatprep.subr.bf16.mxu0 %v5923_v30 }
 0x199   :  { %v3965_v46 = vadd.f32 %v5177_v39, %v3925_v25  ;;  %v5199_v47 = vadd.f32 %v5198_v45, %v5197_v42  ;;  %v5200_v48 = vpop.f32.mrb[22].mxu1 }
 0x19a   :  { %v5201_v49 = vpop.f32.mrb[23].mxu1 }
 0x19b   :  { %v4005_v50 = vadd.f32 %v5199_v47, %v3965_v46  ;;  %5489 = vmatpush3.bf16.msra.mxu0 %v5896_v43 }
 0x19c   :  { %5490 = vmatprep.subr.bf16.mxu0 %v5923_v30 }
 0x19f   :  { %5491 = vmatpush3.bf16.msra.mxu0 %v5897_v51 }
 0x1a2   :  { %5493 = vmatmul.mubr.bf16.vlgmr.msra.gmra.mrb[48].mxu0 %v1128_v53 }
 0x1b5   :  { %v5219_v54 = vpop.f32.mrb[24].mxu0 }
 0x1b6   :  { %v5220_v55 = vpop.f32.mrb[25].mxu0 }
 0x1b7   :  { %v5221_v56 = vadd.f32 %v5220_v55, %v5219_v54  ;;  %v5222_v57 = vpop.f32.mrb[26].mxu0  ;;  %v5241_v58 = vpop.f32.mrb[24].mxu1 }
 0x1b8   :  { %v5223_v59 = vpop.f32.mrb[27].mxu0  ;;  %v5242_v60 = vpop.f32.mrb[25].mxu1 }
 0x1b9   :  { %v4045_v61 = vadd.f32 %v5221_v56, %v4005_v50  ;;  %v5243_v62 = vadd.f32 %v5242_v60, %v5241_v58  ;;  %v5244_v63 = vpop.f32.mrb[26].mxu1 }
 0x1ba   :  { %v5245_v0 = vpop.f32.mrb[27].mxu1 }
 0x1bb   :  { %v4085_v1 = vadd.f32 %v5243_v62, %v4045_v61 }
 0x1d5   :  { %v5263_v2 = vpop.f32.mrb[28].mxu0 }
 0x1d6   :  { %v5264_v3 = vpop.f32.mrb[29].mxu0 }
 0x1d7   :  { %v5265_v4 = vadd.f32 %v5264_v3, %v5263_v2  ;;  %v5266_v5 = vpop.f32.mrb[30].mxu0  ;;  %v5285_v6 = vpop.f32.mrb[28].mxu1 }
 0x1d8   :  { %v5267_v41 = vpop.f32.mrb[31].mxu0  ;;  %v5286_v7 = vpop.f32.mrb[29].mxu1 }
 0x1d9   :  { %v4125_v8 = vadd.f32 %v5265_v4, %v4085_v1  ;;  %v5287_v9 = vadd.f32 %v5286_v7, %v5285_v6  ;;  %v5288_v10 = vpop.f32.mrb[30].mxu1 }
 0x1da   :  { %v5289_v11 = vpop.f32.mrb[31].mxu1 }
 0x1db   :  { %v4165_v12 = vadd.f32 %v5287_v9, %v4125_v8 }
 0x1f5   :  { %v5307_v13 = vpop.f32.mrb[32].mxu0 }
 0x1f6   :  { %v5308_v14 = vpop.f32.mrb[33].mxu0 }
 0x1f7   :  { %v5309_v15 = vadd.f32 %v5308_v14, %v5307_v13  ;;  %v5310_v16 = vpop.f32.mrb[34].mxu0  ;;  %v5329_v17 = vpop.f32.mrb[32].mxu1 }
 0x1f8   :  { %v5311_v18 = vpop.f32.mrb[35].mxu0  ;;  %v5330_v19 = vpop.f32.mrb[33].mxu1 }
 0x1f9   :  { %v4205_v20 = vadd.f32 %v5309_v15, %v4165_v12  ;;  %v5331_v21 = vadd.f32 %v5330_v19, %v5329_v17  ;;  %v5332_v22 = vpop.f32.mrb[34].mxu1 }
 0x1fa   :  { %v5333_v23 = vpop.f32.mrb[35].mxu1 }
 0x1fb   :  { %v4245_v24 = vadd.f32 %v5331_v21, %v4205_v20 }
 0x215   :  { %v5351_v25 = vpop.f32.mrb[36].mxu0 }
 0x216   :  { %v5352_v26 = vpop.f32.mrb[37].mxu0 }
 0x217   :  { %v5353_v27 = vadd.f32 %v5352_v26, %v5351_v25  ;;  %v5354_v28 = vpop.f32.mrb[38].mxu0  ;;  %v5373_v29 = vpop.f32.mrb[36].mxu1 }
 0x218   :  { %v5355_v30 = vpop.f32.mrb[39].mxu0  ;;  %v5374_v31 = vpop.f32.mrb[37].mxu1 }
 0x219   :  { %v4285_v32 = vadd.f32 %v5353_v27, %v4245_v24  ;;  %v5375_v33 = vadd.f32 %v5374_v31, %v5373_v29  ;;  %v5376_v34 = vpop.f32.mrb[38].mxu1 }
 0x21a   :  { %v5377_v35 = vpop.f32.mrb[39].mxu1 }
 0x21b   :  { %v4325_v36 = vadd.f32 %v5375_v33, %v4285_v32 }
 0x235   :  { %v5395_v37 = vpop.f32.mrb[40].mxu0 }
 0x236   :  { %v5396_v38 = vpop.f32.mrb[41].mxu0 }
 0x237   :  { %v5397_v39 = vadd.f32 %v5396_v38, %v5395_v37  ;;  %v5398_v40 = vpop.f32.mrb[42].mxu0  ;;  %v5417_v42 = vpop.f32.mrb[40].mxu1 }
 0x238   :  { %v5399_v43 = vpop.f32.mrb[43].mxu0  ;;  %v5418_v44 = vpop.f32.mrb[41].mxu1 }
 0x239   :  { %v4365_v45 = vadd.f32 %v5397_v39, %v4325_v36  ;;  %v5419_v46 = vadd.f32 %v5418_v44, %v5417_v42  ;;  %v5420_v47 = vpop.f32.mrb[42].mxu1 }
 0x23a   :  { %v5421_v48 = vpop.f32.mrb[43].mxu1 }
 0x23b   :  { %v4405_v49 = vadd.f32 %v5419_v46, %v4365_v45 }
 0x255   :  { %v5439_v50 = vpop.f32.mrb[44].mxu0 }
 0x256   :  { %v5440_v51 = vpop.f32.mrb[45].mxu0 }
 0x257   :  { %v5441_v52 = vadd.f32 %v5440_v51, %v5439_v50  ;;  %v5442_v53 = vpop.f32.mrb[46].mxu0  ;;  %v5461_v54 = vpop.f32.mrb[44].mxu1 }
 0x258   :  { %v5443_v55 = vpop.f32.mrb[47].mxu0  ;;  %v5462_v56 = vpop.f32.mrb[45].mxu1 }
 0x259   :  { %v4445_v57 = vadd.f32 %v5441_v52, %v4405_v49  ;;  %v5463_v58 = vadd.f32 %v5462_v56, %v5461_v54  ;;  %v5464_v59 = vpop.f32.mrb[46].mxu1 }
 0x25a   :  { %v5465_v60 = vpop.f32.mrb[47].mxu1 }
 0x25b   :  { %v4485_v61 = vadd.f32 %v5463_v58, %v4445_v57 }
 0x275   :  { %v4524_v62 = vpop.f32.mrb[48].mxu0 }
 0x276   :  { %v4525_v63 = vadd.f32 %v4524_v62, %v4485_v61  ;;  %v5494_v0 = vpop.f32.mrb[49].mxu0 }
 0x277   :  { %v4527_v1 = vpop.f32.mrb[50].mxu0 }
 0x278   :  { %4530 = vst [vmem:[#allocation2] sm:$0x3] %v4525_v63  ;;  %v5495_v2 = vpop.f32.mrb[51].mxu0 }
 0x279   :  { %5909 = shalt.err (!%p5906_p4)
}
 0x27a   :  { %s5910_s21 = scalar_lea.hbm %s7242_s3, 32 }
 0x27b   :  { %p5911_p5 = scmp.ne.s32.totalorder %s7242_s3, %s5910_s21  ;;  %p5914_p6 = scmp.lt.u32.totalorder %s5910_s21, %s7242_s3 }
 0x27d   :  { %p5916_p7 = pnand %p5914_p6, %p5911_p5 }
 0x27f   :  { %5919 = shalt.err (!%p5916_p7)
}
 0x280   :  { %4540 = dma.vmem_to_hbm [thread:$0]  %s4538_s1, 32, %s7242_s3, [#allocation3]  }
 0x281   :  { %5920 = dma.done.wait [#allocation3], 32  }
 0x282   :  { %5921 = vsyncadd [#allocation3], 4294967264 }
 0x283   :  { %4544 = vsyncpa [#allocation3], 1 }

</bundles_post_ra>
